<compile_context>
chip_gen: v5e
topology: v5e:2x2
jax: 0.10.0
libtpu: 0.0.40
codegen_flags: <defaults>
</compile_context>

<pallas_src>
import jax
import jax.numpy as jnp
from jax.experimental import pallas as pl
from jax.experimental.pallas import tpu as pltpu


# ----------------------------- Pallas kernels -----------------------------

def _conv_block_kernel(p1_ref, w1_ref, b1_ref, w2_ref, b2_ref, o_ref, y1s, ms):
    """conv1 + ReLU + conv2 + ReLU + 2x2 max-pool for ONE image.

    p1_ref: (676, 9) f32   im2col of the 28x28 input (rows = oh*26+ow)
    w1_ref: (9, 32) f32    conv1 weight [i*3+j, oc]
    b1_ref: (1, 32) f32
    w2_ref: (9, 32, 64) bf16  conv2 weight [i*3+j, ic, oc]
    b2_ref: (1, 64) f32
    o_ref : (144, 64) bf16  pooled output, rows = h*12+w (NHWC flatten order)
    y1s   : VMEM (680, 32) f32 scratch (conv1 output + zero pad rows)
    ms    : VMEM (596, 64) f32 scratch (pool candidate maxima)
    """
    # ---- conv1: (676, 9) @ (9, 32) + bias, ReLU (tiny; stays in f32) ----
    y1 = jnp.dot(p1_ref[...], w1_ref[...], preferred_element_type=jnp.float32)
    y1 = jnp.maximum(y1 + b1_ref[...], 0.0)                       # (676, 32)

    # Keep conv1 output in VMEM (no HBM round trip).  Zero the 4 pad rows the
    # "wide rows" trick may touch (they only ever feed garbage output rows).
    y1s[pl.ds(672, 8), :] = jnp.zeros((8, 32), jnp.float32)
    y1s[pl.ds(0, 676), :] = y1

    # ---- conv2 as 9 shifted bf16 matmuls on the 26-wide row grid ----
    # y2[r] with r = oh*26 + ow; rows with ow in {24, 25} are garbage and are
    # never consumed by the valid pooled outputs below.
    acc = None
    for i in range(3):
        for j in range(3):
            patch = y1s[pl.ds(i * 26 + j, 624), :].astype(jnp.bfloat16)  # (624, 32)
            term = jnp.dot(patch, w2_ref[i * 3 + j],
                           preferred_element_type=jnp.float32)           # (624, 64)
            acc = term if acc is None else acc + term
    y2 = jnp.maximum(acc + b2_ref[...], 0.0)                      # (624, 64)

    # ---- fused 2x2 / stride-2 max pool ----
    # m[r] = max over rows {r, r+1, r+26, r+27}; pooled(ph, pw) = m[52*ph+2*pw].
    m = jnp.maximum(jnp.maximum(y2[0:596, :], y2[1:597, :]),
                    jnp.maximum(y2[26:622, :], y2[27:623, :]))    # (596, 64)
    ms[...] = m
    for ph in range(12):
        rows = ms[pl.ds(52 * ph, 12, stride=2), :]                # (12, 64)
        o_ref[pl.ds(ph * 12, 12), :] = rows.astype(o_ref.dtype)


def _fc_block_kernel(x_ref, w1_ref, b1_ref, w2_ref, b2_ref, o_ref, acc_ref):
    """K-tiled fc1 (+bias+ReLU) fused with fc2 (+bias) and log_softmax.

    grid = (M tiles, K tiles); K is the reduction ("arbitrary") axis.
    x_ref: (tm, tk) bf16, w1_ref: (tk, 128) bf16, acc_ref: (tm, 128) f32 VMEM.
    w2_ref: (128, 128) f32 (N padded 10->128), b2_ref: (1, 128) f32 (-1e30 pad).
    """
    k = pl.program_id(1)

    @pl.when(k == 0)
    def _init():
        acc_ref[...] = jnp.zeros_like(acc_ref)

    acc_ref[...] += jnp.dot(x_ref[...], w1_ref[...],
                            preferred_element_type=jnp.float32)

    @pl.when(k == pl.num_programs(1) - 1)
    def _finish():
        h = jnp.maximum(acc_ref[...] + b1_ref[...], 0.0)          # fc1 + ReLU
        y = jnp.dot(h, w2_ref[...],
                    preferred_element_type=jnp.float32) + b2_ref[...]
        mx = jnp.max(y, axis=1, keepdims=True)                    # log_softmax
        s = y - mx
        lse = jnp.log(jnp.sum(jnp.exp(s), axis=1, keepdims=True))
        o_ref[...] = s - lse


# ----------------------------- Pallas wrappers -----------------------------

def conv_block(p1, w1, b1, w2, b2):
    B = p1.shape[0]
    return pl.pallas_call(
        _conv_block_kernel,
        out_shape=jax.ShapeDtypeStruct((B, 144, 64), jnp.bfloat16),
        grid=(B,),
        in_specs=[
            pl.BlockSpec((None, 676, 9), lambda b: (b, 0, 0)),
            pl.BlockSpec((9, 32), lambda b: (0, 0)),
            pl.BlockSpec((1, 32), lambda b: (0, 0)),
            pl.BlockSpec((9, 32, 64), lambda b: (0, 0, 0)),
            pl.BlockSpec((1, 64), lambda b: (0, 0)),
        ],
        out_specs=pl.BlockSpec((None, 144, 64), lambda b: (b, 0, 0)),
        scratch_shapes=[
            pltpu.VMEM((680, 32), jnp.float32),   # conv1 output (+ pad rows)
            pltpu.VMEM((596, 64), jnp.float32),   # pool candidate maxima
        ],
        compiler_params=pltpu.CompilerParams(
            dimension_semantics=("parallel",)),
    )(p1, w1, b1, w2, b2)


def fc_block(x, w1, b1, w2p, b2p, *, tk=1152):
    M, K = x.shape
    N1 = w1.shape[1]        # 128
    N2 = w2p.shape[1]       # 128 (padded from 10)
    assert K % tk == 0
    tm = 256 if (M % 256 == 0) else M   # tiny batches: single full-M tile
    grid = (M // tm, K // tk)

    flops = 2 * M * K * N1 + 2 * M * N1 * N2
    bytes_accessed = (M * K + K * N1) * 2 + (N1 + N1 * N2 + N2 + M * N2) * 4
    return pl.pallas_call(
        _fc_block_kernel,
        out_shape=jax.ShapeDtypeStruct((M, N2), jnp.float32),
        grid=grid,
        in_specs=[
            pl.BlockSpec((tm, tk), lambda m, k: (m, k)),
            pl.BlockSpec((tk, N1), lambda m, k: (k, 0)),
            pl.BlockSpec((1, N1), lambda m, k: (0, 0)),
            pl.BlockSpec((N1, N2), lambda m, k: (0, 0)),
            pl.BlockSpec((1, N2), lambda m, k: (0, 0)),
        ],
        out_specs=pl.BlockSpec((tm, N2), lambda m, k: (m, 0)),
        scratch_shapes=[pltpu.VMEM((tm, N1), jnp.float32)],
        compiler_params=pltpu.CompilerParams(
            dimension_semantics=("parallel", "arbitrary")),
        cost_estimate=pl.CostEstimate(flops=flops, transcendentals=M * N2,
                                      bytes_accessed=bytes_accessed),
    )(x, w1, b1, w2p, b2p)


# ----------------------------- params & forward -----------------------------

def init_params(key):
    ks = jax.random.split(key, 8)
    s = 0.05
    return {
        # PyTorch layouts: conv (OC, IC, KH, KW); linear (OUT, IN)
        "conv1_w": jax.random.normal(ks[0], (32, 1, 3, 3), jnp.float32) * s,
        "conv1_b": jax.random.normal(ks[1], (32,), jnp.float32) * s,
        "conv2_w": jax.random.normal(ks[2], (64, 32, 3, 3), jnp.float32) * s,
        "conv2_b": jax.random.normal(ks[3], (64,), jnp.float32) * s,
        "fc1_w": jax.random.normal(ks[4], (128, 64 * 12 * 12), jnp.float32) * s,
        "fc1_b": jax.random.normal(ks[5], (128,), jnp.float32) * s,
        "fc2_w": jax.random.normal(ks[6], (10, 128), jnp.float32) * s,
        "fc2_b": jax.random.normal(ks[7], (10,), jnp.float32) * s,
    }


def prepare_params(p):
    """One-time weight layout prep -- kept out of the hot forward path."""
    w1 = jnp.transpose(p["conv1_w"], (2, 3, 1, 0)).reshape(9, 32)          # [i*3+j, oc]
    b1 = p["conv1_b"].reshape(1, 32)
    w2 = jnp.transpose(p["conv2_w"], (2, 3, 1, 0)).reshape(9, 32, 64)      # [i*3+j, ic, oc]
    w2 = w2.astype(jnp.bfloat16)
    b2 = p["conv2_b"].reshape(1, 64)
    # fc1: permute input columns from PyTorch's NCHW flatten (c*144 + h*12 + w)
    # to the NHWC flatten ((h*12+w)*64 + c) the conv kernel emits, transpose to
    # x @ W form, and cast to bf16.
    fc1 = p["fc1_w"].reshape(128, 64, 12, 12)
    fc1 = jnp.transpose(fc1, (2, 3, 1, 0)).reshape(64 * 12 * 12, 128)
    fc1 = fc1.astype(jnp.bfloat16)
    fc1_b = p["fc1_b"].reshape(1, 128)
    # fc2: transpose + pad N 10 -> 128 (zero weight cols, -1e30 bias) so the
    # output store is lane-dense and log_softmax over padded lanes is exact.
    fc2 = jnp.zeros((128, 128), jnp.float32).at[:, :10].set(p["fc2_w"].T)
    fc2_b = jnp.full((1, 128), -1e30, jnp.float32).at[0, :10].set(p["fc2_b"])
    return {"w1": w1, "b1": b1, "w2": w2, "b2": b2,
            "fc1_w": fc1, "fc1_b": fc1_b, "fc2_w": fc2, "fc2_b": fc2_b}


def simple_cnn_forward(x_nchw, pp):
    B = x_nchw.shape[0]
    x = x_nchw.reshape(B, 28, 28).astype(jnp.float32)

    # Tiny im2col for conv1 only (B x 676 x 9 f32); conv2's 9x-larger im2col is
    # fused inside the kernel and never materialized.
    cols = [x[:, i:i + 26, j:j + 26] for i in range(3) for j in range(3)]
    p1 = jnp.stack(cols, axis=-1).reshape(B, 26 * 26, 9)

    # conv1 + ReLU + conv2 + ReLU + 2x2 max-pool (fused, one image per step).
    pooled = conv_block(p1, pp["w1"], pp["b1"], pp["w2"], pp["b2"])  # (B,144,64) bf16

    # NHWC flatten -- matches the column-permuted fc1 weight (no transpose).
    flat = pooled.reshape(B, 64 * 12 * 12)

    # fc1 + ReLU + fc2 + log_softmax (fused, K-tiled fc1).
    logp = fc_block(flat, pp["fc1_w"], pp["fc1_b"], pp["fc2_w"], pp["fc2_b"])
    return logp[:, :10]


# ----------------------------- main -----------------------------

if __name__ == "__main__":
    key = jax.random.PRNGKey(0)
    x = jax.random.normal(key, (2, 1, 28, 28), dtype=jnp.float32)

    params = init_params(jax.random.PRNGKey(42))
    pp = prepare_params(params)          # one-time weight prep, outside forward

    fwd = jax.jit(simple_cnn_forward)
    out = jax.block_until_ready(fwd(x, pp))

    assert out.shape == (2, 10), out.shape
    assert bool(jnp.all(jnp.isfinite(out)))
    # log_softmax rows should exponentiate-sum to ~1
    row_sums = jnp.sum(jnp.exp(out), axis=1)
    assert bool(jnp.all(jnp.abs(row_sums - 1.0) < 1e-3))

    print("KERNEL_OK")
</pallas_src>

<mosaic_0001>
module attributes {stable_mosaic.version = 11 : i64} {
  func.func @_conv_block_kernel(%arg0: i32, %arg1: memref<1x676x9xf32, #tpu.memory_space<vmem>>, %arg2: memref<9x32xf32, #tpu.memory_space<vmem>>, %arg3: memref<1x32xf32, #tpu.memory_space<vmem>>, %arg4: memref<9x32x64xbf16, #tpu.memory_space<vmem>>, %arg5: memref<1x64xf32, #tpu.memory_space<vmem>>, %arg6: memref<1x144x64xbf16, #tpu.memory_space<vmem>>, %arg7: memref<680x32xf32, #tpu.memory_space<vmem>>, %arg8: memref<596x64xf32, #tpu.memory_space<vmem>>) attributes {dimension_semantics = [#tpu.dimension_semantics<parallel>], iteration_bounds = array<i64: 2>, scalar_prefetch = 0 : i64, scratch_operands = 2 : i64, tpu.core_type = #tpu.core_type<tc>, window_params = [{transform_indices = @transform_0, window_bounds = array<i64: 1, 676, 9>}, {pipeline_mode = #tpu.pipeline_mode<synchronous>, transform_indices = @transform_1, window_bounds = array<i64: 9, 32>}, {pipeline_mode = #tpu.pipeline_mode<synchronous>, transform_indices = @transform_2, window_bounds = array<i64: 1, 32>}, {pipeline_mode = #tpu.pipeline_mode<synchronous>, transform_indices = @transform_3, window_bounds = array<i64: 9, 32, 64>}, {pipeline_mode = #tpu.pipeline_mode<synchronous>, transform_indices = @transform_4, window_bounds = array<i64: 1, 64>}, {transform_indices = @transform_5, window_bounds = array<i64: 1, 144, 64>}]} {
    %c0 = arith.constant 0 : index
    %c0_0 = arith.constant 0 : index
    %c0_1 = arith.constant 0 : index
    %0 = vector.load %arg1[%c0, %c0_0, %c0_1] : memref<1x676x9xf32, #tpu.memory_space<vmem>>, vector<1x676x9xf32>
    %1 = vector.shape_cast %0 : vector<1x676x9xf32> to vector<676x9xf32>
    %c0_2 = arith.constant 0 : index
    %c0_3 = arith.constant 0 : index
    %2 = vector.load %arg2[%c0_2, %c0_3] : memref<9x32xf32, #tpu.memory_space<vmem>>, vector<9x32xf32>
    %cst = arith.constant dense<0.000000e+00> : vector<676x32xf32>
    %3 = tpu.matmul %1, %2, %cst {dimension_numbers = #tpu.dot_dimension_numbers<[1], [0], [0], [1], [0, 0, 1, 1], [], []>} : vector<676x9xf32>, vector<9x32xf32>, vector<676x32xf32> -> vector<676x32xf32>
    %c0_4 = arith.constant 0 : index
    %c0_5 = arith.constant 0 : index
    %4 = vector.load %arg3[%c0_4, %c0_5] : memref<1x32xf32, #tpu.memory_space<vmem>>, vector<1x32xf32>
    %5 = vector.broadcast %4 : vector<1x32xf32> to vector<676x32xf32>
    %6 = arith.addf %3, %5 : vector<676x32xf32>
    %cst_6 = arith.constant 0.000000e+00 : f32
    %7 = vector.broadcast %cst_6 : f32 to vector<676x32xf32>
    %8 = arith.maximumf %6, %7 : vector<676x32xf32>
    %cst_7 = arith.constant 0.000000e+00 : f32
    %9 = vector.broadcast %cst_7 : f32 to vector<8x32xf32>
    %c672 = arith.constant 672 : index
    %c0_8 = arith.constant 0 : index
    %10 = vector.load %arg7[%c672, %c0_8] : memref<680x32xf32, #tpu.memory_space<vmem>>, vector<8x32xf32>
    tpu.vector_store %arg7[%c672, %c0_8], %9 {strides = array<i32>} : memref<680x32xf32, #tpu.memory_space<vmem>>, vector<8x32xf32>,
    %c0_9 = arith.constant 0 : index
    %c0_10 = arith.constant 0 : index
    %11 = vector.load %arg7[%c0_9, %c0_10] : memref<680x32xf32, #tpu.memory_space<vmem>>, vector<676x32xf32>
    tpu.vector_store %arg7[%c0_9, %c0_10], %8 {strides = array<i32>} : memref<680x32xf32, #tpu.memory_space<vmem>>, vector<676x32xf32>,
    %c0_11 = arith.constant 0 : index
    %c0_12 = arith.constant 0 : index
    %12 = vector.load %arg7[%c0_11, %c0_12] : memref<680x32xf32, #tpu.memory_space<vmem>>, vector<624x32xf32>
    %13 = arith.truncf %12 : vector<624x32xf32> to vector<624x32xbf16>
    %c0_13 = arith.constant 0 : index
    %c0_14 = arith.constant 0 : index
    %c0_15 = arith.constant 0 : index
    %14 = vector.load %arg4[%c0_13, %c0_14, %c0_15] : memref<9x32x64xbf16, #tpu.memory_space<vmem>>, vector<1x32x64xbf16>
    %15 = vector.shape_cast %14 : vector<1x32x64xbf16> to vector<32x64xbf16>
    %cst_16 = arith.constant dense<0.000000e+00> : vector<624x64xf32>
    %16 = tpu.matmul %13, %15, %cst_16 {dimension_numbers = #tpu.dot_dimension_numbers<[1], [0], [0], [1], [0, 0, 1, 1], [], []>} : vector<624x32xbf16>, vector<32x64xbf16>, vector<624x64xf32> -> vector<624x64xf32>
    %c1 = arith.constant 1 : index
    %c0_17 = arith.constant 0 : index
    %17 = vector.load %arg7[%c1, %c0_17] : memref<680x32xf32, #tpu.memory_space<vmem>>, vector<624x32xf32>
    %18 = arith.truncf %17 : vector<624x32xf32> to vector<624x32xbf16>
    %c1_18 = arith.constant 1 : index
    %c0_19 = arith.constant 0 : index
    %c0_20 = arith.constant 0 : index
    %19 = vector.load %arg4[%c1_18, %c0_19, %c0_20] : memref<9x32x64xbf16, #tpu.memory_space<vmem>>, vector<1x32x64xbf16>
    %20 = vector.shape_cast %19 : vector<1x32x64xbf16> to vector<32x64xbf16>
    %cst_21 = arith.constant dense<0.000000e+00> : vector<624x64xf32>
    %21 = tpu.matmul %18, %20, %cst_21 {dimension_numbers = #tpu.dot_dimension_numbers<[1], [0], [0], [1], [0, 0, 1, 1], [], []>} : vector<624x32xbf16>, vector<32x64xbf16>, vector<624x64xf32> -> vector<624x64xf32>
    %22 = arith.addf %16, %21 : vector<624x64xf32>
    %c2 = arith.constant 2 : index
    %c0_22 = arith.constant 0 : index
    %23 = vector.load %arg7[%c2, %c0_22] : memref<680x32xf32, #tpu.memory_space<vmem>>, vector<624x32xf32>
    %24 = arith.truncf %23 : vector<624x32xf32> to vector<624x32xbf16>
    %c2_23 = arith.constant 2 : index
    %c0_24 = arith.constant 0 : index
    %c0_25 = arith.constant 0 : index
    %25 = vector.load %arg4[%c2_23, %c0_24, %c0_25] : memref<9x32x64xbf16, #tpu.memory_space<vmem>>, vector<1x32x64xbf16>
    %26 = vector.shape_cast %25 : vector<1x32x64xbf16> to vector<32x64xbf16>
    %cst_26 = arith.constant dense<0.000000e+00> : vector<624x64xf32>
    %27 = tpu.matmul %24, %26, %cst_26 {dimension_numbers = #tpu.dot_dimension_numbers<[1], [0], [0], [1], [0, 0, 1, 1], [], []>} : vector<624x32xbf16>, vector<32x64xbf16>, vector<624x64xf32> -> vector<624x64xf32>
    %28 = arith.addf %22, %27 : vector<624x64xf32>
    %c26 = arith.constant 26 : index
    %c0_27 = arith.constant 0 : index
    %29 = vector.load %arg7[%c26, %c0_27] : memref<680x32xf32, #tpu.memory_space<vmem>>, vector<624x32xf32>
    %30 = arith.truncf %29 : vector<624x32xf32> to vector<624x32xbf16>
    %c3 = arith.constant 3 : index
    %c0_28 = arith.constant 0 : index
    %c0_29 = arith.constant 0 : index
    %31 = vector.load %arg4[%c3, %c0_28, %c0_29] : memref<9x32x64xbf16, #tpu.memory_space<vmem>>, vector<1x32x64xbf16>
    %32 = vector.shape_cast %31 : vector<1x32x64xbf16> to vector<32x64xbf16>
    %cst_30 = arith.constant dense<0.000000e+00> : vector<624x64xf32>
    %33 = tpu.matmul %30, %32, %cst_30 {dimension_numbers = #tpu.dot_dimension_numbers<[1], [0], [0], [1], [0, 0, 1, 1], [], []>} : vector<624x32xbf16>, vector<32x64xbf16>, vector<624x64xf32> -> vector<624x64xf32>
    %34 = arith.addf %28, %33 : vector<624x64xf32>
    %c27 = arith.constant 27 : index
    %c0_31 = arith.constant 0 : index
    %35 = vector.load %arg7[%c27, %c0_31] : memref<680x32xf32, #tpu.memory_space<vmem>>, vector<624x32xf32>
    %36 = arith.truncf %35 : vector<624x32xf32> to vector<624x32xbf16>
    %c4 = arith.constant 4 : index
    %c0_32 = arith.constant 0 : index
    %c0_33 = arith.constant 0 : index
    %37 = vector.load %arg4[%c4, %c0_32, %c0_33] : memref<9x32x64xbf16, #tpu.memory_space<vmem>>, vector<1x32x64xbf16>
    %38 = vector.shape_cast %37 : vector<1x32x64xbf16> to vector<32x64xbf16>
    %cst_34 = arith.constant dense<0.000000e+00> : vector<624x64xf32>
    %39 = tpu.matmul %36, %38, %cst_34 {dimension_numbers = #tpu.dot_dimension_numbers<[1], [0], [0], [1], [0, 0, 1, 1], [], []>} : vector<624x32xbf16>, vector<32x64xbf16>, vector<624x64xf32> -> vector<624x64xf32>
    %40 = arith.addf %34, %39 : vector<624x64xf32>
    %c28 = arith.constant 28 : index
    %c0_35 = arith.constant 0 : index
    %41 = vector.load %arg7[%c28, %c0_35] : memref<680x32xf32, #tpu.memory_space<vmem>>, vector<624x32xf32>
    %42 = arith.truncf %41 : vector<624x32xf32> to vector<624x32xbf16>
    %c5 = arith.constant 5 : index
    %c0_36 = arith.constant 0 : index
    %c0_37 = arith.constant 0 : index
    %43 = vector.load %arg4[%c5, %c0_36, %c0_37] : memref<9x32x64xbf16, #tpu.memory_space<vmem>>, vector<1x32x64xbf16>
    %44 = vector.shape_cast %43 : vector<1x32x64xbf16> to vector<32x64xbf16>
    %cst_38 = arith.constant dense<0.000000e+00> : vector<624x64xf32>
    %45 = tpu.matmul %42, %44, %cst_38 {dimension_numbers = #tpu.dot_dimension_numbers<[1], [0], [0], [1], [0, 0, 1, 1], [], []>} : vector<624x32xbf16>, vector<32x64xbf16>, vector<624x64xf32> -> vector<624x64xf32>
    %46 = arith.addf %40, %45 : vector<624x64xf32>
    %c52 = arith.constant 52 : index
    %c0_39 = arith.constant 0 : index
    %47 = vector.load %arg7[%c52, %c0_39] : memref<680x32xf32, #tpu.memory_space<vmem>>, vector<624x32xf32>
    %48 = arith.truncf %47 : vector<624x32xf32> to vector<624x32xbf16>
    %c6 = arith.constant 6 : index
    %c0_40 = arith.constant 0 : index
    %c0_41 = arith.constant 0 : index
    %49 = vector.load %arg4[%c6, %c0_40, %c0_41] : memref<9x32x64xbf16, #tpu.memory_space<vmem>>, vector<1x32x64xbf16>
    %50 = vector.shape_cast %49 : vector<1x32x64xbf16> to vector<32x64xbf16>
    %cst_42 = arith.constant dense<0.000000e+00> : vector<624x64xf32>
    %51 = tpu.matmul %48, %50, %cst_42 {dimension_numbers = #tpu.dot_dimension_numbers<[1], [0], [0], [1], [0, 0, 1, 1], [], []>} : vector<624x32xbf16>, vector<32x64xbf16>, vector<624x64xf32> -> vector<624x64xf32>
    %52 = arith.addf %46, %51 : vector<624x64xf32>
    %c53 = arith.constant 53 : index
    %c0_43 = arith.constant 0 : index
    %53 = vector.load %arg7[%c53, %c0_43] : memref<680x32xf32, #tpu.memory_space<vmem>>, vector<624x32xf32>
    %54 = arith.truncf %53 : vector<624x32xf32> to vector<624x32xbf16>
    %c7 = arith.constant 7 : index
    %c0_44 = arith.constant 0 : index
    %c0_45 = arith.constant 0 : index
    %55 = vector.load %arg4[%c7, %c0_44, %c0_45] : memref<9x32x64xbf16, #tpu.memory_space<vmem>>, vector<1x32x64xbf16>
    %56 = vector.shape_cast %55 : vector<1x32x64xbf16> to vector<32x64xbf16>
    %cst_46 = arith.constant dense<0.000000e+00> : vector<624x64xf32>
    %57 = tpu.matmul %54, %56, %cst_46 {dimension_numbers = #tpu.dot_dimension_numbers<[1], [0], [0], [1], [0, 0, 1, 1], [], []>} : vector<624x32xbf16>, vector<32x64xbf16>, vector<624x64xf32> -> vector<624x64xf32>
    %58 = arith.addf %52, %57 : vector<624x64xf32>
    %c54 = arith.constant 54 : index
    %c0_47 = arith.constant 0 : index
    %59 = vector.load %arg7[%c54, %c0_47] : memref<680x32xf32, #tpu.memory_space<vmem>>, vector<624x32xf32>
    %60 = arith.truncf %59 : vector<624x32xf32> to vector<624x32xbf16>
    %c8 = arith.constant 8 : index
    %c0_48 = arith.constant 0 : index
    %c0_49 = arith.constant 0 : index
    %61 = vector.load %arg4[%c8, %c0_48, %c0_49] : memref<9x32x64xbf16, #tpu.memory_space<vmem>>, vector<1x32x64xbf16>
    %62 = vector.shape_cast %61 : vector<1x32x64xbf16> to vector<32x64xbf16>
    %cst_50 = arith.constant dense<0.000000e+00> : vector<624x64xf32>
    %63 = tpu.matmul %60, %62, %cst_50 {dimension_numbers = #tpu.dot_dimension_numbers<[1], [0], [0], [1], [0, 0, 1, 1], [], []>} : vector<624x32xbf16>, vector<32x64xbf16>, vector<624x64xf32> -> vector<624x64xf32>
    %64 = arith.addf %58, %63 : vector<624x64xf32>
    %c0_51 = arith.constant 0 : index
    %c0_52 = arith.constant 0 : index
    %65 = vector.load %arg5[%c0_51, %c0_52] : memref<1x64xf32, #tpu.memory_space<vmem>>, vector<1x64xf32>
    %66 = vector.broadcast %65 : vector<1x64xf32> to vector<624x64xf32>
    %67 = arith.addf %64, %66 : vector<624x64xf32>
    %cst_53 = arith.constant 0.000000e+00 : f32
    %68 = vector.broadcast %cst_53 : f32 to vector<624x64xf32>
    %69 = arith.maximumf %67, %68 : vector<624x64xf32>
    %70 = vector.extract_strided_slice %69 {offsets = [0, 0], sizes = [596, 64], strides = [1, 1]} : vector<624x64xf32> to vector<596x64xf32>
    %71 = vector.extract_strided_slice %69 {offsets = [1, 0], sizes = [596, 64], strides = [1, 1]} : vector<624x64xf32> to vector<596x64xf32>
    %72 = arith.maximumf %70, %71 : vector<596x64xf32>
    %73 = vector.extract_strided_slice %69 {offsets = [26, 0], sizes = [596, 64], strides = [1, 1]} : vector<624x64xf32> to vector<596x64xf32>
    %74 = vector.extract_strided_slice %69 {offsets = [27, 0], sizes = [596, 64], strides = [1, 1]} : vector<624x64xf32> to vector<596x64xf32>
    %75 = arith.maximumf %73, %74 : vector<596x64xf32>
    %76 = arith.maximumf %72, %75 : vector<596x64xf32>
    %c0_54 = arith.constant 0 : index
    %c0_55 = arith.constant 0 : index
    %77 = vector.load %arg8[%c0_54, %c0_55] : memref<596x64xf32, #tpu.memory_space<vmem>>, vector<596x64xf32>
    tpu.vector_store %arg8[%c0_54, %c0_55], %76 {strides = array<i32>} : memref<596x64xf32, #tpu.memory_space<vmem>>, vector<596x64xf32>,
    %c0_56 = arith.constant 0 : index
    %c0_57 = arith.constant 0 : index
    %78 = tpu.strided_load %arg8[%c0_56, %c0_57] {strides = array<i32: 2, 1>} : memref<596x64xf32, #tpu.memory_space<vmem>>, vector<12x64xf32>
    %79 = arith.truncf %78 : vector<12x64xf32> to vector<12x64xbf16>
    %c0_58 = arith.constant 0 : index
    %c0_59 = arith.constant 0 : index
    %c0_60 = arith.constant 0 : index
    %80 = vector.load %arg6[%c0_58, %c0_59, %c0_60] : memref<1x144x64xbf16, #tpu.memory_space<vmem>>, vector<1x12x64xbf16>
    %81 = vector.shape_cast %80 : vector<1x12x64xbf16> to vector<12x64xbf16>
    %82 = vector.shape_cast %79 : vector<12x64xbf16> to vector<1x12x64xbf16>
    tpu.vector_store %arg6[%c0_58, %c0_59, %c0_60], %82 {strides = array<i32>} : memref<1x144x64xbf16, #tpu.memory_space<vmem>>, vector<1x12x64xbf16>,
    %c52_61 = arith.constant 52 : index
    %c0_62 = arith.constant 0 : index
    %83 = tpu.strided_load %arg8[%c52_61, %c0_62] {strides = array<i32: 2, 1>} : memref<596x64xf32, #tpu.memory_space<vmem>>, vector<12x64xf32>
    %84 = arith.truncf %83 : vector<12x64xf32> to vector<12x64xbf16>
    %c0_63 = arith.constant 0 : index
    %c12 = arith.constant 12 : index
    %c0_64 = arith.constant 0 : index
    %85 = vector.load %arg6[%c0_63, %c12, %c0_64] : memref<1x144x64xbf16, #tpu.memory_space<vmem>>, vector<1x12x64xbf16>
    %86 = vector.shape_cast %85 : vector<1x12x64xbf16> to vector<12x64xbf16>
    %87 = vector.shape_cast %84 : vector<12x64xbf16> to vector<1x12x64xbf16>
    tpu.vector_store %arg6[%c0_63, %c12, %c0_64], %87 {strides = array<i32>} : memref<1x144x64xbf16, #tpu.memory_space<vmem>>, vector<1x12x64xbf16>,
    %c104 = arith.constant 104 : index
    %c0_65 = arith.constant 0 : index
    %88 = tpu.strided_load %arg8[%c104, %c0_65] {strides = array<i32: 2, 1>} : memref<596x64xf32, #tpu.memory_space<vmem>>, vector<12x64xf32>
    %89 = arith.truncf %88 : vector<12x64xf32> to vector<12x64xbf16>
    %c0_66 = arith.constant 0 : index
    %c24 = arith.constant 24 : index
    %c0_67 = arith.constant 0 : index
    %90 = vector.load %arg6[%c0_66, %c24, %c0_67] : memref<1x144x64xbf16, #tpu.memory_space<vmem>>, vector<1x12x64xbf16>
    %91 = vector.shape_cast %90 : vector<1x12x64xbf16> to vector<12x64xbf16>
    %92 = vector.shape_cast %89 : vector<12x64xbf16> to vector<1x12x64xbf16>
    tpu.vector_store %arg6[%c0_66, %c24, %c0_67], %92 {strides = array<i32>} : memref<1x144x64xbf16, #tpu.memory_space<vmem>>, vector<1x12x64xbf16>,
    %c156 = arith.constant 156 : index
    %c0_68 = arith.constant 0 : index
    %93 = tpu.strided_load %arg8[%c156, %c0_68] {strides = array<i32: 2, 1>} : memref<596x64xf32, #tpu.memory_space<vmem>>, vector<12x64xf32>
    %94 = arith.truncf %93 : vector<12x64xf32> to vector<12x64xbf16>
    %c0_69 = arith.constant 0 : index
    %c36 = arith.constant 36 : index
    %c0_70 = arith.constant 0 : index
    %95 = vector.load %arg6[%c0_69, %c36, %c0_70] : memref<1x144x64xbf16, #tpu.memory_space<vmem>>, vector<1x12x64xbf16>
    %96 = vector.shape_cast %95 : vector<1x12x64xbf16> to vector<12x64xbf16>
    %97 = vector.shape_cast %94 : vector<12x64xbf16> to vector<1x12x64xbf16>
    tpu.vector_store %arg6[%c0_69, %c36, %c0_70], %97 {strides = array<i32>} : memref<1x144x64xbf16, #tpu.memory_space<vmem>>, vector<1x12x64xbf16>,
    %c208 = arith.constant 208 : index
    %c0_71 = arith.constant 0 : index
    %98 = tpu.strided_load %arg8[%c208, %c0_71] {strides = array<i32: 2, 1>} : memref<596x64xf32, #tpu.memory_space<vmem>>, vector<12x64xf32>
    %99 = arith.truncf %98 : vector<12x64xf32> to vector<12x64xbf16>
    %c0_72 = arith.constant 0 : index
    %c48 = arith.constant 48 : index
    %c0_73 = arith.constant 0 : index
    %100 = vector.load %arg6[%c0_72, %c48, %c0_73] : memref<1x144x64xbf16, #tpu.memory_space<vmem>>, vector<1x12x64xbf16>
    %101 = vector.shape_cast %100 : vector<1x12x64xbf16> to vector<12x64xbf16>
    %102 = vector.shape_cast %99 : vector<12x64xbf16> to vector<1x12x64xbf16>
    tpu.vector_store %arg6[%c0_72, %c48, %c0_73], %102 {strides = array<i32>} : memref<1x144x64xbf16, #tpu.memory_space<vmem>>, vector<1x12x64xbf16>,
    %c260 = arith.constant 260 : index
    %c0_74 = arith.constant 0 : index
    %103 = tpu.strided_load %arg8[%c260, %c0_74] {strides = array<i32: 2, 1>} : memref<596x64xf32, #tpu.memory_space<vmem>>, vector<12x64xf32>
    %104 = arith.truncf %103 : vector<12x64xf32> to vector<12x64xbf16>
    %c0_75 = arith.constant 0 : index
    %c60 = arith.constant 60 : index
    %c0_76 = arith.constant 0 : index
    %105 = vector.load %arg6[%c0_75, %c60, %c0_76] : memref<1x144x64xbf16, #tpu.memory_space<vmem>>, vector<1x12x64xbf16>
    %106 = vector.shape_cast %105 : vector<1x12x64xbf16> to vector<12x64xbf16>
    %107 = vector.shape_cast %104 : vector<12x64xbf16> to vector<1x12x64xbf16>
    tpu.vector_store %arg6[%c0_75, %c60, %c0_76], %107 {strides = array<i32>} : memref<1x144x64xbf16, #tpu.memory_space<vmem>>, vector<1x12x64xbf16>,
    %c312 = arith.constant 312 : index
    %c0_77 = arith.constant 0 : index
    %108 = tpu.strided_load %arg8[%c312, %c0_77] {strides = array<i32: 2, 1>} : memref<596x64xf32, #tpu.memory_space<vmem>>, vector<12x64xf32>
    %109 = arith.truncf %108 : vector<12x64xf32> to vector<12x64xbf16>
    %c0_78 = arith.constant 0 : index
    %c72 = arith.constant 72 : index
    %c0_79 = arith.constant 0 : index
    %110 = vector.load %arg6[%c0_78, %c72, %c0_79] : memref<1x144x64xbf16, #tpu.memory_space<vmem>>, vector<1x12x64xbf16>
    %111 = vector.shape_cast %110 : vector<1x12x64xbf16> to vector<12x64xbf16>
    %112 = vector.shape_cast %109 : vector<12x64xbf16> to vector<1x12x64xbf16>
    tpu.vector_store %arg6[%c0_78, %c72, %c0_79], %112 {strides = array<i32>} : memref<1x144x64xbf16, #tpu.memory_space<vmem>>, vector<1x12x64xbf16>,
    %c364 = arith.constant 364 : index
    %c0_80 = arith.constant 0 : index
    %113 = tpu.strided_load %arg8[%c364, %c0_80] {strides = array<i32: 2, 1>} : memref<596x64xf32, #tpu.memory_space<vmem>>, vector<12x64xf32>
    %114 = arith.truncf %113 : vector<12x64xf32> to vector<12x64xbf16>
    %c0_81 = arith.constant 0 : index
    %c84 = arith.constant 84 : index
    %c0_82 = arith.constant 0 : index
    %115 = vector.load %arg6[%c0_81, %c84, %c0_82] : memref<1x144x64xbf16, #tpu.memory_space<vmem>>, vector<1x12x64xbf16>
    %116 = vector.shape_cast %115 : vector<1x12x64xbf16> to vector<12x64xbf16>
    %117 = vector.shape_cast %114 : vector<12x64xbf16> to vector<1x12x64xbf16>
    tpu.vector_store %arg6[%c0_81, %c84, %c0_82], %117 {strides = array<i32>} : memref<1x144x64xbf16, #tpu.memory_space<vmem>>, vector<1x12x64xbf16>,
    %c416 = arith.constant 416 : index
    %c0_83 = arith.constant 0 : index
    %118 = tpu.strided_load %arg8[%c416, %c0_83] {strides = array<i32: 2, 1>} : memref<596x64xf32, #tpu.memory_space<vmem>>, vector<12x64xf32>
    %119 = arith.truncf %118 : vector<12x64xf32> to vector<12x64xbf16>
    %c0_84 = arith.constant 0 : index
    %c96 = arith.constant 96 : index
    %c0_85 = arith.constant 0 : index
    %120 = vector.load %arg6[%c0_84, %c96, %c0_85] : memref<1x144x64xbf16, #tpu.memory_space<vmem>>, vector<1x12x64xbf16>
    %121 = vector.shape_cast %120 : vector<1x12x64xbf16> to vector<12x64xbf16>
    %122 = vector.shape_cast %119 : vector<12x64xbf16> to vector<1x12x64xbf16>
    tpu.vector_store %arg6[%c0_84, %c96, %c0_85], %122 {strides = array<i32>} : memref<1x144x64xbf16, #tpu.memory_space<vmem>>, vector<1x12x64xbf16>,
    %c468 = arith.constant 468 : index
    %c0_86 = arith.constant 0 : index
    %123 = tpu.strided_load %arg8[%c468, %c0_86] {strides = array<i32: 2, 1>} : memref<596x64xf32, #tpu.memory_space<vmem>>, vector<12x64xf32>
    %124 = arith.truncf %123 : vector<12x64xf32> to vector<12x64xbf16>
    %c0_87 = arith.constant 0 : index
    %c108 = arith.constant 108 : index
    %c0_88 = arith.constant 0 : index
    %125 = vector.load %arg6[%c0_87, %c108, %c0_88] : memref<1x144x64xbf16, #tpu.memory_space<vmem>>, vector<1x12x64xbf16>
    %126 = vector.shape_cast %125 : vector<1x12x64xbf16> to vector<12x64xbf16>
    %127 = vector.shape_cast %124 : vector<12x64xbf16> to vector<1x12x64xbf16>
    tpu.vector_store %arg6[%c0_87, %c108, %c0_88], %127 {strides = array<i32>} : memref<1x144x64xbf16, #tpu.memory_space<vmem>>, vector<1x12x64xbf16>,
    %c520 = arith.constant 520 : index
    %c0_89 = arith.constant 0 : index
    %128 = tpu.strided_load %arg8[%c520, %c0_89] {strides = array<i32: 2, 1>} : memref<596x64xf32, #tpu.memory_space<vmem>>, vector<12x64xf32>
    %129 = arith.truncf %128 : vector<12x64xf32> to vector<12x64xbf16>
    %c0_90 = arith.constant 0 : index
    %c120 = arith.constant 120 : index
    %c0_91 = arith.constant 0 : index
    %130 = vector.load %arg6[%c0_90, %c120, %c0_91] : memref<1x144x64xbf16, #tpu.memory_space<vmem>>, vector<1x12x64xbf16>
    %131 = vector.shape_cast %130 : vector<1x12x64xbf16> to vector<12x64xbf16>
    %132 = vector.shape_cast %129 : vector<12x64xbf16> to vector<1x12x64xbf16>
    tpu.vector_store %arg6[%c0_90, %c120, %c0_91], %132 {strides = array<i32>} : memref<1x144x64xbf16, #tpu.memory_space<vmem>>, vector<1x12x64xbf16>,
    %c572 = arith.constant 572 : index
    %c0_92 = arith.constant 0 : index
    %133 = tpu.strided_load %arg8[%c572, %c0_92] {strides = array<i32: 2, 1>} : memref<596x64xf32, #tpu.memory_space<vmem>>, vector<12x64xf32>
    %134 = arith.truncf %133 : vector<12x64xf32> to vector<12x64xbf16>
    %c0_93 = arith.constant 0 : index
    %c132 = arith.constant 132 : index
    %c0_94 = arith.constant 0 : index
    %135 = vector.load %arg6[%c0_93, %c132, %c0_94] : memref<1x144x64xbf16, #tpu.memory_space<vmem>>, vector<1x12x64xbf16>
    %136 = vector.shape_cast %135 : vector<1x12x64xbf16> to vector<12x64xbf16>
    %137 = vector.shape_cast %134 : vector<12x64xbf16> to vector<1x12x64xbf16>
    tpu.vector_store %arg6[%c0_93, %c132, %c0_94], %137 {strides = array<i32>} : memref<1x144x64xbf16, #tpu.memory_space<vmem>>, vector<1x12x64xbf16>,
    return
  }
  func.func @transform_0(%arg0: i32) -> (i32, i32, i32) {
    %c0_i32 = arith.constant 0 : i32
    %c0_i32_0 = arith.constant 0 : i32
    %c0_i32_1 = arith.constant 0 : i32
    return %arg0, %c0_i32, %c0_i32_0 : i32, i32, i32
  }
  func.func @transform_1(%arg0: i32) -> (i32, i32) {
    %c0_i32 = arith.constant 0 : i32
    %c0_i32_0 = arith.constant 0 : i32
    %c0_i32_1 = arith.constant 0 : i32
    return %c0_i32, %c0_i32_0 : i32, i32
  }
  func.func @transform_2(%arg0: i32) -> (i32, i32) {
    %c0_i32 = arith.constant 0 : i32
    %c0_i32_0 = arith.constant 0 : i32
    %c0_i32_1 = arith.constant 0 : i32
    return %c0_i32, %c0_i32_0 : i32, i32
  }
  func.func @transform_3(%arg0: i32) -> (i32, i32, i32) {
    %c0_i32 = arith.constant 0 : i32
    %c0_i32_0 = arith.constant 0 : i32
    %c0_i32_1 = arith.constant 0 : i32
    %c0_i32_2 = arith.constant 0 : i32
    return %c0_i32, %c0_i32_0, %c0_i32_1 : i32, i32, i32
  }
  func.func @transform_4(%arg0: i32) -> (i32, i32) {
    %c0_i32 = arith.constant 0 : i32
    %c0_i32_0 = arith.constant 0 : i32
    %c0_i32_1 = arith.constant 0 : i32
    return %c0_i32, %c0_i32_0 : i32, i32
  }
  func.func @transform_5(%arg0: i32) -> (i32, i32, i32) {
    %c0_i32 = arith.constant 0 : i32
    %c0_i32_0 = arith.constant 0 : i32
    %c0_i32_1 = arith.constant 0 : i32
    return %arg0, %c0_i32, %c0_i32_0 : i32, i32, i32
  }
}

module attributes {stable_mosaic.version = 11 : i64} {
  func.func @_fc_block_kernel(%arg0: i32, %arg1: i32, %arg2: memref<2x1152xbf16, #tpu.memory_space<vmem>>, %arg3: memref<1152x128xbf16, #tpu.memory_space<vmem>>, %arg4: memref<1x128xf32, #tpu.memory_space<vmem>>, %arg5: memref<128x128xf32, #tpu.memory_space<vmem>>, %arg6: memref<1x128xf32, #tpu.memory_space<vmem>>, %arg7: memref<2x128xf32, #tpu.memory_space<vmem>>, %arg8: memref<2x128xf32, #tpu.memory_space<vmem>>) attributes {dimension_semantics = [#tpu.dimension_semantics<parallel>, #tpu.dimension_semantics<arbitrary>], iteration_bounds = array<i64: 1, 8>, scalar_prefetch = 0 : i64, scratch_operands = 1 : i64, tpu.core_type = #tpu.core_type<tc>, window_params = [{transform_indices = @transform_0, window_bounds = array<i64: 2, 1152>}, {transform_indices = @transform_1, window_bounds = array<i64: 1152, 128>}, {pipeline_mode = #tpu.pipeline_mode<synchronous>, transform_indices = @transform_2, window_bounds = array<i64: 1, 128>}, {pipeline_mode = #tpu.pipeline_mode<synchronous>, transform_indices = @transform_3, window_bounds = array<i64: 128, 128>}, {pipeline_mode = #tpu.pipeline_mode<synchronous>, transform_indices = @transform_4, window_bounds = array<i64: 1, 128>}, {transform_indices = @transform_5, window_bounds = array<i64: 2, 128>}]} {
    %c0_i32 = arith.constant 0 : i32
    %0 = arith.cmpi eq, %arg1, %c0_i32 : i32
    %1 = arith.extui %0 : i1 to i32
    %c0_i32_0 = arith.constant 0 : i32
    %2 = arith.cmpi ne, %1, %c0_i32_0 : i32
    scf.if %2 {
      %cst_9 = arith.constant 0.000000e+00 : f32
      %12 = vector.broadcast %cst_9 : f32 to vector<2x128xf32>
      %c0_10 = arith.constant 0 : index
      %c0_11 = arith.constant 0 : index
      %13 = vector.load %arg8[%c0_10, %c0_11] : memref<2x128xf32, #tpu.memory_space<vmem>>, vector<2x128xf32>
      tpu.vector_store %arg8[%c0_10, %c0_11], %12 {strides = array<i32>} : memref<2x128xf32, #tpu.memory_space<vmem>>, vector<2x128xf32>,
    } else {
    }
    %c0 = arith.constant 0 : index
    %c0_1 = arith.constant 0 : index
    %3 = vector.load %arg8[%c0, %c0_1] : memref<2x128xf32, #tpu.memory_space<vmem>>, vector<2x128xf32>
    %c0_2 = arith.constant 0 : index
    %c0_3 = arith.constant 0 : index
    %4 = vector.load %arg2[%c0_2, %c0_3] : memref<2x1152xbf16, #tpu.memory_space<vmem>>, vector<2x1152xbf16>
    %c0_4 = arith.constant 0 : index
    %c0_5 = arith.constant 0 : index
    %5 = vector.load %arg3[%c0_4, %c0_5] : memref<1152x128xbf16, #tpu.memory_space<vmem>>, vector<1152x128xbf16>
    %cst = arith.constant dense<0.000000e+00> : vector<2x128xf32>
    %6 = tpu.matmul %4, %5, %cst {dimension_numbers = #tpu.dot_dimension_numbers<[1], [0], [0], [1], [0, 0, 1, 1], [], []>} : vector<2x1152xbf16>, vector<1152x128xbf16>, vector<2x128xf32> -> vector<2x128xf32>
    %7 = arith.addf %3, %6 : vector<2x128xf32>
    %c0_6 = arith.constant 0 : index
    %c0_7 = arith.constant 0 : index
    %8 = vector.load %arg8[%c0_6, %c0_7] : memref<2x128xf32, #tpu.memory_space<vmem>>, vector<2x128xf32>
    tpu.vector_store %arg8[%c0_6, %c0_7], %7 {strides = array<i32>} : memref<2x128xf32, #tpu.memory_space<vmem>>, vector<2x128xf32>,
    %c7_i32 = arith.constant 7 : i32
    %9 = arith.cmpi eq, %arg1, %c7_i32 : i32
    %10 = arith.extui %9 : i1 to i32
    %c0_i32_8 = arith.constant 0 : i32
    %11 = arith.cmpi ne, %10, %c0_i32_8 : i32
    scf.if %11 {
      %c0_9 = arith.constant 0 : index
      %c0_10 = arith.constant 0 : index
      %12 = vector.load %arg8[%c0_9, %c0_10] : memref<2x128xf32, #tpu.memory_space<vmem>>, vector<2x128xf32>
      %c0_11 = arith.constant 0 : index
      %c0_12 = arith.constant 0 : index
      %13 = vector.load %arg4[%c0_11, %c0_12] : memref<1x128xf32, #tpu.memory_space<vmem>>, vector<1x128xf32>
      %14 = vector.broadcast %13 : vector<1x128xf32> to vector<2x128xf32>
      %15 = arith.addf %12, %14 : vector<2x128xf32>
      %cst_13 = arith.constant 0.000000e+00 : f32
      %16 = vector.broadcast %cst_13 : f32 to vector<2x128xf32>
      %17 = arith.maximumf %15, %16 : vector<2x128xf32>
      %c0_14 = arith.constant 0 : index
      %c0_15 = arith.constant 0 : index
      %18 = vector.load %arg5[%c0_14, %c0_15] : memref<128x128xf32, #tpu.memory_space<vmem>>, vector<128x128xf32>
      %cst_16 = arith.constant dense<0.000000e+00> : vector<2x128xf32>
      %19 = tpu.matmul %17, %18, %cst_16 {dimension_numbers = #tpu.dot_dimension_numbers<[1], [0], [0], [1], [0, 0, 1, 1], [], []>} : vector<2x128xf32>, vector<128x128xf32>, vector<2x128xf32> -> vector<2x128xf32>
      %c0_17 = arith.constant 0 : index
      %c0_18 = arith.constant 0 : index
      %20 = vector.load %arg6[%c0_17, %c0_18] : memref<1x128xf32, #tpu.memory_space<vmem>>, vector<1x128xf32>
      %21 = vector.broadcast %20 : vector<1x128xf32> to vector<2x128xf32>
      %22 = arith.addf %19, %21 : vector<2x128xf32>
      %cst_19 = arith.constant dense<0xFF800000> : vector<2xf32>
      %23 = vector.multi_reduction <maximumf>, %22, %cst_19 [1] : vector<2x128xf32> to vector<2xf32>
      %24 = vector.shape_cast %23 : vector<2xf32> to vector<2x1xf32>
      %25 = vector.broadcast %24 : vector<2x1xf32> to vector<2x128xf32>
      %26 = arith.subf %22, %25 : vector<2x128xf32>
      %27 = math.exp %26 : vector<2x128xf32>
      %cst_20 = arith.constant dense<0.000000e+00> : vector<2xf32>
      %28 = vector.multi_reduction <add>, %27, %cst_20 [1] : vector<2x128xf32> to vector<2xf32>
      %29 = vector.shape_cast %28 : vector<2xf32> to vector<2x1xf32>
      %30 = math.log %29 : vector<2x1xf32>
      %31 = vector.broadcast %30 : vector<2x1xf32> to vector<2x128xf32>
      %32 = arith.subf %26, %31 : vector<2x128xf32>
      %c0_21 = arith.constant 0 : index
      %c0_22 = arith.constant 0 : index
      %33 = vector.load %arg7[%c0_21, %c0_22] : memref<2x128xf32, #tpu.memory_space<vmem>>, vector<2x128xf32>
      tpu.vector_store %arg7[%c0_21, %c0_22], %32 {strides = array<i32>} : memref<2x128xf32, #tpu.memory_space<vmem>>, vector<2x128xf32>,
    } else {
    }
    return
  }
  func.func @transform_0(%arg0: i32, %arg1: i32) -> (i32, i32) {
    %c0_i32 = arith.constant 0 : i32
    return %arg0, %arg1 : i32, i32
  }
  func.func @transform_1(%arg0: i32, %arg1: i32) -> (i32, i32) {
    %c0_i32 = arith.constant 0 : i32
    %c0_i32_0 = arith.constant 0 : i32
    return %arg1, %c0_i32 : i32, i32
  }
  func.func @transform_2(%arg0: i32, %arg1: i32) -> (i32, i32) {
    %c0_i32 = arith.constant 0 : i32
    %c0_i32_0 = arith.constant 0 : i32
    %c0_i32_1 = arith.constant 0 : i32
    return %c0_i32, %c0_i32_0 : i32, i32
  }
  func.func @transform_3(%arg0: i32, %arg1: i32) -> (i32, i32) {
    %c0_i32 = arith.constant 0 : i32
    %c0_i32_0 = arith.constant 0 : i32
    %c0_i32_1 = arith.constant 0 : i32
    return %c0_i32, %c0_i32_0 : i32, i32
  }
  func.func @transform_4(%arg0: i32, %arg1: i32) -> (i32, i32) {
    %c0_i32 = arith.constant 0 : i32
    %c0_i32_0 = arith.constant 0 : i32
    %c0_i32_1 = arith.constant 0 : i32
    return %c0_i32, %c0_i32_0 : i32, i32
  }
  func.func @transform_5(%arg0: i32, %arg1: i32) -> (i32, i32) {
    %c0_i32 = arith.constant 0 : i32
    %c0_i32_0 = arith.constant 0 : i32
    return %arg0, %c0_i32 : i32, i32
  }
}

</mosaic_0001>

<bundles_post_ra>
// kernel: simple_cnn_forward.3
= control target key start
LH: loop header
LB: loop body
LE: loop exit
PB: predicated region body
PF: predicated region fallthrough
CT: control target
= control target key end

     0   :  { %10 = vsyncpa [#allocation4], 0  ;;  %s1853_s0 = inlined_call_operand.vmem [shape: bf16[2,9216], index: 0, kind: input, shape index: {}]   ;;  %s1854_s1 = inlined_call_operand.vmem [shape: bf16[9216,128], index: 1, kind: input, shape index: {}]   ;;  %s1855_s2 = inlined_call_operand.vmem [shape: f32[1,128], index: 2, kind: input, shape index: {}]   ;;  %s1856_s3 = inlined_call_operand.hbm [shape: f32[128,128], index: 3, kind: input, shape index: {}]   ;;  %s1857_s4 = inlined_call_operand.vmem [shape: f32[1,128], index: 4, kind: input, shape index: {}]   ;;  %s1858_s5 = inlined_call_operand.hbm [shape: f32[2,128], index: 5, kind: output, shape index: {}]  }
   0x1   :  { %11 = vsyncpa [#allocation5], 0  ;;  %s1707_s18 = smov 0   ;;  %s1709_s19 = smov 0  }
   0x2   :  { %s1711_s20 = smov 0  }
   0x3 LB: > { %s1158_s21 = sadd.s32 4294967295, %s1670_s20   ;;  %s26_s22 = sadd.s32 1, %s1666_s19  ;;  %s1670_s20 = sphi %s1711_s20, %s17_s20   ;;  %s1666_s19 = sphi %s1709_s19, %s1860_s19   ;;  %s1662_s18 = sphi %s1707_s18, %s1859_s18  }
   0x4   : > { %p27_p0 = scmp.ge.s32.totalorder %s26_s22, 8  ;;  %p1159_p1 = scmp.ge.s32.totalorder %s1670_s20, 1 }
   0x5   : > { %p177_p2 = scmp.lt.s32.totalorder %s1670_s20, 9  ;;  %p1543_p4 = scmp.eq.s32.totalorder %s1158_s21, 0 }
   0x6   : > { %s1862_s22 = smov (%p27_p0, %s26_s22), 0  ;;  %s191_s25 = sshll.u32 %s1856_s3, 4  ;;  %s192_s25 = int_to_ptr.hbm [resolvable:$true] %s191_s25 }
   0x7   : > { %p178_p3 = pnand %p1159_p1, %p177_p2  ;;  %s1672_s26 = smov [#allocation3]  }
   0x8   : > { %s193_s27 = sshll.u32 %s1672_s26, 4  ;;  %s1673_s28 = smov 128   ;;  %s194_s27 = int_to_ptr.vmem [resolvable:$true] %s193_s27 }
   0x9   : > { %p1539_p5 = pneg %p178_p3  ;;  %s1674_s29 = smov 8  }
   0xa   : > { %233 = sbr.rel (%p178_p3) target bundleno = 679 (0x2a7), region = 40 }
   0xb   : > { %p1540_p6 = pnand %p1543_p4, %p1539_p5 }
   0xd   : > { %1542 = dma.hbm_to_vmem [thread:$0]  (!%p1540_p6), %s192_s25, 2048, %s194_s27, [#allocation4], %s1673_s28, %s1673_s28, %s1674_s29  }
   0xf   : > { %1653 = dma.done.wait (%p1543_p4), [#allocation4], 2048  }
  0x10   : > { %1655 = vsyncadd (%p1543_p4), [#allocation4], 4294965248  ;;  %s265_s30 = smul.u32 9, %s1662_s18  ;;  %p1165_p9 = scmp.ne.s32.totalorder %s1662_s18, 0 }
  0x11   : > { %s274_s6 = smul.u32 144, %s1662_s18 }
  0x12   : > { %p268_p7 = scmp.lt.s32.totalorder %s265_s30, 71 }
  0x13   : > { %p275_p8 = scmp.lt.s32.totalorder %s274_s6, 1151  ;;  %283 = sbr.rel (%p1165_p9) target bundleno = 26 (0x1a), region = 48 }
  0x14   : > { %s1864_s30 = smov (!%p268_p7, %s265_s30), 71 }
  0x15   : > { %s1866_s6 = smov (!%p275_p8, %s274_s6), 1151  ;;  %s1738_s9 = scalar_lea.vmem %s1853_s0, %s1864_s30 }
  0x16   : > { %s1164_s10 = sshll.u32 %s1866_s6, 2 }
  0x17   : > { %s1743_s13 = scalar_lea.vmem %s1854_s1, %s1164_s10 }
  0x18   : > { %v1675_v0 = vmov 0.0  }
  0x19   : > { %284 = vst [vmem:[#allocation2] sm:$0x3] %v1675_v0 }
  0x1a PF: > { %v1466_v1 = vld [vmem:[%s1743_s13 + $0x38] sm:$0xff]  ;;  %v1465_v5 = vld [vmem:[%s1743_s13 + $0x30] sm:$0xff]  ;;  %v1464_v9 = vld [vmem:[%s1743_s13 + $0x28] sm:$0xff]  ;;  %p1454_p10 = scmp.ne.s32.totalorder %s1662_s18, 7 }
  0x1b   : > { %v1482_v2 = vld [vmem:[%s1743_s13 + $0xb8] sm:$0xff]  ;;  %886 = vmatpush.bf16.msra.mxu0 %v1466_v1  ;;  %v1481_v6 = vld [vmem:[%s1743_s13 + $0xb0] sm:$0xff]  ;;  %v1480_v10 = vld [vmem:[%s1743_s13 + $0xa8] sm:$0xff] }
  0x1c   : > { %v1490_v3 = vld [vmem:[%s1743_s13 + $0xf8] sm:$0xff]  ;;  %912 = vmatpush.bf16.msra.mxu2 %v1482_v2  ;;  %v1489_v7 = vld [vmem:[%s1743_s13 + $0xf0] sm:$0xff]  ;;  %v1488_v11 = vld [vmem:[%s1743_s13 + $0xe8] sm:$0xff] }
  0x1d   : > { %v1474_v4 = vld [vmem:[%s1743_s13 + $0x78] sm:$0xff]  ;;  %925 = vmatpush.bf16.msra.mxu3 %v1490_v3  ;;  %v1473_v8 = vld [vmem:[%s1743_s13 + $0x70] sm:$0xff]  ;;  %v1472_v12 = vld [vmem:[%s1743_s13 + $0x68] sm:$0xff] }
  0x1e   : > { %899 = vmatpush.bf16.msra.mxu1 %v1474_v4  ;;  %v1463_v13 = vld [vmem:[%s1743_s13 + $0x20] sm:$0xff]  ;;  %v1462_v17 = vld [vmem:[%s1743_s13 + $0x18] sm:$0xff]  ;;  %v1461_v22 = vld [vmem:[%s1743_s13 + $0x10] sm:$0xff] }
  0x1f   : > { %887 = vmatpush.bf16.msra.mxu0 %v1465_v5  ;;  %v1479_v14 = vld [vmem:[%s1743_s13 + $0xa0] sm:$0xff]  ;;  %v1478_v18 = vld [vmem:[%s1743_s13 + $0x98] sm:$0xff]  ;;  %v1477_v23 = vld [vmem:[%s1743_s13 + $0x90] sm:$0xff] }
  0x20   : > { %913 = vmatpush.bf16.msra.mxu2 %v1481_v6  ;;  %v1487_v15 = vld [vmem:[%s1743_s13 + $0xe0] sm:$0xff]  ;;  %v1486_v19 = vld [vmem:[%s1743_s13 + $0xd8] sm:$0xff]  ;;  %v1485_v24 = vld [vmem:[%s1743_s13 + $0xd0] sm:$0xff] }
  0x21   : > { %926 = vmatpush.bf16.msra.mxu3 %v1489_v7  ;;  %v1471_v16 = vld [vmem:[%s1743_s13 + $0x60] sm:$0xff]  ;;  %v1470_v20 = vld [vmem:[%s1743_s13 + $0x58] sm:$0xff]  ;;  %v1469_v25 = vld [vmem:[%s1743_s13 + $0x50] sm:$0xff] }
  0x22   : > { %900 = vmatpush.bf16.msra.mxu1 %v1473_v8  ;;  %v286_v21 = vld [vmem:[%s1738_s9] sm:$0xff]  ;;  %v1460_v26 = vld [vmem:[%s1743_s13 + $0x8] sm:$0xff]  ;;  %v1498_v32 = vld [vmem:[%s1743_s13 + $0x138] sm:$0xff] }
  0x23   : > { %888 = vmatpush.bf16.msra.mxu0 %v1464_v9  ;;  %433 = vst [vmem:[#allocation1] ss:$9 sm:$0xff] %v286_v21  ;;  %v1476_v27 = vld [vmem:[%s1743_s13 + $0x88] sm:$0xff]  ;;  %v1459_v30 = vld [vmem:[%s1743_s13] sm:$0xff]  ;;  %v1514_v33 = vld [vmem:[%s1743_s13 + $0x1b8] sm:$0xff] }
  0x24   : > { %914 = vmatpush.bf16.msra.mxu2 %v1480_v10  ;;  %v1484_v28 = vld [vmem:[%s1743_s13 + $0xc8] sm:$0xff]  ;;  %v1475_v31 = vld [vmem:[%s1743_s13 + $0x80] sm:$0xff]  ;;  %v1522_v36 = vld [vmem:[%s1743_s13 + $0x1f8] sm:$0xff] }
  0x25   : > { %927 = vmatpush.bf16.msra.mxu3 %v1488_v11  ;;  %v1468_v29 = vld [vmem:[%s1743_s13 + $0x48] sm:$0xff]  ;;  %v1483_v34 = vld [vmem:[%s1743_s13 + $0xc0] sm:$0xff]  ;;  %v1506_v37 = vld [vmem:[%s1743_s13 + $0x178] sm:$0xff] }
  0x26   : > { %901 = vmatpush.bf16.msra.mxu1 %v1472_v12  ;;  %v1467_v35 = vld [vmem:[%s1743_s13 + $0x40] sm:$0xff]  ;;  %v1497_v38 = vld [vmem:[%s1743_s13 + $0x130] sm:$0xff]  ;;  %v287_v47 = vld [vmem:[%s1738_s9 + $0x8] sm:$0x1] }
  0x27   : > { %889 = vmatpush.bf16.msra.mxu0 %v1463_v13  ;;  %v1513_v39 = vld [vmem:[%s1743_s13 + $0x1b0] sm:$0xff]  ;;  %v1496_v51 = vld [vmem:[%s1743_s13 + $0x128] sm:$0xff]  ;;  %v1495_v55 = vld [vmem:[%s1743_s13 + $0x120] sm:$0xff] }
  0x28   : > { %915 = vmatpush.bf16.msra.mxu2 %v1479_v14  ;;  %v1521_v40 = vld [vmem:[%s1743_s13 + $0x1f0] sm:$0xff]  ;;  %v1512_v52 = vld [vmem:[%s1743_s13 + $0x1a8] sm:$0xff]  ;;  %v1511_v56 = vld [vmem:[%s1743_s13 + $0x1a0] sm:$0xff] }
  0x29   : > { %928 = vmatpush.bf16.msra.mxu3 %v1487_v15  ;;  %v1505_v41 = vld [vmem:[%s1743_s13 + $0x170] sm:$0xff]  ;;  %v1520_v53 = vld [vmem:[%s1743_s13 + $0x1e8] sm:$0xff]  ;;  %v1519_v57 = vld [vmem:[%s1743_s13 + $0x1e0] sm:$0xff] }
  0x2a   : > { %902 = vmatpush.bf16.msra.mxu1 %v1471_v16  ;;  %v436_v42 = vld [vmem:[#allocation1 + $0x12] sm:$0xff]  ;;  %v434_v43 = vld [vmem:[#allocation1] sm:$0xff]  ;;  %v435_v45 = vld [vmem:[#allocation1 + $0x9] sm:$0xff] }
  0x2b   : > { %890 = vmatpush.bf16.msra.mxu0 %v1462_v17  ;;  %v437_v44 = vld [vmem:[#allocation1 + $0x1b] sm:$0xff]  ;;  %v1790_v48 = vld [vmem:[#allocation1 + $0x24] sm:$0xff]  ;;  %v1794_v50 = vld [vmem:[#allocation1 + $0x2d] sm:$0xff] }
  0x2c   : > { %916 = vmatpush.bf16.msra.mxu2 %v1478_v18  ;;  %v1787_v46 = vld [vmem:[#allocation1 + $0x36] sm:$0xff]  ;;  %v1792_v49 = vld [vmem:[#allocation1 + $0x3f] sm:$0xff]  ;;  %v1504_v54 = vld [vmem:[%s1743_s13 + $0x168] sm:$0xff] }
  0x2d   : > { %929 = vmatpush.bf16.msra.mxu3 %v1486_v19  ;;  %443 = vst [vmem:[#allocation1] ss:$9 sm:$0xff] %v287_v47  ;;  %v1503_v58 = vld [vmem:[%s1743_s13 + $0x160] sm:$0xff]  ;;  %v1494_v59 = vld [vmem:[%s1743_s13 + $0x118] sm:$0xff]  ;;  %v1493_v63 = vld [vmem:[%s1743_s13 + $0x110] sm:$0xff] }
  0x2e   : > { %903 = vmatpush.bf16.msra.mxu1 %v1470_v20  ;;  %v1510_v60 = vld [vmem:[%s1743_s13 + $0x198] sm:$0xff]  ;;  %v1509_v0 = vld [vmem:[%s1743_s13 + $0x190] sm:$0xff]  ;;  %v1492_v3 = vld [vmem:[%s1743_s13 + $0x108] sm:$0xff] }
  0x2f   : > { %891 = vmatpush.bf16.msra.mxu0 %v1461_v22  ;;  %v1518_v61 = vld [vmem:[%s1743_s13 + $0x1d8] sm:$0xff]  ;;  %v1517_v1 = vld [vmem:[%s1743_s13 + $0x1d0] sm:$0xff]  ;;  %v1508_v4 = vld [vmem:[%s1743_s13 + $0x188] sm:$0xff] }
  0x30   : > { %917 = vmatpush.bf16.msra.mxu2 %v1477_v23  ;;  %v1502_v62 = vld [vmem:[%s1743_s13 + $0x158] sm:$0xff]  ;;  %v1501_v2 = vld [vmem:[%s1743_s13 + $0x150] sm:$0xff]  ;;  %v1516_v5 = vld [vmem:[%s1743_s13 + $0x1c8] sm:$0xff] }
  0x31   : > { %930 = vmatpush.bf16.msra.mxu3 %v1485_v24  ;;  %v1500_v6 = vld [vmem:[%s1743_s13 + $0x148] sm:$0xff]  ;;  %v1491_v7 = vld [vmem:[%s1743_s13 + $0x100] sm:$0xff]  ;;  %v1530_v9 = vld [vmem:[%s1743_s13 + $0x238] sm:$0xff] }
  0x32   : > { %904 = vmatpush.bf16.msra.mxu1 %v1469_v25  ;;  %v1507_v8 = vld [vmem:[%s1743_s13 + $0x180] sm:$0xff]  ;;  %v1529_v12 = vld [vmem:[%s1743_s13 + $0x230] sm:$0xff]  ;;  %v1528_v13 = vld [vmem:[%s1743_s13 + $0x228] sm:$0xff] }
  0x33   : > { %892 = vmatpush.bf16.msra.mxu0 %v1460_v26  ;;  %v1515_v10 = vld [vmem:[%s1743_s13 + $0x1c0] sm:$0xff]  ;;  %v1526_v15 = vld [vmem:[%s1743_s13 + $0x218] sm:$0xff]  ;;  %v1525_v16 = vld [vmem:[%s1743_s13 + $0x210] sm:$0xff] }
  0x34   : > { %918 = vmatpush.bf16.msra.mxu2 %v1476_v27  ;;  %v1499_v11 = vld [vmem:[%s1743_s13 + $0x140] sm:$0xff]  ;;  %v1524_v17 = vld [vmem:[%s1743_s13 + $0x208] sm:$0xff] }
  0x35   : > { %931 = vmatpush.bf16.msra.mxu3 %v1484_v28  ;;  %v1527_v14 = vld [vmem:[%s1743_s13 + $0x220] sm:$0xff] }
  0x36   : > { %905 = vmatpush.bf16.msra.mxu1 %v1468_v29  ;;  %v1523_v18 = vld [vmem:[%s1743_s13 + $0x200] sm:$0xff] }
  0x37   : > { %893 = vmatpush.bf16.msra.mxu0 %v1459_v30  ;;  %v444_v19 = vld [vmem:[#allocation1] sm:$0xff] }
  0x38   : > { %919 = vmatpush.bf16.msra.mxu2 %v1475_v31 }
  0x39   : > { %932 = vmatpush.bf16.msra.mxu3 %v1483_v34 }
  0x3a   : > { %906 = vmatpush.bf16.msra.mxu1 %v1467_v35  ;;  %894 = vmatmul.bf16.vlgmr.msra.gmra.mxu0 %v434_v43  ;;  %v285_v43 = vld [vmem:[#allocation2] sm:$0x3] }
  0x3b   : > { %938 = vmatpush.bf16.msrb.mxu0 %v1498_v32  ;;  %920 = vmatmul.bf16.vlgmr.msra.gmra.mxu2 %v436_v42 }
  0x3c   : > { %964 = vmatpush.bf16.msrb.mxu2 %v1514_v33  ;;  %933 = vmatmul.bf16.vlgmr.msra.gmra.mxu3 %v437_v44 }
  0x3d   : > { %977 = vmatpush.bf16.msrb.mxu3 %v1522_v36  ;;  %907 = vmatmul.bf16.vlgmr.msra.gmra.mxu1 %v435_v45 }
  0x3e   : > { %951 = vmatpush.bf16.msrb.mxu1 %v1506_v37 }
  0x3f   : > { %939 = vmatpush.bf16.msrb.mxu0 %v1497_v38 }
  0x40   : > { %965 = vmatpush.bf16.msrb.mxu2 %v1513_v39 }
  0x41   : > { %978 = vmatpush.bf16.msrb.mxu3 %v1521_v40 }
  0x42   : > { %952 = vmatpush.bf16.msrb.mxu1 %v1505_v41 }
  0x43   : > { %940 = vmatpush.bf16.msrb.mxu0 %v1496_v51 }
  0x44   : > { %966 = vmatpush.bf16.msrb.mxu2 %v1512_v52 }
  0x45   : > { %979 = vmatpush.bf16.msrb.mxu3 %v1520_v53 }
  0x46   : > { %953 = vmatpush.bf16.msrb.mxu1 %v1504_v54 }
  0x47   : > { %941 = vmatpush.bf16.msrb.mxu0 %v1495_v55 }
  0x48   : > { %967 = vmatpush.bf16.msrb.mxu2 %v1511_v56 }
  0x49   : > { %980 = vmatpush.bf16.msrb.mxu3 %v1519_v57 }
  0x4a   : > { %954 = vmatpush.bf16.msrb.mxu1 %v1503_v58 }
  0x4b   : > { %942 = vmatpush.bf16.msrb.mxu0 %v1494_v59 }
  0x4c   : > { %968 = vmatpush.bf16.msrb.mxu2 %v1510_v60 }
  0x4d   : > { %981 = vmatpush.bf16.msrb.mxu3 %v1518_v61 }
  0x4e   : > { %955 = vmatpush.bf16.msrb.mxu1 %v1502_v62 }
  0x4f   : > { %943 = vmatpush.bf16.msrb.mxu0 %v1493_v63 }
  0x50   : > { %969 = vmatpush.bf16.msrb.mxu2 %v1509_v0 }
  0x51   : > { %982 = vmatpush.bf16.msrb.mxu3 %v1517_v1 }
  0x52   : > { %956 = vmatpush.bf16.msrb.mxu1 %v1501_v2 }
  0x53   : > { %944 = vmatpush.bf16.msrb.mxu0 %v1492_v3 }
  0x54   : > { %970 = vmatpush.bf16.msrb.mxu2 %v1508_v4 }
  0x55   : > { %983 = vmatpush.bf16.msrb.mxu3 %v1516_v5 }
  0x56   : > { %957 = vmatpush.bf16.msrb.mxu1 %v1500_v6 }
  0x57   : > { %945 = vmatpush.bf16.msrb.mxu0 %v1491_v7 }
  0x58   : > { %971 = vmatpush.bf16.msrb.mxu2 %v1507_v8 }
  0x59   : > { %984 = vmatpush.bf16.msrb.mxu3 %v1515_v10 }
  0x5a   : > { %958 = vmatpush.bf16.msrb.mxu1 %v1499_v11  ;;  %946 = vmatmul.bf16.vlgmr.msrb.gmra.mxu0 %v1790_v48 }
  0x5b   : > { %990 = vmatpush.bf16.msra.mxu0 %v1530_v9  ;;  %972 = vmatmul.bf16.vlgmr.msrb.gmra.mxu2 %v1787_v46 }
  0x5c   : > { %985 = vmatmul.bf16.vlgmr.msrb.gmra.mxu3 %v1792_v49 }
  0x5d   : > { %959 = vmatmul.bf16.vlgmr.msrb.gmra.mxu1 %v1794_v50 }
  0x5f   : > { %991 = vmatpush.bf16.msra.mxu0 %v1529_v12 }
  0x63   : > { %992 = vmatpush.bf16.msra.mxu0 %v1528_v13 }
  0x67   : > { %993 = vmatpush.bf16.msra.mxu0 %v1527_v14 }
  0x6b   : > { %994 = vmatpush.bf16.msra.mxu0 %v1526_v15 }
  0x6f   : > { %995 = vmatpush.bf16.msra.mxu0 %v1525_v16 }
  0x73   : > { %996 = vmatpush.bf16.msra.mxu0 %v1524_v17 }
  0x77   : > { %997 = vmatpush.bf16.msra.mxu0 %v1523_v18 }
  0x7a   : > { %998 = vmatmul.bf16.vlgmr.msra.gmra.mxu0 %v444_v19 }
  0xb7   : > { %v895_v20 = vpop.f32.mrf.mxu0 }
  0xba   : > { %v908_v21 = vpop.f32.mrf.mxu1 }
  0xbb   : > { %v909_v30 = vadd.f32 %v908_v21, %v895_v20 }
  0xbe   : > { %v921_v22 = vpop.f32.mrf.mxu2 }
  0xbf   : > { %v934_v23 = vpop.f32.mrf.mxu3  ;;  %v897_v24 = vpop.f32.mrf.mxu0  ;;  %v922_v32 = vadd.f32 %v921_v22, %v909_v30 }
  0xc1   : > { %v935_v36 = vadd.f32 %v934_v23, %v922_v32 }
  0xc2   : > { %v910_v25 = vpop.f32.mrf.mxu1 }
  0xc6   : > { %v923_v26 = vpop.f32.mrf.mxu2 }
  0xc7   : > { %v936_v27 = vpop.f32.mrf.mxu3 }
  0xd7   : > { %v947_v28 = vpop.f32.mrf.mxu0 }
  0xd8   : > { %v948_v38 = vadd.f32 %v947_v28, %v935_v36 }
  0xda   : > { %v960_v29 = vpop.f32.mrf.mxu1 }
  0xdb   : > { %v961_v40 = vadd.f32 %v960_v29, %v948_v38 }
  0xde   : > { %v973_v31 = vpop.f32.mrf.mxu2 }
  0xdf   : > { %v986_v33 = vpop.f32.mrf.mxu3  ;;  %v949_v34 = vpop.f32.mrf.mxu0  ;;  %v974_v41 = vadd.f32 %v973_v31, %v961_v40 }
  0xe1   : > { %v987_v42 = vadd.f32 %v986_v33, %v974_v41 }
  0xe2   : > { %v962_v35 = vpop.f32.mrf.mxu1 }
  0xe6   : > { %v975_v37 = vpop.f32.mrf.mxu2 }
  0xe7   : > { %v988_v39 = vpop.f32.mrf.mxu3 }
  0xf7   : > { %v999_v44 = vpop.f32.mrf.mxu0 }
  0xf8   : > { %v1000_v45 = vadd.f32 %v999_v44, %v987_v42 }
  0xfa   : > { %v1003_v46 = vadd.f32 %v1000_v45, %v285_v43 }
  0xfb   : > { %1008 = sbr.rel (%p1454_p10) target bundleno = 673 (0x2a1), region = 52 }
  0xfc   : > { %1004 = vst [vmem:[#allocation2] sm:$0x3] %v1003_v46 }
  0xff   : > { %v1001_v47 = vpop.f32.mrf.mxu0 }
 0x100   : > { %v1031_v48 = vld [vmem:[#allocation3 + $0x78] sm:$0xff]  ;;  %v1030_v49 = vld [vmem:[#allocation3 + $0x70] sm:$0xff]  ;;  %v1029_v50 = vld [vmem:[#allocation3 + $0x68] sm:$0xff]  ;;  %vm1056_vm0 = vcmask 1041408  }
 0x101   : > { %1036 = vmatpush.msra.mxu0 %v1031_v48  ;;  %v1028_v51 = vld [vmem:[#allocation3 + $0x60] sm:$0xff]  ;;  %v1027_v52 = vld [vmem:[#allocation3 + $0x58] sm:$0xff]  ;;  %v1026_v53 = vld [vmem:[#allocation3 + $0x50] sm:$0xff] }
 0x102   : > { %v1025_v54 = vld [vmem:[#allocation3 + $0x48] sm:$0xff]  ;;  %v1024_v55 = vld [vmem:[#allocation3 + $0x40] sm:$0xff]  ;;  %v1023_v56 = vld [vmem:[#allocation3 + $0x38] sm:$0xff] }
 0x103   : > { %1037 = vmatpush.msra.mxu0 %v1030_v49  ;;  %v1022_v57 = vld [vmem:[#allocation3 + $0x30] sm:$0xff]  ;;  %v1021_v58 = vld [vmem:[#allocation3 + $0x28] sm:$0xff]  ;;  %v1020_v59 = vld [vmem:[#allocation3 + $0x20] sm:$0xff] }
 0x104   : > { %v1576_v60 = vld [vmem:[%s1855_s2] ss:$0 sm:$0xff]  ;;  %v1009_v61 = vld [vmem:[#allocation2] sm:$0x3]  ;;  %v1017_v1 = vld [vmem:[#allocation3 + $0x8] sm:$0xff] }
 0x105   : > { %1038 = vmatpush.msra.mxu0 %v1029_v50  ;;  %v1019_v62 = vld [vmem:[#allocation3 + $0x18] sm:$0xff]  ;;  %v1018_v63 = vld [vmem:[#allocation3 + $0x10] sm:$0xff]  ;;  %v1014_v0 = vadd.f32 %v1576_v60, %v1009_v61  ;;  %v1016_v2 = vld [vmem:[#allocation3] sm:$0xff] }
 0x106   : > { %v1577_v4 = vld [vmem:[%s1857_s4] ss:$0 sm:$0xff] }
 0x107   : > { %1039 = vmatpush.msra.mxu0 %v1028_v51  ;;  %v1015_v3 = vmax.f32 %v1014_v0, 0.0 }
 0x109   : > { %1040 = vmatpush.msra.mxu0 %v1027_v52 }
 0x10b   : > { %1041 = vmatpush.msra.mxu0 %v1026_v53 }
 0x10d   : > { %1042 = vmatpush.msra.mxu0 %v1025_v54 }
 0x10f   : > { %1043 = vmatpush.msra.mxu0 %v1024_v55 }
 0x111   : > { %1044 = vmatpush.msra.mxu0 %v1023_v56 }
 0x113   : > { %1045 = vmatpush.msra.mxu0 %v1022_v57 }
 0x115   : > { %1046 = vmatpush.msra.mxu0 %v1021_v58 }
 0x117   : > { %1047 = vmatpush.msra.mxu0 %v1020_v59 }
 0x119   : > { %1048 = vmatpush.msra.mxu0 %v1019_v62 }
 0x11b   : > { %1049 = vmatpush.msra.mxu0 %v1018_v63 }
 0x11d   : > { %1050 = vmatpush.msra.mxu0 %v1017_v1 }
 0x11f   : > { %1051 = vmatpush.msra.mxu0 %v1016_v2 }
 0x120   : > { %1052 = vmatmul.f32.vlgmr.msra.gmra.mxu0 %v1015_v3 }
 0x19d   : > { %v1053_v5 = vpop.f32.mrf.mxu0 }
 0x19e   : > { %v1054_v6 = vadd.f32 %v1577_v4, %v1053_v5 }
 0x1a0   : > { %v1057_v7 = vsel %vm1056_vm0, %v1054_v6, -inf }
 0x1a1   : > { %1058 = vmax.xlane.f32.xlu0 %v1057_v7 }
 0x214   : > { %v1059_v8 = vpop.xlane.xlu0 %1058 }
 0x215   : > { %v1060_v9 = vsub.f32 %v1054_v6, %v1059_v8 }
 0x217   : > { %v1061_v10 = vmul.f32 1.442695, %v1060_v9 }
 0x219   : > { %1578 = vpow2.f32 %v1061_v10 }
 0x21f   : > { %v1579_v11 = vpop.eup %1578 }
 0x220   : > { %v1063_v12 = vsel %vm1056_vm0, %v1579_v11, 0.0 }
 0x221   : > { %1064 = vadd.xlane.f32.xlu0 %v1063_v12 }
 0x294   : > { %v1065_v13 = vpop.xlane.xlu0 %1064 }
 0x295   : > { %1580 = vlog2.f32 %v1065_v13 }
 0x29b   : > { %v1581_v14 = vpop.eup %1580 }
 0x29c   : > { %v1067_v15 = vmul.f32 0.6931472, %v1581_v14 }
 0x29e   : > { %v1068_v16 = vsub.f32 %v1060_v9, %v1067_v15 }
 0x2a0   : > { %1069 = vst [vmem:[#allocation6] sm:$0x3] %v1068_v16 }
 0x2a1 PF: > { %p1545_p11 = scmp.eq.s32.totalorder %s1158_s21, 7  ;;  %s1080_s24 = sshll.u32 %s1858_s5, 4  ;;  %s1081_s24 = int_to_ptr.hbm [resolvable:$true] %s1080_s24 }
 0x2a2   : > { %s1676_s25 = smov [#allocation6]  }
 0x2a3   : > { %s1078_s26 = sshll.u32 %s1676_s25, 4  ;;  %s1079_s26 = int_to_ptr.vmem [resolvable:$true] %s1078_s26 }
 0x2a4   : > { %1536 = dma.vmem_to_hbm [thread:$0]  (%p1545_p11), %s1079_s26, 32, %s1081_s24, [#allocation5]  }
 0x2a5   : > { %1657 = dma.done.wait (%p1545_p11), [#allocation5], 32  }
 0x2a6   : > { %1659 = vsyncadd (%p1545_p11), [#allocation5], 4294967264 }
 0x2a7 PF: > { %s17_s20 = sadd.s32 1, %s1670_s20   ;;  %s1859_s18 = smov %s1666_s19 }
 0x2a8   : > { %p14_p12 = scmp.ge.s32.totalorder %s17_s20, 10   ;;  %s1860_s19 = smov %s1862_s22 }
 0x2aa   :  { %16 = sbr.rel (!%p14_p12) target bundleno = 3 (0x3), region = 84 }
 0x2af   :  { %1094 = vsyncpa [#allocation4], 1 }
 0x2b0   :  { %1096 = vsyncpa [#allocation4 + $0x1], 1 }
 0x2b1   :  { %1097 = vsyncpa [#allocation5], 1 }
 0x2b2   :  { %1099 = vsyncpa [#allocation5 + $0x1], 1 }

// kernel: simple_cnn_forward.2
= control target key start
LH: loop header
LB: loop body
LE: loop exit
PB: predicated region body
PF: predicated region fallthrough
CT: control target
= control target key end

     0   :  { %10 = vsyncpa [#allocation5], 0  ;;  %s10171_s0 = inlined_call_operand.vmem [shape: f32[2,676,9], index: 0, kind: input, shape index: {}]   ;;  %s10172_s1 = inlined_call_operand.hbm [shape: f32[9,32], index: 1, kind: input, shape index: {}]   ;;  %s10173_s2 = inlined_call_operand.hbm [shape: f32[1,32], index: 2, kind: input, shape index: {}]   ;;  %s10174_s3 = inlined_call_operand.hbm [shape: bf16[9,32,64], index: 3, kind: input, shape index: {}]   ;;  %s10175_s4 = inlined_call_operand.hbm [shape: f32[1,64], index: 4, kind: input, shape index: {}]   ;;  %s10176_s5 = inlined_call_operand.vmem [shape: bf16[2,144,64], index: 5, kind: output, shape index: {}]  }
   0x1   :  { %11 = vsyncpa [#allocation7], 0 }
   0x2   :  { %12 = vsyncpa [#allocation10], 0  ;;  %s7764_s18 = smov 0  }
   0x3 LB: > { %s185_s21 = sshll.u32 %s10173_s2, 4  ;;  %s7773_s22 = sadd.s32 4294967295, %s7723_s18   ;;  %s7723_s18 = sphi %s7764_s18, %s18_s18   ;;  %s186_s21 = int_to_ptr.hbm [resolvable:$true] %s185_s21 }
   0x4   : > { %p6975_p0 = scmp.ge.s32.totalorder %s7723_s18, 1  ;;  %p159_p1 = scmp.lt.s32.totalorder %s7723_s18, 3 }
   0x5   : > { %p7554_p2 = scmp.eq.s32.totalorder %s7773_s22, 0  ;;  %s7725_s24 = smov [#allocation6]  }
   0x6   : > { %p7778_p3 = pnand %p6975_p0, %p159_p1  ;;  %s187_s25 = sshll.u32 %s7725_s24, 4  ;;  %s188_s25 = int_to_ptr.vmem [resolvable:$true] %s187_s25 }
   0x7   : > { %s170_s28 = sshll.u32 %s10172_s1, 4  ;;  %s7726_s30 = smov [#allocation4]   ;;  %s171_s28 = int_to_ptr.hbm [resolvable:$true] %s170_s28 }
   0x8   : > { %p7541_p4 = pneg %p7778_p3  ;;  %s172_s6 = sshll.u32 %s7726_s30, 4  ;;  %s173_s6 = int_to_ptr.vmem [resolvable:$true] %s172_s6 }
   0x9   : > { %s196_s9 = sshll.u32 %s10174_s3, 4  ;;  %s7727_s10 = smov 128   ;;  %s197_s9 = int_to_ptr.hbm [resolvable:$true] %s196_s9 }
   0xa   : > { %p7789_p5 = pnand %p7554_p2, %p7541_p4  ;;  %s7728_s11 = smov 8  }
   0xb   : > { %s7729_s12 = smov [#allocation8]   ;;  %s7730_s14 = smov 64  }
   0xc   : > { %7547 = dma.hbm_to_vmem [thread:$0]  (!%p7789_p5), %s186_s21, 16, %s188_s25, [#allocation7]  }
   0xd   : > { %7544 = dma.hbm_to_vmem [thread:$0]  (!%p7789_p5), %s171_s28, 256, %s173_s6, [#allocation5], %s7727_s10, %s7727_s10, %s7728_s11  }
   0xe   : > { %s198_s13 = sshll.u32 %s7729_s12, 4  ;;  %s7731_s15 = smov 4   ;;  %s199_s13 = int_to_ptr.vmem [resolvable:$true] %s198_s13 }
   0xf   : > { %7550 = dma.hbm_to_vmem [thread:$0]  (!%p7789_p5), %s197_s9, 2304, %s199_s13, [#allocation7], %s7730_s14, %s7730_s14, %s7731_s15  }
  0x10   : > { %s211_s19 = sshll.u32 %s10175_s4, 4  ;;  %s7732_s20 = smov [#allocation9]   ;;  %s212_s19 = int_to_ptr.hbm [resolvable:$true] %s211_s19 }
  0x11   : > { %s213_s21 = sshll.u32 %s7732_s20, 4  ;;  %234 = sbr.rel (%p7778_p3) target bundleno = 2226 (0x8b2), region = 40  ;;  %s214_s21 = int_to_ptr.vmem [resolvable:$true] %s213_s21 }
  0x12   : > { %7553 = dma.hbm_to_vmem [thread:$0]  (!%p7789_p5), %s212_s19, 16, %s214_s21, [#allocation10]  }
  0x16   : > { %7710 = dma.done.wait (%p7554_p2), [#allocation5], 256  }
  0x17   : > { %7712 = vsyncadd (%p7554_p2), [#allocation5], 4294967040 }
  0x18   : > { %7714 = dma.done.wait (%p7554_p2), [#allocation7], 2320  }
  0x19   : > { %7716 = vsyncadd (%p7554_p2), [#allocation7], 4294964976 }
  0x1a   : > { %7718 = dma.done.wait (%p7554_p2), [#allocation10], 16  }
  0x1b   : > { %7720 = vsyncadd (%p7554_p2), [#allocation10], 4294967280  ;;  %p278_p6 = scmp.lt.s32.totalorder %s7773_s22, 1  ;;  %vm636_vm0 = vcmask 1040384   ;;  %v375_v0 = vld [vmem:[#allocation4 + $0x8] sm:$0x1] }
  0x1c   : > { %v374_v1 = vld [vmem:[#allocation4] sm:$0xff]  ;;  %6988 = vmatpush.msk.msra.mxu0 %vm636_vm0, %v375_v0  ;;  %vm380_vm1 = vcmask 72704   ;;  %7517 = vmatpush.msk.msra.mxu3 %vm636_vm0, %v375_v0  ;;  %v7502_v17 = vld [vmem:[#allocation8 + $0x18] sm:$0xff]  ;;  %vm997_vm2 = vcmask 261120   ;;  %vm1083_vm3 = vcmask 257024   ;;  %vm5960_vm4 = vcmask 1046528  }
  0x1d   : > { %s10600_s22 = smov (!%p278_p6, %s7773_s22), 1  ;;  %1463 = vmatpush.bf16.msra.mxu1 %v7502_v17  ;;  %v7501_v19 = vld [vmem:[#allocation8 + $0x10] sm:$0xff]  ;;  %v7863_v20 = vld [vmem:[#allocation6] ss:$0 sm:$0xff]  ;;  %vm6352_vm5 = vcmask 1045504   ;;  %vm6652_vm6 = vcmask 523264  }
  0x1e   : > { %s7523_s23 = smul.u32 680, %s10600_s22  ;;  %655 = vmatpush.msra.mxu0 %v374_v1  ;;  %7518 = vmatpush.msra.mxu3 %v374_v1  ;;  %vm6727_vm7 = vcmask 519168   ;;  %vm6735_vm8 = vcmask 517120   ;;  %vm6754_vm9 = vcmask 519170   ;;  %vm6745_vm10 = vcmask 1041408  }
  0x1f   : > { %s7524_s27 = smul.u32 72, %s10600_s22  ;;  %vm6746_vm11 = vcmask 1045508  }
  0x20   : > { %s7829_s26 = scalar_lea.vmem %s10171_s0, %s7523_s23  ;;  %7519 = vmatpush.bf16.msrb.mxu3 %v7502_v17  ;;  %vm9564_vm12 = vmor %vm6745_vm10, %vm6746_vm11 }
  0x21   : > { %v289_v2 = vld [vmem:[%s7829_s26] sm:$0xff]  ;;  %v290_v3 = vld [vmem:[%s7829_s26 + $0x8] sm:$0xff]  ;;  %v291_v4 = vld [vmem:[%s7829_s26 + $0x10] sm:$0xff]  ;;  %1464 = vmatpush.bf16.msra.mxu1 %v7501_v19  ;;  %s9462_s29 = scalar_lea.vmem %s10176_s5, %s7524_s27 }
  0x22   : > { %6989 = vmatmul.msk.f32.vlgmr.msra.gmra.mxu0 %vm380_vm1, %v289_v2  ;;  %v292_v5 = vld [vmem:[%s7829_s26 + $0x18] sm:$0xff]  ;;  %v293_v6 = vld [vmem:[%s7829_s26 + $0x20] sm:$0xff]  ;;  %v294_v7 = vld [vmem:[%s7829_s26 + $0x28] sm:$0xff] }
  0x23   : > { %v295_v8 = vld [vmem:[%s7829_s26 + $0x30] sm:$0xff]  ;;  %v296_v9 = vld [vmem:[%s7829_s26 + $0x38] sm:$0xff]  ;;  %v297_v10 = vld [vmem:[%s7829_s26 + $0x40] sm:$0xff] }
  0x24   : > { %v298_v11 = vld [vmem:[%s7829_s26 + $0x48] sm:$0xff]  ;;  %v299_v12 = vld [vmem:[%s7829_s26 + $0x50] sm:$0xff]  ;;  %v300_v13 = vld [vmem:[%s7829_s26 + $0x58] sm:$0xff]  ;;  %7520 = vmatpush.bf16.msrb.mxu3 %v7501_v19 }
  0x25   : > { %v301_v14 = vld [vmem:[%s7829_s26 + $0x60] sm:$0xff]  ;;  %v302_v15 = vld [vmem:[%s7829_s26 + $0x68] sm:$0xff]  ;;  %v303_v16 = vld [vmem:[%s7829_s26 + $0x70] sm:$0xff] }
  0x26   : > { %v304_v18 = vld [vmem:[%s7829_s26 + $0x78] sm:$0xff]  ;;  %v305_v22 = vld [vmem:[%s7829_s26 + $0x80] sm:$0xff]  ;;  %v306_v26 = vld [vmem:[%s7829_s26 + $0x88] sm:$0xff] }
  0x27   : > { %v307_v30 = vld [vmem:[%s7829_s26 + $0x90] sm:$0xff]  ;;  %v308_v34 = vld [vmem:[%s7829_s26 + $0x98] sm:$0xff]  ;;  %v309_v41 = vld [vmem:[%s7829_s26 + $0xa0] sm:$0xff] }
  0x28   : > { %v310_v45 = vld [vmem:[%s7829_s26 + $0xa8] sm:$0xff]  ;;  %v311_v52 = vld [vmem:[%s7829_s26 + $0xb0] sm:$0xff]  ;;  %v312_v56 = vld [vmem:[%s7829_s26 + $0xb8] sm:$0xff] }
  0x29   : > { %v313_v63 = vld [vmem:[%s7829_s26 + $0xc0] sm:$0xff] }
  0x2a   : > { %6990 = vmatmul.msk.f32.gmra.mxu0 %vm380_vm1, %v290_v3  ;;  %v314_v3 = vld [vmem:[%s7829_s26 + $0xc8] sm:$0xff] }
  0x32   : > { %6991 = vmatmul.msk.f32.gmra.mxu0 %vm380_vm1, %v291_v4 }
  0x3a   : > { %6992 = vmatmul.msk.f32.gmra.mxu0 %vm380_vm1, %v292_v5 }
  0x42   : > { %6993 = vmatmul.msk.f32.gmra.mxu0 %vm380_vm1, %v293_v6 }
  0x4a   : > { %6994 = vmatmul.msk.f32.gmra.mxu0 %vm380_vm1, %v294_v7 }
  0x52   : > { %6995 = vmatmul.msk.f32.gmra.mxu0 %vm380_vm1, %v295_v8 }
  0x5a   : > { %6996 = vmatmul.msk.f32.gmra.mxu0 %vm380_vm1, %v296_v9 }
  0x62   : > { %6997 = vmatmul.msk.f32.gmra.mxu0 %vm380_vm1, %v297_v10  ;;  %v315_v10 = vld [vmem:[%s7829_s26 + $0xd0] sm:$0xff] }
  0x6a   : > { %6998 = vmatmul.msk.f32.gmra.mxu0 %vm380_vm1, %v298_v11 }
  0x72   : > { %6999 = vmatmul.msk.f32.gmra.mxu0 %vm380_vm1, %v299_v12 }
  0x7a   : > { %7000 = vmatmul.msk.f32.gmra.mxu0 %vm380_vm1, %v300_v13 }
  0x82   : > { %7001 = vmatmul.msk.f32.gmra.mxu0 %vm380_vm1, %v301_v14  ;;  %v316_v14 = vld [vmem:[%s7829_s26 + $0xd8] sm:$0xff] }
  0x8a   : > { %7002 = vmatmul.msk.f32.gmra.mxu0 %vm380_vm1, %v302_v15 }
  0x92   : > { %7003 = vmatmul.msk.f32.gmra.mxu0 %vm380_vm1, %v303_v16 }
  0x9a   : > { %7004 = vmatmul.msk.f32.gmra.mxu0 %vm380_vm1, %v304_v18 }
  0x9f   : > { %v657_v21 = vpop.f32.mrf.mxu0 }
  0xa0   : > { %v658_v23 = vadd.f32 %v7863_v20, %v657_v21 }
  0xa2   : > { %v912_v24 = vmax.f32 %v658_v23, 0.0  ;;  %7005 = vmatmul.msk.f32.gmra.mxu0 %vm380_vm1, %v305_v22  ;;  %v317_v22 = vld [vmem:[%s7829_s26 + $0xe0] sm:$0xff] }
  0xa4   : > { %999 = vst.msk [vmem:[#allocation2] sm:$0xff] %vm997_vm2, %v912_v24 }
  0xa7   : > { %v660_v25 = vpop.f32.mrf.mxu0 }
  0xa8   : > { %v661_v27 = vadd.f32 %v7863_v20, %v660_v25 }
  0xaa   : > { %v913_v28 = vmax.f32 %v661_v27, 0.0  ;;  %7006 = vmatmul.msk.f32.gmra.mxu0 %vm380_vm1, %v306_v26  ;;  %v318_v26 = vld [vmem:[%s7829_s26 + $0xe8] sm:$0xff] }
  0xac   : > { %1000 = vst.msk [vmem:[#allocation2 + $0x8] sm:$0xff] %vm997_vm2, %v913_v28 }
  0xaf   : > { %v663_v29 = vpop.f32.mrf.mxu0 }
  0xb0   : > { %v664_v31 = vadd.f32 %v7863_v20, %v663_v29 }
  0xb2   : > { %v914_v32 = vmax.f32 %v664_v31, 0.0  ;;  %7007 = vmatmul.msk.f32.gmra.mxu0 %vm380_vm1, %v307_v30 }
  0xb3   : > { %v1206_v37 = vld [vmem:[#allocation2 + $0x1] sm:$0xff] }
  0xb4   : > { %1001 = vst.msk [vmem:[#allocation2 + $0x10] sm:$0xff] %vm997_vm2, %v914_v32 }
  0xb7   : > { %v666_v33 = vpop.f32.mrf.mxu0 }
  0xb8   : > { %v667_v35 = vadd.f32 %v7863_v20, %v666_v33  ;;  %v319_v33 = vld [vmem:[%s7829_s26 + $0xf0] sm:$0xff] }
  0xba   : > { %v915_v36 = vmax.f32 %v667_v35, 0.0  ;;  %7008 = vmatmul.msk.f32.gmra.mxu0 %vm380_vm1, %v308_v34 }
  0xbb   : > { %v1207_v38 = vld [vmem:[#allocation2 + $0x9] sm:$0xff] }
  0xbc   : > { %1002 = vst.msk [vmem:[#allocation2 + $0x18] sm:$0xff] %vm997_vm2, %v915_v36  ;;  %v1284_v39 = vpack.c.bf16 %v1207_v38, %v1206_v37  ;;  %v320_v37 = vld [vmem:[%s7829_s26 + $0xf8] sm:$0xff] }
  0xbe   : > { %7082 = vmatmul.msk.bf16.vlgmr.msra.gmra.mxu1 %vm997_vm2, %v1284_v39 }
  0xbf   : > { %v669_v40 = vpop.f32.mrf.mxu0 }
  0xc0   : > { %v670_v42 = vadd.f32 %v7863_v20, %v669_v40 }
  0xc2   : > { %v916_v43 = vmax.f32 %v670_v42, 0.0  ;;  %7009 = vmatmul.msk.f32.gmra.mxu0 %vm380_vm1, %v309_v41 }
  0xc3   : > { %v1208_v48 = vld [vmem:[#allocation2 + $0x11] sm:$0xff] }
  0xc4   : > { %1003 = vst.msk [vmem:[#allocation2 + $0x20] sm:$0xff] %vm997_vm2, %v916_v43 }
  0xc7   : > { %v672_v44 = vpop.f32.mrf.mxu0 }
  0xc8   : > { %v673_v46 = vadd.f32 %v7863_v20, %v672_v44  ;;  %v321_v44 = vld [vmem:[%s7829_s26 + $0x100] sm:$0xff] }
  0xca   : > { %v917_v47 = vmax.f32 %v673_v46, 0.0  ;;  %7010 = vmatmul.msk.f32.gmra.mxu0 %vm380_vm1, %v310_v45 }
  0xcb   : > { %v1209_v49 = vld [vmem:[#allocation2 + $0x19] sm:$0xff] }
  0xcc   : > { %1004 = vst.msk [vmem:[#allocation2 + $0x28] sm:$0xff] %vm997_vm2, %v917_v47  ;;  %v1285_v50 = vpack.c.bf16 %v1209_v49, %v1208_v48  ;;  %v322_v48 = vld [vmem:[%s7829_s26 + $0x108] sm:$0xff] }
  0xce   : > { %7083 = vmatmul.msk.bf16.gmra.mxu1 %vm997_vm2, %v1285_v50 }
  0xcf   : > { %v675_v51 = vpop.f32.mrf.mxu0 }
  0xd0   : > { %v676_v53 = vadd.f32 %v7863_v20, %v675_v51 }
  0xd2   : > { %v918_v54 = vmax.f32 %v676_v53, 0.0  ;;  %7011 = vmatmul.msk.f32.gmra.mxu0 %vm380_vm1, %v311_v52 }
  0xd3   : > { %v1210_v59 = vld [vmem:[#allocation2 + $0x21] sm:$0xff] }
  0xd4   : > { %1005 = vst.msk [vmem:[#allocation2 + $0x30] sm:$0xff] %vm997_vm2, %v918_v54 }
  0xd7   : > { %v678_v55 = vpop.f32.mrf.mxu0 }
  0xd8   : > { %v679_v57 = vadd.f32 %v7863_v20, %v678_v55  ;;  %v323_v55 = vld [vmem:[%s7829_s26 + $0x110] sm:$0xff] }
  0xda   : > { %v919_v58 = vmax.f32 %v679_v57, 0.0  ;;  %7012 = vmatmul.msk.f32.gmra.mxu0 %vm380_vm1, %v312_v56 }
  0xdb   : > { %v1211_v60 = vld [vmem:[#allocation2 + $0x29] sm:$0xff] }
  0xdc   : > { %1006 = vst.msk [vmem:[#allocation2 + $0x38] sm:$0xff] %vm997_vm2, %v919_v58  ;;  %v1286_v61 = vpack.c.bf16 %v1211_v60, %v1210_v59  ;;  %v324_v59 = vld [vmem:[%s7829_s26 + $0x118] sm:$0xff] }
  0xde   : > { %7084 = vmatmul.msk.bf16.gmra.mxu1 %vm997_vm2, %v1286_v61 }
  0xdf   : > { %v681_v62 = vpop.f32.mrf.mxu0 }
  0xe0   : > { %v682_v0 = vadd.f32 %v7863_v20, %v681_v62 }
  0xe2   : > { %v920_v1 = vmax.f32 %v682_v0, 0.0  ;;  %7013 = vmatmul.msk.f32.gmra.mxu0 %vm380_vm1, %v313_v63 }
  0xe3   : > { %v1212_v6 = vld [vmem:[#allocation2 + $0x31] sm:$0xff] }
  0xe4   : > { %1007 = vst.msk [vmem:[#allocation2 + $0x40] sm:$0xff] %vm997_vm2, %v920_v1 }
  0xe7   : > { %v684_v2 = vpop.f32.mrf.mxu0 }
  0xe8   : > { %v685_v4 = vadd.f32 %v7863_v20, %v684_v2 }
  0xea   : > { %v921_v5 = vmax.f32 %v685_v4, 0.0  ;;  %7014 = vmatmul.msk.f32.gmra.mxu0 %vm380_vm1, %v314_v3  ;;  %v325_v3 = vld [vmem:[%s7829_s26 + $0x120] sm:$0xff] }
  0xeb   : > { %v1213_v7 = vld [vmem:[#allocation2 + $0x39] sm:$0xff] }
  0xec   : > { %1008 = vst.msk [vmem:[#allocation2 + $0x48] sm:$0xff] %vm997_vm2, %v921_v5  ;;  %v1287_v8 = vpack.c.bf16 %v1213_v7, %v1212_v6 }
  0xee   : > { %7085 = vmatmul.msk.bf16.gmra.mxu1 %vm997_vm2, %v1287_v8  ;;  %v326_v8 = vld [vmem:[%s7829_s26 + $0x128] sm:$0xff] }
  0xef   : > { %v687_v9 = vpop.f32.mrf.mxu0 }
  0xf0   : > { %v688_v11 = vadd.f32 %v7863_v20, %v687_v9 }
  0xf2   : > { %v922_v12 = vmax.f32 %v688_v11, 0.0  ;;  %7015 = vmatmul.msk.f32.gmra.mxu0 %vm380_vm1, %v315_v10 }
  0xf3   : > { %v1214_v17 = vld [vmem:[#allocation2 + $0x41] sm:$0xff] }
  0xf4   : > { %1009 = vst.msk [vmem:[#allocation2 + $0x50] sm:$0xff] %vm997_vm2, %v922_v12 }
  0xf7   : > { %v690_v13 = vpop.f32.mrf.mxu0 }
  0xf8   : > { %v691_v15 = vadd.f32 %v7863_v20, %v690_v13 }
  0xfa   : > { %v923_v16 = vmax.f32 %v691_v15, 0.0  ;;  %7016 = vmatmul.msk.f32.gmra.mxu0 %vm380_vm1, %v316_v14 }
  0xfb   : > { %v1215_v18 = vld [vmem:[#allocation2 + $0x49] sm:$0xff] }
  0xfc   : > { %1010 = vst.msk [vmem:[#allocation2 + $0x58] sm:$0xff] %vm997_vm2, %v923_v16  ;;  %v1288_v19 = vpack.c.bf16 %v1215_v18, %v1214_v17  ;;  %v327_v16 = vld [vmem:[%s7829_s26 + $0x130] sm:$0xff] }
  0xfe   : > { %7086 = vmatmul.msk.bf16.gmra.mxu1 %vm997_vm2, %v1288_v19 }
  0xff   : > { %v693_v21 = vpop.f32.mrf.mxu0 }
 0x100   : > { %v694_v23 = vadd.f32 %v7863_v20, %v693_v21 }
 0x102   : > { %v924_v24 = vmax.f32 %v694_v23, 0.0  ;;  %7017 = vmatmul.msk.f32.gmra.mxu0 %vm380_vm1, %v317_v22  ;;  %v328_v22 = vld [vmem:[%s7829_s26 + $0x138] sm:$0xff] }
 0x103   : > { %v1216_v29 = vld [vmem:[#allocation2 + $0x51] sm:$0xff] }
 0x104   : > { %1011 = vst.msk [vmem:[#allocation2 + $0x60] sm:$0xff] %vm997_vm2, %v924_v24 }
 0x107   : > { %v696_v25 = vpop.f32.mrf.mxu0 }
 0x108   : > { %v697_v27 = vadd.f32 %v7863_v20, %v696_v25 }
 0x10a   : > { %v925_v28 = vmax.f32 %v697_v27, 0.0  ;;  %7018 = vmatmul.msk.f32.gmra.mxu0 %vm380_vm1, %v318_v26 }
 0x10b   : > { %v1217_v30 = vld [vmem:[#allocation2 + $0x59] sm:$0xff] }
 0x10c   : > { %1012 = vst.msk [vmem:[#allocation2 + $0x68] sm:$0xff] %vm997_vm2, %v925_v28  ;;  %v1289_v31 = vpack.c.bf16 %v1217_v30, %v1216_v29  ;;  %v329_v30 = vld [vmem:[%s7829_s26 + $0x140] sm:$0xff] }
 0x10e   : > { %7087 = vmatmul.msk.bf16.gmra.mxu1 %vm997_vm2, %v1289_v31 }
 0x10f   : > { %v699_v32 = vpop.f32.mrf.mxu0 }
 0x110   : > { %v700_v34 = vadd.f32 %v7863_v20, %v699_v32 }
 0x112   : > { %v926_v35 = vmax.f32 %v700_v34, 0.0  ;;  %7019 = vmatmul.msk.f32.gmra.mxu0 %vm380_vm1, %v319_v33 }
 0x113   : > { %v1218_v40 = vld [vmem:[#allocation2 + $0x61] sm:$0xff] }
 0x114   : > { %1013 = vst.msk [vmem:[#allocation2 + $0x70] sm:$0xff] %vm997_vm2, %v926_v35  ;;  %v330_v35 = vld [vmem:[%s7829_s26 + $0x148] sm:$0xff] }
 0x117   : > { %v702_v36 = vpop.f32.mrf.mxu0 }
 0x118   : > { %v703_v38 = vadd.f32 %v7863_v20, %v702_v36 }
 0x11a   : > { %v927_v39 = vmax.f32 %v703_v38, 0.0  ;;  %7020 = vmatmul.msk.f32.gmra.mxu0 %vm380_vm1, %v320_v37 }
 0x11b   : > { %v1219_v41 = vld [vmem:[#allocation2 + $0x69] sm:$0xff] }
 0x11c   : > { %1014 = vst.msk [vmem:[#allocation2 + $0x78] sm:$0xff] %vm997_vm2, %v927_v39  ;;  %v1290_v42 = vpack.c.bf16 %v1219_v41, %v1218_v40 }
 0x11e   : > { %7088 = vmatmul.msk.bf16.gmra.mxu1 %vm997_vm2, %v1290_v42 }
 0x11f   : > { %v705_v43 = vpop.f32.mrf.mxu0 }
 0x120   : > { %v706_v45 = vadd.f32 %v7863_v20, %v705_v43  ;;  %v331_v43 = vld [vmem:[%s7829_s26 + $0x150] sm:$0xff] }
 0x122   : > { %v928_v46 = vmax.f32 %v706_v45, 0.0  ;;  %7021 = vmatmul.msk.f32.gmra.mxu0 %vm380_vm1, %v321_v44 }
 0x123   : > { %v1220_v51 = vld [vmem:[#allocation2 + $0x71] sm:$0xff] }
 0x124   : > { %1015 = vst.msk [vmem:[#allocation2 + $0x80] sm:$0xff] %vm997_vm2, %v928_v46 }
 0x127   : > { %v708_v47 = vpop.f32.mrf.mxu0 }
 0x128   : > { %v709_v49 = vadd.f32 %v7863_v20, %v708_v47 }
 0x12a   : > { %v929_v50 = vmax.f32 %v709_v49, 0.0  ;;  %7022 = vmatmul.msk.f32.gmra.mxu0 %vm380_vm1, %v322_v48  ;;  %v332_v48 = vld [vmem:[%s7829_s26 + $0x158] sm:$0xff] }
 0x12b   : > { %v1221_v52 = vld [vmem:[#allocation2 + $0x79] sm:$0xff] }
 0x12c   : > { %1016 = vst.msk [vmem:[#allocation2 + $0x88] sm:$0xff] %vm997_vm2, %v929_v50  ;;  %v1291_v53 = vpack.c.bf16 %v1221_v52, %v1220_v51 }
 0x12e   : > { %7089 = vmatmul.msk.bf16.gmra.mxu1 %vm997_vm2, %v1291_v53 }
 0x12f   : > { %v711_v54 = vpop.f32.mrf.mxu0 }
 0x130   : > { %v712_v56 = vadd.f32 %v7863_v20, %v711_v54 }
 0x132   : > { %v930_v57 = vmax.f32 %v712_v56, 0.0  ;;  %7023 = vmatmul.msk.f32.gmra.mxu0 %vm380_vm1, %v323_v55  ;;  %v333_v56 = vld [vmem:[%s7829_s26 + $0x160] sm:$0xff] }
 0x133   : > { %v1222_v63 = vld [vmem:[#allocation2 + $0x81] sm:$0xff] }
 0x134   : > { %1017 = vst.msk [vmem:[#allocation2 + $0x90] sm:$0xff] %vm997_vm2, %v930_v57 }
 0x137   : > { %v714_v58 = vpop.f32.mrf.mxu0 }
 0x138   : > { %v715_v60 = vadd.f32 %v7863_v20, %v714_v58 }
 0x13a   : > { %v931_v61 = vmax.f32 %v715_v60, 0.0  ;;  %7024 = vmatmul.msk.f32.gmra.mxu0 %vm380_vm1, %v324_v59 }
 0x13b   : > { %v7952_v62 = vpop.f32.mrf.mxu1  ;;  %v1223_v0 = vld [vmem:[#allocation2 + $0x89] sm:$0xff] }
 0x13c   : > { %1018 = vst.msk [vmem:[#allocation2 + $0x98] sm:$0xff] %vm997_vm2, %v931_v61  ;;  %v1292_v1 = vpack.c.bf16 %v1223_v0, %v1222_v63  ;;  %v334_v61 = vld [vmem:[%s7829_s26 + $0x168] sm:$0xff] }
 0x13e   : > { %7090 = vmatmul.msk.bf16.gmra.mxu1 %vm997_vm2, %v1292_v1 }
 0x13f   : > { %v717_v2 = vpop.f32.mrf.mxu0 }
 0x140   : > { %v718_v4 = vadd.f32 %v7863_v20, %v717_v2 }
 0x142   : > { %v932_v5 = vmax.f32 %v718_v4, 0.0  ;;  %7025 = vmatmul.msk.f32.gmra.mxu0 %vm380_vm1, %v325_v3 }
 0x143   : > { %v7959_v6 = vpop.f32.mrf.mxu1  ;;  %v1224_v12 = vld [vmem:[#allocation2 + $0x91] sm:$0xff] }
 0x144   : > { %1019 = vst.msk [vmem:[#allocation2 + $0xa0] sm:$0xff] %vm997_vm2, %v932_v5 }
 0x147   : > { %v720_v7 = vpop.f32.mrf.mxu0 }
 0x148   : > { %v721_v9 = vadd.f32 %v7863_v20, %v720_v7  ;;  %v335_v7 = vld [vmem:[%s7829_s26 + $0x170] sm:$0xff] }
 0x14a   : > { %v933_v10 = vmax.f32 %v721_v9, 0.0  ;;  %7026 = vmatmul.msk.f32.gmra.mxu0 %vm380_vm1, %v326_v8 }
 0x14b   : > { %v7965_v11 = vpop.f32.mrf.mxu1  ;;  %v1225_v13 = vld [vmem:[#allocation2 + $0x99] sm:$0xff] }
 0x14c   : > { %1020 = vst.msk [vmem:[#allocation2 + $0xa8] sm:$0xff] %vm997_vm2, %v933_v10  ;;  %v1293_v14 = vpack.c.bf16 %v1225_v13, %v1224_v12  ;;  %v336_v13 = vld [vmem:[%s7829_s26 + $0x178] sm:$0xff] }
 0x14e   : > { %7091 = vmatmul.msk.bf16.gmra.mxu1 %vm997_vm2, %v1293_v14 }
 0x14f   : > { %v723_v15 = vpop.f32.mrf.mxu0 }
 0x150   : > { %v724_v17 = vadd.f32 %v7863_v20, %v723_v15 }
 0x152   : > { %v934_v18 = vmax.f32 %v724_v17, 0.0  ;;  %7027 = vmatmul.msk.f32.gmra.mxu0 %vm380_vm1, %v327_v16 }
 0x153   : > { %v7972_v19 = vpop.f32.mrf.mxu1  ;;  %v1226_v26 = vld [vmem:[#allocation2 + $0xa1] sm:$0xff] }
 0x154   : > { %1021 = vst.msk [vmem:[#allocation2 + $0xb0] sm:$0xff] %vm997_vm2, %v934_v18 }
 0x157   : > { %v726_v21 = vpop.f32.mrf.mxu0 }
 0x158   : > { %v727_v23 = vadd.f32 %v7863_v20, %v726_v21 }
 0x15a   : > { %v935_v24 = vmax.f32 %v727_v23, 0.0  ;;  %7028 = vmatmul.msk.f32.gmra.mxu0 %vm380_vm1, %v328_v22  ;;  %v337_v23 = vld [vmem:[%s7829_s26 + $0x180] sm:$0xff] }
 0x15b   : > { %v7978_v25 = vpop.f32.mrf.mxu1  ;;  %v1227_v27 = vld [vmem:[#allocation2 + $0xa9] sm:$0xff] }
 0x15c   : > { %1022 = vst.msk [vmem:[#allocation2 + $0xb8] sm:$0xff] %vm997_vm2, %v935_v24  ;;  %v1294_v28 = vpack.c.bf16 %v1227_v27, %v1226_v26 }
 0x15e   : > { %7092 = vmatmul.msk.bf16.gmra.mxu1 %vm997_vm2, %v1294_v28 }
 0x15f   : > { %v729_v29 = vpop.f32.mrf.mxu0 }
 0x160   : > { %v730_v31 = vadd.f32 %v7863_v20, %v729_v29  ;;  %v338_v29 = vld [vmem:[%s7829_s26 + $0x188] sm:$0xff] }
 0x162   : > { %v936_v32 = vmax.f32 %v730_v31, 0.0  ;;  %7029 = vmatmul.msk.f32.gmra.mxu0 %vm380_vm1, %v329_v30 }
 0x163   : > { %v7985_v33 = vpop.f32.mrf.mxu1  ;;  %v1228_v39 = vld [vmem:[#allocation2 + $0xb1] sm:$0xff] }
 0x164   : > { %1023 = vst.msk [vmem:[#allocation2 + $0xc0] sm:$0xff] %vm997_vm2, %v936_v32 }
 0x167   : > { %v732_v34 = vpop.f32.mrf.mxu0 }
 0x168   : > { %v733_v36 = vadd.f32 %v7863_v20, %v732_v34 }
 0x16a   : > { %v937_v37 = vmax.f32 %v733_v36, 0.0  ;;  %7030 = vmatmul.msk.f32.gmra.mxu0 %vm380_vm1, %v330_v35 }
 0x16b   : > { %v7991_v38 = vpop.f32.mrf.mxu1  ;;  %v1229_v40 = vld [vmem:[#allocation2 + $0xb9] sm:$0xff] }
 0x16c   : > { %1024 = vst.msk [vmem:[#allocation2 + $0xc8] sm:$0xff] %vm997_vm2, %v937_v37  ;;  %v1295_v41 = vpack.c.bf16 %v1229_v40, %v1228_v39  ;;  %v7500_v37 = vld [vmem:[#allocation8 + $0x8] sm:$0xff]  ;;  %v339_v40 = vld [vmem:[%s7829_s26 + $0x190] sm:$0xff] }
 0x16d   : > { %7521 = vmatpush.bf16.msra.mxu2 %v7500_v37  ;;  %1796 = vmatpush.bf16.msrb.mxu0 %v7500_v37 }
 0x16e   : > { %7093 = vmatmul.msk.bf16.gmra.mxu1 %vm997_vm2, %v1295_v41 }
 0x16f   : > { %v735_v42 = vpop.f32.mrf.mxu0 }
 0x170   : > { %v736_v44 = vadd.f32 %v7863_v20, %v735_v42  ;;  %v7499_v42 = vld [vmem:[#allocation8] sm:$0xff] }
 0x171   : > { %7522 = vmatpush.bf16.msra.mxu2 %v7499_v42  ;;  %1797 = vmatpush.bf16.msrb.mxu0 %v7499_v42 }
 0x172   : > { %v938_v45 = vmax.f32 %v736_v44, 0.0  ;;  %7031 = vmatmul.msk.f32.gmra.mxu0 %vm380_vm1, %v331_v43 }
 0x173   : > { %v7998_v46 = vpop.f32.mrf.mxu1  ;;  %v1230_v52 = vld [vmem:[#allocation2 + $0xc1] sm:$0xff] }
 0x174   : > { %1025 = vst.msk [vmem:[#allocation2 + $0xd0] sm:$0xff] %vm997_vm2, %v938_v45 }
 0x177   : > { %v738_v47 = vpop.f32.mrf.mxu0 }
 0x178   : > { %v739_v49 = vadd.f32 %v7863_v20, %v738_v47  ;;  %v340_v47 = vld [vmem:[%s7829_s26 + $0x198] sm:$0xff] }
 0x17a   : > { %v939_v50 = vmax.f32 %v739_v49, 0.0  ;;  %7032 = vmatmul.msk.f32.gmra.mxu0 %vm380_vm1, %v332_v48 }
 0x17b   : > { %v8004_v51 = vpop.f32.mrf.mxu1  ;;  %v1231_v53 = vld [vmem:[#allocation2 + $0xc9] sm:$0xff] }
 0x17c   : > { %1026 = vst.msk [vmem:[#allocation2 + $0xd8] sm:$0xff] %vm997_vm2, %v939_v50  ;;  %v1296_v54 = vpack.c.bf16 %v1231_v53, %v1230_v52 }
 0x17e   : > { %7094 = vmatmul.msk.bf16.gmra.mxu1 %vm997_vm2, %v1296_v54 }
 0x17f   : > { %v741_v55 = vpop.f32.mrf.mxu0 }
 0x180   : > { %v742_v57 = vadd.f32 %v7863_v20, %v741_v55 }
 0x182   : > { %v940_v58 = vmax.f32 %v742_v57, 0.0  ;;  %7033 = vmatmul.msk.f32.gmra.mxu0 %vm380_vm1, %v333_v56  ;;  %v341_v56 = vld [vmem:[%s7829_s26 + $0x1a0] sm:$0xff] }
 0x183   : > { %v8011_v59 = vpop.f32.mrf.mxu1  ;;  %v1232_v2 = vld [vmem:[#allocation2 + $0xd1] sm:$0xff] }
 0x184   : > { %1027 = vst.msk [vmem:[#allocation2 + $0xe0] sm:$0xff] %vm997_vm2, %v940_v58 }
 0x187   : > { %v744_v60 = vpop.f32.mrf.mxu0 }
 0x188   : > { %v745_v63 = vadd.f32 %v7863_v20, %v744_v60 }
 0x18a   : > { %v941_v0 = vmax.f32 %v745_v63, 0.0  ;;  %7034 = vmatmul.msk.f32.gmra.mxu0 %vm380_vm1, %v334_v61  ;;  %v7508_v61 = vld [vmem:[#allocation8 + $0x48] sm:$0xff] }
 0x18b   : > { %v8017_v1 = vpop.f32.mrf.mxu1  ;;  %v1233_v3 = vld [vmem:[#allocation2 + $0xd9] sm:$0xff]  ;;  %3317 = vmatpush.bf16.msrb.mxu2 %v7508_v61 }
 0x18c   : > { %1028 = vst.msk [vmem:[#allocation2 + $0xe8] sm:$0xff] %vm997_vm2, %v941_v0  ;;  %v1297_v4 = vpack.c.bf16 %v1233_v3, %v1232_v2  ;;  %v342_v0 = vld [vmem:[%s7829_s26 + $0x1a8] sm:$0xff]  ;;  %v7504_v61 = vld [vmem:[#allocation8 + $0x28] sm:$0xff] }
 0x18e   : > { %7095 = vmatmul.msk.bf16.gmra.mxu1 %vm997_vm2, %v1297_v4 }
 0x18f   : > { %v747_v5 = vpop.f32.mrf.mxu0 }
 0x190   : > { %v748_v8 = vadd.f32 %v7863_v20, %v747_v5 }
 0x192   : > { %v942_v9 = vmax.f32 %v748_v8, 0.0  ;;  %7035 = vmatmul.msk.f32.gmra.mxu0 %vm380_vm1, %v335_v7 }
 0x193   : > { %v8024_v10 = vpop.f32.mrf.mxu1  ;;  %v1234_v17 = vld [vmem:[#allocation2 + $0xe1] sm:$0xff] }
 0x194   : > { %1029 = vst.msk [vmem:[#allocation2 + $0xf0] sm:$0xff] %vm997_vm2, %v942_v9  ;;  %v7506_v9 = vld [vmem:[#allocation8 + $0x38] sm:$0xff] }
 0x195   : > { %2784 = vmatpush.bf16.msrb.mxu1 %v7506_v9 }
 0x197   : > { %v750_v12 = vpop.f32.mrf.mxu0 }
 0x198   : > { %v751_v14 = vadd.f32 %v7863_v20, %v750_v12 }
 0x19a   : > { %v943_v15 = vmax.f32 %v751_v14, 0.0  ;;  %7036 = vmatmul.msk.f32.gmra.mxu0 %vm380_vm1, %v336_v13  ;;  %v343_v13 = vld [vmem:[%s7829_s26 + $0x1b0] sm:$0xff] }
 0x19b   : > { %v8030_v16 = vpop.f32.mrf.mxu1  ;;  %v1235_v18 = vld [vmem:[#allocation2 + $0xe9] sm:$0xff] }
 0x19c   : > { %1030 = vst.msk [vmem:[#allocation2 + $0xf8] sm:$0xff] %vm997_vm2, %v943_v15  ;;  %v1298_v21 = vpack.c.bf16 %v1235_v18, %v1234_v17 }
 0x19e   : > { %7096 = vmatmul.msk.bf16.gmra.mxu1 %vm997_vm2, %v1298_v21 }
 0x19f   : > { %v753_v22 = vpop.f32.mrf.mxu0 }
 0x1a0   : > { %v754_v24 = vadd.f32 %v7863_v20, %v753_v22 }
 0x1a2   : > { %v944_v26 = vmax.f32 %v754_v24, 0.0  ;;  %7037 = vmatmul.msk.f32.gmra.mxu0 %vm380_vm1, %v337_v23  ;;  %v372_v23 = vld [vmem:[%s7829_s26 + $0x298] sm:$0xff] }
 0x1a3   : > { %v8037_v27 = vpop.f32.mrf.mxu1  ;;  %v1236_v34 = vld [vmem:[#allocation2 + $0xf1] sm:$0xff]  ;;  %7072 = vmatmul.msk.f32.vlgmr.msra.gmra.mxu3 %vm380_vm1, %v372_v23 }
 0x1a4   : > { %1031 = vst.msk [vmem:[#allocation2 + $0x100] sm:$0xff] %vm997_vm2, %v944_v26  ;;  %v344_v26 = vld [vmem:[%s7829_s26 + $0x1b8] sm:$0xff]  ;;  %2251 = vmatpush.bf16.msra.mxu3 %v7504_v61 }
 0x1a7   : > { %v756_v28 = vpop.f32.mrf.mxu0 }
 0x1a8   : > { %v757_v30 = vadd.f32 %v7863_v20, %v756_v28 }
 0x1aa   : > { %v945_v31 = vmax.f32 %v757_v30, 0.0  ;;  %7038 = vmatmul.msk.f32.gmra.mxu0 %vm380_vm1, %v338_v29 }
 0x1ab   : > { %v8043_v32 = vpop.f32.mrf.mxu1  ;;  %v1237_v35 = vld [vmem:[#allocation2 + $0xf9] sm:$0xff] }
 0x1ac   : > { %1032 = vst.msk [vmem:[#allocation2 + $0x108] sm:$0xff] %vm997_vm2, %v945_v31  ;;  %v1299_v36 = vpack.c.bf16 %v1237_v35, %v1236_v34 }
 0x1ae   : > { %7097 = vmatmul.msk.bf16.gmra.mxu1 %vm997_vm2, %v1299_v36  ;;  %v373_v36 = vld [vmem:[%s7829_s26 + $0x2a0] sm:$0xf] }
 0x1af   : > { %v759_v39 = vpop.f32.mrf.mxu0  ;;  %7073 = vmatmul.msk.f32.gmra.mxu3 %vm380_vm1, %v373_v36 }
 0x1b0   : > { %v760_v41 = vadd.f32 %v7863_v20, %v759_v39  ;;  %v345_v39 = vld [vmem:[%s7829_s26 + $0x1c0] sm:$0xff] }
 0x1b2   : > { %v946_v43 = vmax.f32 %v760_v41, 0.0  ;;  %7039 = vmatmul.msk.f32.gmra.mxu0 %vm380_vm1, %v339_v40 }
 0x1b3   : > { %v8050_v44 = vpop.f32.mrf.mxu1  ;;  %v1238_v52 = vld [vmem:[#allocation2 + $0x101] sm:$0xff] }
 0x1b4   : > { %1033 = vst.msk [vmem:[#allocation2 + $0x110] sm:$0xff] %vm997_vm2, %v946_v43 }
 0x1b7   : > { %v762_v45 = vpop.f32.mrf.mxu0 }
 0x1b8   : > { %v763_v48 = vadd.f32 %v7863_v20, %v762_v45 }
 0x1ba   : > { %v947_v49 = vmax.f32 %v763_v48, 0.0  ;;  %7040 = vmatmul.msk.f32.gmra.mxu0 %vm380_vm1, %v340_v47 }
 0x1bb   : > { %v8056_v50 = vpop.f32.mrf.mxu1  ;;  %v1239_v53 = vld [vmem:[#allocation2 + $0x109] sm:$0xff] }
 0x1bc   : > { %10179 = vst [vmem:[#allocation14_spill] sm:$0xff] %v8056_v50  ;;  %v1300_v54 = vpack.c.bf16 %v1239_v53, %v1238_v52  ;;  %v7505_v53 = vld [vmem:[#allocation8 + $0x30] sm:$0xff]  ;;  %v2013_v50 = vld [vmem:[#allocation2 + $0x9a] sm:$0xff] }
 0x1bd   : > { %1034 = vst.msk [vmem:[#allocation2 + $0x118] sm:$0xff] %vm997_vm2, %v947_v49  ;;  %v346_v49 = vld [vmem:[%s7829_s26 + $0x1c8] sm:$0xff]  ;;  %2785 = vmatpush.bf16.msrb.mxu1 %v7505_v53 }
 0x1be   : > { %7098 = vmatmul.msk.bf16.gmra.mxu1 %vm997_vm2, %v1300_v54 }
 0x1bf   : > { %v765_v55 = vpop.f32.mrf.mxu0 }
 0x1c0   : > { %v766_v57 = vadd.f32 %v7863_v20, %v765_v55 }
 0x1c2   : > { %v948_v58 = vmax.f32 %v766_v57, 0.0  ;;  %7041 = vmatmul.msk.f32.gmra.mxu0 %vm380_vm1, %v341_v56 }
 0x1c3   : > { %v8063_v60 = vpop.f32.mrf.mxu1 }
 0x1c4   : > { %10180 = vst [vmem:[#allocation15_spill] sm:$0xff] %v8063_v60  ;;  %v1240_v5 = vld [vmem:[#allocation2 + $0x111] sm:$0xff] }
 0x1c5   : > { %1035 = vst.msk [vmem:[#allocation2 + $0x120] sm:$0xff] %vm997_vm2, %v948_v58 }
 0x1c7   : > { %v768_v63 = vpop.f32.mrf.mxu0 }
 0x1c8   : > { %v769_v2 = vadd.f32 %v7863_v20, %v768_v63 }
 0x1ca   : > { %v949_v3 = vmax.f32 %v769_v2, 0.0  ;;  %7042 = vmatmul.msk.f32.gmra.mxu0 %vm380_vm1, %v342_v0  ;;  %v347_v0 = vld [vmem:[%s7829_s26 + $0x1d0] sm:$0xff] }
 0x1cb   : > { %v8069_v4 = vpop.f32.mrf.mxu1 }
 0x1cc   : > { %10181 = vst [vmem:[#allocation16_spill] sm:$0xff] %v8069_v4  ;;  %v1241_v7 = vld [vmem:[#allocation2 + $0x119] sm:$0xff] }
 0x1cd   : > { %1036 = vst.msk [vmem:[#allocation2 + $0x128] sm:$0xff] %vm997_vm2, %v949_v3  ;;  %v1301_v8 = vpack.c.bf16 %v1241_v7, %v1240_v5  ;;  %v1121_v18 = vld [vmem:[#allocation2 + $0x120] sm:$0xff] }
 0x1cf   : > { %7099 = vmatmul.msk.bf16.gmra.mxu1 %vm997_vm2, %v1301_v8  ;;  %v771_v12 = vpop.f32.mrf.mxu0 }
 0x1d0   : > { %v772_v14 = vadd.f32 %v7863_v20, %v771_v12 }
 0x1d2   : > { %v950_v15 = vmax.f32 %v772_v14, 0.0  ;;  %7043 = vmatmul.msk.f32.gmra.mxu0 %vm380_vm1, %v343_v13  ;;  %v348_v13 = vld [vmem:[%s7829_s26 + $0x1d8] sm:$0xff] }
 0x1d3   : > { %v8076_v17 = vpop.f32.mrf.mxu1 }
 0x1d4   : > { %10182 = vst [vmem:[#allocation17_spill] sm:$0xff] %v8076_v17  ;;  %v1122_v21 = vld [vmem:[#allocation2 + $0x128] sm:$0xff] }
 0x1d5   : > { %1037 = vst.msk [vmem:[#allocation2 + $0x130] sm:$0xff] %vm997_vm2, %v950_v15  ;;  %v1181_v22 = vpack.c.bf16 %v1122_v21, %v1121_v18  ;;  %v1242_v31 = vld [vmem:[#allocation2 + $0x121] sm:$0xff] }
 0x1d7   : > { %7147 = vmatmul.msk.bf16.vlgmr.msra.gmra.mxu2 %vm997_vm2, %v1181_v22  ;;  %v774_v24 = vpop.f32.mrf.mxu0 }
 0x1d8   : > { %v775_v28 = vadd.f32 %v7863_v20, %v774_v24 }
 0x1da   : > { %v951_v29 = vmax.f32 %v775_v28, 0.0  ;;  %7044 = vmatmul.msk.f32.gmra.mxu0 %vm380_vm1, %v344_v26  ;;  %v349_v26 = vld [vmem:[%s7829_s26 + $0x1e0] sm:$0xff] }
 0x1db   : > { %v8085_v30 = vpop.f32.mrf.mxu1 }
 0x1dc   : > { %10183 = vst [vmem:[#allocation18_spill] sm:$0xff] %v8085_v30  ;;  %v1243_v34 = vld [vmem:[#allocation2 + $0x129] sm:$0xff] }
 0x1dd   : > { %1038 = vst.msk [vmem:[#allocation2 + $0x138] sm:$0xff] %vm997_vm2, %v951_v29  ;;  %v1302_v35 = vpack.c.bf16 %v1243_v34, %v1242_v31  ;;  %v1123_v43 = vld [vmem:[#allocation2 + $0x130] sm:$0xff] }
 0x1df   : > { %7100 = vmatmul.msk.bf16.gmra.mxu1 %vm997_vm2, %v1302_v35  ;;  %v777_v37 = vpop.f32.mrf.mxu0 }
 0x1e0   : > { %v778_v40 = vadd.f32 %v7863_v20, %v777_v37 }
 0x1e2   : > { %v952_v41 = vmax.f32 %v778_v40, 0.0  ;;  %7045 = vmatmul.msk.f32.gmra.mxu0 %vm380_vm1, %v345_v39  ;;  %v350_v39 = vld [vmem:[%s7829_s26 + $0x1e8] sm:$0xff] }
 0x1e3   : > { %v8094_v42 = vpop.f32.mrf.mxu1 }
 0x1e4   : > { %10184 = vst [vmem:[#allocation19_spill] sm:$0xff] %v8094_v42  ;;  %v1124_v45 = vld [vmem:[#allocation2 + $0x138] sm:$0xff] }
 0x1e5   : > { %1039 = vst.msk [vmem:[#allocation2 + $0x140] sm:$0xff] %vm997_vm2, %v952_v41  ;;  %v1182_v47 = vpack.c.bf16 %v1124_v45, %v1123_v43  ;;  %v1244_v56 = vld [vmem:[#allocation2 + $0x131] sm:$0xff]  ;;  %v2528_v41 = vld [vmem:[#allocation2 + $0x22] sm:$0xff] }
 0x1e7   : > { %7148 = vmatmul.msk.bf16.gmra.mxu2 %vm997_vm2, %v1182_v47  ;;  %v780_v48 = vpop.f32.mrf.mxu0 }
 0x1e8   : > { %v781_v52 = vadd.f32 %v7863_v20, %v780_v48 }
 0x1ea   : > { %v953_v54 = vmax.f32 %v781_v52, 0.0  ;;  %7046 = vmatmul.msk.f32.gmra.mxu0 %vm380_vm1, %v346_v49  ;;  %v2527_v49 = vld [vmem:[#allocation2 + $0x1a] sm:$0xff] }
 0x1eb   : > { %v8101_v55 = vpop.f32.mrf.mxu1  ;;  %v2605_v53 = vpack.c.bf16 %v2528_v41, %v2527_v49 }
 0x1ec   : > { %10185 = vst [vmem:[#allocation20_spill] sm:$0xff] %v8101_v55  ;;  %v1245_v57 = vld [vmem:[#allocation2 + $0x139] sm:$0xff] }
 0x1ed   : > { %1040 = vst.msk [vmem:[#allocation2 + $0x148] sm:$0xff] %vm997_vm2, %v953_v54  ;;  %v1303_v58 = vpack.c.bf16 %v1245_v57, %v1244_v56  ;;  %v1125_v7 = vld [vmem:[#allocation2 + $0x140] sm:$0xff]  ;;  %v351_v56 = vld [vmem:[%s7829_s26 + $0x1f0] sm:$0xff] }
 0x1ef   : > { %7101 = vmatmul.msk.bf16.gmra.mxu1 %vm997_vm2, %v1303_v58  ;;  %v783_v63 = vpop.f32.mrf.mxu0 }
 0x1f0   : > { %v784_v2 = vadd.f32 %v7863_v20, %v783_v63 }
 0x1f2   : > { %v954_v3 = vmax.f32 %v784_v2, 0.0  ;;  %7047 = vmatmul.msk.f32.gmra.mxu0 %vm380_vm1, %v347_v0 }
 0x1f3   : > { %v8108_v5 = vpop.f32.mrf.mxu1 }
 0x1f4   : > { %10186 = vst [vmem:[#allocation21_spill] sm:$0xff] %v8108_v5  ;;  %v1126_v8 = vld [vmem:[#allocation2 + $0x148] sm:$0xff] }
 0x1f5   : > { %1041 = vst.msk [vmem:[#allocation2 + $0x150] sm:$0xff] %vm997_vm2, %v954_v3  ;;  %v1183_v9 = vpack.c.bf16 %v1126_v8, %v1125_v7  ;;  %v1246_v21 = vld [vmem:[#allocation2 + $0x141] sm:$0xff]  ;;  %v352_v7 = vld [vmem:[%s7829_s26 + $0x1f8] sm:$0xff] }
 0x1f7   : > { %7149 = vmatmul.msk.bf16.gmra.mxu2 %vm997_vm2, %v1183_v9  ;;  %v786_v12 = vpop.f32.mrf.mxu0  ;;  %v2530_v9 = vld [vmem:[#allocation2 + $0x32] sm:$0xff] }
 0x1f8   : > { %v787_v14 = vadd.f32 %v7863_v20, %v786_v12 }
 0x1fa   : > { %v955_v15 = vmax.f32 %v787_v14, 0.0  ;;  %7048 = vmatmul.msk.f32.gmra.mxu0 %vm380_vm1, %v348_v13 }
 0x1fb   : > { %v8115_v18 = vpop.f32.mrf.mxu1 }
 0x1fc   : > { %10187 = vst [vmem:[#allocation22_spill] sm:$0xff] %v8115_v18  ;;  %v1247_v22 = vld [vmem:[#allocation2 + $0x149] sm:$0xff] }
 0x1fd   : > { %1042 = vst.msk [vmem:[#allocation2 + $0x158] sm:$0xff] %vm997_vm2, %v955_v15  ;;  %v1304_v23 = vpack.c.bf16 %v1247_v22, %v1246_v21  ;;  %v1127_v34 = vld [vmem:[#allocation2 + $0x150] sm:$0xff] }
 0x1fe   : > { %v2529_v21 = vld [vmem:[#allocation2 + $0x2a] sm:$0xff] }
 0x1ff   : > { %7102 = vmatmul.msk.bf16.gmra.mxu1 %vm997_vm2, %v1304_v23  ;;  %v789_v24 = vpop.f32.mrf.mxu0  ;;  %v2606_v23 = vpack.c.bf16 %v2530_v9, %v2529_v21 }
 0x200   : > { %v790_v28 = vadd.f32 %v7863_v20, %v789_v24 }
 0x202   : > { %v956_v29 = vmax.f32 %v790_v28, 0.0  ;;  %7049 = vmatmul.msk.f32.gmra.mxu0 %vm380_vm1, %v349_v26  ;;  %v353_v26 = vld [vmem:[%s7829_s26 + $0x200] sm:$0xff] }
 0x203   : > { %v8122_v31 = vpop.f32.mrf.mxu1 }
 0x204   : > { %10188 = vst [vmem:[#allocation23_spill] sm:$0xff] %v8122_v31  ;;  %v1128_v35 = vld [vmem:[#allocation2 + $0x158] sm:$0xff]  ;;  %v3062_v31 = vld [vmem:[#allocation2 + $0x2b] sm:$0xff] }
 0x205   : > { %1043 = vst.msk [vmem:[#allocation2 + $0x160] sm:$0xff] %vm997_vm2, %v956_v29  ;;  %v1184_v36 = vpack.c.bf16 %v1128_v35, %v1127_v34  ;;  %v1248_v47 = vld [vmem:[#allocation2 + $0x151] sm:$0xff] }
 0x207   : > { %7150 = vmatmul.msk.bf16.gmra.mxu2 %vm997_vm2, %v1184_v36  ;;  %v792_v37 = vpop.f32.mrf.mxu0 }
 0x208   : > { %v793_v40 = vadd.f32 %v7863_v20, %v792_v37 }
 0x20a   : > { %v957_v43 = vmax.f32 %v793_v40, 0.0  ;;  %7050 = vmatmul.msk.f32.gmra.mxu0 %vm380_vm1, %v350_v39  ;;  %v354_v40 = vld [vmem:[%s7829_s26 + $0x208] sm:$0xff] }
 0x20b   : > { %v8129_v45 = vpop.f32.mrf.mxu1 }
 0x20c   : > { %10189 = vst [vmem:[#allocation24_spill] sm:$0xff] %v8129_v45  ;;  %v1249_v48 = vld [vmem:[#allocation2 + $0x159] sm:$0xff]  ;;  %v1995_v45 = vld [vmem:[#allocation2 + $0xa] sm:$0xff] }
 0x20d   : > { %1044 = vst.msk [vmem:[#allocation2 + $0x168] sm:$0xff] %vm997_vm2, %v957_v43  ;;  %v1305_v52 = vpack.c.bf16 %v1249_v48, %v1248_v47  ;;  %v1129_v63 = vld [vmem:[#allocation2 + $0x160] sm:$0xff] }
 0x20e   : > { %v2532_v43 = vld [vmem:[#allocation2 + $0x42] sm:$0xff] }
 0x20f   : > { %7103 = vmatmul.msk.bf16.vlgmr.msrb.gmra.mxu3 %vm997_vm2, %v1305_v52  ;;  %7223 = vmatmul.msk.bf16.vlgmr.msrb.gmra.mxu1 %vm997_vm2, %v2605_v53  ;;  %v795_v54 = vpop.f32.mrf.mxu0  ;;  %v2531_v53 = vld [vmem:[#allocation2 + $0x3a] sm:$0xff] }
 0x210   : > { %v796_v57 = vadd.f32 %v7863_v20, %v795_v54 }
 0x212   : > { %v958_v58 = vmax.f32 %v796_v57, 0.0  ;;  %7051 = vmatmul.msk.f32.gmra.mxu0 %vm380_vm1, %v351_v56  ;;  %v2607_v56 = vpack.c.bf16 %v2532_v43, %v2531_v53  ;;  %v8187_v53 = vld [vmem:[#allocation6] ss:$0 sm:$0xff] }
 0x213   : > { %v8137_v61 = vpop.f32.mrf.mxu1 }
 0x214   : > { %10190 = vst [vmem:[#allocation25_spill] sm:$0xff] %v8137_v61  ;;  %v1130_v0 = vld [vmem:[#allocation2 + $0x168] sm:$0xff]  ;;  %v3060_v61 = vld [vmem:[#allocation2 + $0x1b] sm:$0xff] }
 0x215   : > { %1045 = vst.msk [vmem:[#allocation2 + $0x170] sm:$0xff] %vm997_vm2, %v958_v58  ;;  %v1185_v2 = vpack.c.bf16 %v1130_v0, %v1129_v63  ;;  %v1250_v14 = vld [vmem:[#allocation2 + $0x161] sm:$0xff]  ;;  %v355_v58 = vld [vmem:[%s7829_s26 + $0x210] sm:$0xff] }
 0x216   : > { %v2568_v5 = vld [vmem:[#allocation2 + $0x162] sm:$0xff] }
 0x217   : > { %7151 = vmatmul.msk.bf16.gmra.mxu2 %vm997_vm2, %v1185_v2  ;;  %v798_v3 = vpop.f32.mrf.mxu0 }
 0x218   : > { %v799_v8 = vadd.f32 %v7863_v20, %v798_v3 }
 0x21a   : > { %v959_v12 = vmax.f32 %v799_v8, 0.0  ;;  %7052 = vmatmul.msk.f32.gmra.mxu0 %vm380_vm1, %v352_v7 }
 0x21b   : > { %v8144_v13 = vpop.f32.mrf.mxu1 }
 0x21c   : > { %10191 = vst [vmem:[#allocation26_spill] sm:$0xff] %v8144_v13  ;;  %v1251_v15 = vld [vmem:[#allocation2 + $0x169] sm:$0xff] }
 0x21d   : > { %1046 = vst.msk [vmem:[#allocation2 + $0x178] sm:$0xff] %vm997_vm2, %v959_v12  ;;  %v1306_v22 = vpack.c.bf16 %v1251_v15, %v1250_v14  ;;  %v1131_v35 = vld [vmem:[#allocation2 + $0x170] sm:$0xff]  ;;  %v356_v12 = vld [vmem:[%s7829_s26 + $0x218] sm:$0xff] }
 0x21e   : > { %v2534_v15 = vld [vmem:[#allocation2 + $0x52] sm:$0xff] }
 0x21f   : > { %7104 = vmatmul.msk.bf16.gmra.mxu3 %vm997_vm2, %v1306_v22  ;;  %7224 = vmatmul.msk.bf16.gmra.mxu1 %vm997_vm2, %v2606_v23  ;;  %v801_v24 = vpop.f32.mrf.mxu0 }
 0x220   : > { %v802_v28 = vadd.f32 %v7863_v20, %v801_v24 }
 0x222   : > { %v960_v29 = vmax.f32 %v802_v28, 0.0  ;;  %7053 = vmatmul.msk.f32.gmra.mxu0 %vm380_vm1, %v353_v26  ;;  %v2533_v26 = vld [vmem:[#allocation2 + $0x4a] sm:$0xff] }
 0x223   : > { %v8152_v34 = vpop.f32.mrf.mxu1 }
 0x224   : > { %10192 = vst [vmem:[#allocation27_spill] sm:$0xff] %v8152_v34  ;;  %v1132_v36 = vld [vmem:[#allocation2 + $0x178] sm:$0xff] }
 0x225   : > { %1047 = vst.msk [vmem:[#allocation2 + $0x180] sm:$0xff] %vm997_vm2, %v960_v29  ;;  %v1186_v37 = vpack.c.bf16 %v1132_v36, %v1131_v35  ;;  %v1252_v49 = vld [vmem:[#allocation2 + $0x171] sm:$0xff]  ;;  %v2608_v29 = vpack.c.bf16 %v2534_v15, %v2533_v26  ;;  %v357_v36 = vld [vmem:[%s7829_s26 + $0x220] sm:$0xff] }
 0x227   : > { %7152 = vmatmul.msk.bf16.gmra.mxu2 %vm997_vm2, %v1186_v37  ;;  %v804_v39 = vpop.f32.mrf.mxu0 }
 0x228   : > { %v805_v41 = vadd.f32 %v7863_v20, %v804_v39 }
 0x22a   : > { %v961_v47 = vmax.f32 %v805_v41, 0.0  ;;  %7054 = vmatmul.msk.f32.gmra.mxu0 %vm380_vm1, %v354_v40 }
 0x22b   : > { %v8159_v48 = vpop.f32.mrf.mxu1 }
 0x22c   : > { %10193 = vst [vmem:[#allocation28_spill] sm:$0xff] %v8159_v48  ;;  %v1253_v52 = vld [vmem:[#allocation2 + $0x179] sm:$0xff] }
 0x22d   : > { %1048 = vst.msk [vmem:[#allocation2 + $0x188] sm:$0xff] %vm997_vm2, %v961_v47  ;;  %v1307_v54 = vpack.c.bf16 %v1253_v52, %v1252_v49  ;;  %v1133_v3 = vld [vmem:[#allocation2 + $0x180] sm:$0xff]  ;;  %v358_v52 = vld [vmem:[%s7829_s26 + $0x228] sm:$0xff] }
 0x22f   : > { %7105 = vmatmul.msk.bf16.gmra.mxu3 %vm997_vm2, %v1307_v54  ;;  %7225 = vmatmul.msk.bf16.gmra.mxu1 %vm997_vm2, %v2607_v56  ;;  %v807_v57 = vpop.f32.mrf.mxu0 }
 0x230   : > { %v808_v63 = vadd.f32 %v7863_v20, %v807_v57 }
 0x232   : > { %v962_v0 = vmax.f32 %v808_v63, 0.0  ;;  %7055 = vmatmul.msk.f32.gmra.mxu0 %vm380_vm1, %v355_v58 }
 0x233   : > { %v8167_v2 = vpop.f32.mrf.mxu1 }
 0x234   : > { %10194 = vst [vmem:[#allocation29_spill] sm:$0xff] %v8167_v2  ;;  %v1134_v7 = vld [vmem:[#allocation2 + $0x188] sm:$0xff] }
 0x235   : > { %1049 = vst.msk [vmem:[#allocation2 + $0x190] sm:$0xff] %vm997_vm2, %v962_v0  ;;  %v1187_v8 = vpack.c.bf16 %v1134_v7, %v1133_v3  ;;  %v1254_v23 = vld [vmem:[#allocation2 + $0x181] sm:$0xff] }
 0x236   : > { %v2535_v0 = vld [vmem:[#allocation2 + $0x5a] sm:$0xff] }
 0x237   : > { %7153 = vmatmul.msk.bf16.gmra.mxu2 %vm997_vm2, %v1187_v8  ;;  %v810_v9 = vpop.f32.mrf.mxu0 }
 0x238   : > { %v811_v14 = vadd.f32 %v7863_v20, %v810_v9  ;;  %v359_v9 = vld [vmem:[%s7829_s26 + $0x230] sm:$0xff] }
 0x23a   : > { %v963_v21 = vmax.f32 %v811_v14, 0.0  ;;  %7056 = vmatmul.msk.f32.gmra.mxu0 %vm380_vm1, %v356_v12 }
 0x23b   : > { %v8174_v22 = vpop.f32.mrf.mxu1 }
 0x23c   : > { %10195 = vst [vmem:[#allocation30_spill] sm:$0xff] %v8174_v22  ;;  %v1255_v24 = vld [vmem:[#allocation2 + $0x189] sm:$0xff] }
 0x23d   : > { %1050 = vst.msk [vmem:[#allocation2 + $0x198] sm:$0xff] %vm997_vm2, %v963_v21  ;;  %v1308_v28 = vpack.c.bf16 %v1255_v24, %v1254_v23  ;;  %v1135_v41 = vld [vmem:[#allocation2 + $0x190] sm:$0xff] }
 0x23f   : > { %7106 = vmatmul.msk.bf16.gmra.mxu3 %vm997_vm2, %v1308_v28  ;;  %7226 = vmatmul.msk.bf16.gmra.mxu1 %vm997_vm2, %v2608_v29  ;;  %v813_v35 = vpop.f32.mrf.mxu0  ;;  %v360_v28 = vld [vmem:[%s7829_s26 + $0x238] sm:$0xff] }
 0x240   : > { %v814_v37 = vadd.f32 %v7863_v20, %v813_v35  ;;  %v2536_v20 = vld [vmem:[#allocation2 + $0x62] sm:$0xff] }
 0x241   : > { %v2609_v7 = vpack.c.bf16 %v2536_v20, %v2535_v0  ;;  %v361_v0 = vld [vmem:[%s7829_s26 + $0x240] sm:$0xff] }
 0x242   : > { %v964_v39 = vmax.f32 %v814_v37, 0.0  ;;  %7057 = vmatmul.msk.f32.gmra.mxu0 %vm380_vm1, %v357_v36  ;;  %v2538_v36 = vld [vmem:[#allocation2 + $0x72] sm:$0xff]  ;;  %v906_v37 = vpop.f32.mrf.mxu3 }
 0x243   : > { %v8182_v40 = vpop.f32.mrf.mxu1 }
 0x244   : > { %10196 = vst [vmem:[#allocation31_spill] sm:$0xff] %v8182_v40  ;;  %v1136_v43 = vld [vmem:[#allocation2 + $0x198] sm:$0xff] }
 0x245   : > { %1051 = vst.msk [vmem:[#allocation2 + $0x1a0] sm:$0xff] %vm997_vm2, %v964_v39  ;;  %v1188_v47 = vpack.c.bf16 %v1136_v43, %v1135_v41  ;;  %v1256_v58 = vld [vmem:[#allocation2 + $0x191] sm:$0xff] }
 0x247   : > { %7154 = vmatmul.msk.bf16.gmra.mxu2 %vm997_vm2, %v1188_v47  ;;  %v816_v49 = vpop.f32.mrf.mxu0 }
 0x248   : > { %v817_v54 = vadd.f32 %v8187_v53, %v816_v49  ;;  %v2537_v49 = vld [vmem:[#allocation2 + $0x6a] sm:$0xff] }
 0x249   : > { %v2610_v20 = vpack.c.bf16 %v2538_v36, %v2537_v49  ;;  %v362_v36 = vld [vmem:[%s7829_s26 + $0x248] sm:$0xff] }
 0x24a   : > { %v965_v56 = vmax.f32 %v817_v54, 0.0  ;;  %7058 = vmatmul.msk.f32.gmra.mxu0 %vm380_vm1, %v358_v52 }
 0x24c   : > { %v8191_v57 = vpop.f32.mrf.mxu1  ;;  %v1257_v63 = vld [vmem:[#allocation2 + $0x199] sm:$0xff]  ;;  %1052 = vst.msk [vmem:[#allocation2 + $0x1a8] sm:$0xff] %vm997_vm2, %v965_v56  ;;  %v907_v56 = vadd.f32 %v8187_v53, %v906_v37 }
 0x24d   : > { %10197 = vst [vmem:[#allocation32_spill] sm:$0xff] %v8191_v57  ;;  %v1309_v3 = vpack.c.bf16 %v1257_v63, %v1256_v58  ;;  %v1137_v21 = vld [vmem:[#allocation2 + $0x1a0] sm:$0xff] }
 0x24e   : > { %v995_v58 = vmax.f32 %v907_v56, 0.0 }
 0x24f   : > { %7107 = vmatmul.msk.bf16.gmra.mxu3 %vm997_vm2, %v1309_v3  ;;  %7227 = vmatmul.msk.bf16.gmra.mxu1 %vm997_vm2, %v2609_v7  ;;  %v819_v8 = vpop.f32.mrf.mxu0 }
 0x250   : > { %v820_v12 = vadd.f32 %v8187_v53, %v819_v8  ;;  %1082 = vst.msk [vmem:[#allocation2 + $0x298] sm:$0xff] %vm997_vm2, %v995_v58  ;;  %v909_v8 = vpop.f32.mrf.mxu3 }
 0x252   : > { %v966_v14 = vmax.f32 %v820_v12, 0.0  ;;  %7059 = vmatmul.msk.f32.gmra.mxu0 %vm380_vm1, %v359_v9  ;;  %v910_v12 = vadd.f32 %v8187_v53, %v909_v8 }
 0x253   : > { %v1138_v23 = vld [vmem:[#allocation2 + $0x1a8] sm:$0xff] }
 0x254   : > { %v8199_v15 = vpop.f32.mrf.mxu1  ;;  %1053 = vst.msk [vmem:[#allocation2 + $0x1b0] sm:$0xff] %vm997_vm2, %v966_v14  ;;  %v1189_v24 = vpack.c.bf16 %v1138_v23, %v1137_v21  ;;  %v1258_v43 = vld [vmem:[#allocation2 + $0x1a1] sm:$0xff] }
 0x255   : > { %10198 = vst [vmem:[#allocation33_spill] sm:$0xff] %v8199_v15 }
 0x257   : > { %7155 = vmatmul.msk.bf16.gmra.mxu2 %vm997_vm2, %v1189_v24  ;;  %v822_v26 = vpop.f32.mrf.mxu0 }
 0x258   : > { %v823_v29 = vadd.f32 %v8187_v53, %v822_v26 }
 0x25a   : > { %v1889_v35 = vpop.f32.mrf.mxu2  ;;  %v967_v39 = vmax.f32 %v823_v29, 0.0  ;;  %7060 = vmatmul.msk.f32.gmra.mxu0 %vm380_vm1, %v360_v28  ;;  %v996_v28 = vmax.f32 %v910_v12, 0.0  ;;  %v7733_v29 = vmov 0.0  }
 0x25b   : > { %v1259_v47 = vld [vmem:[#allocation2 + $0x1a9] sm:$0xff]  ;;  %998 = vst.msk [vmem:[#allocation2 + $0x2a0] sm:$0xff] %vm997_vm2, %v7733_v29 }
 0x25c   : > { %v1556_v41 = vpop.f32.mrf.mxu1  ;;  %1054 = vst.msk [vmem:[#allocation2 + $0x1b8] sm:$0xff] %vm997_vm2, %v967_v39  ;;  %v1310_v54 = vpack.c.bf16 %v1259_v47, %v1258_v43  ;;  %v1139_v21 = vld [vmem:[#allocation2 + $0x1b0] sm:$0xff] }
 0x25d   : > { %v8207_v52 = vadd.f32 %v1889_v35, %v1556_v41  ;;  %1084 = vst.msk [vmem:[#allocation2 + $0x2a0] sm:$0xf] %vm1083_vm3, %v996_v28  ;;  %v2540_v41 = vld [vmem:[#allocation2 + $0x82] sm:$0xff] }
 0x25f   : > { %10199 = vst [vmem:[#allocation34_spill] sm:$0xff] %v8207_v52  ;;  %7108 = vmatmul.msk.bf16.gmra.mxu3 %vm997_vm2, %v1310_v54  ;;  %7228 = vmatmul.msk.bf16.gmra.mxu1 %vm997_vm2, %v2610_v20  ;;  %v825_v63 = vpop.f32.mrf.mxu0  ;;  %v2539_v20 = vld [vmem:[#allocation2 + $0x7a] sm:$0xff] }
 0x260   : > { %v826_v3 = vadd.f32 %v8187_v53, %v825_v63  ;;  %v2611_v63 = vpack.c.bf16 %v2540_v41, %v2539_v20 }
 0x262   : > { %v1891_v7 = vpop.f32.mrf.mxu2  ;;  %v968_v9 = vmax.f32 %v826_v3, 0.0  ;;  %7061 = vmatmul.msk.f32.gmra.mxu0 %vm380_vm1, %v361_v0  ;;  %v7507_v0 = vld [vmem:[#allocation8 + $0x40] sm:$0xff] }
 0x263   : > { %v1140_v23 = vld [vmem:[#allocation2 + $0x1b8] sm:$0xff]  ;;  %3318 = vmatpush.bf16.msrb.mxu2 %v7507_v0 }
 0x264   : > { %v1558_v14 = vpop.f32.mrf.mxu1  ;;  %1055 = vst.msk [vmem:[#allocation2 + $0x1c0] sm:$0xff] %vm997_vm2, %v968_v9  ;;  %v1190_v26 = vpack.c.bf16 %v1140_v23, %v1139_v21  ;;  %v1260_v49 = vld [vmem:[#allocation2 + $0x1b1] sm:$0xff] }
 0x265   : > { %v8218_v24 = vadd.f32 %v1891_v7, %v1558_v14  ;;  %v363_v7 = vld [vmem:[%s7829_s26 + $0x250] sm:$0xff] }
 0x266   : > { %v7503_v0 = vld [vmem:[#allocation8 + $0x20] sm:$0xff] }
 0x267   : > { %10200 = vst [vmem:[#allocation35_spill] sm:$0xff] %v8218_v24  ;;  %7156 = vmatmul.msk.bf16.gmra.mxu2 %vm997_vm2, %v1190_v26  ;;  %v828_v35 = vpop.f32.mrf.mxu0  ;;  %2252 = vmatpush.bf16.msra.mxu3 %v7503_v0 }
 0x268   : > { %v829_v37 = vadd.f32 %v8187_v53, %v828_v35  ;;  %v364_v35 = vld [vmem:[%s7829_s26 + $0x258] sm:$0xff] }
 0x26a   : > { %v1894_v39 = vpop.f32.mrf.mxu2  ;;  %v969_v43 = vmax.f32 %v829_v37, 0.0  ;;  %7062 = vmatmul.msk.f32.gmra.mxu0 %vm380_vm1, %v362_v36 }
 0x26b   : > { %v1261_v54 = vld [vmem:[#allocation2 + $0x1b9] sm:$0xff] }
 0x26c   : > { %v1561_v47 = vpop.f32.mrf.mxu1  ;;  %1056 = vst.msk [vmem:[#allocation2 + $0x1c8] sm:$0xff] %vm997_vm2, %v969_v43  ;;  %v1311_v58 = vpack.c.bf16 %v1261_v54, %v1260_v49  ;;  %v1141_v21 = vld [vmem:[#allocation2 + $0x1c0] sm:$0xff]  ;;  %v2541_v54 = vld [vmem:[#allocation2 + $0x8a] sm:$0xff] }
 0x26d   : > { %v8226_v56 = vadd.f32 %v1894_v39, %v1561_v47  ;;  %v2542_v39 = vld [vmem:[#allocation2 + $0x92] sm:$0xff] }
 0x26f   : > { %10201 = vst [vmem:[#allocation36_spill] sm:$0xff] %v8226_v56  ;;  %7109 = vmatmul.msk.bf16.gmra.mxu3 %vm997_vm2, %v1311_v58  ;;  %7229 = vmatmul.msk.bf16.gmra.mxu1 %vm997_vm2, %v2611_v63  ;;  %v831_v3 = vpop.f32.mrf.mxu0  ;;  %v2612_v63 = vpack.c.bf16 %v2542_v39, %v2541_v54 }
 0x270   : > { %v832_v8 = vadd.f32 %v8187_v53, %v831_v3 }
 0x272   : > { %v1896_v9 = vpop.f32.mrf.mxu2  ;;  %v970_v12 = vmax.f32 %v832_v8, 0.0  ;;  %7063 = vmatmul.msk.f32.gmra.mxu0 %vm380_vm1, %v363_v7  ;;  %v365_v7 = vld [vmem:[%s7829_s26 + $0x260] sm:$0xff] }
 0x273   : > { %v1142_v23 = vld [vmem:[#allocation2 + $0x1c8] sm:$0xff] }
 0x274   : > { %v1563_v14 = vpop.f32.mrf.mxu1  ;;  %1057 = vst.msk [vmem:[#allocation2 + $0x1d0] sm:$0xff] %vm997_vm2, %v970_v12  ;;  %v1191_v28 = vpack.c.bf16 %v1142_v23, %v1141_v21  ;;  %v1262_v47 = vld [vmem:[#allocation2 + $0x1c1] sm:$0xff] }
 0x275   : > { %v8234_v26 = vadd.f32 %v1896_v9, %v1563_v14 }
 0x277   : > { %10202 = vst [vmem:[#allocation37_spill] sm:$0xff] %v8234_v26  ;;  %7157 = vmatmul.msk.bf16.gmra.mxu2 %vm997_vm2, %v1191_v28  ;;  %v834_v29 = vpop.f32.mrf.mxu0 }
 0x278   : > { %v835_v36 = vadd.f32 %v8187_v53, %v834_v29 }
 0x27a   : > { %v1899_v37 = vpop.f32.mrf.mxu2  ;;  %v971_v41 = vmax.f32 %v835_v36, 0.0  ;;  %7064 = vmatmul.msk.f32.gmra.mxu0 %vm380_vm1, %v364_v35  ;;  %v366_v36 = vld [vmem:[%s7829_s26 + $0x268] sm:$0xff] }
 0x27b   : > { %v1263_v49 = vld [vmem:[#allocation2 + $0x1c9] sm:$0xff] }
 0x27c   : > { %v1566_v43 = vpop.f32.mrf.mxu1  ;;  %1058 = vst.msk [vmem:[#allocation2 + $0x1d8] sm:$0xff] %vm997_vm2, %v971_v41  ;;  %v1312_v58 = vpack.c.bf16 %v1263_v49, %v1262_v47  ;;  %v1143_v21 = vld [vmem:[#allocation2 + $0x1d0] sm:$0xff]  ;;  %v2544_v41 = vld [vmem:[#allocation2 + $0xa2] sm:$0xff] }
 0x27d   : > { %v8241_v20 = vadd.f32 %v1899_v37, %v1566_v43 }
 0x27f   : > { %10203 = vst [vmem:[#allocation38_spill] sm:$0xff] %v8241_v20  ;;  %7110 = vmatmul.msk.bf16.gmra.mxu3 %vm997_vm2, %v1312_v58  ;;  %7230 = vmatmul.msk.bf16.gmra.mxu1 %vm997_vm2, %v2612_v63  ;;  %v837_v3 = vpop.f32.mrf.mxu0  ;;  %v2543_v58 = vld [vmem:[#allocation2 + $0x9a] sm:$0xff] }
 0x280   : > { %v838_v8 = vadd.f32 %v8187_v53, %v837_v3  ;;  %v2613_v0 = vpack.c.bf16 %v2544_v41, %v2543_v58  ;;  %v368_v41 = vld [vmem:[%s7829_s26 + $0x278] sm:$0xff] }
 0x282   : > { %v1901_v9 = vpop.f32.mrf.mxu2  ;;  %v972_v12 = vmax.f32 %v838_v8, 0.0  ;;  %7065 = vmatmul.msk.f32.gmra.mxu0 %vm380_vm1, %v365_v7  ;;  %v367_v7 = vld [vmem:[%s7829_s26 + $0x270] sm:$0xff] }
 0x283   : > { %v1144_v23 = vld [vmem:[#allocation2 + $0x1d8] sm:$0xff] }
 0x284   : > { %v1568_v14 = vpop.f32.mrf.mxu1  ;;  %1059 = vst.msk [vmem:[#allocation2 + $0x1e0] sm:$0xff] %vm997_vm2, %v972_v12  ;;  %v1192_v29 = vpack.c.bf16 %v1144_v23, %v1143_v21  ;;  %v1264_v49 = vld [vmem:[#allocation2 + $0x1d1] sm:$0xff] }
 0x285   : > { %v8249_v28 = vadd.f32 %v1901_v9, %v1568_v14 }
 0x287   : > { %10204 = vst [vmem:[#allocation39_spill] sm:$0xff] %v8249_v28  ;;  %7158 = vmatmul.msk.bf16.gmra.mxu2 %vm997_vm2, %v1192_v29  ;;  %v840_v35 = vpop.f32.mrf.mxu0 }
 0x288   : > { %v841_v37 = vadd.f32 %v8187_v53, %v840_v35 }
 0x28a   : > { %v1904_v39 = vpop.f32.mrf.mxu2  ;;  %v973_v43 = vmax.f32 %v841_v37, 0.0  ;;  %7066 = vmatmul.msk.f32.gmra.mxu0 %vm380_vm1, %v366_v36 }
 0x28b   : > { %v1265_v54 = vld [vmem:[#allocation2 + $0x1d9] sm:$0xff] }
 0x28c   : > { %v8255_v47 = vpop.f32.mrf.mxu1  ;;  %1060 = vst.msk [vmem:[#allocation2 + $0x1e8] sm:$0xff] %vm997_vm2, %v973_v43  ;;  %v1313_v63 = vpack.c.bf16 %v1265_v54, %v1264_v49  ;;  %v1145_v29 = vld [vmem:[#allocation2 + $0x1e0] sm:$0xff] }
 0x28f   : > { %7111 = vmatmul.msk.bf16.gmra.mxu3 %vm997_vm2, %v1313_v63  ;;  %7231 = vmatmul.msk.bf16.gmra.mxu1 %vm997_vm2, %v2613_v0  ;;  %v843_v3 = vpop.f32.mrf.mxu0 }
 0x290   : > { %v844_v8 = vadd.f32 %v8187_v53, %v843_v3 }
 0x292   : > { %v1571_v9 = vpop.f32.mrf.mxu3  ;;  %v1906_v12 = vpop.f32.mrf.mxu2  ;;  %v974_v14 = vmax.f32 %v844_v8, 0.0  ;;  %7067 = vmatmul.msk.f32.gmra.mxu0 %vm380_vm1, %v367_v7  ;;  %v2545_v8 = vld [vmem:[#allocation2 + $0xaa] sm:$0xff] }
 0x293   : > { %v8262_v21 = vadd.f32 %v1904_v39, %v1571_v9  ;;  %v1146_v35 = vld [vmem:[#allocation2 + $0x1e8] sm:$0xff]  ;;  %v2546_v39 = vld [vmem:[#allocation2 + $0xb2] sm:$0xff] }
 0x294   : > { %v8265_v23 = vpop.f32.mrf.mxu1  ;;  %1061 = vst.msk [vmem:[#allocation2 + $0x1f0] sm:$0xff] %vm997_vm2, %v974_v14  ;;  %v1193_v36 = vpack.c.bf16 %v1146_v35, %v1145_v29  ;;  %v1266_v3 = vld [vmem:[#allocation2 + $0x1e1] sm:$0xff]  ;;  %v2614_v14 = vpack.c.bf16 %v2546_v39, %v2545_v8 }
 0x295   : > { %10205 = vst [vmem:[#allocation40_spill] sm:$0xff] %v8262_v21  ;;  %v369_v35 = vld [vmem:[%s7829_s26 + $0x280] sm:$0xff]  ;;  %v370_v8 = vld [vmem:[%s7829_s26 + $0x288] sm:$0xff] }
 0x297   : > { %7159 = vmatmul.msk.bf16.gmra.mxu2 %vm997_vm2, %v1193_v36  ;;  %v846_v37 = vpop.f32.mrf.mxu0 }
 0x298   : > { %v847_v43 = vadd.f32 %v8187_v53, %v846_v37 }
 0x29a   : > { %v1573_v49 = vpop.f32.mrf.mxu3  ;;  %v1909_v54 = vpop.f32.mrf.mxu2  ;;  %v975_v58 = vmax.f32 %v847_v43, 0.0  ;;  %7068 = vmatmul.msk.f32.gmra.mxu0 %vm380_vm1, %v368_v41 }
 0x29b   : > { %v8271_v63 = vadd.f32 %v1906_v12, %v1573_v49  ;;  %v1267_v7 = vld [vmem:[#allocation2 + $0x1e9] sm:$0xff] }
 0x29c   : > { %v8274_v0 = vpop.f32.mrf.mxu1  ;;  %1062 = vst.msk [vmem:[#allocation2 + $0x1f8] sm:$0xff] %vm997_vm2, %v975_v58  ;;  %v1314_v9 = vpack.c.bf16 %v1267_v7, %v1266_v3  ;;  %v1147_v58 = vld [vmem:[#allocation2 + $0x1f0] sm:$0xff] }
 0x29d   : > { %10206 = vst [vmem:[#allocation41_spill] sm:$0xff] %v8271_v63  ;;  %v371_v63 = vld [vmem:[%s7829_s26 + $0x290] sm:$0xff] }
 0x29f   : > { %7112 = vmatmul.msk.bf16.gmra.mxu3 %vm997_vm2, %v1314_v9  ;;  %7232 = vmatmul.msk.bf16.gmra.mxu1 %vm997_vm2, %v2614_v14  ;;  %v849_v29 = vpop.f32.mrf.mxu0 }
 0x2a0   : > { %v850_v12 = vadd.f32 %v8187_v53, %v849_v29 }
 0x2a2   : > { %v1576_v36 = vpop.f32.mrf.mxu3  ;;  %v1911_v37 = vpop.f32.mrf.mxu2  ;;  %v976_v41 = vmax.f32 %v850_v12, 0.0  ;;  %7069 = vmatmul.msk.f32.gmra.mxu0 %vm380_vm1, %v369_v35 }
 0x2a3   : > { %v8281_v43 = vadd.f32 %v1909_v54, %v1576_v36  ;;  %v1148_v39 = vld [vmem:[#allocation2 + $0x1f8] sm:$0xff]  ;;  %v2548_v54 = vld [vmem:[#allocation2 + $0xc2] sm:$0xff] }
 0x2a4   : > { %v8284_v49 = vpop.f32.mrf.mxu1  ;;  %1063 = vst.msk [vmem:[#allocation2 + $0x200] sm:$0xff] %vm997_vm2, %v976_v41  ;;  %v1194_v3 = vpack.c.bf16 %v1148_v39, %v1147_v58  ;;  %v2547_v58 = vld [vmem:[#allocation2 + $0xba] sm:$0xff] }
 0x2a5   : > { %10207 = vst [vmem:[#allocation42_spill] sm:$0xff] %v8281_v43  ;;  %v1268_v43 = vld [vmem:[#allocation2 + $0x1f1] sm:$0xff] }
 0x2a7   : > { %7160 = vmatmul.msk.bf16.gmra.mxu2 %vm997_vm2, %v1194_v3  ;;  %v852_v7 = vpop.f32.mrf.mxu0  ;;  %v2615_v3 = vpack.c.bf16 %v2548_v54, %v2547_v58 }
 0x2a8   : > { %v853_v9 = vadd.f32 %v8187_v53, %v852_v7 }
 0x2aa   : > { %v1578_v14 = vpop.f32.mrf.mxu3  ;;  %v1914_v29 = vpop.f32.mrf.mxu2  ;;  %v977_v12 = vmax.f32 %v853_v9, 0.0  ;;  %7070 = vmatmul.msk.f32.gmra.mxu0 %vm380_vm1, %v370_v8 }
 0x2ab   : > { %v8290_v36 = vadd.f32 %v1911_v37, %v1578_v14  ;;  %v1269_v41 = vld [vmem:[#allocation2 + $0x1f9] sm:$0xff] }
 0x2ac   : > { %v8293_v35 = vpop.f32.mrf.mxu1  ;;  %1064 = vst.msk [vmem:[#allocation2 + $0x208] sm:$0xff] %vm997_vm2, %v977_v12  ;;  %v1315_v39 = vpack.c.bf16 %v1269_v41, %v1268_v43  ;;  %v1149_v12 = vld [vmem:[#allocation2 + $0x200] sm:$0xff]  ;;  %v1086_v41 = vld [vmem:[#allocation2 + $0x8] sm:$0xff] }
 0x2ad   : > { %10208 = vst [vmem:[#allocation43_spill] sm:$0xff] %v8290_v36 }
 0x2af   : > { %7113 = vmatmul.msk.bf16.gmra.mxu3 %vm997_vm2, %v1315_v39  ;;  %7233 = vmatmul.msk.bf16.gmra.mxu1 %vm997_vm2, %v2615_v3  ;;  %v855_v7 = vpop.f32.mrf.mxu0  ;;  %v1085_v39 = vld [vmem:[#allocation2] sm:$0xff] }
 0x2b0   : > { %v856_v37 = vadd.f32 %v8187_v53, %v855_v7  ;;  %v1163_v7 = vpack.c.bf16 %v1086_v41, %v1085_v39 }
 0x2b2   : > { %v1581_v9 = vpop.f32.mrf.mxu3  ;;  %v1916_v14 = vpop.f32.mrf.mxu2  ;;  %v978_v8 = vmax.f32 %v856_v37, 0.0  ;;  %7071 = vmatmul.msk.f32.gmra.mxu0 %vm380_vm1, %v371_v63 }
 0x2b3   : > { %v8300_v36 = vadd.f32 %v1914_v29, %v1581_v9  ;;  %v1150_v43 = vld [vmem:[#allocation2 + $0x208] sm:$0xff]  ;;  %v2550_v9 = vld [vmem:[#allocation2 + $0xd2] sm:$0xff] }
 0x2b4   : > { %v8303_v21 = vpop.f32.mrf.mxu1  ;;  %1065 = vst.msk [vmem:[#allocation2 + $0x210] sm:$0xff] %vm997_vm2, %v978_v8  ;;  %v1195_v54 = vpack.c.bf16 %v1150_v43, %v1149_v12  ;;  %v1270_v8 = vld [vmem:[#allocation2 + $0x201] sm:$0xff]  ;;  %v2549_v43 = vld [vmem:[#allocation2 + $0xca] sm:$0xff] }
 0x2b5   : > { %10209 = vst [vmem:[#allocation44_spill] sm:$0xff] %v8300_v36  ;;  %v2616_v20 = vpack.c.bf16 %v2550_v9, %v2549_v43  ;;  %v1088_v9 = vld [vmem:[#allocation2 + $0x18] sm:$0xff] }
 0x2b7   : > { %7161 = vmatmul.msk.bf16.gmra.mxu2 %vm997_vm2, %v1195_v54  ;;  %v858_v58 = vpop.f32.mrf.mxu0 }
 0x2b8   : > { %v859_v3 = vadd.f32 %v8187_v53, %v858_v58 }
 0x2ba   : > { %v1583_v37 = vpop.f32.mrf.mxu3  ;;  %v1919_v29 = vpop.f32.mrf.mxu2  ;;  %v979_v36 = vmax.f32 %v859_v3, 0.0  ;;  %7129 = vmatmul.msk.bf16.vlgmr.msrb.gmra.mxu0 %vm997_vm2, %v1163_v7 }
 0x2bb   : > { %v8308_v63 = vadd.f32 %v1916_v14, %v1583_v37  ;;  %v1271_v12 = vld [vmem:[#allocation2 + $0x209] sm:$0xff] }
 0x2bc   : > { %v8311_v28 = vpop.f32.mrf.mxu1  ;;  %1066 = vst.msk [vmem:[#allocation2 + $0x218] sm:$0xff] %vm997_vm2, %v979_v36  ;;  %v1316_v54 = vpack.c.bf16 %v1271_v12, %v1270_v8 }
 0x2bd   : > { %10210 = vst [vmem:[#allocation45_spill] sm:$0xff] %v8308_v63  ;;  %v1151_v63 = vld [vmem:[#allocation2 + $0x210] sm:$0xff] }
 0x2bf   : > { %7114 = vmatmul.msk.bf16.gmra.mxu3 %vm997_vm2, %v1316_v54  ;;  %7234 = vmatmul.msk.bf16.gmra.mxu1 %vm997_vm2, %v2616_v20  ;;  %v861_v41 = vpop.f32.mrf.mxu0  ;;  %v1087_v20 = vld [vmem:[#allocation2 + $0x10] sm:$0xff] }
 0x2c0   : > { %v862_v58 = vadd.f32 %v8187_v53, %v861_v41  ;;  %v1164_v43 = vpack.c.bf16 %v1088_v9, %v1087_v20 }
 0x2c2   : > { %v1586_v14 = vpop.f32.mrf.mxu3  ;;  %v1921_v39 = vpop.f32.mrf.mxu2  ;;  %v980_v3 = vmax.f32 %v862_v58, 0.0  ;;  %v2552_v58 = vld [vmem:[#allocation2 + $0xe2] sm:$0xff] }
 0x2c3   : > { %v8317_v7 = vadd.f32 %v1919_v29, %v1586_v14  ;;  %v1152_v26 = vld [vmem:[#allocation2 + $0x218] sm:$0xff] }
 0x2c4   : > { %v8319_v37 = vpop.f32.mrf.mxu1  ;;  %1067 = vst.msk [vmem:[#allocation2 + $0x220] sm:$0xff] %vm997_vm2, %v980_v3  ;;  %v1196_v36 = vpack.c.bf16 %v1152_v26, %v1151_v63  ;;  %v1272_v3 = vld [vmem:[#allocation2 + $0x211] sm:$0xff]  ;;  %v2551_v63 = vld [vmem:[#allocation2 + $0xda] sm:$0xff] }
 0x2c5   : > { %10211 = vst [vmem:[#allocation46_spill] sm:$0xff] %v8317_v7  ;;  %v2617_v56 = vpack.c.bf16 %v2552_v58, %v2551_v63  ;;  %v1090_v58 = vld [vmem:[#allocation2 + $0x28] sm:$0xff] }
 0x2c7   : > { %7162 = vmatmul.msk.bf16.gmra.mxu2 %vm997_vm2, %v1196_v36  ;;  %v864_v8 = vpop.f32.mrf.mxu0 }
 0x2c8   : > { %v865_v12 = vadd.f32 %v8187_v53, %v864_v8 }
 0x2ca   : > { %v1588_v54 = vpop.f32.mrf.mxu3  ;;  %v1924_v41 = vpop.f32.mrf.mxu2  ;;  %v981_v29 = vmax.f32 %v865_v12, 0.0  ;;  %7130 = vmatmul.msk.bf16.gmra.mxu0 %vm997_vm2, %v1164_v43 }
 0x2cb   : > { %v8324_v14 = vadd.f32 %v1921_v39, %v1588_v54  ;;  %v1273_v26 = vld [vmem:[#allocation2 + $0x219] sm:$0xff] }
 0x2cc   : > { %v8327_v7 = vpop.f32.mrf.mxu1  ;;  %1068 = vst.msk [vmem:[#allocation2 + $0x228] sm:$0xff] %vm997_vm2, %v981_v29  ;;  %v1317_v36 = vpack.c.bf16 %v1273_v26, %v1272_v3 }
 0x2cd   : > { %10212 = vst [vmem:[#allocation47_spill] sm:$0xff] %v8324_v14  ;;  %v1153_v14 = vld [vmem:[#allocation2 + $0x220] sm:$0xff] }
 0x2cf   : > { %7115 = vmatmul.msk.bf16.gmra.mxu3 %vm997_vm2, %v1317_v36  ;;  %7235 = vmatmul.msk.bf16.gmra.mxu1 %vm997_vm2, %v2617_v56  ;;  %v867_v9 = vpop.f32.mrf.mxu0  ;;  %v1089_v56 = vld [vmem:[#allocation2 + $0x20] sm:$0xff] }
 0x2d0   : > { %v868_v8 = vadd.f32 %v8187_v53, %v867_v9  ;;  %v1165_v63 = vpack.c.bf16 %v1090_v58, %v1089_v56 }
 0x2d2   : > { %v1591_v39 = vpop.f32.mrf.mxu3  ;;  %v1926_v20 = vpop.f32.mrf.mxu2  ;;  %v982_v12 = vmax.f32 %v868_v8, 0.0  ;;  %v2554_v8 = vld [vmem:[#allocation2 + $0xf2] sm:$0xff] }
 0x2d3   : > { %v8333_v43 = vadd.f32 %v1924_v41, %v1591_v39  ;;  %v1154_v24 = vld [vmem:[#allocation2 + $0x228] sm:$0xff] }
 0x2d4   : > { %v8335_v54 = vpop.f32.mrf.mxu1  ;;  %1069 = vst.msk [vmem:[#allocation2 + $0x230] sm:$0xff] %vm997_vm2, %v982_v12  ;;  %v1197_v29 = vpack.c.bf16 %v1154_v24, %v1153_v14  ;;  %v1274_v12 = vld [vmem:[#allocation2 + $0x221] sm:$0xff]  ;;  %v2553_v14 = vld [vmem:[#allocation2 + $0xea] sm:$0xff] }
 0x2d5   : > { %10213 = vst [vmem:[#allocation48_spill] sm:$0xff] %v8333_v43  ;;  %v2618_v52 = vpack.c.bf16 %v2554_v8, %v2553_v14  ;;  %v1092_v8 = vld [vmem:[#allocation2 + $0x38] sm:$0xff] }
 0x2d7   : > { %7163 = vmatmul.msk.bf16.gmra.mxu2 %vm997_vm2, %v1197_v29  ;;  %v870_v3 = vpop.f32.mrf.mxu0 }
 0x2d8   : > { %v871_v26 = vadd.f32 %v8187_v53, %v870_v3 }
 0x2da   : > { %v1593_v36 = vpop.f32.mrf.mxu3  ;;  %v1929_v9 = vpop.f32.mrf.mxu2  ;;  %v983_v41 = vmax.f32 %v871_v26, 0.0  ;;  %7131 = vmatmul.msk.bf16.gmra.mxu0 %vm997_vm2, %v1165_v63 }
 0x2db   : > { %v8340_v39 = vadd.f32 %v1926_v20, %v1593_v36  ;;  %v1275_v24 = vld [vmem:[#allocation2 + $0x229] sm:$0xff] }
 0x2dc   : > { %v8343_v43 = vpop.f32.mrf.mxu1  ;;  %1070 = vst.msk [vmem:[#allocation2 + $0x238] sm:$0xff] %vm997_vm2, %v983_v41  ;;  %v1318_v29 = vpack.c.bf16 %v1275_v24, %v1274_v12 }
 0x2dd   : > { %10214 = vst [vmem:[#allocation49_spill] sm:$0xff] %v8340_v39  ;;  %v1155_v39 = vld [vmem:[#allocation2 + $0x230] sm:$0xff] }
 0x2df   : > { %7116 = vmatmul.msk.bf16.gmra.mxu3 %vm997_vm2, %v1318_v29  ;;  %7236 = vmatmul.msk.bf16.gmra.mxu1 %vm997_vm2, %v2618_v52  ;;  %v873_v58 = vpop.f32.mrf.mxu0  ;;  %v1091_v52 = vld [vmem:[#allocation2 + $0x30] sm:$0xff] }
 0x2e0   : > { %v874_v3 = vadd.f32 %v8187_v53, %v873_v58  ;;  %v1166_v14 = vpack.c.bf16 %v1092_v8, %v1091_v52 }
 0x2e2   : > { %v1596_v20 = vpop.f32.mrf.mxu3  ;;  %v1931_v56 = vpop.f32.mrf.mxu2  ;;  %v984_v26 = vmax.f32 %v874_v3, 0.0  ;;  %v2556_v3 = vld [vmem:[#allocation2 + $0x102] sm:$0xff] }
 0x2e3   : > { %v8349_v63 = vadd.f32 %v1929_v9, %v1596_v20  ;;  %v1156_v15 = vld [vmem:[#allocation2 + $0x238] sm:$0xff] }
 0x2e4   : > { %v8351_v36 = vpop.f32.mrf.mxu1  ;;  %1071 = vst.msk [vmem:[#allocation2 + $0x240] sm:$0xff] %vm997_vm2, %v984_v26  ;;  %v1198_v41 = vpack.c.bf16 %v1156_v15, %v1155_v39  ;;  %v1276_v26 = vld [vmem:[#allocation2 + $0x231] sm:$0xff]  ;;  %v2555_v39 = vld [vmem:[#allocation2 + $0xfa] sm:$0xff] }
 0x2e5   : > { %10215 = vst [vmem:[#allocation50_spill] sm:$0xff] %v8349_v63  ;;  %v2619_v57 = vpack.c.bf16 %v2556_v3, %v2555_v39  ;;  %v1094_v3 = vld [vmem:[#allocation2 + $0x48] sm:$0xff] }
 0x2e7   : > { %7164 = vmatmul.msk.bf16.gmra.mxu2 %vm997_vm2, %v1198_v41  ;;  %v876_v12 = vpop.f32.mrf.mxu0 }
 0x2e8   : > { %v877_v24 = vadd.f32 %v8187_v53, %v876_v12 }
 0x2ea   : > { %v1598_v29 = vpop.f32.mrf.mxu3  ;;  %v1934_v58 = vpop.f32.mrf.mxu2  ;;  %v985_v9 = vmax.f32 %v877_v24, 0.0  ;;  %7132 = vmatmul.msk.bf16.gmra.mxu0 %vm997_vm2, %v1166_v14 }
 0x2eb   : > { %v8356_v20 = vadd.f32 %v1931_v56, %v1598_v29  ;;  %v1277_v15 = vld [vmem:[#allocation2 + $0x239] sm:$0xff] }
 0x2ec   : > { %v8359_v63 = vpop.f32.mrf.mxu1  ;;  %1072 = vst.msk [vmem:[#allocation2 + $0x248] sm:$0xff] %vm997_vm2, %v985_v9  ;;  %v1319_v41 = vpack.c.bf16 %v1277_v15, %v1276_v26 }
 0x2ed   : > { %10216 = vst [vmem:[#allocation51_spill] sm:$0xff] %v8356_v20  ;;  %v1157_v20 = vld [vmem:[#allocation2 + $0x240] sm:$0xff] }
 0x2ef   : > { %7117 = vmatmul.msk.bf16.gmra.mxu3 %vm997_vm2, %v1319_v41  ;;  %7237 = vmatmul.msk.bf16.gmra.mxu1 %vm997_vm2, %v2619_v57  ;;  %v879_v8 = vpop.f32.mrf.mxu0  ;;  %v1093_v57 = vld [vmem:[#allocation2 + $0x40] sm:$0xff] }
 0x2f0   : > { %v880_v12 = vadd.f32 %v8187_v53, %v879_v8  ;;  %v1167_v39 = vpack.c.bf16 %v1094_v3, %v1093_v57 }
 0x2f2   : > { %v1601_v56 = vpop.f32.mrf.mxu3  ;;  %v1936_v52 = vpop.f32.mrf.mxu2  ;;  %v986_v24 = vmax.f32 %v880_v12, 0.0  ;;  %v2558_v12 = vld [vmem:[#allocation2 + $0x112] sm:$0xff] }
 0x2f3   : > { %v8365_v14 = vadd.f32 %v1934_v58, %v1601_v56  ;;  %v1158_v40 = vld [vmem:[#allocation2 + $0x248] sm:$0xff] }
 0x2f4   : > { %v8367_v29 = vpop.f32.mrf.mxu1  ;;  %1073 = vst.msk [vmem:[#allocation2 + $0x250] sm:$0xff] %vm997_vm2, %v986_v24  ;;  %v1199_v9 = vpack.c.bf16 %v1158_v40, %v1157_v20  ;;  %v1278_v24 = vld [vmem:[#allocation2 + $0x241] sm:$0xff]  ;;  %v2557_v20 = vld [vmem:[#allocation2 + $0x10a] sm:$0xff] }
 0x2f5   : > { %10217 = vst [vmem:[#allocation52_spill] sm:$0xff] %v8365_v14  ;;  %v2620_v22 = vpack.c.bf16 %v2558_v12, %v2557_v20  ;;  %v1096_v12 = vld [vmem:[#allocation2 + $0x58] sm:$0xff] }
 0x2f7   : > { %7165 = vmatmul.msk.bf16.gmra.mxu2 %vm997_vm2, %v1199_v9  ;;  %v882_v26 = vpop.f32.mrf.mxu0 }
 0x2f8   : > { %v883_v15 = vadd.f32 %v8187_v53, %v882_v26 }
 0x2fa   : > { %v1603_v41 = vpop.f32.mrf.mxu3  ;;  %v1939_v8 = vpop.f32.mrf.mxu2  ;;  %v987_v58 = vmax.f32 %v883_v15, 0.0  ;;  %7133 = vmatmul.msk.bf16.gmra.mxu0 %vm997_vm2, %v1167_v39 }
 0x2fb   : > { %v8372_v56 = vadd.f32 %v1936_v52, %v1603_v41  ;;  %v1279_v40 = vld [vmem:[#allocation2 + $0x249] sm:$0xff] }
 0x2fc   : > { %v8375_v14 = vpop.f32.mrf.mxu1  ;;  %1074 = vst.msk [vmem:[#allocation2 + $0x258] sm:$0xff] %vm997_vm2, %v987_v58  ;;  %v1320_v9 = vpack.c.bf16 %v1279_v40, %v1278_v24 }
 0x2fd   : > { %10218 = vst [vmem:[#allocation53_spill] sm:$0xff] %v8372_v56  ;;  %v1159_v56 = vld [vmem:[#allocation2 + $0x250] sm:$0xff] }
 0x2ff   : > { %7118 = vmatmul.msk.bf16.gmra.mxu3 %vm997_vm2, %v1320_v9  ;;  %7238 = vmatmul.msk.bf16.gmra.mxu1 %vm997_vm2, %v2620_v22  ;;  %v885_v3 = vpop.f32.mrf.mxu0  ;;  %v1095_v22 = vld [vmem:[#allocation2 + $0x50] sm:$0xff] }
 0x300   : > { %v886_v26 = vadd.f32 %v8187_v53, %v885_v3  ;;  %v1168_v20 = vpack.c.bf16 %v1096_v12, %v1095_v22  ;;  %v7510_v12 = vld [vmem:[#allocation8 + $0x58] sm:$0xff] }
 0x301   : > { %3850 = vmatpush.bf16.msrb.mxu3 %v7510_v12 }
 0x302   : > { %v1606_v52 = vpop.f32.mrf.mxu3  ;;  %v1941_v57 = vpop.f32.mrf.mxu2  ;;  %v988_v15 = vmax.f32 %v886_v26, 0.0  ;;  %v2560_v26 = vld [vmem:[#allocation2 + $0x122] sm:$0xff] }
 0x303   : > { %v8381_v39 = vadd.f32 %v1939_v8, %v1606_v52  ;;  %v1160_v2 = vld [vmem:[#allocation2 + $0x258] sm:$0xff] }
 0x304   : > { %v8383_v41 = vpop.f32.mrf.mxu1  ;;  %1075 = vst.msk [vmem:[#allocation2 + $0x260] sm:$0xff] %vm997_vm2, %v988_v15  ;;  %v1200_v58 = vpack.c.bf16 %v1160_v2, %v1159_v56  ;;  %v1280_v15 = vld [vmem:[#allocation2 + $0x251] sm:$0xff]  ;;  %v2559_v56 = vld [vmem:[#allocation2 + $0x11a] sm:$0xff] }
 0x305   : > { %10219 = vst [vmem:[#allocation54_spill] sm:$0xff] %v8381_v39  ;;  %v2621_v48 = vpack.c.bf16 %v2560_v26, %v2559_v56  ;;  %v1097_v56 = vld [vmem:[#allocation2 + $0x60] sm:$0xff] }
 0x307   : > { %7166 = vmatmul.msk.bf16.gmra.mxu2 %vm997_vm2, %v1200_v58  ;;  %v888_v24 = vpop.f32.mrf.mxu0 }
 0x308   : > { %v889_v40 = vadd.f32 %v8187_v53, %v888_v24 }
 0x30a   : > { %v1608_v9 = vpop.f32.mrf.mxu3  ;;  %v1944_v3 = vpop.f32.mrf.mxu2  ;;  %v989_v8 = vmax.f32 %v889_v40, 0.0  ;;  %7134 = vmatmul.msk.bf16.gmra.mxu0 %vm997_vm2, %v1168_v20 }
 0x30b   : > { %v8388_v52 = vadd.f32 %v1941_v57, %v1608_v9  ;;  %v1281_v2 = vld [vmem:[#allocation2 + $0x259] sm:$0xff] }
 0x30c   : > { %v8391_v39 = vpop.f32.mrf.mxu1  ;;  %1076 = vst.msk [vmem:[#allocation2 + $0x268] sm:$0xff] %vm997_vm2, %v989_v8  ;;  %v1321_v58 = vpack.c.bf16 %v1281_v2, %v1280_v15  ;;  %v1161_v34 = vld [vmem:[#allocation2 + $0x260] sm:$0xff]  ;;  %v1098_v2 = vld [vmem:[#allocation2 + $0x68] sm:$0xff] }
 0x30d   : > { %10220 = vst [vmem:[#allocation55_spill] sm:$0xff] %v8388_v52  ;;  %v7516_v15 = vld [vmem:[#allocation8 + $0x88] sm:$0xff]  ;;  %v1169_v12 = vpack.c.bf16 %v1098_v2, %v1097_v56 }
 0x30e   : > { %10221 = vst [vmem:[#allocation56_spill] sm:$0xff] %v8391_v39  ;;  %5449 = vmatpush.bf16.msra.mxu2 %v7516_v15 }
 0x30f   : > { %7119 = vmatmul.msk.bf16.gmra.mxu3 %vm997_vm2, %v1321_v58  ;;  %7239 = vmatmul.msk.bf16.gmra.mxu1 %vm997_vm2, %v2621_v48  ;;  %v891_v24 = vpop.f32.mrf.mxu0 }
 0x310   : > { %v892_v57 = vadd.f32 %v8187_v53, %v891_v24  ;;  %v7514_v24 = vld [vmem:[#allocation8 + $0x78] sm:$0xff] }
 0x311   : > { %4916 = vmatpush.bf16.msra.mxu1 %v7514_v24 }
 0x312   : > { %v1611_v22 = vpop.f32.mrf.mxu3  ;;  %v1946_v40 = vpop.f32.mrf.mxu2  ;;  %v990_v20 = vmax.f32 %v892_v57, 0.0 }
 0x313   : > { %v8397_v9 = vadd.f32 %v1944_v3, %v1611_v22  ;;  %v1162_v8 = vld [vmem:[#allocation2 + $0x268] sm:$0xff]  ;;  %v2562_v22 = vld [vmem:[#allocation2 + $0x132] sm:$0xff] }
 0x314   : > { %v8399_v52 = vpop.f32.mrf.mxu1  ;;  %1077 = vst.msk [vmem:[#allocation2 + $0x270] sm:$0xff] %vm997_vm2, %v990_v20  ;;  %v1201_v26 = vpack.c.bf16 %v1162_v8, %v1161_v34  ;;  %v1282_v20 = vld [vmem:[#allocation2 + $0x261] sm:$0xff] }
 0x315   : > { %10222 = vst [vmem:[#allocation57_spill] sm:$0xff] %v8397_v9 }
 0x316   : > { %10223 = vst [vmem:[#allocation58_spill] sm:$0xff] %v8399_v52 }
 0x317   : > { %7167 = vmatmul.msk.bf16.gmra.mxu2 %vm997_vm2, %v1201_v26  ;;  %v894_v48 = vpop.f32.mrf.mxu0  ;;  %v2561_v26 = vld [vmem:[#allocation2 + $0x12a] sm:$0xff] }
 0x318   : > { %v895_v58 = vadd.f32 %v8187_v53, %v894_v48  ;;  %v2622_v48 = vpack.c.bf16 %v2562_v22, %v2561_v26  ;;  %v1100_v22 = vld [vmem:[#allocation2 + $0x78] sm:$0xff] }
 0x31a   : > { %v1613_v3 = vpop.f32.mrf.mxu3  ;;  %v1949_v57 = vpop.f32.mrf.mxu2  ;;  %v991_v9 = vmax.f32 %v895_v58, 0.0  ;;  %7135 = vmatmul.msk.bf16.gmra.mxu0 %vm997_vm2, %v1169_v12  ;;  %v3061_v12 = vld [vmem:[#allocation2 + $0x23] sm:$0xff] }
 0x31b   : > { %v8404_v13 = vadd.f32 %v1946_v40, %v1613_v3  ;;  %v1283_v8 = vld [vmem:[#allocation2 + $0x269] sm:$0xff] }
 0x31c   : > { %v8407_v34 = vpop.f32.mrf.mxu1  ;;  %1078 = vst.msk [vmem:[#allocation2 + $0x278] sm:$0xff] %vm997_vm2, %v991_v9  ;;  %v1322_v15 = vpack.c.bf16 %v1283_v8, %v1282_v20  ;;  %v3138_v9 = vpack.c.bf16 %v3061_v12, %v3060_v61  ;;  %v1099_v8 = vld [vmem:[#allocation2 + $0x70] sm:$0xff]  ;;  %v1994_v61 = vld [vmem:[#allocation2 + $0x2] sm:$0xff]  ;;  %v2563_v12 = vld [vmem:[#allocation2 + $0x13a] sm:$0xff] }
 0x31d   : > { %10224 = vst [vmem:[#allocation59_spill] sm:$0xff] %v8404_v13 }
 0x31e   : > { %10225 = vst [vmem:[#allocation60_spill] sm:$0xff] %v8407_v34 }
 0x31f   : > { %7120 = vmatmul.msk.bf16.gmra.mxu3 %vm997_vm2, %v1322_v15  ;;  %7240 = vmatmul.msk.bf16.gmra.mxu1 %vm997_vm2, %v2622_v48  ;;  %v897_v2 = vpop.f32.mrf.mxu0  ;;  %v1170_v15 = vpack.c.bf16 %v1100_v22, %v1099_v8 }
 0x320   : > { %v898_v40 = vadd.f32 %v8187_v53, %v897_v2 }
 0x322   : > { %v1616_v56 = vpop.f32.mrf.mxu3  ;;  %v1951_v58 = vpop.f32.mrf.mxu2  ;;  %v992_v24 = vmax.f32 %v898_v40, 0.0  ;;  %v2564_v40 = vld [vmem:[#allocation2 + $0x142] sm:$0xff] }
 0x323   : > { %v8413_v3 = vadd.f32 %v1949_v57, %v1616_v56 }
 0x324   : > { %v8415_v13 = vpop.f32.mrf.mxu1  ;;  %1079 = vst.msk [vmem:[#allocation2 + $0x280] sm:$0xff] %vm997_vm2, %v992_v24  ;;  %v2072_v24 = vpack.c.bf16 %v1995_v45, %v1994_v61  ;;  %v1101_v61 = vld [vmem:[#allocation2 + $0x80] sm:$0xff] }
 0x325   : > { %10226 = vst [vmem:[#allocation61_spill] sm:$0xff] %v8413_v3 }
 0x326   : > { %10227 = vst [vmem:[#allocation62_spill] sm:$0xff] %v8415_v13 }
 0x327   : > { %7270 = vmatmul.msk.bf16.vlgmr.msrb.gmra.mxu2 %vm997_vm2, %v3138_v9  ;;  %v900_v20 = vpop.f32.mrf.mxu0  ;;  %v2623_v9 = vpack.c.bf16 %v2564_v40, %v2563_v12  ;;  %v1102_v40 = vld [vmem:[#allocation2 + $0x88] sm:$0xff] }
 0x328   : > { %v901_v26 = vadd.f32 %v8187_v53, %v900_v20  ;;  %v1171_v12 = vpack.c.bf16 %v1102_v40, %v1101_v61 }
 0x32a   : > { %v1618_v48 = vpop.f32.mrf.mxu3  ;;  %v1954_v2 = vpop.f32.mrf.mxu2  ;;  %v993_v57 = vmax.f32 %v901_v26, 0.0  ;;  %7136 = vmatmul.msk.bf16.gmra.mxu0 %vm997_vm2, %v1170_v15  ;;  %v3063_v26 = vld [vmem:[#allocation2 + $0x33] sm:$0xff] }
 0x32b   : > { %v8420_v56 = vadd.f32 %v1951_v58, %v1618_v48  ;;  %v3139_v45 = vpack.c.bf16 %v3063_v26, %v3062_v31 }
 0x32c   : > { %v8423_v3 = vpop.f32.mrf.mxu1  ;;  %1080 = vst.msk [vmem:[#allocation2 + $0x288] sm:$0xff] %vm997_vm2, %v993_v57 }
 0x32d   : > { %10228 = vst [vmem:[#allocation63_spill] sm:$0xff] %v8420_v56 }
 0x32e   : > { %10229 = vst [vmem:[#allocation64_spill] sm:$0xff] %v8423_v3 }
 0x32f   : > { %7176 = vmatmul.msk.bf16.vlgmr.msra.gmra.mxu3 %vm997_vm2, %v2072_v24  ;;  %7241 = vmatmul.msk.bf16.gmra.mxu1 %vm997_vm2, %v2623_v9  ;;  %v903_v22 = vpop.f32.mrf.mxu0  ;;  %v1997_v9 = vld [vmem:[#allocation2 + $0x1a] sm:$0xff] }
 0x330   : > { %v904_v20 = vadd.f32 %v8187_v53, %v903_v22  ;;  %v2566_v22 = vld [vmem:[#allocation2 + $0x152] sm:$0xff] }
 0x332   : > { %v1621_v8 = vpop.f32.mrf.mxu3  ;;  %v1956_v58 = vpop.f32.mrf.mxu2  ;;  %v994_v48 = vmax.f32 %v904_v20, 0.0 }
 0x333   : > { %v8429_v15 = vadd.f32 %v1954_v2, %v1621_v8  ;;  %v1996_v8 = vld [vmem:[#allocation2 + $0x12] sm:$0xff] }
 0x334   : > { %v8431_v56 = vpop.f32.mrf.mxu1  ;;  %1081 = vst.msk [vmem:[#allocation2 + $0x290] sm:$0xff] %vm997_vm2, %v994_v48  ;;  %v2565_v48 = vld [vmem:[#allocation2 + $0x14a] sm:$0xff]  ;;  %v2073_v31 = vpack.c.bf16 %v1997_v9, %v1996_v8 }
 0x335   : > { %10230 = vst [vmem:[#allocation65_spill] sm:$0xff] %v8429_v15  ;;  %v2624_v26 = vpack.c.bf16 %v2566_v22, %v2565_v48  ;;  %v3065_v15 = vld [vmem:[#allocation2 + $0x43] sm:$0xff]  ;;  %v1103_v22 = vld [vmem:[#allocation2 + $0x90] sm:$0xff] }
 0x336   : > { %10231 = vst [vmem:[#allocation66_spill] sm:$0xff] %v8431_v56 }
 0x337   : > { %7271 = vmatmul.msk.bf16.gmra.mxu2 %vm997_vm2, %v3139_v45  ;;  %v8435_v57 = vpop.f32.mrf.mxu0 }
 0x33a   : > { %v1623_v53 = vpop.f32.mrf.mxu3  ;;  %v1959_v24 = vpop.f32.mrf.mxu2  ;;  %7137 = vmatmul.msk.bf16.gmra.mxu0 %vm997_vm2, %v1171_v12  ;;  %v3064_v12 = vld [vmem:[#allocation2 + $0x3b] sm:$0xff] }
 0x33b   : > { %v8437_v20 = vadd.f32 %v1956_v58, %v1623_v53  ;;  %v3140_v53 = vpack.c.bf16 %v3065_v15, %v3064_v12 }
 0x33c   : > { %v8440_v2 = vpop.f32.mrf.mxu1 }
 0x33d   : > { %10232 = vst [vmem:[#allocation67_spill] sm:$0xff] %v8437_v20  ;;  %v1104_v20 = vld [vmem:[#allocation2 + $0x98] sm:$0xff] }
 0x33e   : > { %10233 = vst [vmem:[#allocation68_spill] sm:$0xff] %v8440_v2  ;;  %v1172_v8 = vpack.c.bf16 %v1104_v20, %v1103_v22 }
 0x33f   : > { %7177 = vmatmul.msk.bf16.gmra.mxu3 %vm997_vm2, %v2073_v31  ;;  %7242 = vmatmul.msk.bf16.gmra.mxu1 %vm997_vm2, %v2624_v26  ;;  %v8444_v45 = vpop.f32.mrf.mxu0  ;;  %v1999_v26 = vld [vmem:[#allocation2 + $0x2a] sm:$0xff] }
 0x342   : > { %v1626_v40 = vpop.f32.mrf.mxu3  ;;  %v1961_v61 = vpop.f32.mrf.mxu2 }
 0x343   : > { %v8446_v18 = vadd.f32 %v1959_v24, %v1626_v40  ;;  %v1998_v40 = vld [vmem:[#allocation2 + $0x22] sm:$0xff] }
 0x344   : > { %v8448_v58 = vpop.f32.mrf.mxu1  ;;  %v2074_v15 = vpack.c.bf16 %v1999_v26, %v1998_v40 }
 0x345   : > { %10234 = vst [vmem:[#allocation69_spill] sm:$0xff] %v8446_v18  ;;  %v2567_v18 = vld [vmem:[#allocation2 + $0x15a] sm:$0xff] }
 0x346   : > { %10235 = vst [vmem:[#allocation70_spill] sm:$0xff] %v8448_v58  ;;  %v2625_v12 = vpack.c.bf16 %v2568_v5, %v2567_v18  ;;  %v3067_v58 = vld [vmem:[#allocation2 + $0x53] sm:$0xff]  ;;  %v1105_v5 = vld [vmem:[#allocation2 + $0xa0] sm:$0xff] }
 0x347   : > { %7272 = vmatmul.msk.bf16.gmra.mxu2 %vm997_vm2, %v3140_v53  ;;  %v8451_v9 = vpop.f32.mrf.mxu0 }
 0x34a   : > { %v1628_v48 = vpop.f32.mrf.mxu3  ;;  %v1964_v31 = vpop.f32.mrf.mxu2  ;;  %7138 = vmatmul.msk.bf16.gmra.mxu0 %vm997_vm2, %v1172_v8  ;;  %v3066_v8 = vld [vmem:[#allocation2 + $0x4b] sm:$0xff] }
 0x34b   : > { %v8453_v2 = vadd.f32 %v1961_v61, %v1628_v48  ;;  %v3141_v48 = vpack.c.bf16 %v3067_v58, %v3066_v8 }
 0x34c   : > { %v8456_v24 = vpop.f32.mrf.mxu1 }
 0x34d   : > { %10236 = vst [vmem:[#allocation71_spill] sm:$0xff] %v8453_v2  ;;  %v1106_v2 = vld [vmem:[#allocation2 + $0xa8] sm:$0xff] }
 0x34e   : > { %10237 = vst [vmem:[#allocation72_spill] sm:$0xff] %v8456_v24  ;;  %v1173_v18 = vpack.c.bf16 %v1106_v2, %v1105_v5  ;;  %v2570_v24 = vld [vmem:[#allocation2 + $0x172] sm:$0xff] }
 0x34f   : > { %7178 = vmatmul.msk.bf16.gmra.mxu3 %vm997_vm2, %v2074_v15  ;;  %7243 = vmatmul.msk.bf16.gmra.mxu1 %vm997_vm2, %v2625_v12  ;;  %v8460_v53 = vpop.f32.mrf.mxu0  ;;  %v2001_v12 = vld [vmem:[#allocation2 + $0x3a] sm:$0xff] }
 0x352   : > { %v1631_v20 = vpop.f32.mrf.mxu3  ;;  %v1966_v22 = vpop.f32.mrf.mxu2 }
 0x353   : > { %v8462_v55 = vadd.f32 %v1964_v31, %v1631_v20  ;;  %v2000_v20 = vld [vmem:[#allocation2 + $0x32] sm:$0xff] }
 0x354   : > { %v8464_v61 = vpop.f32.mrf.mxu1  ;;  %v2075_v58 = vpack.c.bf16 %v2001_v12, %v2000_v20 }
 0x355   : > { %10238 = vst [vmem:[#allocation73_spill] sm:$0xff] %v8462_v55  ;;  %v2569_v55 = vld [vmem:[#allocation2 + $0x16a] sm:$0xff] }
 0x356   : > { %10239 = vst [vmem:[#allocation74_spill] sm:$0xff] %v8464_v61  ;;  %v2626_v8 = vpack.c.bf16 %v2570_v24, %v2569_v55  ;;  %v3069_v61 = vld [vmem:[#allocation2 + $0x63] sm:$0xff]  ;;  %v1107_v55 = vld [vmem:[#allocation2 + $0xb0] sm:$0xff] }
 0x357   : > { %7273 = vmatmul.msk.bf16.gmra.mxu2 %vm997_vm2, %v3141_v48  ;;  %v8467_v26 = vpop.f32.mrf.mxu0 }
 0x35a   : > { %v1633_v40 = vpop.f32.mrf.mxu3  ;;  %v1969_v15 = vpop.f32.mrf.mxu2  ;;  %7139 = vmatmul.msk.bf16.gmra.mxu0 %vm997_vm2, %v1173_v18  ;;  %v3068_v18 = vld [vmem:[#allocation2 + $0x5b] sm:$0xff] }
 0x35b   : > { %v8469_v56 = vadd.f32 %v1966_v22, %v1633_v40  ;;  %v3142_v40 = vpack.c.bf16 %v3069_v61, %v3068_v18 }
 0x35c   : > { %v8472_v31 = vpop.f32.mrf.mxu1 }
 0x35d   : > { %10240 = vst [vmem:[#allocation75_spill] sm:$0xff] %v8469_v56  ;;  %v1108_v56 = vld [vmem:[#allocation2 + $0xb8] sm:$0xff] }
 0x35e   : > { %10241 = vst [vmem:[#allocation76_spill] sm:$0xff] %v8472_v31  ;;  %v1174_v24 = vpack.c.bf16 %v1108_v56, %v1107_v55  ;;  %v2572_v31 = vld [vmem:[#allocation2 + $0x182] sm:$0xff] }
 0x35f   : > { %7179 = vmatmul.msk.bf16.gmra.mxu3 %vm997_vm2, %v2075_v58  ;;  %7244 = vmatmul.msk.bf16.gmra.mxu1 %vm997_vm2, %v2626_v8  ;;  %v8476_v48 = vpop.f32.mrf.mxu0  ;;  %v2003_v8 = vld [vmem:[#allocation2 + $0x4a] sm:$0xff] }
 0x362   : > { %v1636_v2 = vpop.f32.mrf.mxu3  ;;  %v1971_v5 = vpop.f32.mrf.mxu2 }
 0x363   : > { %v8478_v42 = vadd.f32 %v1969_v15, %v1636_v2  ;;  %v2002_v2 = vld [vmem:[#allocation2 + $0x42] sm:$0xff] }
 0x364   : > { %v8480_v22 = vpop.f32.mrf.mxu1  ;;  %v2076_v61 = vpack.c.bf16 %v2003_v8, %v2002_v2 }
 0x365   : > { %10242 = vst [vmem:[#allocation77_spill] sm:$0xff] %v8478_v42  ;;  %v2571_v42 = vld [vmem:[#allocation2 + $0x17a] sm:$0xff] }
 0x366   : > { %10243 = vst [vmem:[#allocation78_spill] sm:$0xff] %v8480_v22  ;;  %v2627_v18 = vpack.c.bf16 %v2572_v31, %v2571_v42  ;;  %v3071_v22 = vld [vmem:[#allocation2 + $0x73] sm:$0xff]  ;;  %v1109_v42 = vld [vmem:[#allocation2 + $0xc0] sm:$0xff] }
 0x367   : > { %7274 = vmatmul.msk.bf16.gmra.mxu2 %vm997_vm2, %v3142_v40  ;;  %v8483_v12 = vpop.f32.mrf.mxu0 }
 0x36a   : > { %v1638_v20 = vpop.f32.mrf.mxu3  ;;  %v1974_v58 = vpop.f32.mrf.mxu2  ;;  %7140 = vmatmul.msk.bf16.gmra.mxu0 %vm997_vm2, %v1174_v24  ;;  %v3070_v24 = vld [vmem:[#allocation2 + $0x6b] sm:$0xff] }
 0x36b   : > { %v8485_v3 = vadd.f32 %v1971_v5, %v1638_v20  ;;  %v3143_v20 = vpack.c.bf16 %v3071_v22, %v3070_v24 }
 0x36c   : > { %v8488_v15 = vpop.f32.mrf.mxu1 }
 0x36d   : > { %10244 = vst [vmem:[#allocation79_spill] sm:$0xff] %v8485_v3  ;;  %v1110_v3 = vld [vmem:[#allocation2 + $0xc8] sm:$0xff] }
 0x36e   : > { %10245 = vst [vmem:[#allocation80_spill] sm:$0xff] %v8488_v15  ;;  %v1175_v31 = vpack.c.bf16 %v1110_v3, %v1109_v42  ;;  %v2574_v15 = vld [vmem:[#allocation2 + $0x192] sm:$0xff] }
 0x36f   : > { %7180 = vmatmul.msk.bf16.gmra.mxu3 %vm997_vm2, %v2076_v61  ;;  %7245 = vmatmul.msk.bf16.gmra.mxu1 %vm997_vm2, %v2627_v18  ;;  %v8492_v40 = vpop.f32.mrf.mxu0  ;;  %v2005_v18 = vld [vmem:[#allocation2 + $0x5a] sm:$0xff] }
 0x372   : > { %v1641_v56 = vpop.f32.mrf.mxu3  ;;  %v1976_v55 = vpop.f32.mrf.mxu2 }
 0x373   : > { %v8494_v30 = vadd.f32 %v1974_v58, %v1641_v56  ;;  %v2004_v56 = vld [vmem:[#allocation2 + $0x52] sm:$0xff] }
 0x374   : > { %v8496_v5 = vpop.f32.mrf.mxu1  ;;  %v2077_v22 = vpack.c.bf16 %v2005_v18, %v2004_v56 }
 0x375   : > { %10246 = vst [vmem:[#allocation81_spill] sm:$0xff] %v8494_v30  ;;  %v2573_v30 = vld [vmem:[#allocation2 + $0x18a] sm:$0xff] }
 0x376   : > { %10247 = vst [vmem:[#allocation82_spill] sm:$0xff] %v8496_v5  ;;  %v2628_v24 = vpack.c.bf16 %v2574_v15, %v2573_v30  ;;  %v3073_v5 = vld [vmem:[#allocation2 + $0x83] sm:$0xff]  ;;  %v1111_v30 = vld [vmem:[#allocation2 + $0xd0] sm:$0xff] }
 0x377   : > { %7275 = vmatmul.msk.bf16.gmra.mxu2 %vm997_vm2, %v3143_v20  ;;  %v8499_v8 = vpop.f32.mrf.mxu0 }
 0x37a   : > { %v1643_v2 = vpop.f32.mrf.mxu3  ;;  %v1979_v61 = vpop.f32.mrf.mxu2  ;;  %7141 = vmatmul.msk.bf16.gmra.mxu0 %vm997_vm2, %v1175_v31  ;;  %v3072_v31 = vld [vmem:[#allocation2 + $0x7b] sm:$0xff] }
 0x37b   : > { %v8501_v13 = vadd.f32 %v1976_v55, %v1643_v2  ;;  %v3144_v2 = vpack.c.bf16 %v3073_v5, %v3072_v31 }
 0x37c   : > { %v8504_v58 = vpop.f32.mrf.mxu1 }
 0x37d   : > { %10248 = vst [vmem:[#allocation83_spill] sm:$0xff] %v8501_v13  ;;  %v1112_v13 = vld [vmem:[#allocation2 + $0xd8] sm:$0xff] }
 0x37e   : > { %10249 = vst [vmem:[#allocation84_spill] sm:$0xff] %v8504_v58  ;;  %v1176_v15 = vpack.c.bf16 %v1112_v13, %v1111_v30  ;;  %v2576_v58 = vld [vmem:[#allocation2 + $0x1a2] sm:$0xff] }
 0x37f   : > { %7181 = vmatmul.msk.bf16.gmra.mxu3 %vm997_vm2, %v2077_v22  ;;  %7246 = vmatmul.msk.bf16.gmra.mxu1 %vm997_vm2, %v2628_v24  ;;  %v8508_v20 = vpop.f32.mrf.mxu0  ;;  %v2007_v24 = vld [vmem:[#allocation2 + $0x6a] sm:$0xff] }
 0x382   : > { %v1646_v3 = vpop.f32.mrf.mxu3  ;;  %v1981_v42 = vpop.f32.mrf.mxu2 }
 0x383   : > { %v8510_v17 = vadd.f32 %v1979_v61, %v1646_v3  ;;  %v2006_v3 = vld [vmem:[#allocation2 + $0x62] sm:$0xff] }
 0x384   : > { %v8512_v55 = vpop.f32.mrf.mxu1  ;;  %v2078_v5 = vpack.c.bf16 %v2007_v24, %v2006_v3 }
 0x385   : > { %10250 = vst [vmem:[#allocation85_spill] sm:$0xff] %v8510_v17  ;;  %v2575_v17 = vld [vmem:[#allocation2 + $0x19a] sm:$0xff] }
 0x386   : > { %10251 = vst [vmem:[#allocation86_spill] sm:$0xff] %v8512_v55  ;;  %v2629_v31 = vpack.c.bf16 %v2576_v58, %v2575_v17  ;;  %v3075_v55 = vld [vmem:[#allocation2 + $0x93] sm:$0xff]  ;;  %v1113_v17 = vld [vmem:[#allocation2 + $0xe0] sm:$0xff] }
 0x387   : > { %7276 = vmatmul.msk.bf16.gmra.mxu2 %vm997_vm2, %v3144_v2  ;;  %v8515_v18 = vpop.f32.mrf.mxu0 }
 0x38a   : > { %v1648_v56 = vpop.f32.mrf.mxu3  ;;  %v1984_v22 = vpop.f32.mrf.mxu2  ;;  %7142 = vmatmul.msk.bf16.gmra.mxu0 %vm997_vm2, %v1176_v15  ;;  %v3074_v15 = vld [vmem:[#allocation2 + $0x8b] sm:$0xff] }
 0x38b   : > { %v8517_v34 = vadd.f32 %v1981_v42, %v1648_v56  ;;  %v3145_v56 = vpack.c.bf16 %v3075_v55, %v3074_v15 }
 0x38c   : > { %v8520_v61 = vpop.f32.mrf.mxu1 }
 0x38d   : > { %10252 = vst [vmem:[#allocation87_spill] sm:$0xff] %v8517_v34  ;;  %v1114_v34 = vld [vmem:[#allocation2 + $0xe8] sm:$0xff] }
 0x38e   : > { %10253 = vst [vmem:[#allocation88_spill] sm:$0xff] %v8520_v61  ;;  %v1177_v58 = vpack.c.bf16 %v1114_v34, %v1113_v17  ;;  %v2578_v61 = vld [vmem:[#allocation2 + $0x1b2] sm:$0xff] }
 0x38f   : > { %7182 = vmatmul.msk.bf16.gmra.mxu3 %vm997_vm2, %v2078_v5  ;;  %7247 = vmatmul.msk.bf16.gmra.mxu1 %vm997_vm2, %v2629_v31  ;;  %v8524_v2 = vpop.f32.mrf.mxu0  ;;  %v2009_v31 = vld [vmem:[#allocation2 + $0x7a] sm:$0xff] }
 0x392   : > { %v1651_v13 = vpop.f32.mrf.mxu3  ;;  %v1986_v30 = vpop.f32.mrf.mxu2 }
 0x393   : > { %v8526_v4 = vadd.f32 %v1984_v22, %v1651_v13  ;;  %v2008_v13 = vld [vmem:[#allocation2 + $0x72] sm:$0xff] }
 0x394   : > { %v8528_v42 = vpop.f32.mrf.mxu1  ;;  %v2079_v55 = vpack.c.bf16 %v2009_v31, %v2008_v13 }
 0x395   : > { %10254 = vst [vmem:[#allocation89_spill] sm:$0xff] %v8526_v4  ;;  %v2577_v4 = vld [vmem:[#allocation2 + $0x1aa] sm:$0xff] }
 0x396   : > { %10255 = vst [vmem:[#allocation90_spill] sm:$0xff] %v8528_v42  ;;  %v2630_v15 = vpack.c.bf16 %v2578_v61, %v2577_v4  ;;  %v3077_v42 = vld [vmem:[#allocation2 + $0xa3] sm:$0xff]  ;;  %v1115_v4 = vld [vmem:[#allocation2 + $0xf0] sm:$0xff] }
 0x397   : > { %7277 = vmatmul.msk.bf16.gmra.mxu2 %vm997_vm2, %v3145_v56  ;;  %v8531_v24 = vpop.f32.mrf.mxu0 }
 0x39a   : > { %v1653_v3 = vpop.f32.mrf.mxu3  ;;  %v1989_v5 = vpop.f32.mrf.mxu2  ;;  %7143 = vmatmul.msk.bf16.gmra.mxu0 %vm997_vm2, %v1177_v58  ;;  %v3076_v58 = vld [vmem:[#allocation2 + $0x9b] sm:$0xff] }
 0x39b   : > { %v8533_v52 = vadd.f32 %v1986_v30, %v1653_v3  ;;  %v3146_v3 = vpack.c.bf16 %v3077_v42, %v3076_v58 }
 0x39c   : > { %v8536_v22 = vpop.f32.mrf.mxu1 }
 0x39d   : > { %10256 = vst [vmem:[#allocation91_spill] sm:$0xff] %v8533_v52  ;;  %v1116_v52 = vld [vmem:[#allocation2 + $0xf8] sm:$0xff] }
 0x39e   : > { %10257 = vst [vmem:[#allocation92_spill] sm:$0xff] %v8536_v22  ;;  %v1178_v61 = vpack.c.bf16 %v1116_v52, %v1115_v4  ;;  %v2580_v22 = vld [vmem:[#allocation2 + $0x1c2] sm:$0xff]  ;;  %v1800_v52 = vadd.f32 %v8435_v57, %v7952_v62  ;;  %v1802_v57 = vadd.f32 %v8444_v45, %v7959_v6 }
 0x39f   : > { %7183 = vmatmul.msk.bf16.gmra.mxu3 %vm997_vm2, %v2079_v55  ;;  %7248 = vmatmul.msk.bf16.gmra.mxu1 %vm997_vm2, %v2630_v15  ;;  %v8540_v56 = vpop.f32.mrf.mxu0  ;;  %v2011_v15 = vld [vmem:[#allocation2 + $0x8a] sm:$0xff]  ;;  %v1117_v62 = vld [vmem:[#allocation2 + $0x100] sm:$0xff] }
 0x3a2   : > { %v1656_v34 = vpop.f32.mrf.mxu3  ;;  %v1991_v17 = vpop.f32.mrf.mxu2 }
 0x3a3   : > { %v8542_v60 = vadd.f32 %v1989_v5, %v1656_v34  ;;  %v2010_v34 = vld [vmem:[#allocation2 + $0x82] sm:$0xff] }
 0x3a4   : > { %v8544_v30 = vpop.f32.mrf.mxu1  ;;  %v2080_v42 = vpack.c.bf16 %v2011_v15, %v2010_v34  ;;  %v7511_v34 = vld [vmem:[#allocation8 + $0x60] sm:$0xff] }
 0x3a5   : > { %10258 = vst [vmem:[#allocation93_spill] sm:$0xff] %v8542_v60  ;;  %v2579_v60 = vld [vmem:[#allocation2 + $0x1ba] sm:$0xff] }
 0x3a6   : > { %10259 = vst [vmem:[#allocation94_spill] sm:$0xff] %v8544_v30  ;;  %v2631_v58 = vpack.c.bf16 %v2580_v22, %v2579_v60  ;;  %v1118_v22 = vld [vmem:[#allocation2 + $0x108] sm:$0xff] }
 0x3a7   : > { %7278 = vmatmul.msk.bf16.gmra.mxu2 %vm997_vm2, %v3146_v3  ;;  %v8547_v31 = vpop.f32.mrf.mxu0 }
 0x3aa   : > { %v1658_v13 = vpop.f32.mrf.mxu3  ;;  %v3320_v55 = vpop.f32.mrf.mxu2  ;;  %7144 = vmatmul.msk.bf16.gmra.mxu0 %vm997_vm2, %v1178_v61  ;;  %v7512_v61 = vld [vmem:[#allocation8 + $0x68] sm:$0xff] }
 0x3ab   : > { %v8549_v39 = vadd.f32 %v1991_v17, %v1658_v13  ;;  %v3079_v13 = vld [vmem:[#allocation2 + $0xb3] sm:$0xff]  ;;  %4383 = vmatpush.bf16.msra.mxu0 %v7512_v61 }
 0x3ac   : > { %v8552_v5 = vpop.f32.mrf.mxu1 }
 0x3ad   : > { %10260 = vst [vmem:[#allocation95_spill] sm:$0xff] %v8549_v39 }
 0x3ae   : > { %10261 = vst [vmem:[#allocation96_spill] sm:$0xff] %v8552_v5  ;;  %v3078_v5 = vld [vmem:[#allocation2 + $0xab] sm:$0xff] }
 0x3af   : > { %7184 = vmatmul.msk.bf16.gmra.mxu3 %vm997_vm2, %v2080_v42  ;;  %7249 = vmatmul.msk.bf16.gmra.mxu1 %vm997_vm2, %v2631_v58  ;;  %v8556_v3 = vpop.f32.mrf.mxu0  ;;  %v3147_v60 = vpack.c.bf16 %v3079_v13, %v3078_v5  ;;  %v2012_v13 = vld [vmem:[#allocation2 + $0x92] sm:$0xff] }
 0x3b0   : > { %4384 = vmatpush.bf16.msra.mxu0 %v7511_v34 }
 0x3b2   : > { %v2254_v4 = vpop.f32.mrf.mxu3  ;;  %v3322_v17 = vpop.f32.mrf.mxu2 }
 0x3b3   : > { %v2449_v39 = vadd.f32 %v2254_v4, %v1800_v52  ;;  %v1179_v52 = vpack.c.bf16 %v1118_v22, %v1117_v62  ;;  %v1805_v22 = vadd.f32 %v8451_v9, %v7965_v11  ;;  %v1807_v11 = vadd.f32 %v8460_v53, %v7972_v19 }
 0x3b4   : > { %v8560_v30 = vpop.f32.mrf.mxu1 }
 0x3b5   : > { %10262 = vst [vmem:[#allocation97_spill] sm:$0xff] %v8560_v30  ;;  %v2982_v15 = vadd.f32 %v8255_v47, %v2449_v39  ;;  %v2582_v47 = vld [vmem:[#allocation2 + $0x1d2] sm:$0xff] }
 0x3b7   : > { %7279 = vmatmul.msk.bf16.gmra.mxu2 %vm997_vm2, %v3147_v60  ;;  %v8564_v42 = vadd.f32 %v3320_v55, %v2982_v15  ;;  %v8566_v58 = vpop.f32.mrf.mxu0  ;;  %v2581_v55 = vld [vmem:[#allocation2 + $0x1ca] sm:$0xff]  ;;  %v2081_v15 = vpack.c.bf16 %v2013_v50, %v2012_v13 }
 0x3b8   : > { %v2632_v60 = vpack.c.bf16 %v2582_v47, %v2581_v55  ;;  %v1119_v55 = vld [vmem:[#allocation2 + $0x110] sm:$0xff] }
 0x3ba   : > { %v2256_v4 = vpop.f32.mrf.mxu3  ;;  %v3325_v30 = vpop.f32.mrf.mxu2  ;;  %7145 = vmatmul.msk.bf16.gmra.mxu0 %vm997_vm2, %v1179_v52 }
 0x3bb   : > { %v2450_v39 = vadd.f32 %v2256_v4, %v1802_v57  ;;  %v3081_v57 = vld [vmem:[#allocation2 + $0xc3] sm:$0xff] }
 0x3bc   : > { %v8571_v5 = vpop.f32.mrf.mxu1 }
 0x3bd   : > { %v2983_v61 = vadd.f32 %v8265_v23, %v2450_v39  ;;  %v3080_v23 = vld [vmem:[#allocation2 + $0xbb] sm:$0xff] }
 0x3be   : > { %v3148_v47 = vpack.c.bf16 %v3081_v57, %v3080_v23  ;;  %v1120_v39 = vld [vmem:[#allocation2 + $0x118] sm:$0xff]  ;;  %v2014_v57 = vld [vmem:[#allocation2 + $0xa2] sm:$0xff] }
 0x3bf   : > { %7185 = vmatmul.msk.bf16.gmra.mxu3 %vm997_vm2, %v2081_v15  ;;  %7250 = vmatmul.msk.bf16.gmra.mxu1 %vm997_vm2, %v2632_v60  ;;  %v8576_v6 = vadd.f32 %v3322_v17, %v2983_v61  ;;  %v8578_v45 = vpop.f32.mrf.mxu0  ;;  %v1180_v9 = vpack.c.bf16 %v1120_v39, %v1119_v55  ;;  %v2015_v60 = vld [vmem:[#allocation2 + $0xaa] sm:$0xff] }
 0x3c0   : > { %v2082_v23 = vpack.c.bf16 %v2015_v60, %v2014_v57 }
 0x3c2   : > { %v2259_v34 = vpop.f32.mrf.mxu3  ;;  %v3327_v62 = vpop.f32.mrf.mxu2 }
 0x3c3   : > { %v2451_v52 = vadd.f32 %v2259_v34, %v1805_v22  ;;  %v2584_v22 = vld [vmem:[#allocation2 + $0x1e2] sm:$0xff] }
 0x3c4   : > { %v8582_v4 = vpop.f32.mrf.mxu1 }
 0x3c5   : > { %v2984_v50 = vadd.f32 %v8274_v0, %v2451_v52  ;;  %v2583_v52 = vld [vmem:[#allocation2 + $0x1da] sm:$0xff] }
 0x3c7   : > { %7280 = vmatmul.msk.bf16.gmra.mxu2 %vm997_vm2, %v3148_v47  ;;  %v8586_v17 = vadd.f32 %v3325_v30, %v2984_v50  ;;  %v8588_v13 = vpop.f32.mrf.mxu0  ;;  %v2633_v50 = vpack.c.bf16 %v2584_v22, %v2583_v52  ;;  %v1810_v47 = vadd.f32 %v8467_v26, %v7978_v25  ;;  %v4126_v52 = vld [vmem:[#allocation2 + $0x34] sm:$0xff]  ;;  %v1812_v25 = vadd.f32 %v8476_v48, %v7985_v33 }
 0x3ca   : > { %v2261_v61 = vpop.f32.mrf.mxu3  ;;  %v3330_v15 = vpop.f32.mrf.mxu2  ;;  %7146 = vmatmul.msk.bf16.gmra.mxu0 %vm997_vm2, %v1180_v9 }
 0x3cb   : > { %v2452_v34 = vadd.f32 %v2261_v61, %v1807_v11  ;;  %v3083_v11 = vld [vmem:[#allocation2 + $0xd3] sm:$0xff] }
 0x3cc   : > { %v8593_v0 = vpop.f32.mrf.mxu1 }
 0x3cd   : > { %v2985_v30 = vadd.f32 %v8284_v49, %v2452_v34  ;;  %v3082_v49 = vld [vmem:[#allocation2 + $0xcb] sm:$0xff]  ;;  %v4127_v34 = vld [vmem:[#allocation2 + $0x3c] sm:$0xff] }
 0x3ce   : > { %v3149_v22 = vpack.c.bf16 %v3083_v11, %v3082_v49  ;;  %v4204_v26 = vpack.c.bf16 %v4127_v34, %v4126_v52  ;;  %v2016_v11 = vld [vmem:[#allocation2 + $0xb2] sm:$0xff] }
 0x3cf   : > { %7186 = vmatmul.msk.bf16.gmra.mxu3 %vm997_vm2, %v2082_v23  ;;  %7251 = vmatmul.msk.bf16.gmra.mxu1 %vm997_vm2, %v2633_v50  ;;  %v8598_v19 = vadd.f32 %v3327_v62, %v2985_v30  ;;  %v8600_v53 = vpop.f32.mrf.mxu0  ;;  %v2017_v50 = vld [vmem:[#allocation2 + $0xba] sm:$0xff] }
 0x3d0   : > { %v2083_v49 = vpack.c.bf16 %v2017_v50, %v2016_v11 }
 0x3d2   : > { %v2264_v39 = vpop.f32.mrf.mxu3  ;;  %v3332_v55 = vpop.f32.mrf.mxu2 }
 0x3d3   : > { %v2453_v9 = vadd.f32 %v2264_v39, %v1810_v47  ;;  %v2586_v47 = vld [vmem:[#allocation2 + $0x1f2] sm:$0xff] }
 0x3d4   : > { %v8604_v61 = vpop.f32.mrf.mxu1 }
 0x3d5   : > { %v2986_v60 = vadd.f32 %v8293_v35, %v2453_v9  ;;  %v2585_v9 = vld [vmem:[#allocation2 + $0x1ea] sm:$0xff] }
 0x3d7   : > { %7281 = vmatmul.msk.bf16.gmra.mxu2 %vm997_vm2, %v3149_v22  ;;  %v8608_v62 = vadd.f32 %v3330_v15, %v2986_v60  ;;  %v8610_v57 = vpop.f32.mrf.mxu0  ;;  %v2634_v60 = vpack.c.bf16 %v2586_v47, %v2585_v9  ;;  %v1815_v22 = vadd.f32 %v8483_v12, %v7991_v38  ;;  %v4128_v9 = vld [vmem:[#allocation2 + $0x44] sm:$0xff]  ;;  %v1817_v38 = vadd.f32 %v8492_v40, %v7998_v46 }
 0x3d9   : > { %10263 = vst [vmem:[#allocation98_spill] sm:$0xff] %v8608_v62  ;;  %v10349_v62 = vld [vmem:[#allocation96_spill] sm:$0xff] }
 0x3da   : > { %v2266_v30 = vpop.f32.mrf.mxu3  ;;  %v3335_v23 = vpop.f32.mrf.mxu2  ;;  %7364 = vmatmul.msk.bf16.vlgmr.msra.gmra.mxu0 %vm997_vm2, %v4204_v26 }
 0x3db   : > { %v2454_v39 = vadd.f32 %v2266_v30, %v1812_v25  ;;  %v3085_v25 = vld [vmem:[#allocation2 + $0xe3] sm:$0xff] }
 0x3dc   : > { %v8615_v35 = vpop.f32.mrf.mxu1 }
 0x3dd   : > { %v2987_v15 = vadd.f32 %v8303_v21, %v2454_v39  ;;  %v3084_v21 = vld [vmem:[#allocation2 + $0xdb] sm:$0xff]  ;;  %v4129_v39 = vld [vmem:[#allocation2 + $0x4c] sm:$0xff] }
 0x3de   : > { %v3150_v47 = vpack.c.bf16 %v3085_v25, %v3084_v21  ;;  %v4205_v12 = vpack.c.bf16 %v4129_v39, %v4128_v9  ;;  %v2018_v25 = vld [vmem:[#allocation2 + $0xc2] sm:$0xff] }
 0x3df   : > { %7187 = vmatmul.msk.bf16.gmra.mxu3 %vm997_vm2, %v2083_v49  ;;  %7252 = vmatmul.msk.bf16.gmra.mxu1 %vm997_vm2, %v2634_v60  ;;  %v8620_v33 = vadd.f32 %v3332_v55, %v2987_v15  ;;  %v8622_v48 = vpop.f32.mrf.mxu0  ;;  %v2019_v60 = vld [vmem:[#allocation2 + $0xca] sm:$0xff] }
 0x3e0   : > { %v2084_v21 = vpack.c.bf16 %v2019_v60, %v2018_v25 }
 0x3e1   : > { %10264 = vst [vmem:[#allocation99_spill] sm:$0xff] %v8620_v33 }
 0x3e2   : > { %v2269_v34 = vpop.f32.mrf.mxu3  ;;  %v3337_v52 = vpop.f32.mrf.mxu2 }
 0x3e3   : > { %v2455_v26 = vadd.f32 %v2269_v34, %v1815_v22  ;;  %v2588_v22 = vld [vmem:[#allocation2 + $0x202] sm:$0xff] }
 0x3e4   : > { %v8626_v30 = vpop.f32.mrf.mxu1 }
 0x3e5   : > { %v2988_v50 = vadd.f32 %v8311_v28, %v2455_v26  ;;  %v2587_v26 = vld [vmem:[#allocation2 + $0x1fa] sm:$0xff] }
 0x3e7   : > { %7282 = vmatmul.msk.bf16.gmra.mxu2 %vm997_vm2, %v3150_v47  ;;  %v8630_v55 = vadd.f32 %v3335_v23, %v2988_v50  ;;  %v8632_v11 = vpop.f32.mrf.mxu0  ;;  %v2635_v50 = vpack.c.bf16 %v2588_v22, %v2587_v26  ;;  %v1820_v47 = vadd.f32 %v8499_v8, %v8004_v51  ;;  %v4130_v26 = vld [vmem:[#allocation2 + $0x54] sm:$0xff]  ;;  %v1822_v51 = vadd.f32 %v8508_v20, %v8011_v59 }
 0x3e9   : > { %10265 = vst [vmem:[#allocation100_spill] sm:$0xff] %v8630_v55 }
 0x3ea   : > { %v2271_v15 = vpop.f32.mrf.mxu3  ;;  %v3340_v49 = vpop.f32.mrf.mxu2  ;;  %7365 = vmatmul.msk.bf16.gmra.mxu0 %vm997_vm2, %v4205_v12 }
 0x3eb   : > { %v2456_v34 = vadd.f32 %v2271_v15, %v1817_v38  ;;  %v3087_v38 = vld [vmem:[#allocation2 + $0xf3] sm:$0xff] }
 0x3ec   : > { %v8637_v28 = vpop.f32.mrf.mxu1 }
 0x3ed   : > { %v2989_v23 = vadd.f32 %v8319_v37, %v2456_v34  ;;  %v3086_v37 = vld [vmem:[#allocation2 + $0xeb] sm:$0xff]  ;;  %v4131_v34 = vld [vmem:[#allocation2 + $0x5c] sm:$0xff] }
 0x3ee   : > { %v3151_v22 = vpack.c.bf16 %v3087_v38, %v3086_v37  ;;  %v4206_v8 = vpack.c.bf16 %v4131_v34, %v4130_v26  ;;  %v2020_v38 = vld [vmem:[#allocation2 + $0xd2] sm:$0xff] }
 0x3ef   : > { %7188 = vmatmul.msk.bf16.gmra.mxu3 %vm997_vm2, %v2084_v21  ;;  %7253 = vmatmul.msk.bf16.gmra.mxu1 %vm997_vm2, %v2635_v50  ;;  %v8642_v46 = vadd.f32 %v3337_v52, %v2989_v23  ;;  %v8644_v40 = vpop.f32.mrf.mxu0  ;;  %v2021_v50 = vld [vmem:[#allocation2 + $0xda] sm:$0xff] }
 0x3f0   : > { %v2085_v37 = vpack.c.bf16 %v2021_v50, %v2020_v38 }
 0x3f1   : > { %10266 = vst [vmem:[#allocation101_spill] sm:$0xff] %v8642_v46  ;;  %v2035_v46 = vld [vmem:[#allocation2 + $0x14a] sm:$0xff] }
 0x3f2   : > { %v2274_v39 = vpop.f32.mrf.mxu3  ;;  %v3342_v9 = vpop.f32.mrf.mxu2 }
 0x3f3   : > { %v2457_v12 = vadd.f32 %v2274_v39, %v1820_v47  ;;  %v2590_v47 = vld [vmem:[#allocation2 + $0x212] sm:$0xff] }
 0x3f4   : > { %v8648_v15 = vpop.f32.mrf.mxu1 }
 0x3f5   : > { %v2990_v60 = vadd.f32 %v8327_v7, %v2457_v12  ;;  %v2589_v12 = vld [vmem:[#allocation2 + $0x20a] sm:$0xff] }
 0x3f7   : > { %7283 = vmatmul.msk.bf16.gmra.mxu2 %vm997_vm2, %v3151_v22  ;;  %v8652_v52 = vadd.f32 %v3340_v49, %v2990_v60  ;;  %v8654_v25 = vpop.f32.mrf.mxu0  ;;  %v2636_v60 = vpack.c.bf16 %v2590_v47, %v2589_v12  ;;  %v1825_v22 = vadd.f32 %v8515_v18, %v8017_v1  ;;  %v4132_v12 = vld [vmem:[#allocation2 + $0x64] sm:$0xff]  ;;  %v1827_v1 = vadd.f32 %v8524_v2, %v8024_v10 }
 0x3f9   : > { %10267 = vst [vmem:[#allocation102_spill] sm:$0xff] %v8652_v52 }
 0x3fa   : > { %v2276_v23 = vpop.f32.mrf.mxu3  ;;  %v3345_v21 = vpop.f32.mrf.mxu2  ;;  %7366 = vmatmul.msk.bf16.gmra.mxu0 %vm997_vm2, %v4206_v8 }
 0x3fb   : > { %v2458_v39 = vadd.f32 %v2276_v23, %v1822_v51  ;;  %v3089_v51 = vld [vmem:[#allocation2 + $0x103] sm:$0xff] }
 0x3fc   : > { %v8659_v7 = vpop.f32.mrf.mxu1 }
 0x3fd   : > { %v2991_v49 = vadd.f32 %v8335_v54, %v2458_v39  ;;  %v3088_v54 = vld [vmem:[#allocation2 + $0xfb] sm:$0xff]  ;;  %v4133_v39 = vld [vmem:[#allocation2 + $0x6c] sm:$0xff] }
 0x3fe   : > { %v3152_v47 = vpack.c.bf16 %v3089_v51, %v3088_v54  ;;  %v4207_v18 = vpack.c.bf16 %v4133_v39, %v4132_v12  ;;  %v2022_v51 = vld [vmem:[#allocation2 + $0xe2] sm:$0xff] }
 0x3ff   : > { %7189 = vmatmul.msk.bf16.gmra.mxu3 %vm997_vm2, %v2085_v37  ;;  %7254 = vmatmul.msk.bf16.gmra.mxu1 %vm997_vm2, %v2636_v60  ;;  %v8664_v59 = vadd.f32 %v3342_v9, %v2991_v49  ;;  %v8666_v20 = vpop.f32.mrf.mxu0  ;;  %v2023_v60 = vld [vmem:[#allocation2 + $0xea] sm:$0xff] }
 0x400   : > { %v2086_v54 = vpack.c.bf16 %v2023_v60, %v2022_v51 }
 0x401   : > { %10268 = vst [vmem:[#allocation103_spill] sm:$0xff] %v8664_v59 }
 0x402   : > { %v2279_v34 = vpop.f32.mrf.mxu3  ;;  %v3347_v26 = vpop.f32.mrf.mxu2 }
 0x403   : > { %v2459_v8 = vadd.f32 %v2279_v34, %v1825_v22  ;;  %v2592_v22 = vld [vmem:[#allocation2 + $0x222] sm:$0xff] }
 0x404   : > { %v8670_v23 = vpop.f32.mrf.mxu1 }
 0x405   : > { %v2992_v50 = vadd.f32 %v8343_v43, %v2459_v8  ;;  %v2591_v8 = vld [vmem:[#allocation2 + $0x21a] sm:$0xff] }
 0x407   : > { %7284 = vmatmul.msk.bf16.gmra.mxu2 %vm997_vm2, %v3152_v47  ;;  %v8674_v9 = vadd.f32 %v3345_v21, %v2992_v50  ;;  %v8676_v38 = vpop.f32.mrf.mxu0  ;;  %v2637_v50 = vpack.c.bf16 %v2592_v22, %v2591_v8  ;;  %v1830_v47 = vadd.f32 %v8531_v24, %v8030_v16  ;;  %v4134_v8 = vld [vmem:[#allocation2 + $0x74] sm:$0xff]  ;;  %v1832_v16 = vadd.f32 %v8540_v56, %v8037_v27 }
 0x409   : > { %10269 = vst [vmem:[#allocation104_spill] sm:$0xff] %v8674_v9  ;;  %v7515_v9 = vld [vmem:[#allocation8 + $0x80] sm:$0xff] }
 0x40a   : > { %v2281_v49 = vpop.f32.mrf.mxu3  ;;  %v3350_v37 = vpop.f32.mrf.mxu2  ;;  %7367 = vmatmul.msk.bf16.gmra.mxu0 %vm997_vm2, %v4207_v18  ;;  %5450 = vmatpush.bf16.msra.mxu2 %v7515_v9 }
 0x40b   : > { %v2460_v34 = vadd.f32 %v2281_v49, %v1827_v1  ;;  %v3091_v1 = vld [vmem:[#allocation2 + $0x113] sm:$0xff] }
 0x40c   : > { %v8681_v43 = vpop.f32.mrf.mxu1 }
 0x40d   : > { %v2993_v21 = vadd.f32 %v8351_v36, %v2460_v34  ;;  %v3090_v36 = vld [vmem:[#allocation2 + $0x10b] sm:$0xff]  ;;  %v4135_v34 = vld [vmem:[#allocation2 + $0x7c] sm:$0xff] }
 0x40e   : > { %v3153_v22 = vpack.c.bf16 %v3091_v1, %v3090_v36  ;;  %v4208_v24 = vpack.c.bf16 %v4135_v34, %v4134_v8  ;;  %v2024_v1 = vld [vmem:[#allocation2 + $0xf2] sm:$0xff] }
 0x40f   : > { %7190 = vmatmul.msk.bf16.gmra.mxu3 %vm997_vm2, %v2086_v54  ;;  %7255 = vmatmul.msk.bf16.gmra.mxu1 %vm997_vm2, %v2637_v50  ;;  %v8686_v10 = vadd.f32 %v3347_v26, %v2993_v21  ;;  %v8688_v2 = vpop.f32.mrf.mxu0  ;;  %v2025_v50 = vld [vmem:[#allocation2 + $0xfa] sm:$0xff] }
 0x410   : > { %v2087_v36 = vpack.c.bf16 %v2025_v50, %v2024_v1 }
 0x411   : > { %10270 = vst [vmem:[#allocation105_spill] sm:$0xff] %v8686_v10  ;;  %v2600_v10 = vld [vmem:[#allocation2 + $0x262] sm:$0xff] }
 0x412   : > { %v2284_v39 = vpop.f32.mrf.mxu3  ;;  %v3352_v12 = vpop.f32.mrf.mxu2 }
 0x413   : > { %v2461_v18 = vadd.f32 %v2284_v39, %v1830_v47  ;;  %v2594_v47 = vld [vmem:[#allocation2 + $0x232] sm:$0xff] }
 0x414   : > { %v8692_v49 = vpop.f32.mrf.mxu1 }
 0x415   : > { %v2994_v60 = vadd.f32 %v8359_v63, %v2461_v18  ;;  %v2593_v18 = vld [vmem:[#allocation2 + $0x22a] sm:$0xff] }
 0x417   : > { %7285 = vmatmul.msk.bf16.gmra.mxu2 %vm997_vm2, %v3153_v22  ;;  %v8696_v26 = vadd.f32 %v3350_v37, %v2994_v60  ;;  %v8698_v51 = vpop.f32.mrf.mxu0  ;;  %v2638_v60 = vpack.c.bf16 %v2594_v47, %v2593_v18  ;;  %v1835_v22 = vadd.f32 %v8547_v31, %v8043_v32  ;;  %v4136_v18 = vld [vmem:[#allocation2 + $0x84] sm:$0xff]  ;;  %v1837_v32 = vadd.f32 %v8556_v3, %v8050_v44 }
 0x419   : > { %10271 = vst [vmem:[#allocation106_spill] sm:$0xff] %v8696_v26 }
 0x41a   : > { %v2286_v21 = vpop.f32.mrf.mxu3  ;;  %v3355_v54 = vpop.f32.mrf.mxu2  ;;  %7368 = vmatmul.msk.bf16.gmra.mxu0 %vm997_vm2, %v4208_v24 }
 0x41b   : > { %v2462_v39 = vadd.f32 %v2286_v21, %v1832_v16  ;;  %v3093_v16 = vld [vmem:[#allocation2 + $0x123] sm:$0xff] }
 0x41c   : > { %v8703_v63 = vpop.f32.mrf.mxu1 }
 0x41d   : > { %v2995_v37 = vadd.f32 %v8367_v29, %v2462_v39  ;;  %v3092_v29 = vld [vmem:[#allocation2 + $0x11b] sm:$0xff]  ;;  %v4137_v39 = vld [vmem:[#allocation2 + $0x8c] sm:$0xff] }
 0x41e   : > { %v3154_v47 = vpack.c.bf16 %v3093_v16, %v3092_v29  ;;  %v4209_v31 = vpack.c.bf16 %v4137_v39, %v4136_v18  ;;  %v2026_v16 = vld [vmem:[#allocation2 + $0x102] sm:$0xff] }
 0x41f   : > { %7191 = vmatmul.msk.bf16.gmra.mxu3 %vm997_vm2, %v2087_v36  ;;  %7256 = vmatmul.msk.bf16.gmra.mxu1 %vm997_vm2, %v2638_v60  ;;  %v8708_v27 = vadd.f32 %v3352_v12, %v2995_v37  ;;  %v8710_v56 = vpop.f32.mrf.mxu0  ;;  %v2027_v60 = vld [vmem:[#allocation2 + $0x10a] sm:$0xff] }
 0x420   : > { %v2088_v29 = vpack.c.bf16 %v2027_v60, %v2026_v16  ;;  %v10276_v60 = vld [vmem:[#allocation56_spill] sm:$0xff]  ;;  %v4139_v16 = vld [vmem:[#allocation2 + $0x9c] sm:$0xff] }
 0x421   : > { %10272 = vst [vmem:[#allocation107_spill] sm:$0xff] %v8708_v27 }
 0x422   : > { %v2289_v34 = vpop.f32.mrf.mxu3  ;;  %v3357_v8 = vpop.f32.mrf.mxu2 }
 0x423   : > { %v2463_v24 = vadd.f32 %v2289_v34, %v1835_v22  ;;  %v2596_v22 = vld [vmem:[#allocation2 + $0x242] sm:$0xff] }
 0x424   : > { %v8714_v21 = vpop.f32.mrf.mxu1 }
 0x425   : > { %v2996_v50 = vadd.f32 %v8375_v14, %v2463_v24  ;;  %v2595_v24 = vld [vmem:[#allocation2 + $0x23a] sm:$0xff] }
 0x427   : > { %7286 = vmatmul.msk.bf16.gmra.mxu2 %vm997_vm2, %v3154_v47  ;;  %v8718_v12 = vadd.f32 %v3355_v54, %v2996_v50  ;;  %v8720_v1 = vpop.f32.mrf.mxu0  ;;  %v2639_v50 = vpack.c.bf16 %v2596_v22, %v2595_v24  ;;  %v10275_v47 = vld [vmem:[#allocation14_spill] sm:$0xff] }
 0x428   : > { %v1840_v39 = vadd.f32 %v8566_v58, %v10275_v47 }
 0x429   : > { %10273 = vst [vmem:[#allocation108_spill] sm:$0xff] %v8718_v12 }
 0x42a   : > { %v2291_v37 = vpop.f32.mrf.mxu3  ;;  %v3360_v36 = vpop.f32.mrf.mxu2  ;;  %7369 = vmatmul.msk.bf16.gmra.mxu0 %vm997_vm2, %v4209_v31  ;;  %v3095_v31 = vld [vmem:[#allocation2 + $0x133] sm:$0xff] }
 0x42b   : > { %v2464_v34 = vadd.f32 %v2291_v37, %v1837_v32 }
 0x42c   : > { %v8725_v14 = vpop.f32.mrf.mxu1 }
 0x42d   : > { %v2997_v54 = vadd.f32 %v8383_v41, %v2464_v34  ;;  %v3094_v41 = vld [vmem:[#allocation2 + $0x12b] sm:$0xff] }
 0x42e   : > { %v3155_v34 = vpack.c.bf16 %v3095_v31, %v3094_v41  ;;  %v2597_v41 = vld [vmem:[#allocation2 + $0x24a] sm:$0xff] }
 0x42f   : > { %7192 = vmatmul.msk.bf16.gmra.mxu3 %vm997_vm2, %v2088_v29  ;;  %7257 = vmatmul.msk.bf16.gmra.mxu1 %vm997_vm2, %v2639_v50  ;;  %v8730_v44 = vadd.f32 %v3357_v8, %v2997_v54  ;;  %v8732_v3 = vpop.f32.mrf.mxu0  ;;  %v4138_v54 = vld [vmem:[#allocation2 + $0x94] sm:$0xff]  ;;  %v10278_v29 = vld [vmem:[#allocation15_spill] sm:$0xff] }
 0x430   : > { %v1842_v58 = vadd.f32 %v8578_v45, %v10278_v29  ;;  %v4210_v50 = vpack.c.bf16 %v4139_v16, %v4138_v54  ;;  %v10281_v54 = vld [vmem:[#allocation16_spill] sm:$0xff] }
 0x431   : > { %10274 = vst [vmem:[#allocation109_spill] sm:$0xff] %v8730_v44  ;;  %v2598_v44 = vld [vmem:[#allocation2 + $0x252] sm:$0xff]  ;;  %v1845_v29 = vadd.f32 %v8588_v13, %v10281_v54  ;;  %v10284_v13 = vld [vmem:[#allocation17_spill] sm:$0xff] }
 0x432   : > { %v2294_v18 = vpop.f32.mrf.mxu3  ;;  %v3362_v32 = vpop.f32.mrf.mxu2 }
 0x433   : > { %v2465_v37 = vadd.f32 %v2294_v18, %v1840_v39  ;;  %v2029_v18 = vld [vmem:[#allocation2 + $0x11a] sm:$0xff] }
 0x434   : > { %v8736_v12 = vpop.f32.mrf.mxu1 }
 0x435   : > { %v2998_v22 = vadd.f32 %v10276_v60, %v2465_v37  ;;  %v2028_v37 = vld [vmem:[#allocation2 + $0x112] sm:$0xff] }
 0x437   : > { %7287 = vmatmul.msk.bf16.gmra.mxu2 %vm997_vm2, %v3155_v34  ;;  %v8740_v8 = vadd.f32 %v3360_v36, %v2998_v22  ;;  %v8742_v24 = vpop.f32.mrf.mxu0  ;;  %v10279_v36 = vld [vmem:[#allocation58_spill] sm:$0xff]  ;;  %v2089_v22 = vpack.c.bf16 %v2029_v18, %v2028_v37  ;;  %v2640_v34 = vpack.c.bf16 %v2598_v44, %v2597_v41  ;;  %v10282_v18 = vld [vmem:[#allocation60_spill] sm:$0xff]  ;;  %v4141_v41 = vld [vmem:[#allocation2 + $0xac] sm:$0xff] }
 0x439   : > { %10277 = vst [vmem:[#allocation14_spill] sm:$0xff] %v8740_v8 }
 0x43a   : > { %v2296_v47 = vpop.f32.mrf.mxu3  ;;  %v3365_v39 = vpop.f32.mrf.mxu2  ;;  %7370 = vmatmul.msk.bf16.gmra.mxu0 %vm997_vm2, %v4210_v50 }
 0x43b   : > { %v2466_v27 = vadd.f32 %v2296_v47, %v1842_v58  ;;  %v3097_v47 = vld [vmem:[#allocation2 + $0x143] sm:$0xff] }
 0x43c   : > { %v8747_v31 = vpop.f32.mrf.mxu1 }
 0x43d   : > { %v2999_v60 = vadd.f32 %v10279_v36, %v2466_v27  ;;  %v3096_v27 = vld [vmem:[#allocation2 + $0x13b] sm:$0xff] }
 0x43e   : > { %v3156_v37 = vpack.c.bf16 %v3097_v47, %v3096_v27  ;;  %v2030_v27 = vld [vmem:[#allocation2 + $0x122] sm:$0xff] }
 0x43f   : > { %7193 = vmatmul.msk.bf16.gmra.mxu3 %vm997_vm2, %v2089_v22  ;;  %7258 = vmatmul.msk.bf16.gmra.mxu1 %vm997_vm2, %v2640_v34  ;;  %v8752_v45 = vadd.f32 %v3362_v32, %v2999_v60  ;;  %v8754_v16 = vpop.f32.mrf.mxu0  ;;  %v7509_v32 = vld [vmem:[#allocation8 + $0x50] sm:$0xff]  ;;  %v1847_v34 = vadd.f32 %v8600_v53, %v10284_v13 }
 0x440   : > { %v4140_v22 = vld [vmem:[#allocation2 + $0xa4] sm:$0xff]  ;;  %3851 = vmatpush.bf16.msrb.mxu3 %v7509_v32 }
 0x441   : > { %10280 = vst [vmem:[#allocation56_spill] sm:$0xff] %v8752_v45  ;;  %v4211_v54 = vpack.c.bf16 %v4141_v41, %v4140_v22  ;;  %v2031_v45 = vld [vmem:[#allocation2 + $0x12a] sm:$0xff]  ;;  %v7513_v32 = vld [vmem:[#allocation8 + $0x70] sm:$0xff] }
 0x442   : > { %v2299_v58 = vpop.f32.mrf.mxu3  ;;  %v3367_v50 = vpop.f32.mrf.mxu2  ;;  %v10287_v22 = vld [vmem:[#allocation18_spill] sm:$0xff]  ;;  %4917 = vmatpush.bf16.msra.mxu1 %v7513_v32 }
 0x443   : > { %v2467_v8 = vadd.f32 %v2299_v58, %v1845_v29  ;;  %v1850_v13 = vadd.f32 %v8610_v57, %v10287_v22  ;;  %v10290_v57 = vld [vmem:[#allocation19_spill] sm:$0xff] }
 0x444   : > { %v8758_v26 = vpop.f32.mrf.mxu1 }
 0x445   : > { %v3000_v44 = vadd.f32 %v10282_v18, %v2467_v8  ;;  %v10285_v18 = vld [vmem:[#allocation62_spill] sm:$0xff] }
 0x447   : > { %7288 = vmatmul.msk.bf16.gmra.mxu2 %vm997_vm2, %v3156_v37  ;;  %v8762_v36 = vadd.f32 %v3365_v39, %v3000_v44  ;;  %v8764_v60 = vpop.f32.mrf.mxu0  ;;  %v2599_v39 = vld [vmem:[#allocation2 + $0x25a] sm:$0xff]  ;;  %v2090_v37 = vpack.c.bf16 %v2031_v45, %v2030_v27 }
 0x448   : > { %v10288_v27 = vld [vmem:[#allocation64_spill] sm:$0xff] }
 0x449   : > { %10283 = vst [vmem:[#allocation15_spill] sm:$0xff] %v8762_v36  ;;  %v2641_v36 = vpack.c.bf16 %v2600_v10, %v2599_v39 }
 0x44a   : > { %v2301_v29 = vpop.f32.mrf.mxu3  ;;  %v3370_v58 = vpop.f32.mrf.mxu2  ;;  %7371 = vmatmul.msk.bf16.gmra.mxu0 %vm997_vm2, %v4211_v54 }
 0x44b   : > { %v2468_v8 = vadd.f32 %v2301_v29, %v1847_v34  ;;  %v3099_v29 = vld [vmem:[#allocation2 + $0x153] sm:$0xff] }
 0x44c   : > { %v8769_v47 = vpop.f32.mrf.mxu1 }
 0x44d   : > { %v3001_v44 = vadd.f32 %v10285_v18, %v2468_v8  ;;  %v3098_v8 = vld [vmem:[#allocation2 + $0x14b] sm:$0xff] }
 0x44f   : > { %7194 = vmatmul.msk.bf16.gmra.mxu3 %vm997_vm2, %v2090_v37  ;;  %7259 = vmatmul.msk.bf16.gmra.mxu1 %vm997_vm2, %v2641_v36  ;;  %v8774_v53 = vadd.f32 %v3367_v50, %v3001_v44  ;;  %v8776_v41 = vpop.f32.mrf.mxu0  ;;  %v3157_v36 = vpack.c.bf16 %v3099_v29, %v3098_v8  ;;  %v4143_v50 = vld [vmem:[#allocation2 + $0xbc] sm:$0xff]  ;;  %v4142_v44 = vld [vmem:[#allocation2 + $0xb4] sm:$0xff]  ;;  %v1852_v37 = vadd.f32 %v8622_v48, %v10290_v57  ;;  %v2601_v8 = vld [vmem:[#allocation2 + $0x26a] sm:$0xff] }
 0x450   : > { %v4212_v22 = vpack.c.bf16 %v4143_v50, %v4142_v44  ;;  %v10293_v44 = vld [vmem:[#allocation20_spill] sm:$0xff] }
 0x451   : > { %10286 = vst [vmem:[#allocation58_spill] sm:$0xff] %v8774_v53  ;;  %v2602_v53 = vld [vmem:[#allocation2 + $0x272] sm:$0xff]  ;;  %v1855_v57 = vadd.f32 %v8632_v11, %v10293_v44  ;;  %v2604_v11 = vld [vmem:[#allocation2 + $0x282] sm:$0xff] }
 0x452   : > { %v2304_v34 = vpop.f32.mrf.mxu3  ;;  %v3372_v54 = vpop.f32.mrf.mxu2 }
 0x453   : > { %v2469_v45 = vadd.f32 %v2304_v34, %v1850_v13  ;;  %v2033_v34 = vld [vmem:[#allocation2 + $0x13a] sm:$0xff] }
 0x454   : > { %v8780_v10 = vpop.f32.mrf.mxu1 }
 0x455   : > { %v3002_v39 = vadd.f32 %v10288_v27, %v2469_v45  ;;  %v2032_v45 = vld [vmem:[#allocation2 + $0x132] sm:$0xff] }
 0x457   : > { %7289 = vmatmul.msk.bf16.gmra.mxu2 %vm997_vm2, %v3157_v36  ;;  %v8784_v18 = vadd.f32 %v3370_v58, %v3002_v39  ;;  %v8786_v9 = vpop.f32.mrf.mxu0  ;;  %v10291_v58 = vld [vmem:[#allocation66_spill] sm:$0xff]  ;;  %v2091_v39 = vpack.c.bf16 %v2033_v34, %v2032_v45  ;;  %v2642_v36 = vpack.c.bf16 %v2602_v53, %v2601_v8  ;;  %v10294_v34 = vld [vmem:[#allocation68_spill] sm:$0xff]  ;;  %v4145_v8 = vld [vmem:[#allocation2 + $0xcc] sm:$0xff] }
 0x459   : > { %10289 = vst [vmem:[#allocation16_spill] sm:$0xff] %v8784_v18 }
 0x45a   : > { %v2306_v32 = vpop.f32.mrf.mxu3  ;;  %v3375_v13 = vpop.f32.mrf.mxu2  ;;  %7372 = vmatmul.msk.bf16.gmra.mxu0 %vm997_vm2, %v4212_v22 }
 0x45b   : > { %v2470_v59 = vadd.f32 %v2306_v32, %v1852_v37  ;;  %v3101_v32 = vld [vmem:[#allocation2 + $0x163] sm:$0xff] }
 0x45c   : > { %v8791_v29 = vpop.f32.mrf.mxu1 }
 0x45d   : > { %v3003_v27 = vadd.f32 %v10291_v58, %v2470_v59  ;;  %v3100_v59 = vld [vmem:[#allocation2 + $0x15b] sm:$0xff] }
 0x45e   : > { %v3158_v45 = vpack.c.bf16 %v3101_v32, %v3100_v59  ;;  %v10297_v59 = vld [vmem:[#allocation70_spill] sm:$0xff] }
 0x45f   : > { %7195 = vmatmul.msk.bf16.gmra.mxu3 %vm997_vm2, %v2091_v39  ;;  %7260 = vmatmul.msk.bf16.gmra.mxu1 %vm997_vm2, %v2642_v36  ;;  %v8796_v48 = vadd.f32 %v3372_v54, %v3003_v27  ;;  %v8798_v50 = vpop.f32.mrf.mxu0  ;;  %v4144_v27 = vld [vmem:[#allocation2 + $0xc4] sm:$0xff]  ;;  %v2603_v39 = vld [vmem:[#allocation2 + $0x27a] sm:$0xff] }
 0x460   : > { %v10296_v36 = vld [vmem:[#allocation21_spill] sm:$0xff] }
 0x461   : > { %10292 = vst [vmem:[#allocation60_spill] sm:$0xff] %v8796_v48  ;;  %v1857_v44 = vadd.f32 %v8644_v40, %v10296_v36 }
 0x462   : > { %v2309_v37 = vpop.f32.mrf.mxu3  ;;  %v3377_v22 = vpop.f32.mrf.mxu2 }
 0x463   : > { %v2471_v18 = vadd.f32 %v2309_v37, %v1855_v57  ;;  %v4213_v57 = vpack.c.bf16 %v4145_v8, %v4144_v27  ;;  %v10300_v8 = vld [vmem:[#allocation22_spill] sm:$0xff] }
 0x464   : > { %v8802_v52 = vpop.f32.mrf.mxu1  ;;  %v1860_v27 = vadd.f32 %v8654_v25, %v10300_v8 }
 0x465   : > { %v3004_v53 = vadd.f32 %v10294_v34, %v2471_v18  ;;  %v2643_v18 = vpack.c.bf16 %v2604_v11, %v2603_v39  ;;  %v3103_v39 = vld [vmem:[#allocation2 + $0x173] sm:$0xff] }
 0x467   : > { %7290 = vmatmul.msk.bf16.gmra.mxu2 %vm997_vm2, %v3158_v45  ;;  %v8806_v54 = vadd.f32 %v3375_v13, %v3004_v53  ;;  %v8808_v58 = vpop.f32.mrf.mxu0  ;;  %v2034_v13 = vld [vmem:[#allocation2 + $0x142] sm:$0xff] }
 0x468   : > { %v2092_v53 = vpack.c.bf16 %v2035_v46, %v2034_v13 }
 0x469   : > { %10295 = vst [vmem:[#allocation17_spill] sm:$0xff] %v8806_v54  ;;  %v4660_v54 = vld [vmem:[#allocation2 + $0x3d] sm:$0xff] }
 0x46a   : > { %v2311_v37 = vpop.f32.mrf.mxu3  ;;  %v3380_v48 = vpop.f32.mrf.mxu2  ;;  %7373 = vmatmul.msk.bf16.gmra.mxu0 %vm997_vm2, %v4213_v57 }
 0x46b   : > { %v2472_v55 = vadd.f32 %v2311_v37, %v1857_v44  ;;  %v3102_v37 = vld [vmem:[#allocation2 + $0x16b] sm:$0xff] }
 0x46c   : > { %v8813_v32 = vpop.f32.mrf.mxu1  ;;  %v3159_v13 = vpack.c.bf16 %v3103_v39, %v3102_v37  ;;  %v4659_v37 = vld [vmem:[#allocation2 + $0x35] sm:$0xff] }
 0x46d   : > { %v3005_v34 = vadd.f32 %v10297_v59, %v2472_v55  ;;  %v10301_v55 = vld [vmem:[#allocation72_spill] sm:$0xff]  ;;  %v4147_v59 = vld [vmem:[#allocation2 + $0xdc] sm:$0xff] }
 0x46f   : > { %7196 = vmatmul.msk.bf16.gmra.mxu3 %vm997_vm2, %v2092_v53  ;;  %7261 = vmatmul.msk.bf16.gmra.mxu1 %vm997_vm2, %v2643_v18  ;;  %v8818_v45 = vadd.f32 %v3377_v22, %v3005_v34  ;;  %v8820_v40 = vpop.f32.mrf.mxu0  ;;  %v4146_v34 = vld [vmem:[#allocation2 + $0xd4] sm:$0xff]  ;;  %v10304_v53 = vld [vmem:[#allocation23_spill] sm:$0xff] }
 0x470   : > { %10299 = vst [vmem:[#allocation18_spill] sm:$0xff] %v8820_v40  ;;  %v1862_v25 = vadd.f32 %v8666_v20, %v10304_v53  ;;  %v4214_v8 = vpack.c.bf16 %v4147_v59, %v4146_v34  ;;  %v10308_v34 = vld [vmem:[#allocation24_spill] sm:$0xff] }
 0x471   : > { %10298 = vst [vmem:[#allocation62_spill] sm:$0xff] %v8818_v45  ;;  %v3116_v40 = vld [vmem:[#allocation2 + $0x1db] sm:$0xff] }
 0x472   : > { %v2314_v36 = vpop.f32.mrf.mxu3  ;;  %v3382_v44 = vpop.f32.mrf.mxu2 }
 0x473   : > { %v2473_v11 = vadd.f32 %v2314_v36, %v1860_v27  ;;  %v2037_v36 = vld [vmem:[#allocation2 + $0x15a] sm:$0xff] }
 0x474   : > { %v8824_v57 = vpop.f32.mrf.mxu1 }
 0x475   : > { %v3006_v46 = vadd.f32 %v10301_v55, %v2473_v11  ;;  %v2036_v11 = vld [vmem:[#allocation2 + $0x152] sm:$0xff] }
 0x477   : > { %7291 = vmatmul.msk.bf16.gmra.mxu2 %vm997_vm2, %v3159_v13  ;;  %v8828_v22 = vadd.f32 %v3380_v48, %v3006_v46  ;;  %v8830_v18 = vpop.f32.mrf.mxu0  ;;  %v10305_v48 = vld [vmem:[#allocation74_spill] sm:$0xff]  ;;  %v2093_v46 = vpack.c.bf16 %v2037_v36, %v2036_v11  ;;  %v4737_v13 = vpack.c.bf16 %v4660_v54, %v4659_v37  ;;  %v10309_v36 = vld [vmem:[#allocation76_spill] sm:$0xff]  ;;  %v4149_v37 = vld [vmem:[#allocation2 + $0xec] sm:$0xff] }
 0x478   : > { %10303 = vst [vmem:[#allocation19_spill] sm:$0xff] %v8830_v18 }
 0x479   : > { %10302 = vst [vmem:[#allocation64_spill] sm:$0xff] %v8828_v22 }
 0x47a   : > { %v2316_v45 = vpop.f32.mrf.mxu3  ;;  %v3385_v27 = vpop.f32.mrf.mxu2  ;;  %7374 = vmatmul.msk.bf16.gmra.mxu0 %vm997_vm2, %v4214_v8  ;;  %v3105_v8 = vld [vmem:[#allocation2 + $0x183] sm:$0xff] }
 0x47b   : > { %v2474_v33 = vadd.f32 %v2316_v45, %v1862_v25  ;;  %v1865_v45 = vadd.f32 %v8676_v38, %v10308_v34 }
 0x47c   : > { %v8835_v39 = vpop.f32.mrf.mxu1 }
 0x47d   : > { %v3007_v55 = vadd.f32 %v10305_v48, %v2474_v33  ;;  %v3104_v33 = vld [vmem:[#allocation2 + $0x17b] sm:$0xff] }
 0x47e   : > { %v3160_v11 = vpack.c.bf16 %v3105_v8, %v3104_v33  ;;  %v2038_v8 = vld [vmem:[#allocation2 + $0x162] sm:$0xff] }
 0x47f   : > { %7197 = vmatmul.msk.bf16.gmra.mxu3 %vm997_vm2, %v2093_v46  ;;  %7411 = vmatmul.msk.bf16.vlgmr.msra.gmra.mxu1 %vm997_vm2, %v4737_v13  ;;  %v8840_v20 = vadd.f32 %v3382_v44, %v3007_v55  ;;  %v8842_v59 = vpop.f32.mrf.mxu0  ;;  %v4148_v55 = vld [vmem:[#allocation2 + $0xe4] sm:$0xff]  ;;  %v10312_v46 = vld [vmem:[#allocation25_spill] sm:$0xff] }
 0x480   : > { %10307 = vst [vmem:[#allocation20_spill] sm:$0xff] %v8842_v59  ;;  %v1867_v38 = vadd.f32 %v8688_v2, %v10312_v46  ;;  %v4215_v13 = vpack.c.bf16 %v4149_v37, %v4148_v55  ;;  %v4661_v33 = vld [vmem:[#allocation2 + $0x45] sm:$0xff] }
 0x481   : > { %10306 = vst [vmem:[#allocation66_spill] sm:$0xff] %v8840_v20  ;;  %v4662_v20 = vld [vmem:[#allocation2 + $0x4d] sm:$0xff]  ;;  %v10316_v55 = vld [vmem:[#allocation26_spill] sm:$0xff] }
 0x482   : > { %v2319_v53 = vpop.f32.mrf.mxu3  ;;  %v3387_v25 = vpop.f32.mrf.mxu2  ;;  %v1870_v46 = vadd.f32 %v8698_v51, %v10316_v55 }
 0x483   : > { %v2475_v22 = vadd.f32 %v2319_v53, %v1865_v45  ;;  %v2039_v53 = vld [vmem:[#allocation2 + $0x16a] sm:$0xff] }
 0x484   : > { %v8846_v18 = vpop.f32.mrf.mxu1 }
 0x485   : > { %v3008_v54 = vadd.f32 %v10309_v36, %v2475_v22 }
 0x487   : > { %7292 = vmatmul.msk.bf16.gmra.mxu2 %vm997_vm2, %v3160_v11  ;;  %v8850_v44 = vadd.f32 %v3385_v27, %v3008_v54  ;;  %v8852_v48 = vpop.f32.mrf.mxu0  ;;  %v10313_v27 = vld [vmem:[#allocation78_spill] sm:$0xff]  ;;  %v2094_v54 = vpack.c.bf16 %v2039_v53, %v2038_v8  ;;  %v4738_v11 = vpack.c.bf16 %v4662_v20, %v4661_v33  ;;  %v10317_v53 = vld [vmem:[#allocation80_spill] sm:$0xff]  ;;  %v4151_v33 = vld [vmem:[#allocation2 + $0xfc] sm:$0xff] }
 0x488   : > { %10311 = vst [vmem:[#allocation21_spill] sm:$0xff] %v8852_v48 }
 0x489   : > { %10310 = vst [vmem:[#allocation68_spill] sm:$0xff] %v8850_v44 }
 0x48a   : > { %v2321_v34 = vpop.f32.mrf.mxu3  ;;  %v3390_v45 = vpop.f32.mrf.mxu2  ;;  %7375 = vmatmul.msk.bf16.gmra.mxu0 %vm997_vm2, %v4215_v13 }
 0x48b   : > { %v2476_v59 = vadd.f32 %v2321_v34, %v1867_v38  ;;  %v3107_v34 = vld [vmem:[#allocation2 + $0x193] sm:$0xff] }
 0x48c   : > { %v8857_v22 = vpop.f32.mrf.mxu1 }
 0x48d   : > { %v3009_v36 = vadd.f32 %v10313_v27, %v2476_v59  ;;  %v3106_v59 = vld [vmem:[#allocation2 + $0x18b] sm:$0xff] }
 0x48e   : > { %v3161_v8 = vpack.c.bf16 %v3107_v34, %v3106_v59  ;;  %v2040_v34 = vld [vmem:[#allocation2 + $0x172] sm:$0xff] }
 0x48f   : > { %7198 = vmatmul.msk.bf16.gmra.mxu3 %vm997_vm2, %v2094_v54  ;;  %7412 = vmatmul.msk.bf16.gmra.mxu1 %vm997_vm2, %v4738_v11  ;;  %v8862_v2 = vadd.f32 %v3387_v25, %v3009_v36  ;;  %v8864_v37 = vpop.f32.mrf.mxu0  ;;  %v4150_v36 = vld [vmem:[#allocation2 + $0xf4] sm:$0xff]  ;;  %v10320_v54 = vld [vmem:[#allocation27_spill] sm:$0xff] }
 0x490   : > { %10315 = vst [vmem:[#allocation22_spill] sm:$0xff] %v8864_v37  ;;  %v1872_v51 = vadd.f32 %v8710_v56, %v10320_v54  ;;  %v4216_v11 = vpack.c.bf16 %v4151_v33, %v4150_v36  ;;  %v4663_v59 = vld [vmem:[#allocation2 + $0x55] sm:$0xff] }
 0x491   : > { %10314 = vst [vmem:[#allocation70_spill] sm:$0xff] %v8862_v2  ;;  %v4664_v2 = vld [vmem:[#allocation2 + $0x5d] sm:$0xff]  ;;  %v10324_v36 = vld [vmem:[#allocation28_spill] sm:$0xff] }
 0x492   : > { %v2324_v38 = vpop.f32.mrf.mxu3  ;;  %v3392_v13 = vpop.f32.mrf.mxu2  ;;  %v1875_v54 = vadd.f32 %v8720_v1, %v10324_v36 }
 0x493   : > { %v2477_v44 = vadd.f32 %v2324_v38, %v1870_v46  ;;  %v2041_v38 = vld [vmem:[#allocation2 + $0x17a] sm:$0xff] }
 0x494   : > { %v8868_v48 = vpop.f32.mrf.mxu1 }
 0x495   : > { %v3010_v20 = vadd.f32 %v10317_v53, %v2477_v44 }
 0x497   : > { %7293 = vmatmul.msk.bf16.gmra.mxu2 %vm997_vm2, %v3161_v8  ;;  %v8872_v25 = vadd.f32 %v3390_v45, %v3010_v20  ;;  %v8874_v27 = vpop.f32.mrf.mxu0  ;;  %v10321_v45 = vld [vmem:[#allocation82_spill] sm:$0xff]  ;;  %v2095_v20 = vpack.c.bf16 %v2041_v38, %v2040_v34  ;;  %v4739_v8 = vpack.c.bf16 %v4664_v2, %v4663_v59  ;;  %v10325_v38 = vld [vmem:[#allocation84_spill] sm:$0xff]  ;;  %v4153_v59 = vld [vmem:[#allocation2 + $0x10c] sm:$0xff] }
 0x498   : > { %10319 = vst [vmem:[#allocation23_spill] sm:$0xff] %v8874_v27 }
 0x499   : > { %10318 = vst [vmem:[#allocation72_spill] sm:$0xff] %v8872_v25 }
 0x49a   : > { %v2326_v55 = vpop.f32.mrf.mxu3  ;;  %v3395_v46 = vpop.f32.mrf.mxu2  ;;  %7376 = vmatmul.msk.bf16.gmra.mxu0 %vm997_vm2, %v4216_v11 }
 0x49b   : > { %v2478_v37 = vadd.f32 %v2326_v55, %v1872_v51  ;;  %v3109_v55 = vld [vmem:[#allocation2 + $0x1a3] sm:$0xff] }
 0x49c   : > { %v8879_v44 = vpop.f32.mrf.mxu1 }
 0x49d   : > { %v3011_v53 = vadd.f32 %v10321_v45, %v2478_v37  ;;  %v3108_v37 = vld [vmem:[#allocation2 + $0x19b] sm:$0xff] }
 0x49e   : > { %v3162_v34 = vpack.c.bf16 %v3109_v55, %v3108_v37  ;;  %v2042_v55 = vld [vmem:[#allocation2 + $0x182] sm:$0xff] }
 0x49f   : > { %7199 = vmatmul.msk.bf16.gmra.mxu3 %vm997_vm2, %v2095_v20  ;;  %7413 = vmatmul.msk.bf16.gmra.mxu1 %vm997_vm2, %v4739_v8  ;;  %v8884_v56 = vadd.f32 %v3392_v13, %v3011_v53  ;;  %v8886_v33 = vpop.f32.mrf.mxu0  ;;  %v4152_v53 = vld [vmem:[#allocation2 + $0x104] sm:$0xff]  ;;  %v10328_v20 = vld [vmem:[#allocation29_spill] sm:$0xff] }
 0x4a0   : > { %10323 = vst [vmem:[#allocation24_spill] sm:$0xff] %v8886_v33  ;;  %v1877_v1 = vadd.f32 %v8732_v3, %v10328_v20  ;;  %v4217_v8 = vpack.c.bf16 %v4153_v59, %v4152_v53  ;;  %v4665_v37 = vld [vmem:[#allocation2 + $0x65] sm:$0xff] }
 0x4a1   : > { %10322 = vst [vmem:[#allocation74_spill] sm:$0xff] %v8884_v56  ;;  %v4666_v56 = vld [vmem:[#allocation2 + $0x6d] sm:$0xff]  ;;  %v10332_v53 = vld [vmem:[#allocation30_spill] sm:$0xff] }
 0x4a2   : > { %v2329_v51 = vpop.f32.mrf.mxu3  ;;  %v3397_v11 = vpop.f32.mrf.mxu2  ;;  %v1880_v20 = vadd.f32 %v8742_v24, %v10332_v53 }
 0x4a3   : > { %v2479_v25 = vadd.f32 %v2329_v51, %v1875_v54  ;;  %v2043_v51 = vld [vmem:[#allocation2 + $0x18a] sm:$0xff] }
 0x4a4   : > { %v8890_v27 = vpop.f32.mrf.mxu1 }
 0x4a5   : > { %v3012_v2 = vadd.f32 %v10325_v38, %v2479_v25 }
 0x4a7   : > { %7294 = vmatmul.msk.bf16.gmra.mxu2 %vm997_vm2, %v3162_v34  ;;  %v8894_v13 = vadd.f32 %v3395_v46, %v3012_v2  ;;  %v8896_v45 = vpop.f32.mrf.mxu0  ;;  %v10329_v46 = vld [vmem:[#allocation86_spill] sm:$0xff]  ;;  %v2096_v2 = vpack.c.bf16 %v2043_v51, %v2042_v55  ;;  %v4740_v34 = vpack.c.bf16 %v4666_v56, %v4665_v37  ;;  %v10333_v51 = vld [vmem:[#allocation88_spill] sm:$0xff]  ;;  %v4155_v37 = vld [vmem:[#allocation2 + $0x11c] sm:$0xff] }
 0x4a8   : > { %10327 = vst [vmem:[#allocation25_spill] sm:$0xff] %v8896_v45 }
 0x4a9   : > { %10326 = vst [vmem:[#allocation76_spill] sm:$0xff] %v8894_v13 }
 0x4aa   : > { %v2331_v36 = vpop.f32.mrf.mxu3  ;;  %v3400_v54 = vpop.f32.mrf.mxu2  ;;  %7377 = vmatmul.msk.bf16.gmra.mxu0 %vm997_vm2, %v4217_v8 }
 0x4ab   : > { %v2480_v33 = vadd.f32 %v2331_v36, %v1877_v1  ;;  %v3111_v36 = vld [vmem:[#allocation2 + $0x1b3] sm:$0xff] }
 0x4ac   : > { %v8901_v25 = vpop.f32.mrf.mxu1 }
 0x4ad   : > { %v3013_v38 = vadd.f32 %v10329_v46, %v2480_v33  ;;  %v3110_v33 = vld [vmem:[#allocation2 + $0x1ab] sm:$0xff] }
 0x4ae   : > { %v3163_v55 = vpack.c.bf16 %v3111_v36, %v3110_v33  ;;  %v2044_v36 = vld [vmem:[#allocation2 + $0x192] sm:$0xff] }
 0x4af   : > { %7200 = vmatmul.msk.bf16.gmra.mxu3 %vm997_vm2, %v2096_v2  ;;  %7414 = vmatmul.msk.bf16.gmra.mxu1 %vm997_vm2, %v4740_v34  ;;  %v8906_v3 = vadd.f32 %v3397_v11, %v3013_v38  ;;  %v8908_v59 = vpop.f32.mrf.mxu0  ;;  %v4154_v38 = vld [vmem:[#allocation2 + $0x114] sm:$0xff]  ;;  %v10336_v2 = vld [vmem:[#allocation31_spill] sm:$0xff] }
 0x4b0   : > { %10331 = vst [vmem:[#allocation26_spill] sm:$0xff] %v8908_v59  ;;  %v1882_v24 = vadd.f32 %v8754_v16, %v10336_v2  ;;  %v4218_v34 = vpack.c.bf16 %v4155_v37, %v4154_v38  ;;  %v4667_v33 = vld [vmem:[#allocation2 + $0x75] sm:$0xff] }
 0x4b1   : > { %10330 = vst [vmem:[#allocation78_spill] sm:$0xff] %v8906_v3  ;;  %v4668_v3 = vld [vmem:[#allocation2 + $0x7d] sm:$0xff]  ;;  %v10340_v38 = vld [vmem:[#allocation32_spill] sm:$0xff] }
 0x4b2   : > { %v2334_v1 = vpop.f32.mrf.mxu3  ;;  %v3402_v8 = vpop.f32.mrf.mxu2  ;;  %v1885_v2 = vadd.f32 %v8764_v60, %v10340_v38 }
 0x4b3   : > { %v2481_v13 = vadd.f32 %v2334_v1, %v1880_v20  ;;  %v2045_v1 = vld [vmem:[#allocation2 + $0x19a] sm:$0xff] }
 0x4b4   : > { %v8912_v45 = vpop.f32.mrf.mxu1 }
 0x4b5   : > { %v3014_v56 = vadd.f32 %v10333_v51, %v2481_v13 }
 0x4b7   : > { %7295 = vmatmul.msk.bf16.gmra.mxu2 %vm997_vm2, %v3163_v55  ;;  %v8916_v11 = vadd.f32 %v3400_v54, %v3014_v56  ;;  %v8918_v46 = vpop.f32.mrf.mxu0  ;;  %v10337_v54 = vld [vmem:[#allocation90_spill] sm:$0xff]  ;;  %v2097_v56 = vpack.c.bf16 %v2045_v1, %v2044_v36  ;;  %v4741_v55 = vpack.c.bf16 %v4668_v3, %v4667_v33  ;;  %v10341_v1 = vld [vmem:[#allocation92_spill] sm:$0xff]  ;;  %v4157_v33 = vld [vmem:[#allocation2 + $0x12c] sm:$0xff] }
 0x4b8   : > { %10335 = vst [vmem:[#allocation27_spill] sm:$0xff] %v8918_v46 }
 0x4b9   : > { %10334 = vst [vmem:[#allocation80_spill] sm:$0xff] %v8916_v11 }
 0x4ba   : > { %v2336_v53 = vpop.f32.mrf.mxu3  ;;  %v3405_v20 = vpop.f32.mrf.mxu2  ;;  %7378 = vmatmul.msk.bf16.gmra.mxu0 %vm997_vm2, %v4218_v34 }
 0x4bb   : > { %v2482_v59 = vadd.f32 %v2336_v53, %v1882_v24  ;;  %v3113_v53 = vld [vmem:[#allocation2 + $0x1c3] sm:$0xff] }
 0x4bc   : > { %v8923_v13 = vpop.f32.mrf.mxu1 }
 0x4bd   : > { %v3015_v51 = vadd.f32 %v10337_v54, %v2482_v59  ;;  %v3112_v59 = vld [vmem:[#allocation2 + $0x1bb] sm:$0xff] }
 0x4be   : > { %v3164_v36 = vpack.c.bf16 %v3113_v53, %v3112_v59  ;;  %v2046_v53 = vld [vmem:[#allocation2 + $0x1a2] sm:$0xff] }
 0x4bf   : > { %7201 = vmatmul.msk.bf16.gmra.mxu3 %vm997_vm2, %v2097_v56  ;;  %7415 = vmatmul.msk.bf16.gmra.mxu1 %vm997_vm2, %v4741_v55  ;;  %v8928_v16 = vadd.f32 %v3402_v8, %v3015_v51  ;;  %v8930_v37 = vpop.f32.mrf.mxu0  ;;  %v4156_v51 = vld [vmem:[#allocation2 + $0x124] sm:$0xff]  ;;  %v10344_v56 = vld [vmem:[#allocation33_spill] sm:$0xff] }
 0x4c0   : > { %10339 = vst [vmem:[#allocation28_spill] sm:$0xff] %v8930_v37  ;;  %v1887_v60 = vadd.f32 %v8776_v41, %v10344_v56  ;;  %v4219_v55 = vpack.c.bf16 %v4157_v33, %v4156_v51  ;;  %v4669_v59 = vld [vmem:[#allocation2 + $0x85] sm:$0xff] }
 0x4c1   : > { %10338 = vst [vmem:[#allocation82_spill] sm:$0xff] %v8928_v16  ;;  %v4670_v16 = vld [vmem:[#allocation2 + $0x8d] sm:$0xff] }
 0x4c2   : > { %v2339_v24 = vpop.f32.mrf.mxu3  ;;  %v3407_v34 = vpop.f32.mrf.mxu2 }
 0x4c3   : > { %v2483_v11 = vadd.f32 %v2339_v24, %v1885_v2  ;;  %v2047_v24 = vld [vmem:[#allocation2 + $0x1aa] sm:$0xff] }
 0x4c4   : > { %v8934_v46 = vpop.f32.mrf.mxu1 }
 0x4c5   : > { %v3016_v3 = vadd.f32 %v10341_v1, %v2483_v11 }
 0x4c7   : > { %7296 = vmatmul.msk.bf16.gmra.mxu2 %vm997_vm2, %v3164_v36  ;;  %v8938_v8 = vadd.f32 %v3405_v20, %v3016_v3  ;;  %v8940_v54 = vpop.f32.mrf.mxu0  ;;  %v10345_v20 = vld [vmem:[#allocation94_spill] sm:$0xff]  ;;  %v2098_v3 = vpack.c.bf16 %v2047_v24, %v2046_v53  ;;  %v4742_v36 = vpack.c.bf16 %v4670_v16, %v4669_v59  ;;  %v4159_v16 = vld [vmem:[#allocation2 + $0x13c] sm:$0xff]  ;;  %v4158_v59 = vld [vmem:[#allocation2 + $0x134] sm:$0xff] }
 0x4c8   : > { %10343 = vst [vmem:[#allocation29_spill] sm:$0xff] %v8940_v54  ;;  %v3114_v54 = vld [vmem:[#allocation2 + $0x1cb] sm:$0xff] }
 0x4c9   : > { %10342 = vst [vmem:[#allocation84_spill] sm:$0xff] %v8938_v8 }
 0x4ca   : > { %v2341_v38 = vpop.f32.mrf.mxu3  ;;  %v3410_v2 = vpop.f32.mrf.mxu2  ;;  %7379 = vmatmul.msk.bf16.gmra.mxu0 %vm997_vm2, %v4219_v55  ;;  %v10348_v55 = vld [vmem:[#allocation34_spill] sm:$0xff] }
 0x4cb   : > { %v2484_v37 = vadd.f32 %v2341_v38, %v1887_v60  ;;  %v3115_v60 = vld [vmem:[#allocation2 + $0x1d3] sm:$0xff] }
 0x4cc   : > { %v8945_v11 = vpop.f32.mrf.mxu1  ;;  %v3165_v24 = vpack.c.bf16 %v3115_v60, %v3114_v54  ;;  %v4671_v54 = vld [vmem:[#allocation2 + $0x95] sm:$0xff] }
 0x4cd   : > { %v3017_v1 = vadd.f32 %v10345_v20, %v2484_v37  ;;  %v4220_v20 = vpack.c.bf16 %v4159_v16, %v4158_v59  ;;  %v10353_v60 = vld [vmem:[#allocation97_spill] sm:$0xff] }
 0x4cf   : > { %7202 = vmatmul.msk.bf16.gmra.mxu3 %vm997_vm2, %v2098_v3  ;;  %7416 = vmatmul.msk.bf16.gmra.mxu1 %vm997_vm2, %v4742_v36  ;;  %v8950_v41 = vadd.f32 %v3407_v34, %v3017_v1  ;;  %v8952_v33 = vpop.f32.mrf.mxu0  ;;  %v2049_v36 = vld [vmem:[#allocation2 + $0x1ba] sm:$0xff] }
 0x4d0   : > { %10347 = vst [vmem:[#allocation30_spill] sm:$0xff] %v8952_v33 }
 0x4d1   : > { %10346 = vst [vmem:[#allocation86_spill] sm:$0xff] %v8950_v41  ;;  %v4672_v41 = vld [vmem:[#allocation2 + $0x9d] sm:$0xff] }
 0x4d2   : > { %v2344_v51 = vpop.f32.mrf.mxu3  ;;  %v3412_v56 = vpop.f32.mrf.mxu2 }
 0x4d3   : > { %v2485_v38 = vadd.f32 %v2344_v51, %v10348_v55  ;;  %v10352_v51 = vld [vmem:[#allocation35_spill] sm:$0xff] }
 0x4d4   : > { %v8955_v8 = vpop.f32.mrf.mxu1 }
 0x4d5   : > { %v3018_v37 = vadd.f32 %v10349_v62, %v2485_v38  ;;  %v2048_v62 = vld [vmem:[#allocation2 + $0x1b2] sm:$0xff] }
 0x4d7   : > { %7297 = vmatmul.msk.bf16.gmra.mxu2 %vm997_vm2, %v3165_v24  ;;  %v8959_v53 = vadd.f32 %v3410_v2, %v3018_v37  ;;  %v8961_v34 = vpop.f32.mrf.mxu0  ;;  %v2099_v2 = vpack.c.bf16 %v2049_v36, %v2048_v62  ;;  %v4743_v37 = vpack.c.bf16 %v4672_v41, %v4671_v54  ;;  %v4161_v41 = vld [vmem:[#allocation2 + $0x14c] sm:$0xff]  ;;  %v4160_v54 = vld [vmem:[#allocation2 + $0x144] sm:$0xff] }
 0x4d8   : > { %10351 = vst [vmem:[#allocation31_spill] sm:$0xff] %v8961_v34 }
 0x4d9   : > { %10350 = vst [vmem:[#allocation88_spill] sm:$0xff] %v8959_v53 }
 0x4da   : > { %v2346_v1 = vpop.f32.mrf.mxu3  ;;  %v3415_v3 = vpop.f32.mrf.mxu2  ;;  %7380 = vmatmul.msk.bf16.gmra.mxu0 %vm997_vm2, %v4220_v20  ;;  %v10356_v20 = vld [vmem:[#allocation36_spill] sm:$0xff] }
 0x4db   : > { %v2486_v55 = vadd.f32 %v2346_v1, %v10352_v51  ;;  %v3117_v51 = vld [vmem:[#allocation2 + $0x1e3] sm:$0xff] }
 0x4dc   : > { %v8965_v33 = vpop.f32.mrf.mxu1  ;;  %v3166_v36 = vpack.c.bf16 %v3117_v51, %v3116_v40  ;;  %v4673_v40 = vld [vmem:[#allocation2 + $0xa5] sm:$0xff] }
 0x4dd   : > { %v3019_v38 = vadd.f32 %v10353_v60, %v2486_v55  ;;  %v4221_v60 = vpack.c.bf16 %v4161_v41, %v4160_v54 }
 0x4df   : > { %7203 = vmatmul.msk.bf16.gmra.mxu3 %vm997_vm2, %v2099_v2  ;;  %7417 = vmatmul.msk.bf16.gmra.mxu1 %vm997_vm2, %v4743_v37  ;;  %v8970_v24 = vadd.f32 %v3412_v56, %v3019_v38  ;;  %v8972_v16 = vpop.f32.mrf.mxu0  ;;  %v2051_v37 = vld [vmem:[#allocation2 + $0x1ca] sm:$0xff] }
 0x4e0   : > { %10355 = vst [vmem:[#allocation32_spill] sm:$0xff] %v8972_v16 }
 0x4e1   : > { %10354 = vst [vmem:[#allocation90_spill] sm:$0xff] %v8970_v24  ;;  %v4674_v24 = vld [vmem:[#allocation2 + $0xad] sm:$0xff] }
 0x4e2   : > { %v2349_v59 = vpop.f32.mrf.mxu3  ;;  %v3417_v1 = vpop.f32.mrf.mxu2  ;;  %v4744_v51 = vpack.c.bf16 %v4674_v24, %v4673_v40  ;;  %v4163_v24 = vld [vmem:[#allocation2 + $0x15c] sm:$0xff] }
 0x4e3   : > { %v2487_v53 = vadd.f32 %v2349_v59, %v10356_v20  ;;  %v10359_v59 = vld [vmem:[#allocation37_spill] sm:$0xff] }
 0x4e4   : > { %v8975_v34 = vpop.f32.mrf.mxu1 }
 0x4e5   : > { %v3020_v55 = vadd.f32 %v8571_v5, %v2487_v53  ;;  %v2050_v5 = vld [vmem:[#allocation2 + $0x1c2] sm:$0xff] }
 0x4e7   : > { %7298 = vmatmul.msk.bf16.gmra.mxu2 %vm997_vm2, %v3166_v36  ;;  %v8979_v62 = vadd.f32 %v3415_v3, %v3020_v55  ;;  %v8981_v56 = vpop.f32.mrf.mxu0  ;;  %v2100_v3 = vpack.c.bf16 %v2051_v37, %v2050_v5  ;;  %v4162_v5 = vld [vmem:[#allocation2 + $0x154] sm:$0xff] }
 0x4e8   : > { %10358 = vst [vmem:[#allocation33_spill] sm:$0xff] %v8981_v56  ;;  %v3118_v56 = vld [vmem:[#allocation2 + $0x1eb] sm:$0xff]  ;;  %v4222_v40 = vpack.c.bf16 %v4163_v24, %v4162_v5 }
 0x4e9   : > { %10357 = vst [vmem:[#allocation92_spill] sm:$0xff] %v8979_v62 }
 0x4ea   : > { %v2351_v38 = vpop.f32.mrf.mxu3  ;;  %v3420_v2 = vpop.f32.mrf.mxu2  ;;  %7381 = vmatmul.msk.bf16.gmra.mxu0 %vm997_vm2, %v4221_v60  ;;  %v10362_v60 = vld [vmem:[#allocation38_spill] sm:$0xff] }
 0x4eb   : > { %v2488_v20 = vadd.f32 %v2351_v38, %v10359_v59  ;;  %v3119_v38 = vld [vmem:[#allocation2 + $0x1f3] sm:$0xff] }
 0x4ec   : > { %v8985_v16 = vpop.f32.mrf.mxu1  ;;  %v3167_v37 = vpack.c.bf16 %v3119_v38, %v3118_v56  ;;  %v4675_v56 = vld [vmem:[#allocation2 + $0xb5] sm:$0xff] }
 0x4ed   : > { %v3021_v53 = vadd.f32 %v8582_v4, %v2488_v20 }
 0x4ef   : > { %7204 = vmatmul.msk.bf16.gmra.mxu3 %vm997_vm2, %v2100_v3  ;;  %7418 = vmatmul.msk.bf16.gmra.mxu1 %vm997_vm2, %v4744_v51  ;;  %v8990_v55 = vadd.f32 %v3417_v1, %v3021_v53  ;;  %v8992_v36 = vpop.f32.mrf.mxu0  ;;  %v2053_v51 = vld [vmem:[#allocation2 + $0x1da] sm:$0xff] }
 0x4f0   : > { %10361 = vst [vmem:[#allocation34_spill] sm:$0xff] %v8992_v36 }
 0x4f1   : > { %10360 = vst [vmem:[#allocation94_spill] sm:$0xff] %v8990_v55  ;;  %v4676_v55 = vld [vmem:[#allocation2 + $0xbd] sm:$0xff] }
 0x4f2   : > { %v2354_v41 = vpop.f32.mrf.mxu3  ;;  %v3422_v54 = vpop.f32.mrf.mxu2 }
 0x4f3   : > { %v2489_v59 = vadd.f32 %v2354_v41, %v10362_v60  ;;  %v10365_v41 = vld [vmem:[#allocation39_spill] sm:$0xff] }
 0x4f4   : > { %v8995_v62 = vpop.f32.mrf.mxu1 }
 0x4f5   : > { %v3022_v4 = vadd.f32 %v8593_v0, %v2489_v59  ;;  %v2052_v0 = vld [vmem:[#allocation2 + $0x1d2] sm:$0xff]  ;;  %v4745_v59 = vpack.c.bf16 %v4676_v55, %v4675_v56 }
 0x4f6   : > { %v4165_v55 = vld [vmem:[#allocation2 + $0x16c] sm:$0xff] }
 0x4f7   : > { %7299 = vmatmul.msk.bf16.gmra.mxu2 %vm997_vm2, %v3167_v37  ;;  %v8999_v20 = vadd.f32 %v3420_v2, %v3022_v4  ;;  %v9001_v1 = vpop.f32.mrf.mxu0  ;;  %v2101_v2 = vpack.c.bf16 %v2053_v51, %v2052_v0  ;;  %v4164_v0 = vld [vmem:[#allocation2 + $0x164] sm:$0xff] }
 0x4f8   : > { %10364 = vst [vmem:[#allocation35_spill] sm:$0xff] %v9001_v1  ;;  %v3120_v1 = vld [vmem:[#allocation2 + $0x1fb] sm:$0xff]  ;;  %v4223_v56 = vpack.c.bf16 %v4165_v55, %v4164_v0 }
 0x4f9   : > { %10363 = vst [vmem:[#allocation96_spill] sm:$0xff] %v8999_v20 }
 0x4fa   : > { %v2356_v53 = vpop.f32.mrf.mxu3  ;;  %v3425_v3 = vpop.f32.mrf.mxu2  ;;  %7382 = vmatmul.msk.bf16.gmra.mxu0 %vm997_vm2, %v4222_v40  ;;  %v10368_v40 = vld [vmem:[#allocation40_spill] sm:$0xff] }
 0x4fb   : > { %v2490_v60 = vadd.f32 %v2356_v53, %v10365_v41  ;;  %v3121_v53 = vld [vmem:[#allocation2 + $0x203] sm:$0xff] }
 0x4fc   : > { %v9005_v36 = vpop.f32.mrf.mxu1  ;;  %v3168_v51 = vpack.c.bf16 %v3121_v53, %v3120_v1  ;;  %v4677_v1 = vld [vmem:[#allocation2 + $0xc5] sm:$0xff] }
 0x4fd   : > { %v3023_v38 = vadd.f32 %v8604_v61, %v2490_v60 }
 0x4ff   : > { %7205 = vmatmul.msk.bf16.gmra.mxu3 %vm997_vm2, %v2101_v2  ;;  %7419 = vmatmul.msk.bf16.gmra.mxu1 %vm997_vm2, %v4745_v59  ;;  %v9010_v4 = vadd.f32 %v3422_v54, %v3023_v38  ;;  %v9012_v37 = vpop.f32.mrf.mxu0  ;;  %v2055_v59 = vld [vmem:[#allocation2 + $0x1ea] sm:$0xff] }
 0x500   : > { %10367 = vst [vmem:[#allocation36_spill] sm:$0xff] %v9012_v37 }
 0x501   : > { %10366 = vst [vmem:[#allocation97_spill] sm:$0xff] %v9010_v4  ;;  %v4678_v4 = vld [vmem:[#allocation2 + $0xcd] sm:$0xff] }
 0x502   : > { %v2359_v24 = vpop.f32.mrf.mxu3  ;;  %v3427_v5 = vpop.f32.mrf.mxu2 }
 0x503   : > { %v2491_v41 = vadd.f32 %v2359_v24, %v10368_v40  ;;  %v10371_v24 = vld [vmem:[#allocation41_spill] sm:$0xff] }
 0x504   : > { %v9015_v20 = vpop.f32.mrf.mxu1 }
 0x505   : > { %v3024_v61 = vadd.f32 %v8615_v35, %v2491_v41  ;;  %v2054_v35 = vld [vmem:[#allocation2 + $0x1e2] sm:$0xff]  ;;  %v4746_v41 = vpack.c.bf16 %v4678_v4, %v4677_v1 }
 0x506   : > { %v4167_v4 = vld [vmem:[#allocation2 + $0x17c] sm:$0xff] }
 0x507   : > { %7300 = vmatmul.msk.bf16.gmra.mxu2 %vm997_vm2, %v3168_v51  ;;  %v9019_v60 = vadd.f32 %v3425_v3, %v3024_v61  ;;  %v9021_v54 = vpop.f32.mrf.mxu0  ;;  %v2102_v3 = vpack.c.bf16 %v2055_v59, %v2054_v35 }
 0x508   : > { %10370 = vst [vmem:[#allocation38_spill] sm:$0xff] %v9021_v54  ;;  %v3122_v54 = vld [vmem:[#allocation2 + $0x20b] sm:$0xff] }
 0x509   : > { %10369 = vst [vmem:[#allocation37_spill] sm:$0xff] %v9019_v60 }
 0x50a   : > { %v2361_v38 = vpop.f32.mrf.mxu3  ;;  %v3430_v2 = vpop.f32.mrf.mxu2  ;;  %7383 = vmatmul.msk.bf16.gmra.mxu0 %vm997_vm2, %v4223_v56  ;;  %v10374_v56 = vld [vmem:[#allocation42_spill] sm:$0xff] }
 0x50b   : > { %v2492_v40 = vadd.f32 %v2361_v38, %v10371_v24  ;;  %v3123_v38 = vld [vmem:[#allocation2 + $0x213] sm:$0xff] }
 0x50c   : > { %v9025_v37 = vpop.f32.mrf.mxu1  ;;  %v3169_v59 = vpack.c.bf16 %v3123_v38, %v3122_v54  ;;  %v4679_v54 = vld [vmem:[#allocation2 + $0xd5] sm:$0xff] }
 0x50d   : > { %v3025_v53 = vadd.f32 %v8626_v30, %v2492_v40 }
 0x50f   : > { %7206 = vmatmul.msk.bf16.gmra.mxu3 %vm997_vm2, %v2102_v3  ;;  %7420 = vmatmul.msk.bf16.gmra.mxu1 %vm997_vm2, %v4746_v41  ;;  %v9030_v61 = vadd.f32 %v3427_v5, %v3025_v53  ;;  %v9032_v51 = vpop.f32.mrf.mxu0  ;;  %v4166_v5 = vld [vmem:[#allocation2 + $0x174] sm:$0xff] }
 0x510   : > { %10373 = vst [vmem:[#allocation40_spill] sm:$0xff] %v9032_v51  ;;  %v4224_v1 = vpack.c.bf16 %v4167_v4, %v4166_v5  ;;  %v2057_v41 = vld [vmem:[#allocation2 + $0x1fa] sm:$0xff]  ;;  %v3125_v5 = vld [vmem:[#allocation2 + $0x223] sm:$0xff] }
 0x511   : > { %10372 = vst [vmem:[#allocation39_spill] sm:$0xff] %v9030_v61  ;;  %v4680_v61 = vld [vmem:[#allocation2 + $0xdd] sm:$0xff] }
 0x512   : > { %v2364_v55 = vpop.f32.mrf.mxu3  ;;  %v3432_v0 = vpop.f32.mrf.mxu2 }
 0x513   : > { %v2493_v24 = vadd.f32 %v2364_v55, %v10374_v56  ;;  %v10377_v55 = vld [vmem:[#allocation43_spill] sm:$0xff] }
 0x514   : > { %v9035_v60 = vpop.f32.mrf.mxu1 }
 0x515   : > { %v3026_v30 = vadd.f32 %v8637_v28, %v2493_v24  ;;  %v2056_v28 = vld [vmem:[#allocation2 + $0x1f2] sm:$0xff]  ;;  %v4747_v24 = vpack.c.bf16 %v4680_v61, %v4679_v54 }
 0x516   : > { %v4169_v61 = vld [vmem:[#allocation2 + $0x18c] sm:$0xff] }
 0x517   : > { %7301 = vmatmul.msk.bf16.gmra.mxu2 %vm997_vm2, %v3169_v59  ;;  %v9039_v40 = vadd.f32 %v3430_v2, %v3026_v30  ;;  %v9041_v35 = vpop.f32.mrf.mxu0  ;;  %v2103_v2 = vpack.c.bf16 %v2057_v41, %v2056_v28 }
 0x518   : > { %10376 = vst [vmem:[#allocation42_spill] sm:$0xff] %v9041_v35  ;;  %v3124_v35 = vld [vmem:[#allocation2 + $0x21b] sm:$0xff] }
 0x519   : > { %10375 = vst [vmem:[#allocation41_spill] sm:$0xff] %v9039_v40  ;;  %v3170_v41 = vpack.c.bf16 %v3125_v5, %v3124_v35 }
 0x51a   : > { %v2366_v53 = vpop.f32.mrf.mxu3  ;;  %v3435_v3 = vpop.f32.mrf.mxu2  ;;  %7384 = vmatmul.msk.bf16.gmra.mxu0 %vm997_vm2, %v4224_v1  ;;  %v10380_v1 = vld [vmem:[#allocation44_spill] sm:$0xff] }
 0x51b   : > { %v2494_v56 = vadd.f32 %v2366_v53, %v10377_v55 }
 0x51c   : > { %v9045_v51 = vpop.f32.mrf.mxu1 }
 0x51d   : > { %v3027_v38 = vadd.f32 %v8648_v15, %v2494_v56 }
 0x51f   : > { %7207 = vmatmul.msk.bf16.gmra.mxu3 %vm997_vm2, %v2103_v2  ;;  %7421 = vmatmul.msk.bf16.gmra.mxu1 %vm997_vm2, %v4747_v24  ;;  %v9050_v30 = vadd.f32 %v3432_v0, %v3027_v38  ;;  %v9052_v53 = vpop.f32.mrf.mxu0  ;;  %v4168_v0 = vld [vmem:[#allocation2 + $0x184] sm:$0xff]  ;;  %v4682_v24 = vld [vmem:[#allocation2 + $0xed] sm:$0xff] }
 0x520   : > { %10379 = vst [vmem:[#allocation110_spill] sm:$0xff] %v9052_v53  ;;  %v4225_v28 = vpack.c.bf16 %v4169_v61, %v4168_v0  ;;  %v2059_v2 = vld [vmem:[#allocation2 + $0x20a] sm:$0xff]  ;;  %v3127_v61 = vld [vmem:[#allocation2 + $0x233] sm:$0xff] }
 0x521   : > { %10378 = vst [vmem:[#allocation43_spill] sm:$0xff] %v9050_v30  ;;  %v10382_v30 = vld [vmem:[#allocation45_spill] sm:$0xff]  ;;  %v10386_v0 = vld [vmem:[#allocation46_spill] sm:$0xff] }
 0x522   : > { %v2369_v59 = vpop.f32.mrf.mxu3  ;;  %v3437_v4 = vpop.f32.mrf.mxu2 }
 0x523   : > { %v2495_v55 = vadd.f32 %v2369_v59, %v10380_v1  ;;  %v2058_v1 = vld [vmem:[#allocation2 + $0x202] sm:$0xff] }
 0x524   : > { %v9055_v40 = vpop.f32.mrf.mxu1 }
 0x525   : > { %v3028_v15 = vadd.f32 %v8659_v7, %v2495_v55  ;;  %v4681_v7 = vld [vmem:[#allocation2 + $0xe5] sm:$0xff] }
 0x526   : > { %v4748_v55 = vpack.c.bf16 %v4682_v24, %v4681_v7 }
 0x527   : > { %7302 = vmatmul.msk.bf16.gmra.mxu2 %vm997_vm2, %v3170_v41  ;;  %v9059_v56 = vadd.f32 %v3435_v3, %v3028_v15  ;;  %v9065_v35 = vpop.f32.mrf.mxu0  ;;  %v2104_v3 = vpack.c.bf16 %v2059_v2, %v2058_v1 }
 0x528   : > { %10384 = vst [vmem:[#allocation111_spill] sm:$0xff] %v9065_v35 }
 0x529   : > { %10381 = vst [vmem:[#allocation44_spill] sm:$0xff] %v9059_v56  ;;  %v3126_v56 = vld [vmem:[#allocation2 + $0x22b] sm:$0xff] }
 0x52a   : > { %v2371_v54 = vpop.f32.mrf.mxu3  ;;  %v3440_v38 = vpop.f32.mrf.mxu2  ;;  %7385 = vmatmul.msk.bf16.gmra.mxu0 %vm997_vm2, %v4225_v28 }
 0x52b   : > { %v2496_v53 = vadd.f32 %v2371_v54, %v10382_v30 }
 0x52c   : > { %v9063_v59 = vpop.f32.mrf.mxu1 }
 0x52d   : > { %10383 = vst [vmem:[#allocation45_spill] sm:$0xff] %v9063_v59  ;;  %v3029_v5 = vadd.f32 %v8670_v23, %v2496_v53  ;;  %v3171_v59 = vpack.c.bf16 %v3127_v61, %v3126_v56  ;;  %v4171_v23 = vld [vmem:[#allocation2 + $0x19c] sm:$0xff] }
 0x52e   : > { %v4683_v56 = vld [vmem:[#allocation2 + $0xf5] sm:$0xff] }
 0x52f   : > { %7208 = vmatmul.msk.bf16.gmra.mxu3 %vm997_vm2, %v2104_v3  ;;  %7422 = vmatmul.msk.bf16.gmra.mxu1 %vm997_vm2, %v4748_v55  ;;  %v9070_v15 = vadd.f32 %v3437_v4, %v3029_v5  ;;  %v9076_v53 = vpop.f32.mrf.mxu0  ;;  %v4170_v4 = vld [vmem:[#allocation2 + $0x194] sm:$0xff]  ;;  %v4684_v3 = vld [vmem:[#allocation2 + $0xfd] sm:$0xff]  ;;  %v10389_v55 = vld [vmem:[#allocation47_spill] sm:$0xff] }
 0x530   : > { %10387 = vst [vmem:[#allocation46_spill] sm:$0xff] %v9076_v53  ;;  %v4226_v24 = vpack.c.bf16 %v4171_v23, %v4170_v4  ;;  %v2061_v5 = vld [vmem:[#allocation2 + $0x21a] sm:$0xff] }
 0x531   : > { %10385 = vst [vmem:[#allocation112_spill] sm:$0xff] %v9070_v15  ;;  %v3128_v15 = vld [vmem:[#allocation2 + $0x23b] sm:$0xff] }
 0x532   : > { %v2374_v41 = vpop.f32.mrf.mxu3  ;;  %v3442_v30 = vpop.f32.mrf.mxu2 }
 0x533   : > { %v2497_v28 = vadd.f32 %v2374_v41, %v10386_v0 }
 0x534   : > { %v9073_v54 = vpop.f32.mrf.mxu1 }
 0x535   : > { %v3030_v35 = vadd.f32 %v8681_v43, %v2497_v28  ;;  %v2060_v43 = vld [vmem:[#allocation2 + $0x212] sm:$0xff] }
 0x536   : > { %v2105_v28 = vpack.c.bf16 %v2061_v5, %v2060_v43 }
 0x537   : > { %7303 = vmatmul.msk.bf16.gmra.mxu2 %vm997_vm2, %v3171_v59  ;;  %v9079_v2 = vadd.f32 %v3440_v38, %v3030_v35  ;;  %v4749_v59 = vpack.c.bf16 %v4684_v3, %v4683_v56  ;;  %v9090_v35 = vpop.f32.mrf.mxu0  ;;  %v4173_v3 = vld [vmem:[#allocation2 + $0x1ac] sm:$0xff] }
 0x538   : > { %10391 = vst [vmem:[#allocation114_spill] sm:$0xff] %v9090_v35 }
 0x539   : > { %10388 = vst [vmem:[#allocation113_spill] sm:$0xff] %v9079_v2 }
 0x53a   : > { %v2376_v1 = vpop.f32.mrf.mxu3  ;;  %v3445_v7 = vpop.f32.mrf.mxu2  ;;  %7386 = vmatmul.msk.bf16.gmra.mxu0 %vm997_vm2, %v4226_v24  ;;  %v10392_v24 = vld [vmem:[#allocation48_spill] sm:$0xff] }
 0x53b   : > { %v2498_v41 = vadd.f32 %v2376_v1, %v10389_v55  ;;  %v3129_v1 = vld [vmem:[#allocation2 + $0x243] sm:$0xff] }
 0x53c   : > { %v9083_v0 = vpop.f32.mrf.mxu1  ;;  %v3172_v5 = vpack.c.bf16 %v3129_v1, %v3128_v15  ;;  %v4685_v15 = vld [vmem:[#allocation2 + $0x105] sm:$0xff] }
 0x53d   : > { %v3031_v61 = vadd.f32 %v8692_v49, %v2498_v41 }
 0x53f   : > { %7209 = vmatmul.msk.bf16.gmra.mxu3 %vm997_vm2, %v2105_v28  ;;  %7423 = vmatmul.msk.bf16.gmra.mxu1 %vm997_vm2, %v4749_v59  ;;  %v9088_v38 = vadd.f32 %v3442_v30, %v3031_v61  ;;  %v4172_v30 = vld [vmem:[#allocation2 + $0x1a4] sm:$0xff]  ;;  %v4686_v59 = vld [vmem:[#allocation2 + $0x10d] sm:$0xff] }
 0x540   : > { %v4227_v43 = vpack.c.bf16 %v4173_v3, %v4172_v30  ;;  %v2063_v28 = vld [vmem:[#allocation2 + $0x22a] sm:$0xff]  ;;  %v3131_v30 = vld [vmem:[#allocation2 + $0x253] sm:$0xff] }
 0x541   : > { %10390 = vst [vmem:[#allocation47_spill] sm:$0xff] %v9088_v38  ;;  %v9099_v38 = vpop.f32.mrf.mxu0 }
 0x542   : > { %v2379_v23 = vpop.f32.mrf.mxu3  ;;  %v3447_v4 = vpop.f32.mrf.mxu2  ;;  %10394 = vst [vmem:[#allocation115_spill] sm:$0xff] %v9099_v38 }
 0x543   : > { %v2499_v55 = vadd.f32 %v2379_v23, %v10392_v24  ;;  %v10395_v23 = vld [vmem:[#allocation49_spill] sm:$0xff] }
 0x544   : > { %v9093_v2 = vpop.f32.mrf.mxu1 }
 0x545   : > { %v3032_v49 = vadd.f32 %v8703_v63, %v2499_v55  ;;  %v2062_v63 = vld [vmem:[#allocation2 + $0x222] sm:$0xff]  ;;  %v4750_v55 = vpack.c.bf16 %v4686_v59, %v4685_v15 }
 0x546   : > { %v4175_v59 = vld [vmem:[#allocation2 + $0x1bc] sm:$0xff] }
 0x547   : > { %7304 = vmatmul.msk.bf16.gmra.mxu2 %vm997_vm2, %v3172_v5  ;;  %v9097_v41 = vadd.f32 %v3445_v7, %v3032_v49  ;;  %v2106_v7 = vpack.c.bf16 %v2063_v28, %v2062_v63 }
 0x549   : > { %10393 = vst [vmem:[#allocation48_spill] sm:$0xff] %v9097_v41  ;;  %v3130_v41 = vld [vmem:[#allocation2 + $0x24b] sm:$0xff]  ;;  %v9113_v38 = vpop.f32.mrf.mxu0 }
 0x54a   : > { %v2381_v56 = vpop.f32.mrf.mxu3  ;;  %v3450_v61 = vpop.f32.mrf.mxu2  ;;  %7387 = vmatmul.msk.bf16.gmra.mxu0 %vm997_vm2, %v4227_v43  ;;  %v3173_v28 = vpack.c.bf16 %v3131_v30, %v3130_v41 }
 0x54b   : > { %v2500_v24 = vadd.f32 %v2381_v56, %v10395_v23  ;;  %v10397_v56 = vld [vmem:[#allocation50_spill] sm:$0xff] }
 0x54c   : > { %v9103_v35 = vpop.f32.mrf.mxu1  ;;  %10398 = vst [vmem:[#allocation50_spill] sm:$0xff] %v9113_v38  ;;  %v2064_v38 = vld [vmem:[#allocation2 + $0x232] sm:$0xff] }
 0x54d   : > { %v3033_v1 = vadd.f32 %v8714_v21, %v2500_v24 }
 0x54f   : > { %7210 = vmatmul.msk.bf16.gmra.mxu3 %vm997_vm2, %v2106_v7  ;;  %7424 = vmatmul.msk.bf16.gmra.mxu1 %vm997_vm2, %v4750_v55  ;;  %v9108_v49 = vadd.f32 %v3447_v4, %v3033_v1  ;;  %v4174_v4 = vld [vmem:[#allocation2 + $0x1b4] sm:$0xff]  ;;  %v4688_v55 = vld [vmem:[#allocation2 + $0x11d] sm:$0xff] }
 0x550   : > { %v4228_v63 = vpack.c.bf16 %v4175_v59, %v4174_v4  ;;  %v2065_v7 = vld [vmem:[#allocation2 + $0x23a] sm:$0xff]  ;;  %v3133_v4 = vld [vmem:[#allocation2 + $0x263] sm:$0xff] }
 0x551   : > { %10396 = vst [vmem:[#allocation49_spill] sm:$0xff] %v9108_v49  ;;  %v2107_v30 = vpack.c.bf16 %v2065_v7, %v2064_v38  ;;  %v4177_v7 = vld [vmem:[#allocation2 + $0x1cc] sm:$0xff] }
 0x552   : > { %v2384_v5 = vpop.f32.mrf.mxu3  ;;  %v3452_v3 = vpop.f32.mrf.mxu2 }
 0x553   : > { %v2501_v23 = vadd.f32 %v2384_v5, %v10397_v56  ;;  %v10400_v5 = vld [vmem:[#allocation51_spill] sm:$0xff] }
 0x554   : > { %v9111_v43 = vpop.f32.mrf.mxu1 }
 0x555   : > { %v3034_v21 = vadd.f32 %v8725_v14, %v2501_v23  ;;  %v4687_v14 = vld [vmem:[#allocation2 + $0x115] sm:$0xff] }
 0x556   : > { %v4751_v23 = vpack.c.bf16 %v4688_v55, %v4687_v14 }
 0x557   : > { %7305 = vmatmul.msk.bf16.gmra.mxu2 %vm997_vm2, %v3173_v28  ;;  %v9117_v24 = vadd.f32 %v3450_v61, %v3034_v21  ;;  %v9124_v61 = vpop.f32.mrf.mxu0 }
 0x558   : > { %10401 = vst [vmem:[#allocation51_spill] sm:$0xff] %v9124_v61 }
 0x559   : > { %10399 = vst [vmem:[#allocation116_spill] sm:$0xff] %v9117_v24  ;;  %v3132_v24 = vld [vmem:[#allocation2 + $0x25b] sm:$0xff] }
 0x55a   : > { %v2386_v15 = vpop.f32.mrf.mxu3  ;;  %v3455_v1 = vpop.f32.mrf.mxu2  ;;  %7388 = vmatmul.msk.bf16.gmra.mxu0 %vm997_vm2, %v4228_v63  ;;  %v10403_v63 = vld [vmem:[#allocation52_spill] sm:$0xff]  ;;  %v3174_v38 = vpack.c.bf16 %v3133_v4, %v3132_v24  ;;  %v4689_v24 = vld [vmem:[#allocation2 + $0x125] sm:$0xff] }
 0x55b   : > { %v2502_v56 = vadd.f32 %v2386_v15, %v10400_v5 }
 0x55c   : > { %v9121_v49 = vpop.f32.mrf.mxu1 }
 0x55d   : > { %v3035_v41 = vadd.f32 %v8736_v12, %v2502_v56  ;;  %v4176_v56 = vld [vmem:[#allocation2 + $0x1c4] sm:$0xff] }
 0x55f   : > { %7211 = vmatmul.msk.bf16.gmra.mxu3 %vm997_vm2, %v2107_v30  ;;  %7425 = vmatmul.msk.bf16.gmra.mxu1 %vm997_vm2, %v4751_v23  ;;  %v9128_v21 = vadd.f32 %v3452_v3, %v3035_v41  ;;  %v9137_v14 = vpop.f32.mrf.mxu0  ;;  %v4229_v3 = vpack.c.bf16 %v4177_v7, %v4176_v56  ;;  %v2067_v23 = vld [vmem:[#allocation2 + $0x24a] sm:$0xff]  ;;  %v3135_v56 = vld [vmem:[#allocation2 + $0x273] sm:$0xff] }
 0x560   : > { %10405 = vst [vmem:[#allocation118_spill] sm:$0xff] %v9137_v14  ;;  %v3134_v14 = vld [vmem:[#allocation2 + $0x26b] sm:$0xff] }
 0x561   : > { %10402 = vst [vmem:[#allocation117_spill] sm:$0xff] %v9128_v21  ;;  %v4690_v21 = vld [vmem:[#allocation2 + $0x12d] sm:$0xff] }
 0x562   : > { %v2389_v28 = vpop.f32.mrf.mxu3  ;;  %v3457_v59 = vpop.f32.mrf.mxu2 }
 0x563   : > { %v2503_v15 = vadd.f32 %v2389_v28, %v10403_v63  ;;  %v10406_v28 = vld [vmem:[#allocation53_spill] sm:$0xff] }
 0x564   : > { %v9131_v5 = vpop.f32.mrf.mxu1 }
 0x565   : > { %v3036_v12 = vadd.f32 %v8747_v31, %v2503_v15  ;;  %v2066_v31 = vld [vmem:[#allocation2 + $0x242] sm:$0xff]  ;;  %v4752_v15 = vpack.c.bf16 %v4690_v21, %v4689_v24 }
 0x566   : > { %v4179_v21 = vld [vmem:[#allocation2 + $0x1dc] sm:$0xff] }
 0x567   : > { %7306 = vmatmul.msk.bf16.gmra.mxu2 %vm997_vm2, %v3174_v38  ;;  %v9135_v55 = vadd.f32 %v3455_v1, %v3036_v12  ;;  %v2108_v1 = vpack.c.bf16 %v2067_v23, %v2066_v31  ;;  %v3175_v23 = vpack.c.bf16 %v3135_v56, %v3134_v14 }
 0x569   : > { %10404 = vst [vmem:[#allocation52_spill] sm:$0xff] %v9135_v55 }
 0x56a   : > { %v2391_v41 = vpop.f32.mrf.mxu3  ;;  %v3460_v30 = vpop.f32.mrf.mxu2  ;;  %7389 = vmatmul.msk.bf16.gmra.mxu0 %vm997_vm2, %v4229_v3  ;;  %v10409_v3 = vld [vmem:[#allocation54_spill] sm:$0xff] }
 0x56b   : > { %v2504_v63 = vadd.f32 %v2391_v41, %v10406_v28  ;;  %v9148_v41 = vpop.f32.mrf.mxu0 }
 0x56c   : > { %v9141_v61 = vpop.f32.mrf.mxu1  ;;  %10408 = vst [vmem:[#allocation119_spill] sm:$0xff] %v9148_v41 }
 0x56d   : > { %v3037_v4 = vadd.f32 %v8758_v26, %v2504_v63 }
 0x56f   : > { %7212 = vmatmul.msk.bf16.gmra.mxu3 %vm997_vm2, %v2108_v1  ;;  %7426 = vmatmul.msk.bf16.gmra.mxu1 %vm997_vm2, %v4752_v15  ;;  %v9146_v12 = vadd.f32 %v3457_v59, %v3037_v4  ;;  %v4178_v59 = vld [vmem:[#allocation2 + $0x1d4] sm:$0xff]  ;;  %v4692_v15 = vld [vmem:[#allocation2 + $0x13d] sm:$0xff] }
 0x570   : > { %v4230_v31 = vpack.c.bf16 %v4179_v21, %v4178_v59  ;;  %v2069_v1 = vld [vmem:[#allocation2 + $0x25a] sm:$0xff]  ;;  %v3137_v59 = vld [vmem:[#allocation2 + $0x283] sm:$0xff] }
 0x571   : > { %10407 = vst [vmem:[#allocation53_spill] sm:$0xff] %v9146_v12  ;;  %v10411_v12 = vld [vmem:[#allocation55_spill] sm:$0xff]  ;;  %v3136_v21 = vld [vmem:[#allocation2 + $0x27b] sm:$0xff] }
 0x572   : > { %v2394_v38 = vpop.f32.mrf.mxu3  ;;  %v3462_v7 = vpop.f32.mrf.mxu2  ;;  %v3176_v53 = vpack.c.bf16 %v3137_v59, %v3136_v21  ;;  %v4693_v21 = vld [vmem:[#allocation2 + $0x145] sm:$0xff] }
 0x573   : > { %v2505_v28 = vadd.f32 %v2394_v38, %v10409_v3  ;;  %v2068_v3 = vld [vmem:[#allocation2 + $0x252] sm:$0xff]  ;;  %v9161_v14 = vpop.f32.mrf.mxu0 }
 0x574   : > { %v9151_v55 = vpop.f32.mrf.mxu1  ;;  %10412 = vst [vmem:[#allocation55_spill] sm:$0xff] %v9161_v14 }
 0x575   : > { %v3038_v26 = vadd.f32 %v8769_v47, %v2505_v28  ;;  %v4691_v47 = vld [vmem:[#allocation2 + $0x135] sm:$0xff] }
 0x576   : > { %v4753_v28 = vpack.c.bf16 %v4692_v15, %v4691_v47 }
 0x577   : > { %7307 = vmatmul.msk.bf16.gmra.mxu2 %vm997_vm2, %v3175_v23  ;;  %v9155_v63 = vadd.f32 %v3460_v30, %v3038_v26  ;;  %v2109_v30 = vpack.c.bf16 %v2069_v1, %v2068_v3 }
 0x579   : > { %10410 = vst [vmem:[#allocation54_spill] sm:$0xff] %v9155_v63 }
 0x57a   : > { %v2396_v24 = vpop.f32.mrf.mxu3  ;;  %v3465_v4 = vpop.f32.mrf.mxu2  ;;  %7390 = vmatmul.msk.bf16.gmra.mxu0 %vm997_vm2, %v4230_v31  ;;  %v10414_v31 = vld [vmem:[#allocation57_spill] sm:$0xff] }
 0x57b   : > { %v2506_v41 = vadd.f32 %v2396_v24, %v10411_v12 }
 0x57c   : > { %v9159_v38 = vpop.f32.mrf.mxu1 }
 0x57d   : > { %v3039_v56 = vadd.f32 %v8780_v10, %v2506_v41  ;;  %v4181_v10 = vld [vmem:[#allocation2 + $0x1ec] sm:$0xff]  ;;  %v9172_v41 = vpop.f32.mrf.mxu0 }
 0x57f   : > { %7213 = vmatmul.msk.bf16.gmra.mxu3 %vm997_vm2, %v2109_v30  ;;  %7427 = vmatmul.msk.bf16.gmra.mxu1 %vm997_vm2, %v4753_v28  ;;  %v9166_v26 = vadd.f32 %v3462_v7, %v3039_v56  ;;  %v4180_v7 = vld [vmem:[#allocation2 + $0x1e4] sm:$0xff]  ;;  %v4694_v30 = vld [vmem:[#allocation2 + $0x14d] sm:$0xff] }
 0x580   : > { %v4231_v15 = vpack.c.bf16 %v4181_v10, %v4180_v7  ;;  %v2071_v56 = vld [vmem:[#allocation2 + $0x26a] sm:$0xff] }
 0x581   : > { %10413 = vst [vmem:[#allocation120_spill] sm:$0xff] %v9166_v26  ;;  %v10416_v28 = vld [vmem:[#allocation59_spill] sm:$0xff]  ;;  %v5192_v26 = vld [vmem:[#allocation2 + $0x36] sm:$0xff] }
 0x582   : > { %v2399_v23 = vpop.f32.mrf.mxu3  ;;  %v3467_v12 = vpop.f32.mrf.mxu2 }
 0x583   : > { %v2507_v24 = vadd.f32 %v2399_v23, %v10414_v31 }
 0x584   : > { %v9169_v63 = vpop.f32.mrf.mxu1 }
 0x585   : > { %v3040_v14 = vadd.f32 %v8791_v29, %v2507_v24  ;;  %v2070_v29 = vld [vmem:[#allocation2 + $0x262] sm:$0xff] }
 0x586   : > { %v2110_v24 = vpack.c.bf16 %v2071_v56, %v2070_v29 }
 0x587   : > { %7308 = vmatmul.msk.bf16.gmra.mxu2 %vm997_vm2, %v3176_v53  ;;  %v9175_v1 = vadd.f32 %v3465_v4, %v3040_v14  ;;  %v4754_v53 = vpack.c.bf16 %v4694_v30, %v4693_v21  ;;  %v9186_v14 = vpop.f32.mrf.mxu0  ;;  %v4183_v30 = vld [vmem:[#allocation2 + $0x1fc] sm:$0xff] }
 0x588   : > { %10418 = vst [vmem:[#allocation121_spill] sm:$0xff] %v9186_v14 }
 0x589   : > { %10415 = vst [vmem:[#allocation57_spill] sm:$0xff] %v9175_v1 }
 0x58a   : > { %v2401_v3 = vpop.f32.mrf.mxu3  ;;  %v3470_v47 = vpop.f32.mrf.mxu2  ;;  %7391 = vmatmul.msk.bf16.gmra.mxu0 %vm997_vm2, %v4231_v15  ;;  %v10419_v15 = vld [vmem:[#allocation61_spill] sm:$0xff] }
 0x58b   : > { %v2508_v23 = vadd.f32 %v2401_v3, %v10416_v28  ;;  %v5193_v3 = vld [vmem:[#allocation2 + $0x3e] sm:$0xff] }
 0x58c   : > { %v9179_v31 = vpop.f32.mrf.mxu1  ;;  %v5270_v56 = vpack.c.bf16 %v5193_v3, %v5192_v26  ;;  %v4695_v26 = vld [vmem:[#allocation2 + $0x155] sm:$0xff] }
 0x58d   : > { %v3041_v59 = vadd.f32 %v8802_v52, %v2508_v23 }
 0x58f   : > { %7214 = vmatmul.msk.bf16.gmra.mxu3 %vm997_vm2, %v2110_v24  ;;  %7428 = vmatmul.msk.bf16.gmra.mxu1 %vm997_vm2, %v4754_v53  ;;  %v9184_v4 = vadd.f32 %v3467_v12, %v3041_v59  ;;  %v4182_v12 = vld [vmem:[#allocation2 + $0x1f4] sm:$0xff]  ;;  %v3594_v24 = vld [vmem:[#allocation2 + $0x24] sm:$0xff] }
 0x590   : > { %v4232_v29 = vpack.c.bf16 %v4183_v30, %v4182_v12  ;;  %v4696_v53 = vld [vmem:[#allocation2 + $0x15d] sm:$0xff]  ;;  %v5195_v12 = vld [vmem:[#allocation2 + $0x4e] sm:$0xff] }
 0x591   : > { %10417 = vst [vmem:[#allocation59_spill] sm:$0xff] %v9184_v4  ;;  %v9195_v4 = vpop.f32.mrf.mxu0 }
 0x592   : > { %v2404_v10 = vpop.f32.mrf.mxu3  ;;  %v3472_v7 = vpop.f32.mrf.mxu2  ;;  %10421 = vst [vmem:[#allocation122_spill] sm:$0xff] %v9195_v4 }
 0x593   : > { %v2509_v28 = vadd.f32 %v2404_v10, %v10419_v15  ;;  %v10422_v10 = vld [vmem:[#allocation63_spill] sm:$0xff] }
 0x594   : > { %v9189_v1 = vpop.f32.mrf.mxu1 }
 0x595   : > { %v3042_v52 = vadd.f32 %v8813_v32, %v2509_v28  ;;  %v3593_v32 = vld [vmem:[#allocation2 + $0x1c] sm:$0xff]  ;;  %v4755_v28 = vpack.c.bf16 %v4696_v53, %v4695_v26  ;;  %v4185_v53 = vld [vmem:[#allocation2 + $0x20c] sm:$0xff] }
 0x597   : > { %7458 = vmatmul.msk.bf16.vlgmr.msra.gmra.mxu2 %vm997_vm2, %v5270_v56  ;;  %v9193_v23 = vadd.f32 %v3470_v47, %v3042_v52  ;;  %v3671_v47 = vpack.c.bf16 %v3594_v24, %v3593_v32 }
 0x599   : > { %10420 = vst [vmem:[#allocation61_spill] sm:$0xff] %v9193_v23  ;;  %v5194_v23 = vld [vmem:[#allocation2 + $0x46] sm:$0xff]  ;;  %v9209_v4 = vpop.f32.mrf.mxu0 }
 0x59a   : > { %v2406_v21 = vpop.f32.mrf.mxu3  ;;  %v3475_v59 = vpop.f32.mrf.mxu2  ;;  %7392 = vmatmul.msk.bf16.gmra.mxu0 %vm997_vm2, %v4232_v29  ;;  %v5271_v24 = vpack.c.bf16 %v5195_v12, %v5194_v23 }
 0x59b   : > { %v2510_v15 = vadd.f32 %v2406_v21, %v10422_v10  ;;  %v10424_v21 = vld [vmem:[#allocation65_spill] sm:$0xff] }
 0x59c   : > { %v9199_v14 = vpop.f32.mrf.mxu1  ;;  %10425 = vst [vmem:[#allocation65_spill] sm:$0xff] %v9209_v4  ;;  %v3595_v4 = vld [vmem:[#allocation2 + $0x2c] sm:$0xff] }
 0x59d   : > { %v3043_v3 = vadd.f32 %v8824_v57, %v2510_v15 }
 0x59f   : > { %7317 = vmatmul.msk.bf16.vlgmr.msrb.gmra.mxu3 %vm997_vm2, %v3671_v47  ;;  %7429 = vmatmul.msk.bf16.gmra.mxu1 %vm997_vm2, %v4755_v28  ;;  %v9204_v52 = vadd.f32 %v3472_v7, %v3043_v3  ;;  %v4184_v7 = vld [vmem:[#allocation2 + $0x204] sm:$0xff]  ;;  %v3596_v47 = vld [vmem:[#allocation2 + $0x34] sm:$0xff] }
 0x5a0   : > { %v4233_v32 = vpack.c.bf16 %v4185_v53, %v4184_v7  ;;  %v4698_v28 = vld [vmem:[#allocation2 + $0x16d] sm:$0xff]  ;;  %v3672_v12 = vpack.c.bf16 %v3596_v47, %v3595_v4  ;;  %v5197_v7 = vld [vmem:[#allocation2 + $0x5e] sm:$0xff] }
 0x5a1   : > { %10423 = vst [vmem:[#allocation63_spill] sm:$0xff] %v9204_v52  ;;  %v4187_v47 = vld [vmem:[#allocation2 + $0x21c] sm:$0xff] }
 0x5a2   : > { %v2409_v56 = vpop.f32.mrf.mxu3  ;;  %v3477_v30 = vpop.f32.mrf.mxu2 }
 0x5a3   : > { %v2511_v10 = vadd.f32 %v2409_v56, %v10424_v21  ;;  %v10427_v56 = vld [vmem:[#allocation67_spill] sm:$0xff] }
 0x5a4   : > { %v9207_v29 = vpop.f32.mrf.mxu1 }
 0x5a5   : > { %v3044_v57 = vadd.f32 %v8835_v39, %v2511_v10  ;;  %v4697_v39 = vld [vmem:[#allocation2 + $0x165] sm:$0xff] }
 0x5a6   : > { %v4756_v10 = vpack.c.bf16 %v4698_v28, %v4697_v39 }
 0x5a7   : > { %7459 = vmatmul.msk.bf16.gmra.mxu2 %vm997_vm2, %v5271_v24  ;;  %v9213_v15 = vadd.f32 %v3475_v59, %v3044_v57  ;;  %v9220_v59 = vpop.f32.mrf.mxu0 }
 0x5a8   : > { %10428 = vst [vmem:[#allocation67_spill] sm:$0xff] %v9220_v59  ;;  %v3597_v59 = vld [vmem:[#allocation2 + $0x3c] sm:$0xff] }
 0x5a9   : > { %10426 = vst [vmem:[#allocation123_spill] sm:$0xff] %v9213_v15  ;;  %v5196_v15 = vld [vmem:[#allocation2 + $0x56] sm:$0xff] }
 0x5aa   : > { %v2411_v26 = vpop.f32.mrf.mxu3  ;;  %v3480_v3 = vpop.f32.mrf.mxu2  ;;  %7393 = vmatmul.msk.bf16.gmra.mxu0 %vm997_vm2, %v4233_v32  ;;  %v10430_v32 = vld [vmem:[#allocation69_spill] sm:$0xff]  ;;  %v5272_v4 = vpack.c.bf16 %v5197_v7, %v5196_v15 }
 0x5ab   : > { %v2512_v21 = vadd.f32 %v2411_v26, %v10427_v56 }
 0x5ac   : > { %v9217_v52 = vpop.f32.mrf.mxu1 }
 0x5ad   : > { %v3045_v23 = vadd.f32 %v8846_v18, %v2512_v21  ;;  %v4186_v21 = vld [vmem:[#allocation2 + $0x214] sm:$0xff] }
 0x5af   : > { %7318 = vmatmul.msk.bf16.gmra.mxu3 %vm997_vm2, %v3672_v12  ;;  %7430 = vmatmul.msk.bf16.gmra.mxu1 %vm997_vm2, %v4756_v10  ;;  %v9224_v57 = vadd.f32 %v3477_v30, %v3045_v23  ;;  %v9233_v39 = vpop.f32.mrf.mxu0  ;;  %v4234_v30 = vpack.c.bf16 %v4187_v47, %v4186_v21  ;;  %v3598_v10 = vld [vmem:[#allocation2 + $0x44] sm:$0xff]  ;;  %v5199_v21 = vld [vmem:[#allocation2 + $0x6e] sm:$0xff] }
 0x5b0   : > { %10432 = vst [vmem:[#allocation125_spill] sm:$0xff] %v9233_v39  ;;  %v4189_v39 = vld [vmem:[#allocation2 + $0x22c] sm:$0xff] }
 0x5b1   : > { %10429 = vst [vmem:[#allocation124_spill] sm:$0xff] %v9224_v57  ;;  %v4700_v57 = vld [vmem:[#allocation2 + $0x17d] sm:$0xff] }
 0x5b2   : > { %v2414_v24 = vpop.f32.mrf.mxu3  ;;  %v3482_v53 = vpop.f32.mrf.mxu2 }
 0x5b3   : > { %v2513_v26 = vadd.f32 %v2414_v24, %v10430_v32  ;;  %v10433_v24 = vld [vmem:[#allocation71_spill] sm:$0xff] }
 0x5b4   : > { %v9227_v56 = vpop.f32.mrf.mxu1 }
 0x5b5   : > { %v3046_v18 = vadd.f32 %v8857_v22, %v2513_v26  ;;  %v4699_v22 = vld [vmem:[#allocation2 + $0x175] sm:$0xff] }
 0x5b6   : > { %v4757_v26 = vpack.c.bf16 %v4700_v57, %v4699_v22 }
 0x5b7   : > { %7460 = vmatmul.msk.bf16.gmra.mxu2 %vm997_vm2, %v5272_v4  ;;  %v9231_v28 = vadd.f32 %v3480_v3, %v3046_v18  ;;  %v3673_v3 = vpack.c.bf16 %v3598_v10, %v3597_v59 }
 0x5b9   : > { %10431 = vst [vmem:[#allocation69_spill] sm:$0xff] %v9231_v28  ;;  %v5198_v28 = vld [vmem:[#allocation2 + $0x66] sm:$0xff] }
 0x5ba   : > { %v2416_v23 = vpop.f32.mrf.mxu3  ;;  %v3485_v12 = vpop.f32.mrf.mxu2  ;;  %7394 = vmatmul.msk.bf16.gmra.mxu0 %vm997_vm2, %v4234_v30  ;;  %v10436_v30 = vld [vmem:[#allocation73_spill] sm:$0xff] }
 0x5bb   : > { %v2514_v32 = vadd.f32 %v2416_v23, %v10433_v24  ;;  %v9244_v23 = vpop.f32.mrf.mxu0 }
 0x5bc   : > { %v9238_v7 = vpop.f32.mrf.mxu1  ;;  %10435 = vst [vmem:[#allocation126_spill] sm:$0xff] %v9244_v23 }
 0x5bd   : > { %v3047_v15 = vadd.f32 %v8868_v48, %v2514_v32  ;;  %v5273_v32 = vpack.c.bf16 %v5199_v21, %v5198_v28 }
 0x5bf   : > { %7319 = vmatmul.msk.bf16.gmra.mxu3 %vm997_vm2, %v3673_v3  ;;  %7431 = vmatmul.msk.bf16.gmra.mxu1 %vm997_vm2, %v4757_v26  ;;  %v9242_v18 = vadd.f32 %v3482_v53, %v3047_v15  ;;  %v4188_v53 = vld [vmem:[#allocation2 + $0x224] sm:$0xff]  ;;  %v3600_v3 = vld [vmem:[#allocation2 + $0x54] sm:$0xff] }
 0x5c0   : > { %v4235_v10 = vpack.c.bf16 %v4189_v39, %v4188_v53  ;;  %v4702_v26 = vld [vmem:[#allocation2 + $0x18d] sm:$0xff]  ;;  %v10441_v53 = vld [vmem:[#allocation77_spill] sm:$0xff] }
 0x5c1   : > { %10434 = vst [vmem:[#allocation71_spill] sm:$0xff] %v9242_v18  ;;  %v10438_v18 = vld [vmem:[#allocation75_spill] sm:$0xff] }
 0x5c2   : > { %v2419_v4 = vpop.f32.mrf.mxu3  ;;  %v3487_v47 = vpop.f32.mrf.mxu2 }
 0x5c3   : > { %v2515_v24 = vadd.f32 %v2419_v4, %v10436_v30  ;;  %v3599_v4 = vld [vmem:[#allocation2 + $0x4c] sm:$0xff]  ;;  %v9255_v28 = vpop.f32.mrf.mxu0 }
 0x5c4   : > { %v9248_v59 = vpop.f32.mrf.mxu1  ;;  %10439 = vst [vmem:[#allocation75_spill] sm:$0xff] %v9255_v28  ;;  %v3674_v30 = vpack.c.bf16 %v3600_v3, %v3599_v4 }
 0x5c5   : > { %v3048_v48 = vadd.f32 %v8879_v44, %v2515_v24  ;;  %v4701_v44 = vld [vmem:[#allocation2 + $0x185] sm:$0xff] }
 0x5c6   : > { %v4758_v24 = vpack.c.bf16 %v4702_v26, %v4701_v44 }
 0x5c7   : > { %7461 = vmatmul.msk.bf16.gmra.mxu2 %vm997_vm2, %v5273_v32  ;;  %v9251_v57 = vadd.f32 %v3485_v12, %v3048_v48  ;;  %v5201_v32 = vld [vmem:[#allocation2 + $0x7e] sm:$0xff] }
 0x5c9   : > { %10437 = vst [vmem:[#allocation73_spill] sm:$0xff] %v9251_v57 }
 0x5ca   : > { %v2421_v22 = vpop.f32.mrf.mxu3  ;;  %v3490_v15 = vpop.f32.mrf.mxu2  ;;  %7395 = vmatmul.msk.bf16.gmra.mxu0 %vm997_vm2, %v4235_v10 }
 0x5cb   : > { %v2516_v23 = vadd.f32 %v2421_v22, %v10438_v18  ;;  %v5200_v22 = vld [vmem:[#allocation2 + $0x76] sm:$0xff] }
 0x5cc   : > { %v9262_v12 = vpop.f32.mrf.mxu1  ;;  %v5274_v28 = vpack.c.bf16 %v5201_v32, %v5200_v22  ;;  %v4703_v32 = vld [vmem:[#allocation2 + $0x195] sm:$0xff] }
 0x5cd   : > { %v3049_v21 = vadd.f32 %v8890_v27, %v2516_v23  ;;  %v4191_v27 = vld [vmem:[#allocation2 + $0x23c] sm:$0xff]  ;;  %v9266_v23 = vpop.f32.mrf.mxu0 }
 0x5ce   : > { %10442 = vst [vmem:[#allocation77_spill] sm:$0xff] %v9266_v23 }
 0x5cf   : > { %7320 = vmatmul.msk.bf16.gmra.mxu3 %vm997_vm2, %v3674_v30  ;;  %7432 = vmatmul.msk.bf16.gmra.mxu1 %vm997_vm2, %v4758_v24  ;;  %v9260_v39 = vadd.f32 %v3487_v47, %v3049_v21  ;;  %v4190_v47 = vld [vmem:[#allocation2 + $0x234] sm:$0xff]  ;;  %v3602_v21 = vld [vmem:[#allocation2 + $0x64] sm:$0xff] }
 0x5d0   : > { %v4236_v26 = vpack.c.bf16 %v4191_v27, %v4190_v47  ;;  %v4704_v30 = vld [vmem:[#allocation2 + $0x19d] sm:$0xff] }
 0x5d1   : > { %10440 = vst [vmem:[#allocation127_spill] sm:$0xff] %v9260_v39 }
 0x5d2   : > { %v2424_v48 = vpop.f32.mrf.mxu3  ;;  %v3492_v18 = vpop.f32.mrf.mxu2 }
 0x5d3   : > { %v2517_v10 = vadd.f32 %v2424_v48, %v10441_v53  ;;  %v10444_v48 = vld [vmem:[#allocation79_spill] sm:$0xff] }
 0x5d4   : > { %v9271_v24 = vpop.f32.mrf.mxu1 }
 0x5d5   : > { %v3050_v57 = vadd.f32 %v8901_v25, %v2517_v10  ;;  %v3601_v25 = vld [vmem:[#allocation2 + $0x5c] sm:$0xff] }
 0x5d6   : > { %v3675_v22 = vpack.c.bf16 %v3602_v21, %v3601_v25 }
 0x5d7   : > { %7462 = vmatmul.msk.bf16.gmra.mxu2 %vm997_vm2, %v5274_v28  ;;  %v9269_v3 = vadd.f32 %v3490_v15, %v3050_v57  ;;  %v4759_v28 = vpack.c.bf16 %v4704_v30, %v4703_v32  ;;  %v9280_v15 = vpop.f32.mrf.mxu0  ;;  %v4193_v30 = vld [vmem:[#allocation2 + $0x24c] sm:$0xff] }
 0x5d8   : > { %10446 = vst [vmem:[#allocation129_spill] sm:$0xff] %v9280_v15  ;;  %v3603_v15 = vld [vmem:[#allocation2 + $0x6c] sm:$0xff] }
 0x5d9   : > { %10443 = vst [vmem:[#allocation128_spill] sm:$0xff] %v9269_v3  ;;  %v5203_v3 = vld [vmem:[#allocation2 + $0x8e] sm:$0xff] }
 0x5da   : > { %v2426_v4 = vpop.f32.mrf.mxu3  ;;  %v3495_v44 = vpop.f32.mrf.mxu2  ;;  %7396 = vmatmul.msk.bf16.gmra.mxu0 %vm997_vm2, %v4236_v26  ;;  %v5202_v26 = vld [vmem:[#allocation2 + $0x86] sm:$0xff] }
 0x5db   : > { %v2518_v53 = vadd.f32 %v2426_v4, %v10444_v48  ;;  %v10447_v4 = vld [vmem:[#allocation81_spill] sm:$0xff]  ;;  %v5275_v21 = vpack.c.bf16 %v5203_v3, %v5202_v26 }
 0x5dc   : > { %v9283_v39 = vpop.f32.mrf.mxu1 }
 0x5dd   : > { %v3051_v10 = vadd.f32 %v8912_v45, %v2518_v53 }
 0x5df   : > { %7321 = vmatmul.msk.bf16.gmra.mxu3 %vm997_vm2, %v3675_v22  ;;  %7433 = vmatmul.msk.bf16.gmra.mxu1 %vm997_vm2, %v4759_v28  ;;  %v9278_v57 = vadd.f32 %v3492_v18, %v3051_v10  ;;  %v4192_v18 = vld [vmem:[#allocation2 + $0x244] sm:$0xff]  ;;  %v3604_v22 = vld [vmem:[#allocation2 + $0x74] sm:$0xff] }
 0x5e0   : > { %v4237_v25 = vpack.c.bf16 %v4193_v30, %v4192_v18  ;;  %v4706_v28 = vld [vmem:[#allocation2 + $0x1ad] sm:$0xff]  ;;  %v5205_v18 = vld [vmem:[#allocation2 + $0x9e] sm:$0xff] }
 0x5e1   : > { %10445 = vst [vmem:[#allocation79_spill] sm:$0xff] %v9278_v57  ;;  %v9289_v57 = vpop.f32.mrf.mxu0 }
 0x5e2   : > { %v2429_v27 = vpop.f32.mrf.mxu3  ;;  %v3497_v47 = vpop.f32.mrf.mxu2  ;;  %10449 = vst [vmem:[#allocation130_spill] sm:$0xff] %v9289_v57 }
 0x5e3   : > { %v2519_v48 = vadd.f32 %v2429_v27, %v10447_v4  ;;  %v10450_v27 = vld [vmem:[#allocation83_spill] sm:$0xff] }
 0x5e5   : > { %v3052_v45 = vadd.f32 %v8923_v13, %v2519_v48  ;;  %v4705_v13 = vld [vmem:[#allocation2 + $0x1a5] sm:$0xff]  ;;  %v3676_v48 = vpack.c.bf16 %v3604_v22, %v3603_v15  ;;  %v4195_v22 = vld [vmem:[#allocation2 + $0x25c] sm:$0xff] }
 0x5e6   : > { %v4760_v26 = vpack.c.bf16 %v4706_v28, %v4705_v13 }
 0x5e7   : > { %7463 = vmatmul.msk.bf16.gmra.mxu2 %vm997_vm2, %v5275_v21  ;;  %v9287_v53 = vadd.f32 %v3495_v44, %v3052_v45  ;;  %v9294_v44 = vpop.f32.mrf.mxu1 }
 0x5e9   : > { %10448 = vst [vmem:[#allocation81_spill] sm:$0xff] %v9287_v53  ;;  %v9301_v53 = vpop.f32.mrf.mxu0 }
 0x5ea   : > { %v2431_v32 = vpop.f32.mrf.mxu3  ;;  %v3500_v10 = vpop.f32.mrf.mxu2  ;;  %7397 = vmatmul.msk.bf16.gmra.mxu0 %vm997_vm2, %v4237_v25  ;;  %v5204_v25 = vld [vmem:[#allocation2 + $0x96] sm:$0xff] }
 0x5eb   : > { %v2520_v4 = vadd.f32 %v2431_v32, %v10450_v27  ;;  %v10452_v32 = vld [vmem:[#allocation85_spill] sm:$0xff]  ;;  %v5276_v15 = vpack.c.bf16 %v5205_v18, %v5204_v25 }
 0x5ec   : > { %10453 = vst [vmem:[#allocation85_spill] sm:$0xff] %v9301_v53  ;;  %v3605_v53 = vld [vmem:[#allocation2 + $0x7c] sm:$0xff] }
 0x5ed   : > { %v3053_v3 = vadd.f32 %v8934_v46, %v2520_v4  ;;  %v4194_v4 = vld [vmem:[#allocation2 + $0x254] sm:$0xff] }
 0x5ef   : > { %7322 = vmatmul.msk.bf16.gmra.mxu3 %vm997_vm2, %v3676_v48  ;;  %7434 = vmatmul.msk.bf16.gmra.mxu1 %vm997_vm2, %v4760_v26  ;;  %v9298_v45 = vadd.f32 %v3497_v47, %v3053_v3  ;;  %v9307_v13 = vpop.f32.mrf.mxu1  ;;  %v4238_v47 = vpack.c.bf16 %v4195_v22, %v4194_v4  ;;  %v3606_v26 = vld [vmem:[#allocation2 + $0x84] sm:$0xff]  ;;  %v5207_v4 = vld [vmem:[#allocation2 + $0xae] sm:$0xff] }
 0x5f1   : > { %10451 = vst [vmem:[#allocation83_spill] sm:$0xff] %v9298_v45  ;;  %v4708_v45 = vld [vmem:[#allocation2 + $0x1bd] sm:$0xff] }
 0x5f2   : > { %v2434_v21 = vpop.f32.mrf.mxu3  ;;  %v3502_v30 = vpop.f32.mrf.mxu2 }
 0x5f3   : > { %v2521_v27 = vadd.f32 %v2434_v21, %v10452_v32  ;;  %v10455_v21 = vld [vmem:[#allocation87_spill] sm:$0xff] }
 0x5f5   : > { %v3054_v46 = vadd.f32 %v8945_v11, %v2521_v27  ;;  %v4707_v11 = vld [vmem:[#allocation2 + $0x1b5] sm:$0xff]  ;;  %v3677_v27 = vpack.c.bf16 %v3606_v26, %v3605_v53 }
 0x5f6   : > { %v4761_v25 = vpack.c.bf16 %v4708_v45, %v4707_v11  ;;  %v4197_v45 = vld [vmem:[#allocation2 + $0x26c] sm:$0xff] }
 0x5f7   : > { %7464 = vmatmul.msk.bf16.gmra.mxu2 %vm997_vm2, %v5276_v15  ;;  %v9305_v28 = vadd.f32 %v3500_v10, %v3054_v46  ;;  %v9312_v10 = vpop.f32.mrf.mxu0 }
 0x5f8   : > { %10456 = vst [vmem:[#allocation87_spill] sm:$0xff] %v9312_v10  ;;  %v10461_v10 = vld [vmem:[#allocation91_spill] sm:$0xff] }
 0x5f9   : > { %10454 = vst [vmem:[#allocation131_spill] sm:$0xff] %v9305_v28  ;;  %v5206_v28 = vld [vmem:[#allocation2 + $0xa6] sm:$0xff] }
 0x5fa   : > { %v2436_v3 = vpop.f32.mrf.mxu3  ;;  %v3505_v48 = vpop.f32.mrf.mxu2  ;;  %7398 = vmatmul.msk.bf16.gmra.mxu0 %vm997_vm2, %v4238_v47  ;;  %v10458_v47 = vld [vmem:[#allocation89_spill] sm:$0xff]  ;;  %v5277_v53 = vpack.c.bf16 %v5207_v4, %v5206_v28 }
 0x5fb   : > { %v2522_v32 = vadd.f32 %v2436_v3, %v10455_v21  ;;  %v9318_v3 = vpop.f32.mrf.mxu1 }
 0x5fd   : > { %v3055_v18 = vadd.f32 %v8955_v8, %v2522_v32  ;;  %v4196_v32 = vld [vmem:[#allocation2 + $0x264] sm:$0xff] }
 0x5ff   : > { %7323 = vmatmul.msk.bf16.gmra.mxu3 %vm997_vm2, %v3677_v27  ;;  %7435 = vmatmul.msk.bf16.gmra.mxu1 %vm997_vm2, %v4761_v25  ;;  %v9316_v46 = vadd.f32 %v3502_v30, %v3055_v18  ;;  %v9325_v11 = vpop.f32.mrf.mxu0  ;;  %v4239_v30 = vpack.c.bf16 %v4197_v45, %v4196_v32  ;;  %v3608_v25 = vld [vmem:[#allocation2 + $0x94] sm:$0xff]  ;;  %v5209_v45 = vld [vmem:[#allocation2 + $0xbe] sm:$0xff] }
 0x600   : > { %10460 = vst [vmem:[#allocation133_spill] sm:$0xff] %v9325_v11  ;;  %v10464_v32 = vld [vmem:[#allocation93_spill] sm:$0xff] }
 0x601   : > { %10457 = vst [vmem:[#allocation132_spill] sm:$0xff] %v9316_v46  ;;  %v4710_v46 = vld [vmem:[#allocation2 + $0x1cd] sm:$0xff] }
 0x602   : > { %v2439_v15 = vpop.f32.mrf.mxu3  ;;  %v3507_v22 = vpop.f32.mrf.mxu2 }
 0x603   : > { %v2523_v21 = vadd.f32 %v2439_v15, %v10458_v47  ;;  %v3607_v15 = vld [vmem:[#allocation2 + $0x8c] sm:$0xff]  ;;  %v9329_v28 = vpop.f32.mrf.mxu1 }
 0x605   : > { %v3056_v8 = vadd.f32 %v8965_v33, %v2523_v21  ;;  %v4709_v33 = vld [vmem:[#allocation2 + $0x1c5] sm:$0xff] }
 0x606   : > { %v4762_v47 = vpack.c.bf16 %v4710_v46, %v4709_v33 }
 0x607   : > { %7465 = vmatmul.msk.bf16.gmra.mxu2 %vm997_vm2, %v5277_v53  ;;  %v9323_v26 = vadd.f32 %v3505_v48, %v3056_v8  ;;  %v3678_v48 = vpack.c.bf16 %v3608_v25, %v3607_v15 }
 0x609   : > { %10459 = vst [vmem:[#allocation89_spill] sm:$0xff] %v9323_v26 }
 0x60a   : > { %v2441_v18 = vpop.f32.mrf.mxu3  ;;  %v3510_v27 = vpop.f32.mrf.mxu2  ;;  %7399 = vmatmul.msk.bf16.gmra.mxu0 %vm997_vm2, %v4239_v30 }
 0x60b   : > { %v2524_v57 = vadd.f32 %v2441_v18, %v10461_v10  ;;  %v9336_v10 = vpop.f32.mrf.mxu0  ;;  %v5208_v18 = vld [vmem:[#allocation2 + $0xb6] sm:$0xff] }
 0x60c   : > { %10463 = vst [vmem:[#allocation134_spill] sm:$0xff] %v9336_v10  ;;  %v5278_v11 = vpack.c.bf16 %v5209_v45, %v5208_v18  ;;  %v3618_v10 = vld [vmem:[#allocation2 + $0xe4] sm:$0xff] }
 0x60d   : > { %v3057_v4 = vadd.f32 %v8975_v34, %v2524_v57  ;;  %v4199_v34 = vld [vmem:[#allocation2 + $0x27c] sm:$0xff]  ;;  %v9340_v57 = vpop.f32.mrf.mxu1 }
 0x60f   : > { %7324 = vmatmul.msk.bf16.gmra.mxu3 %vm997_vm2, %v3678_v48  ;;  %7436 = vmatmul.msk.bf16.gmra.mxu1 %vm997_vm2, %v4762_v47  ;;  %v9334_v21 = vadd.f32 %v3507_v22, %v3057_v4  ;;  %v4198_v22 = vld [vmem:[#allocation2 + $0x274] sm:$0xff]  ;;  %v3610_v4 = vld [vmem:[#allocation2 + $0xa4] sm:$0xff]  ;;  %v10466_v47 = vld [vmem:[#allocation95_spill] sm:$0xff] }
 0x610   : > { %v4240_v25 = vpack.c.bf16 %v4199_v34, %v4198_v22  ;;  %v4712_v48 = vld [vmem:[#allocation2 + $0x1dd] sm:$0xff]  ;;  %v5211_v22 = vld [vmem:[#allocation2 + $0xce] sm:$0xff] }
 0x611   : > { %10462 = vst [vmem:[#allocation91_spill] sm:$0xff] %v9334_v21 }
 0x612   : > { %v2444_v8 = vpop.f32.mrf.mxu3  ;;  %v3512_v53 = vpop.f32.mrf.mxu2 }
 0x613   : > { %v2525_v30 = vadd.f32 %v2444_v8, %v10464_v32  ;;  %v3609_v8 = vld [vmem:[#allocation2 + $0x9c] sm:$0xff]  ;;  %v9347_v45 = vpop.f32.mrf.mxu0 }
 0x614   : > { %10467 = vst [vmem:[#allocation95_spill] sm:$0xff] %v9347_v45 }
 0x615   : > { %v3058_v26 = vadd.f32 %v8985_v16, %v2525_v30  ;;  %v4711_v16 = vld [vmem:[#allocation2 + $0x1d5] sm:$0xff]  ;;  %v3679_v30 = vpack.c.bf16 %v3610_v4, %v3609_v8 }
 0x617   : > { %7466 = vmatmul.msk.bf16.gmra.mxu2 %vm997_vm2, %v5278_v11  ;;  %v9343_v46 = vadd.f32 %v3510_v27, %v3058_v26  ;;  %v4763_v11 = vpack.c.bf16 %v4712_v48, %v4711_v16  ;;  %v9354_v27 = vpop.f32.mrf.mxu1 }
 0x619   : > { %10465 = vst [vmem:[#allocation93_spill] sm:$0xff] %v9343_v46 }
 0x61a   : > { %v2446_v15 = vpop.f32.mrf.mxu3  ;;  %v5452_v33 = vpop.f32.mrf.mxu2  ;;  %7400 = vmatmul.msk.bf16.gmra.mxu0 %vm997_vm2, %v4240_v25 }
 0x61b   : > { %v2526_v21 = vadd.f32 %v2446_v15, %v10466_v47  ;;  %v5210_v15 = vld [vmem:[#allocation2 + $0xc6] sm:$0xff]  ;;  %v9358_v4 = vpop.f32.mrf.mxu0 }
 0x61c   : > { %v5279_v46 = vpack.c.bf16 %v5211_v22, %v5210_v15  ;;  %10469 = vst [vmem:[#allocation136_spill] sm:$0xff] %v9358_v4  ;;  %v3611_v22 = vld [vmem:[#allocation2 + $0xac] sm:$0xff] }
 0x61d   : > { %v3059_v32 = vadd.f32 %v8995_v62, %v2526_v21  ;;  %v4200_v62 = vld [vmem:[#allocation2 + $0x284] sm:$0xff]  ;;  %v4201_v21 = vld [vmem:[#allocation2 + $0x28c] sm:$0xff] }
 0x61f   : > { %7325 = vmatmul.msk.bf16.gmra.mxu3 %vm997_vm2, %v3679_v30  ;;  %7437 = vmatmul.msk.bf16.gmra.mxu1 %vm997_vm2, %v4763_v11  ;;  %v9352_v26 = vadd.f32 %v3512_v53, %v3059_v32  ;;  %v4241_v53 = vpack.c.bf16 %v4201_v21, %v4200_v62  ;;  %v3612_v32 = vld [vmem:[#allocation2 + $0xb4] sm:$0xff]  ;;  %v9362_v11 = vpop.f32.mrf.mxu1 }
 0x620   : > { %v4714_v30 = vld [vmem:[#allocation2 + $0x1ed] sm:$0xff]  ;;  %v3680_v15 = vpack.c.bf16 %v3612_v32, %v3611_v22  ;;  %v5212_v32 = vld [vmem:[#allocation2 + $0xd6] sm:$0xff] }
 0x621   : > { %10468 = vst [vmem:[#allocation135_spill] sm:$0xff] %v9352_v26  ;;  %v4202_v22 = vld [vmem:[#allocation2 + $0x294] sm:$0xff] }
 0x622   : > { %v3853_v18 = vpop.f32.mrf.mxu3  ;;  %v5454_v34 = vpop.f32.mrf.mxu2 }
 0x623   : > { %v4048_v25 = vadd.f32 %v3853_v18, %v8564_v42  ;;  %v9364_v18 = vld [vmem:[#allocation9] ss:$0 sm:$0xff] }
 0x625   : > { %v4581_v47 = vadd.f32 %v8786_v9, %v4048_v25  ;;  %v4713_v25 = vld [vmem:[#allocation2 + $0x1e5] sm:$0xff] }
 0x627   : > { %v5114_v48 = vadd.f32 %v9005_v36, %v4581_v47  ;;  %7467 = vmatmul.msk.bf16.gmra.mxu2 %vm997_vm2, %v5279_v46  ;;  %v4764_v46 = vpack.c.bf16 %v4714_v30, %v4713_v25  ;;  %v9377_v30 = vpop.f32.mrf.mxu1 }
 0x629   : > { %v5647_v42 = vadd.f32 %v5452_v33, %v5114_v48  ;;  %v9373_v33 = vpop.f32.mrf.mxu0 }
 0x62a   : > { %v3855_v8 = vpop.f32.mrf.mxu3  ;;  %v5457_v16 = vpop.f32.mrf.mxu2  ;;  %7401 = vmatmul.msk.bf16.gmra.mxu0 %vm997_vm2, %v4241_v53  ;;  %10470 = vst [vmem:[#allocation137_spill] sm:$0xff] %v9373_v33  ;;  %v5213_v53 = vld [vmem:[#allocation2 + $0xde] sm:$0xff] }
 0x62b   : > { %v4049_v9 = vadd.f32 %v3855_v8, %v8576_v6  ;;  %v5729_v47 = vadd.f32 %v9364_v18, %v5647_v42 }
 0x62d   : > { %v4582_v36 = vadd.f32 %v8798_v50, %v4049_v9  ;;  %v5807_v8 = vmax.f32 %v5729_v47, 0.0  ;;  %v5280_v9 = vpack.c.bf16 %v5213_v53, %v5212_v32 }
 0x62f   : > { %v5115_v62 = vadd.f32 %v9015_v20, %v4582_v36  ;;  %7326 = vmatmul.msk.bf16.gmra.mxu3 %vm997_vm2, %v3680_v15  ;;  %7438 = vmatmul.msk.bf16.gmra.mxu1 %vm997_vm2, %v4764_v46  ;;  %v5961_v25 = vrot.slane %v5807_v8, 1  ;;  %v4203_v15 = vld [vmem:[#allocation2 + $0x29c] sm:$0xff] }
 0x631   : > { %v5648_v21 = vadd.f32 %v5454_v34, %v5115_v62  ;;  %v9385_v53 = vpop.f32.mrf.mxu0 }
 0x632   : > { %v3858_v6 = vpop.f32.mrf.mxu3  ;;  %v5459_v48 = vpop.f32.mrf.mxu2  ;;  %10471 = vst [vmem:[#allocation138_spill] sm:$0xff] %v9385_v53  ;;  %v5215_v53 = vld [vmem:[#allocation2 + $0xee] sm:$0xff] }
 0x633   : > { %v5730_v26 = vadd.f32 %v9364_v18, %v5648_v21  ;;  %v4050_v50 = vadd.f32 %v3858_v6, %v8586_v17  ;;  %v4242_v17 = vpack.c.bf16 %v4203_v15, %v4202_v22  ;;  %v3614_v6 = vld [vmem:[#allocation2 + $0xc4] sm:$0xff] }
 0x635   : > { %v5808_v42 = vmax.f32 %v5730_v26, 0.0  ;;  %v4583_v20 = vadd.f32 %v8808_v58, %v4050_v50  ;;  %v4716_v58 = vld [vmem:[#allocation2 + $0x1fd] sm:$0xff] }
 0x637   : > { %v5962_v36 = vrot.slane %v5808_v42, 1  ;;  %v5116_v34 = vadd.f32 %v9025_v37, %v4583_v20  ;;  %7468 = vmatmul.msk.bf16.gmra.mxu2 %vm997_vm2, %v5280_v9  ;;  %v3613_v37 = vld [vmem:[#allocation2 + $0xbc] sm:$0xff] }
 0x638   : > { %v4715_v20 = vld [vmem:[#allocation2 + $0x1f5] sm:$0xff]  ;;  %v3681_v22 = vpack.c.bf16 %v3614_v6, %v3613_v37  ;;  %v5214_v37 = vld [vmem:[#allocation2 + $0xe6] sm:$0xff] }
 0x639   : > { %v5963_v46 = vsel %vm5960_vm4, %v5961_v25, %v5962_v36  ;;  %v5649_v47 = vadd.f32 %v5457_v16, %v5116_v34  ;;  %v10472_v25 = vld [vmem:[#allocation18_spill] sm:$0xff]  ;;  %v9391_v34 = vpop.f32.mrf.mxu1 }
 0x63a   : > { %v9383_v62 = vmax.f32 %v5807_v8, %v5963_v46  ;;  %v3860_v21 = vpop.f32.mrf.mxu3  ;;  %v5462_v26 = vpop.f32.mrf.mxu2  ;;  %7402 = vmatmul.msk.bf16.gmra.mxu0 %vm997_vm2, %v4242_v17  ;;  %v4765_v8 = vpack.c.bf16 %v4716_v58, %v4715_v20  ;;  %v10473_v58 = vld [vmem:[#allocation98_spill] sm:$0xff] }
 0x63b   : > { %v5731_v50 = vadd.f32 %v9364_v18, %v5649_v47  ;;  %v4051_v32 = vadd.f32 %v3860_v21, %v8598_v19 }
 0x63d   : > { %v5809_v9 = vmax.f32 %v5731_v50, 0.0  ;;  %v4584_v16 = vadd.f32 %v10472_v25, %v4051_v32  ;;  %v10474_v25 = vld [vmem:[#allocation19_spill] sm:$0xff] }
 0x63f   : > { %v5964_v15 = vrot.slane %v5809_v9, 1  ;;  %v5117_v46 = vadd.f32 %v9035_v60, %v4584_v16  ;;  %7327 = vmatmul.msk.bf16.gmra.mxu3 %vm997_vm2, %v3681_v22  ;;  %7439 = vmatmul.msk.bf16.gmra.mxu1 %vm997_vm2, %v4765_v8  ;;  %v5281_v16 = vpack.c.bf16 %v5215_v53, %v5214_v37  ;;  %v3615_v37 = vld [vmem:[#allocation2 + $0xcc] sm:$0xff] }
 0x641   : > { %v5965_v19 = vsel %vm5960_vm4, %v5962_v36, %v5964_v15  ;;  %v5650_v47 = vadd.f32 %v5459_v48, %v5117_v46  ;;  %v9404_v48 = vpop.f32.mrf.mxu1 }
 0x642   : > { %v9397_v17 = vmax.f32 %v5808_v42, %v5965_v19  ;;  %v3863_v21 = vpop.f32.mrf.mxu3  ;;  %v5464_v50 = vpop.f32.mrf.mxu2 }
 0x643   : > { %v5732_v6 = vadd.f32 %v9364_v18, %v5650_v47  ;;  %v4052_v32 = vadd.f32 %v3863_v21, %v10473_v58  ;;  %v3616_v21 = vld [vmem:[#allocation2 + $0xd4] sm:$0xff] }
 0x644   : > { %v4718_v58 = vld [vmem:[#allocation2 + $0x20d] sm:$0xff]  ;;  %v3682_v33 = vpack.c.bf16 %v3616_v21, %v3615_v37 }
 0x645   : > { %v5810_v20 = vmax.f32 %v5732_v6, 0.0  ;;  %v4585_v60 = vadd.f32 %v10474_v25, %v4052_v32  ;;  %v10475_v32 = vld [vmem:[#allocation99_spill] sm:$0xff]  ;;  %v10477_v21 = vld [vmem:[#allocation100_spill] sm:$0xff] }
 0x646   : > { %v4717_v25 = vld [vmem:[#allocation2 + $0x205] sm:$0xff] }
 0x647   : > { %v5966_v22 = vrot.slane %v5810_v20, 1  ;;  %v5118_v8 = vadd.f32 %v9045_v51, %v4585_v60  ;;  %7469 = vmatmul.msk.bf16.gmra.mxu2 %vm997_vm2, %v5281_v16  ;;  %v10476_v60 = vld [vmem:[#allocation20_spill] sm:$0xff]  ;;  %v4766_v4 = vpack.c.bf16 %v4718_v58, %v4717_v25 }
 0x649   : > { %v5967_v42 = vsel %vm5960_vm4, %v5964_v15, %v5966_v22  ;;  %v5651_v36 = vadd.f32 %v5462_v26, %v5118_v8 }
 0x64a   : > { %v9407_v46 = vmax.f32 %v5809_v9, %v5967_v42  ;;  %v3865_v19 = vpop.f32.mrf.mxu3  ;;  %v5467_v47 = vpop.f32.mrf.mxu2 }
 0x64b   : > { %v5733_v6 = vadd.f32 %v9364_v18, %v5651_v36  ;;  %v4053_v53 = vadd.f32 %v3865_v19, %v10475_v32  ;;  %v5217_v19 = vld [vmem:[#allocation2 + $0xfe] sm:$0xff]  ;;  %v9416_v32 = vpop.f32.mrf.mxu1 }
 0x64d   : > { %v5811_v51 = vmax.f32 %v5733_v6, 0.0  ;;  %v4586_v16 = vadd.f32 %v10476_v60, %v4053_v53  ;;  %v5216_v53 = vld [vmem:[#allocation2 + $0xf6] sm:$0xff] }
 0x64f   : > { %v5968_v45 = vrot.slane %v5811_v51, 1  ;;  %v5119_v26 = vadd.f32 %v9055_v40, %v4586_v16  ;;  %7328 = vmatmul.msk.bf16.gmra.mxu3 %vm997_vm2, %v3682_v33  ;;  %7440 = vmatmul.msk.bf16.gmra.mxu1 %vm997_vm2, %v4766_v4  ;;  %v10478_v40 = vld [vmem:[#allocation21_spill] sm:$0xff]  ;;  %v5282_v33 = vpack.c.bf16 %v5217_v19, %v5216_v53 }
 0x650   : > { %v10479_v4 = vld [vmem:[#allocation45_spill] sm:$0xff] }
 0x651   : > { %v5969_v9 = vsel %vm5960_vm4, %v5966_v22, %v5968_v45  ;;  %v5652_v15 = vadd.f32 %v5464_v50, %v5119_v26  ;;  %v3617_v53 = vld [vmem:[#allocation2 + $0xdc] sm:$0xff] }
 0x652   : > { %v6188_v8 = vmax.f32 %v5810_v20, %v5969_v9  ;;  %v3868_v42 = vpop.f32.mrf.mxu3  ;;  %v5469_v36 = vpop.f32.mrf.mxu2 }
 0x653   : > { %v5734_v6 = vadd.f32 %v9364_v18, %v5652_v15  ;;  %v4054_v58 = vadd.f32 %v3868_v42, %v10477_v21  ;;  %v4720_v15 = vld [vmem:[#allocation2 + $0x21d] sm:$0xff] }
 0x655   : > { %v5812_v37 = vmax.f32 %v5734_v6, 0.0  ;;  %v4587_v25 = vadd.f32 %v10478_v40, %v4054_v58  ;;  %v10480_v6 = vld [vmem:[#allocation101_spill] sm:$0xff]  ;;  %v6353_v58 = vrot.slane %v6188_v8, 2 }
 0x656   : > { %v4719_v40 = vld [vmem:[#allocation2 + $0x215] sm:$0xff] }
 0x657   : > { %v5970_v60 = vrot.slane %v5812_v37, 1  ;;  %v5120_v16 = vadd.f32 %v10479_v4, %v4587_v25  ;;  %7470 = vmatmul.msk.bf16.gmra.mxu2 %vm997_vm2, %v5282_v33  ;;  %v9426_v25 = vpop.f32.mrf.mxu1  ;;  %v10481_v4 = vld [vmem:[#allocation22_spill] sm:$0xff] }
 0x659   : > { %v5971_v50 = vsel %vm5960_vm4, %v5968_v45, %v5970_v60  ;;  %v5653_v20 = vadd.f32 %v5467_v47, %v5120_v16  ;;  %v3683_v47 = vpack.c.bf16 %v3618_v10, %v3617_v53  ;;  %v5218_v53 = vld [vmem:[#allocation2 + $0x106] sm:$0xff] }
 0x65a   : > { %v6189_v22 = vmax.f32 %v5811_v51, %v5971_v50  ;;  %v3870_v26 = vpop.f32.mrf.mxu3  ;;  %v5472_v9 = vpop.f32.mrf.mxu2  ;;  %v4767_v51 = vpack.c.bf16 %v4720_v15, %v4719_v40  ;;  %v10483_v40 = vld [vmem:[#allocation23_spill] sm:$0xff] }
 0x65b   : > { %v5735_v42 = vadd.f32 %v9364_v18, %v5653_v20  ;;  %v4055_v21 = vadd.f32 %v3870_v26, %v10480_v6 }
 0x65c   : > { %v6354_v19 = vrot.slane %v6189_v22, 2 }
 0x65d   : > { %v5813_v33 = vmax.f32 %v5735_v42, 0.0  ;;  %v4588_v45 = vadd.f32 %v10481_v4, %v4055_v21  ;;  %v5219_v42 = vld [vmem:[#allocation2 + $0x10e] sm:$0xff]  ;;  %v10482_v21 = vld [vmem:[#allocation102_spill] sm:$0xff] }
 0x65e   : > { %v6355_v16 = vsel %vm6352_vm5, %v6353_v58, %v6354_v19 }
 0x65f   : > { %v6577_v50 = vmax.f32 %v9383_v62, %v6355_v16  ;;  %v5972_v23 = vrot.slane %v5813_v33, 1  ;;  %v5121_v20 = vadd.f32 %v9073_v54, %v4588_v45  ;;  %7329 = vmatmul.msk.bf16.gmra.mxu3 %vm997_vm2, %v3683_v47  ;;  %7441 = vmatmul.msk.bf16.gmra.mxu1 %vm997_vm2, %v4767_v51  ;;  %v5283_v45 = vpack.c.bf16 %v5219_v42, %v5218_v53  ;;  %v9440_v51 = vpop.f32.mrf.mxu1  ;;  %v10484_v42 = vld [vmem:[#allocation103_spill] sm:$0xff]  ;;  %v10485_v53 = vld [vmem:[#allocation24_spill] sm:$0xff] }
 0x661   : > { %6653 = vst.msk [vmem:[#allocation3] sm:$0xff] %vm6652_vm6, %v6577_v50  ;;  %v5973_v8 = vsel %vm5960_vm4, %v5970_v60, %v5972_v23  ;;  %v5654_v22 = vadd.f32 %v5469_v36, %v5121_v20 }
 0x662   : > { %v6190_v26 = vmax.f32 %v5812_v37, %v5973_v8  ;;  %v3873_v10 = vpop.f32.mrf.mxu3  ;;  %v5474_v15 = vpop.f32.mrf.mxu2 }
 0x663   : > { %v5736_v6 = vadd.f32 %v9364_v18, %v5654_v22  ;;  %v4056_v62 = vadd.f32 %v3873_v10, %v10482_v21  ;;  %v4721_v21 = vld [vmem:[#allocation2 + $0x225] sm:$0xff] }
 0x664   : > { %v6356_v58 = vrot.slane %v6190_v26, 2  ;;  %v4722_v26 = vld [vmem:[#allocation2 + $0x22d] sm:$0xff] }
 0x665   : > { %v5814_v54 = vmax.f32 %v5736_v6, 0.0  ;;  %v4589_v4 = vadd.f32 %v10483_v40, %v4056_v62  ;;  %v3619_v6 = vld [vmem:[#allocation2 + $0xec] sm:$0xff] }
 0x666   : > { %v6357_v47 = vsel %vm6352_vm5, %v6354_v19, %v6356_v58  ;;  %v3620_v19 = vld [vmem:[#allocation2 + $0xf4] sm:$0xff] }
 0x667   : > { %v6578_v36 = vmax.f32 %v9397_v17, %v6357_v47  ;;  %v5974_v37 = vrot.slane %v5814_v54, 1  ;;  %v5122_v60 = vadd.f32 %v9083_v0, %v4589_v4  ;;  %7471 = vmatmul.msk.bf16.gmra.mxu2 %vm997_vm2, %v5283_v45 }
 0x669   : > { %6654 = vst.msk [vmem:[#allocation3 + $0x8] sm:$0xff] %vm6652_vm6, %v6578_v36  ;;  %v5975_v16 = vsel %vm5960_vm4, %v5972_v23, %v5974_v37  ;;  %v5655_v50 = vadd.f32 %v5472_v9, %v5122_v60  ;;  %v3684_v23 = vpack.c.bf16 %v3620_v19, %v3619_v6  ;;  %v4768_v9 = vpack.c.bf16 %v4722_v26, %v4721_v21  ;;  %v9464_v60 = vpop.f32.mrf.mxu1  ;;  %v5221_v19 = vld [vmem:[#allocation2 + $0x11e] sm:$0xff] }
 0x66a   : > { %v9447_v20 = vmax.f32 %v5813_v33, %v5975_v16  ;;  %v3875_v8 = vpop.f32.mrf.mxu3  ;;  %v5477_v22 = vpop.f32.mrf.mxu2  ;;  %v10487_v6 = vld [vmem:[#allocation25_spill] sm:$0xff] }
 0x66b   : > { %v5737_v10 = vadd.f32 %v9364_v18, %v5655_v50  ;;  %v4057_v17 = vadd.f32 %v3875_v8, %v10484_v42 }
 0x66c   : > { %v6358_v0 = vrot.slane %v9447_v20, 2 }
 0x66d   : > { %v5815_v62 = vmax.f32 %v5737_v10, 0.0  ;;  %v4590_v40 = vadd.f32 %v10485_v53, %v4057_v17  ;;  %v10486_v10 = vld [vmem:[#allocation104_spill] sm:$0xff] }
 0x66e   : > { %v6359_v33 = vsel %vm6352_vm5, %v6356_v58, %v6358_v0  ;;  %v5220_v17 = vld [vmem:[#allocation2 + $0x116] sm:$0xff] }
 0x66f   : > { %v6579_v4 = vmax.f32 %v9407_v46, %v6359_v33  ;;  %v5976_v45 = vrot.slane %v5815_v62, 1  ;;  %v5123_v47 = vadd.f32 %v9093_v2, %v4590_v40  ;;  %7330 = vmatmul.msk.bf16.gmra.mxu3 %vm997_vm2, %v3684_v23  ;;  %7442 = vmatmul.msk.bf16.gmra.mxu1 %vm997_vm2, %v4768_v9  ;;  %v5284_v53 = vpack.c.bf16 %v5221_v19, %v5220_v17  ;;  %v3621_v19 = vld [vmem:[#allocation2 + $0xfc] sm:$0xff] }
 0x670   : > { %v6729_v36 = vld [vmem:[#allocation3] ss:$2 sm:$0xff] }
 0x671   : > { %v6732_v58 = vpack.c.bf16 %v6729_v36, %v6729_v36  ;;  %6655 = vst.msk [vmem:[#allocation3 + $0x10] sm:$0xff] %vm6652_vm6, %v6579_v4  ;;  %v5977_v46 = vsel %vm5960_vm4, %v5974_v37, %v5976_v45  ;;  %v5656_v2 = vadd.f32 %v5474_v15, %v5123_v47  ;;  %v3622_v36 = vld [vmem:[#allocation2 + $0x104] sm:$0xff] }
 0x672   : > { %v9468_v16 = vmax.f32 %v5814_v54, %v5977_v46  ;;  %v3878_v50 = vpop.f32.mrf.mxu3  ;;  %v5479_v8 = vpop.f32.mrf.mxu2 }
 0x673   : > { %v5738_v26 = vadd.f32 %v9364_v18, %v5656_v2  ;;  %v4058_v42 = vadd.f32 %v3878_v50, %v10486_v10  ;;  %6734 = vst.msk [vmem:[%s9462_s29] sm:$0xf] %vm6727_vm7, %v6732_v58  ;;  %v4724_v58 = vld [vmem:[#allocation2 + $0x23d] sm:$0xff]  ;;  %v9480_v46 = vpop.f32.mrf.mxu1 }
 0x674   : > { %v10488_v2 = vld [vmem:[#allocation105_spill] sm:$0xff] }
 0x675   : > { %v5816_v0 = vmax.f32 %v5738_v26, 0.0  ;;  %v4591_v21 = vadd.f32 %v10487_v6, %v4058_v42  ;;  %v4723_v26 = vld [vmem:[#allocation2 + $0x235] sm:$0xff]  ;;  %v10489_v42 = vld [vmem:[#allocation26_spill] sm:$0xff] }
 0x677   : > { %v5978_v40 = vrot.slane %v5816_v0, 1  ;;  %v5124_v15 = vadd.f32 %v9103_v35, %v4591_v21  ;;  %7472 = vmatmul.msk.bf16.gmra.mxu2 %vm997_vm2, %v5284_v53 }
 0x678   : > { %v6731_v54 = vld [vmem:[#allocation3 + $0x10] ss:$2 sm:$0xf] }
 0x679   : > { %v6733_v37 = vpack.c.bf16 %v6731_v54, %v6731_v54  ;;  %v5979_v23 = vsel %vm5960_vm4, %v5976_v45, %v5978_v40  ;;  %v5657_v9 = vadd.f32 %v5477_v22, %v5124_v15  ;;  %v3685_v22 = vpack.c.bf16 %v3622_v36, %v3621_v19 }
 0x67a   : > { %v9478_v33 = vmax.f32 %v5815_v62, %v5979_v23  ;;  %v3880_v4 = vpop.f32.mrf.mxu3  ;;  %v5482_v47 = vpop.f32.mrf.mxu2  ;;  %v4769_v62 = vpack.c.bf16 %v4724_v58, %v4723_v26  ;;  %v5223_v23 = vld [vmem:[#allocation2 + $0x12e] sm:$0xff] }
 0x67b   : > { %6736 = vst.msk [vmem:[%s9462_s29 + $0x4] sm:$0x3] %vm6735_vm8, %v6733_v37  ;;  %v5739_v35 = vadd.f32 %v9364_v18, %v5657_v9  ;;  %v4059_v50 = vadd.f32 %v3880_v4, %v10488_v2  ;;  %v10490_v4 = vld [vmem:[#allocation106_spill] sm:$0xff] }
 0x67d   : > { %v5817_v10 = vmax.f32 %v5739_v35, 0.0  ;;  %v4592_v45 = vadd.f32 %v10489_v42, %v4059_v50  ;;  %v5222_v35 = vld [vmem:[#allocation2 + $0x126] sm:$0xff] }
 0x67e   : > { %v10491_v50 = vld [vmem:[#allocation27_spill] sm:$0xff]  ;;  %v5285_v26 = vpack.c.bf16 %v5223_v23, %v5222_v35 }
 0x67f   : > { %v5980_v17 = vrot.slane %v5817_v10, 1  ;;  %v5125_v6 = vadd.f32 %v9111_v43, %v4592_v45  ;;  %7331 = vmatmul.msk.bf16.gmra.mxu3 %vm997_vm2, %v3685_v22  ;;  %7443 = vmatmul.msk.bf16.gmra.mxu1 %vm997_vm2, %v4769_v62  ;;  %v9496_v43 = vpop.f32.mrf.mxu1  ;;  %v4725_v23 = vld [vmem:[#allocation2 + $0x245] sm:$0xff] }
 0x681   : > { %v5981_v21 = vsel %vm5960_vm4, %v5978_v40, %v5980_v17  ;;  %v5658_v53 = vadd.f32 %v5479_v8, %v5125_v6  ;;  %v3624_v6 = vld [vmem:[#allocation2 + $0x114] sm:$0xff] }
 0x682   : > { %v9491_v15 = vmax.f32 %v5816_v0, %v5981_v21  ;;  %v3883_v54 = vpop.f32.mrf.mxu3  ;;  %v5484_v37 = vpop.f32.mrf.mxu2  ;;  %v4726_v21 = vld [vmem:[#allocation2 + $0x24d] sm:$0xff] }
 0x683   : > { %v5740_v9 = vadd.f32 %v9364_v18, %v5658_v53  ;;  %v4060_v36 = vadd.f32 %v3883_v54, %v10490_v4  ;;  %v10492_v54 = vld [vmem:[#allocation107_spill] sm:$0xff] }
 0x684   : > { %v6364_v58 = vrot.slane %v9491_v15, 2 }
 0x685   : > { %v5818_v2 = vmax.f32 %v5740_v9, 0.0  ;;  %v4593_v19 = vadd.f32 %v10491_v50, %v4060_v36  ;;  %v3623_v36 = vld [vmem:[#allocation2 + $0x10c] sm:$0xff]  ;;  %v10493_v50 = vld [vmem:[#allocation28_spill] sm:$0xff] }
 0x687   : > { %v5982_v40 = vrot.slane %v5818_v2, 1  ;;  %v5126_v8 = vadd.f32 %v9121_v49, %v4593_v19  ;;  %7473 = vmatmul.msk.bf16.gmra.mxu2 %vm997_vm2, %v5285_v26  ;;  %v3686_v19 = vpack.c.bf16 %v3624_v6, %v3623_v36  ;;  %v4770_v26 = vpack.c.bf16 %v4726_v21, %v4725_v23  ;;  %v5224_v36 = vld [vmem:[#allocation2 + $0x136] sm:$0xff] }
 0x688   : > { %v10495_v23 = vld [vmem:[#allocation29_spill] sm:$0xff] }
 0x689   : > { %v5983_v0 = vsel %vm5960_vm4, %v5980_v17, %v5982_v40  ;;  %v5659_v42 = vadd.f32 %v5482_v47, %v5126_v8  ;;  %v9506_v47 = vpop.f32.mrf.mxu1 }
 0x68a   : > { %v6195_v45 = vmax.f32 %v5817_v10, %v5983_v0  ;;  %v3885_v22 = vpop.f32.mrf.mxu3  ;;  %v5487_v62 = vpop.f32.mrf.mxu2 }
 0x68b   : > { %v5741_v53 = vadd.f32 %v9364_v18, %v5659_v42  ;;  %v4061_v9 = vadd.f32 %v3885_v22, %v10492_v54  ;;  %v10494_v54 = vld [vmem:[#allocation108_spill] sm:$0xff] }
 0x68c   : > { %v6366_v4 = vrot.slane %v6195_v45, 2 }
 0x68d   : > { %v5819_v35 = vmax.f32 %v5741_v53, 0.0  ;;  %v4594_v49 = vadd.f32 %v10493_v50, %v4061_v9 }
 0x68e   : > { %v6367_v17 = vsel %vm6352_vm5, %v6364_v58, %v6366_v4  ;;  %v5225_v58 = vld [vmem:[#allocation2 + $0x13e] sm:$0xff] }
 0x68f   : > { %v6583_v10 = vmax.f32 %v9447_v20, %v6367_v17  ;;  %v5984_v8 = vrot.slane %v5819_v35, 1  ;;  %v5127_v0 = vadd.f32 %v9131_v5, %v4594_v49  ;;  %7332 = vmatmul.msk.bf16.gmra.mxu3 %vm997_vm2, %v3686_v19  ;;  %7444 = vmatmul.msk.bf16.gmra.mxu1 %vm997_vm2, %v4770_v26  ;;  %v5286_v49 = vpack.c.bf16 %v5225_v58, %v5224_v36  ;;  %v10497_v36 = vld [vmem:[#allocation30_spill] sm:$0xff] }
 0x691   : > { %6659 = vst.msk [vmem:[#allocation3 + $0x30] sm:$0xff] %vm6652_vm6, %v6583_v10  ;;  %v5985_v42 = vsel %vm5960_vm4, %v5982_v40, %v5984_v8  ;;  %v5660_v45 = vadd.f32 %v5484_v37, %v5127_v0 }
 0x692   : > { %v6196_v22 = vmax.f32 %v5818_v2, %v5985_v42  ;;  %v3888_v6 = vpop.f32.mrf.mxu3  ;;  %v5489_v21 = vpop.f32.mrf.mxu2 }
 0x693   : > { %v5742_v53 = vadd.f32 %v9364_v18, %v5660_v45  ;;  %v4062_v20 = vadd.f32 %v3888_v6, %v10494_v54  ;;  %v9521_v2 = vpop.f32.mrf.mxu1  ;;  %v4728_v6 = vld [vmem:[#allocation2 + $0x25d] sm:$0xff]  ;;  %v4727_v54 = vld [vmem:[#allocation2 + $0x255] sm:$0xff] }
 0x694   : > { %v6368_v9 = vrot.slane %v6196_v22, 2  ;;  %v3626_v22 = vld [vmem:[#allocation2 + $0x124] sm:$0xff] }
 0x695   : > { %v5820_v5 = vmax.f32 %v5742_v53, 0.0  ;;  %v4595_v50 = vadd.f32 %v10495_v23, %v4062_v20 }
 0x696   : > { %v6369_v19 = vsel %vm6352_vm5, %v6366_v4, %v6368_v9 }
 0x697   : > { %v6584_v26 = vmax.f32 %v9468_v16, %v6369_v19  ;;  %v5986_v40 = vrot.slane %v5820_v5, 1  ;;  %v5128_v37 = vadd.f32 %v9141_v61, %v4595_v50  ;;  %7474 = vmatmul.msk.bf16.gmra.mxu2 %vm997_vm2, %v5286_v49  ;;  %v10496_v16 = vld [vmem:[#allocation109_spill] sm:$0xff]  ;;  %v4771_v49 = vpack.c.bf16 %v4728_v6, %v4727_v54 }
 0x698   : > { %v3625_v61 = vld [vmem:[#allocation2 + $0x11c] sm:$0xff] }
 0x699   : > { %6660 = vst.msk [vmem:[#allocation3 + $0x38] sm:$0xff] %vm6652_vm6, %v6584_v26  ;;  %v5987_v17 = vsel %vm5960_vm4, %v5984_v8, %v5986_v40  ;;  %v5661_v10 = vadd.f32 %v5487_v62, %v5128_v37  ;;  %v3687_v50 = vpack.c.bf16 %v3626_v22, %v3625_v61  ;;  %v10498_v22 = vld [vmem:[#allocation14_spill] sm:$0xff] }
 0x69a   : > { %v6197_v0 = vmax.f32 %v5819_v35, %v5987_v17  ;;  %v3890_v42 = vpop.f32.mrf.mxu3  ;;  %v5492_v45 = vpop.f32.mrf.mxu2 }
 0x69b   : > { %v5743_v4 = vadd.f32 %v9364_v18, %v5661_v10  ;;  %v4063_v58 = vadd.f32 %v3890_v42, %v10496_v16  ;;  %v5227_v42 = vld [vmem:[#allocation2 + $0x14e] sm:$0xff] }
 0x69c   : > { %v6370_v53 = vrot.slane %v6197_v0, 2 }
 0x69d   : > { %v5821_v20 = vmax.f32 %v5743_v4, 0.0  ;;  %v4596_v23 = vadd.f32 %v10497_v36, %v4063_v58  ;;  %v5226_v4 = vld [vmem:[#allocation2 + $0x146] sm:$0xff] }
 0x69e   : > { %v6371_v8 = vsel %vm6352_vm5, %v6368_v9, %v6370_v53  ;;  %v9537_v9 = vpop.f32.mrf.mxu1  ;;  %v10499_v58 = vld [vmem:[#allocation31_spill] sm:$0xff]  ;;  %v5287_v54 = vpack.c.bf16 %v5227_v42, %v5226_v4 }
 0x69f   : > { %v6585_v62 = vmax.f32 %v9478_v33, %v6371_v8  ;;  %v5988_v35 = vrot.slane %v5821_v20, 1  ;;  %v5129_v19 = vadd.f32 %v9151_v55, %v4596_v23  ;;  %7333 = vmatmul.msk.bf16.gmra.mxu3 %vm997_vm2, %v3687_v50  ;;  %7445 = vmatmul.msk.bf16.gmra.mxu1 %vm997_vm2, %v4771_v49 }
 0x6a1   : > { %6661 = vst.msk [vmem:[#allocation3 + $0x40] sm:$0xff] %vm6652_vm6, %v6585_v62  ;;  %v5989_v26 = vsel %vm5960_vm4, %v5986_v40, %v5988_v35  ;;  %v5662_v37 = vadd.f32 %v5489_v21, %v5129_v19 }
 0x6a2   : > { %v9535_v17 = vmax.f32 %v5820_v5, %v5989_v26  ;;  %v3893_v10 = vpop.f32.mrf.mxu3  ;;  %v5494_v0 = vpop.f32.mrf.mxu2  ;;  %v3628_v26 = vld [vmem:[#allocation2 + $0x134] sm:$0xff] }
 0x6a3   : > { %v5744_v33 = vadd.f32 %v9364_v18, %v5662_v37  ;;  %v4064_v55 = vadd.f32 %v3893_v10, %v10498_v22  ;;  %v10500_v10 = vld [vmem:[#allocation56_spill] sm:$0xff]  ;;  %v4729_v22 = vld [vmem:[#allocation2 + $0x265] sm:$0xff] }
 0x6a4   : > { %v6372_v6 = vrot.slane %v9535_v17, 2 }
 0x6a5   : > { %v5822_v16 = vmax.f32 %v5744_v33, 0.0  ;;  %v4597_v61 = vadd.f32 %v10499_v58, %v4064_v55  ;;  %v3627_v33 = vld [vmem:[#allocation2 + $0x12c] sm:$0xff] }
 0x6a6   : > { %v6373_v21 = vsel %vm6352_vm5, %v6370_v53, %v6372_v6  ;;  %v9553_v55 = vpop.f32.mrf.mxu1 }
 0x6a7   : > { %v6586_v5 = vmax.f32 %v9491_v15, %v6373_v21  ;;  %v5990_v40 = vrot.slane %v5822_v16, 1  ;;  %v5130_v36 = vadd.f32 %v9159_v38, %v4597_v61  ;;  %7475 = vmatmul.msk.bf16.gmra.mxu2 %vm997_vm2, %v5287_v54  ;;  %v4730_v15 = vld [vmem:[#allocation2 + $0x26d] sm:$0xff] }
 0x6a8   : > { %v6738_v23 = vld [vmem:[#allocation3 + $0x34] ss:$2 sm:$0xff]  ;;  %v4772_v4 = vpack.c.bf16 %v4730_v15, %v4729_v22 }
 0x6a9   : > { %v6741_v50 = vpack.c.bf16 %v6738_v23, %v6738_v23  ;;  %6662 = vst.msk [vmem:[#allocation3 + $0x48] sm:$0xff] %vm6652_vm6, %v6586_v5  ;;  %v5991_v49 = vsel %vm5960_vm4, %v5988_v35, %v5990_v40  ;;  %v5663_v8 = vadd.f32 %v5492_v45, %v5130_v36  ;;  %v10501_v45 = vld [vmem:[#allocation32_spill] sm:$0xff] }
 0x6aa   : > { %v9549_v62 = vmax.f32 %v5821_v20, %v5991_v49  ;;  %v3895_v19 = vpop.f32.mrf.mxu3  ;;  %v5497_v53 = vpop.f32.mrf.mxu2  ;;  %v3688_v20 = vpack.c.bf16 %v3628_v26, %v3627_v33 }
 0x6ab   : > { %v6748_v37 = vrot.slane %v6741_v50, 6  ;;  %v5745_v38 = vadd.f32 %v9364_v18, %v5663_v8  ;;  %v4065_v42 = vadd.f32 %v3895_v19, %v10500_v10  ;;  %v5229_v8 = vld [vmem:[#allocation2 + $0x15e] sm:$0xff] }
 0x6ad   : > { %6755 = vst.msk [vmem:[%s9462_s29 + $0x4] sm:$0xc] %vm6754_vm9, %v6748_v37  ;;  %v5823_v35 = vmax.f32 %v5745_v38, 0.0  ;;  %v4598_v6 = vadd.f32 %v10501_v45, %v4065_v42  ;;  %v10504_v38 = vld [vmem:[#allocation15_spill] sm:$0xff]  ;;  %v5228_v42 = vld [vmem:[#allocation2 + $0x156] sm:$0xff] }
 0x6ae   : > { %v9575_v45 = vpop.f32.mrf.mxu1 }
 0x6af   : > { %v5992_v58 = vrot.slane %v5823_v35, 1  ;;  %v5131_v61 = vadd.f32 %v9169_v63, %v4598_v6  ;;  %7334 = vmatmul.msk.bf16.gmra.mxu3 %vm997_vm2, %v3688_v20  ;;  %7446 = vmatmul.msk.bf16.gmra.mxu1 %vm997_vm2, %v4772_v4  ;;  %v6749_v63 = vrot.slane %v6748_v37, 4 }
 0x6b0   : > { %v6740_v54 = vld [vmem:[#allocation3 + $0x44] ss:$2 sm:$0xf] }
 0x6b1   : > { %v6742_v21 = vpack.c.bf16 %v6740_v54, %v6740_v54  ;;  %v5993_v5 = vsel %vm5960_vm4, %v5990_v40, %v5992_v58  ;;  %v5664_v36 = vadd.f32 %v5494_v0, %v5131_v61  ;;  %v10505_v40 = vld [vmem:[#allocation33_spill] sm:$0xff]  ;;  %v5288_v0 = vpack.c.bf16 %v5229_v8, %v5228_v42  ;;  %v10506_v8 = vld [vmem:[#allocation58_spill] sm:$0xff] }
 0x6b2   : > { %v9562_v23 = vmax.f32 %v5822_v16, %v5993_v5  ;;  %v3898_v50 = vpop.f32.mrf.mxu3  ;;  %v5499_v49 = vpop.f32.mrf.mxu2  ;;  %v3630_v5 = vld [vmem:[#allocation2 + $0x144] sm:$0xff] }
 0x6b3   : > { %v6750_v26 = vrot.slane %v6742_v21, 6  ;;  %v5746_v15 = vadd.f32 %v9364_v18, %v5664_v36  ;;  %v4066_v10 = vadd.f32 %v3898_v50, %v10504_v38  ;;  %v4732_v36 = vld [vmem:[#allocation2 + $0x27d] sm:$0xff]  ;;  %v4731_v38 = vld [vmem:[#allocation2 + $0x275] sm:$0xff] }
 0x6b4   : > { %v10507_v42 = vld [vmem:[#allocation34_spill] sm:$0xff] }
 0x6b5   : > { %v5824_v33 = vmax.f32 %v5746_v15, 0.0  ;;  %v4599_v22 = vadd.f32 %v10505_v40, %v4066_v10  ;;  %v6751_v16 = vsel %vm9564_vm12, %v6749_v63, %v6750_v26  ;;  %v3629_v15 = vld [vmem:[#allocation2 + $0x13c] sm:$0xff] }
 0x6b6   : > { %6756 = vst.msk [vmem:[%s9462_s29 + $0x8] sm:$0xf] %vm6727_vm7, %v6751_v16  ;;  %v3689_v40 = vpack.c.bf16 %v3630_v5, %v3629_v15  ;;  %v10508_v5 = vld [vmem:[#allocation16_spill] sm:$0xff] }
 0x6b7   : > { %v5994_v6 = vrot.slane %v5824_v33, 1  ;;  %v5132_v37 = vadd.f32 %v9179_v31, %v4599_v22  ;;  %7476 = vmatmul.msk.bf16.gmra.mxu2 %vm997_vm2, %v5288_v0  ;;  %v4773_v22 = vpack.c.bf16 %v4732_v36, %v4731_v38 }
 0x6b9   : > { %v5995_v20 = vsel %vm5960_vm4, %v5992_v58, %v5994_v6  ;;  %v5665_v4 = vadd.f32 %v5497_v53, %v5132_v37 }
 0x6ba   : > { %v6201_v61 = vmax.f32 %v5823_v35, %v5995_v20  ;;  %v3900_v54 = vpop.f32.mrf.mxu3  ;;  %v5502_v21 = vpop.f32.mrf.mxu2 }
 0x6bb   : > { %v5747_v50 = vadd.f32 %v9364_v18, %v5665_v4  ;;  %v4067_v63 = vadd.f32 %v3900_v54, %v10506_v8  ;;  %v9586_v35 = vpop.f32.mrf.mxu1  ;;  %v5230_v8 = vld [vmem:[#allocation2 + $0x166] sm:$0xff] }
 0x6bc   : > { %v6378_v26 = vrot.slane %v6201_v61, 2  ;;  %v5231_v61 = vld [vmem:[#allocation2 + $0x16e] sm:$0xff] }
 0x6bd   : > { %v5825_v10 = vmax.f32 %v5747_v50, 0.0  ;;  %v4600_v31 = vadd.f32 %v10507_v42, %v4067_v63  ;;  %v10509_v63 = vld [vmem:[#allocation35_spill] sm:$0xff]  ;;  %v5289_v38 = vpack.c.bf16 %v5231_v61, %v5230_v8  ;;  %v10511_v8 = vld [vmem:[#allocation36_spill] sm:$0xff] }
 0x6bf   : > { %v5996_v0 = vrot.slane %v5825_v10, 1  ;;  %v5133_v53 = vadd.f32 %v9189_v1, %v4600_v31  ;;  %7335 = vmatmul.msk.bf16.gmra.mxu3 %vm997_vm2, %v3689_v40  ;;  %7447 = vmatmul.msk.bf16.gmra.mxu1 %vm997_vm2, %v4773_v22 }
 0x6c1   : > { %v5997_v58 = vsel %vm5960_vm4, %v5994_v6, %v5996_v0  ;;  %v5666_v16 = vadd.f32 %v5499_v49, %v5133_v53 }
 0x6c2   : > { %v6202_v37 = vmax.f32 %v5824_v33, %v5997_v58  ;;  %v3903_v20 = vpop.f32.mrf.mxu3  ;;  %v5504_v4 = vpop.f32.mrf.mxu2 }
 0x6c3   : > { %v5748_v54 = vadd.f32 %v9364_v18, %v5666_v16  ;;  %v4068_v36 = vadd.f32 %v3903_v20, %v10508_v5  ;;  %v3632_v16 = vld [vmem:[#allocation2 + $0x154] sm:$0xff]  ;;  %v9598_v61 = vpop.f32.mrf.mxu1  ;;  %v3631_v5 = vld [vmem:[#allocation2 + $0x14c] sm:$0xff] }
 0x6c4   : > { %v6380_v50 = vrot.slane %v6202_v37, 2  ;;  %v4733_v37 = vld [vmem:[#allocation2 + $0x285] sm:$0xff]  ;;  %v4734_v20 = vld [vmem:[#allocation2 + $0x28d] sm:$0xff] }
 0x6c5   : > { %v5826_v1 = vmax.f32 %v5748_v54, 0.0  ;;  %v4601_v15 = vadd.f32 %v10509_v63, %v4068_v36 }
 0x6c6   : > { %v6381_v42 = vsel %vm6352_vm5, %v6378_v26, %v6380_v50  ;;  %v10510_v26 = vld [vmem:[#allocation60_spill] sm:$0xff] }
 0x6c7   : > { %v6590_v31 = vmax.f32 %v9535_v17, %v6381_v42  ;;  %v5998_v6 = vrot.slane %v5826_v1, 1  ;;  %v5134_v49 = vadd.f32 %v9199_v14, %v4601_v15  ;;  %7477 = vmatmul.msk.bf16.gmra.mxu2 %vm997_vm2, %v5289_v38  ;;  %v3690_v15 = vpack.c.bf16 %v3632_v16, %v3631_v5 }
 0x6c9   : > { %6666 = vst.msk [vmem:[#allocation3 + $0x68] sm:$0xff] %vm6652_vm6, %v6590_v31  ;;  %v5999_v33 = vsel %vm5960_vm4, %v5996_v0, %v5998_v6  ;;  %v5667_v40 = vadd.f32 %v5502_v21, %v5134_v49  ;;  %v4774_v0 = vpack.c.bf16 %v4734_v20, %v4733_v37  ;;  %v5232_v37 = vld [vmem:[#allocation2 + $0x176] sm:$0xff] }
 0x6ca   : > { %v6203_v22 = vmax.f32 %v5825_v10, %v5999_v33  ;;  %v3905_v53 = vpop.f32.mrf.mxu3  ;;  %v5507_v58 = vpop.f32.mrf.mxu2 }
 0x6cb   : > { %v5749_v17 = vadd.f32 %v9364_v18, %v5667_v40  ;;  %v4069_v54 = vadd.f32 %v3905_v53, %v10510_v26  ;;  %v5233_v53 = vld [vmem:[#allocation2 + $0x17e] sm:$0xff]  ;;  %v9615_v20 = vpop.f32.mrf.mxu1 }
 0x6cc   : > { %v6382_v14 = vrot.slane %v6203_v22, 2  ;;  %v10513_v26 = vld [vmem:[#allocation38_spill] sm:$0xff]  ;;  %v5290_v5 = vpack.c.bf16 %v5233_v53, %v5232_v37 }
 0x6cd   : > { %v5827_v36 = vmax.f32 %v5749_v17, 0.0  ;;  %v4602_v63 = vadd.f32 %v10511_v8, %v4069_v54 }
 0x6ce   : > { %v6383_v21 = vsel %vm6352_vm5, %v6380_v50, %v6382_v14 }
 0x6cf   : > { %v6591_v10 = vmax.f32 %v9549_v62, %v6383_v21  ;;  %v6000_v38 = vrot.slane %v5827_v36, 1  ;;  %v5135_v42 = vadd.f32 %v9207_v29, %v4602_v63  ;;  %7336 = vmatmul.msk.bf16.gmra.mxu3 %vm997_vm2, %v3690_v15  ;;  %7448 = vmatmul.msk.bf16.gmra.mxu1 %vm997_vm2, %v4774_v0  ;;  %v10512_v62 = vld [vmem:[#allocation17_spill] sm:$0xff] }
 0x6d1   : > { %6667 = vst.msk [vmem:[#allocation3 + $0x70] sm:$0xff] %vm6652_vm6, %v6591_v10  ;;  %v6001_v31 = vsel %vm5960_vm4, %v5998_v6, %v6000_v38  ;;  %v5668_v49 = vadd.f32 %v5504_v4, %v5135_v42 }
 0x6d2   : > { %v9610_v33 = vmax.f32 %v5826_v1, %v6001_v31  ;;  %v3908_v40 = vpop.f32.mrf.mxu3  ;;  %v5509_v22 = vpop.f32.mrf.mxu2 }
 0x6d3   : > { %v5750_v50 = vadd.f32 %v9364_v18, %v5668_v49  ;;  %v4070_v16 = vadd.f32 %v3908_v40, %v10512_v62  ;;  %v4735_v49 = vld [vmem:[#allocation2 + $0x295] sm:$0xff]  ;;  %v10514_v40 = vld [vmem:[#allocation62_spill] sm:$0xff] }
 0x6d4   : > { %v6384_v29 = vrot.slane %v9610_v33, 2 }
 0x6d5   : > { %v5828_v17 = vmax.f32 %v5750_v50, 0.0  ;;  %v4603_v54 = vadd.f32 %v10513_v26, %v4070_v16  ;;  %v4736_v50 = vld [vmem:[#allocation2 + $0x29d] sm:$0xff]  ;;  %v10515_v16 = vld [vmem:[#allocation40_spill] sm:$0xff] }
 0x6d6   : > { %v6385_v4 = vsel %vm6352_vm5, %v6382_v14, %v6384_v29  ;;  %v3634_v14 = vld [vmem:[#allocation2 + $0x164] sm:$0xff] }
 0x6d7   : > { %v6592_v1 = vmax.f32 %v9562_v23, %v6385_v4  ;;  %v6002_v6 = vrot.slane %v5828_v17, 1  ;;  %v5136_v8 = vadd.f32 %v9217_v52, %v4603_v54  ;;  %7478 = vmatmul.msk.bf16.gmra.mxu2 %vm997_vm2, %v5290_v5  ;;  %v3633_v52 = vld [vmem:[#allocation2 + $0x15c] sm:$0xff] }
 0x6d8   : > { %v6758_v63 = vld [vmem:[#allocation3 + $0x68] ss:$2 sm:$0xff] }
 0x6d9   : > { %v6761_v15 = vpack.c.bf16 %v6758_v63, %v6758_v63  ;;  %6668 = vst.msk [vmem:[#allocation3 + $0x78] sm:$0xff] %vm6652_vm6, %v6592_v1  ;;  %v6003_v0 = vsel %vm5960_vm4, %v6000_v38, %v6002_v6  ;;  %v5669_v21 = vadd.f32 %v5507_v58, %v5136_v8  ;;  %v3691_v38 = vpack.c.bf16 %v3634_v14, %v3633_v52  ;;  %v5234_v14 = vld [vmem:[#allocation2 + $0x186] sm:$0xff] }
 0x6da   : > { %v9624_v10 = vmax.f32 %v5827_v36, %v6003_v0  ;;  %v3910_v42 = vpop.f32.mrf.mxu3  ;;  %v5512_v31 = vpop.f32.mrf.mxu2  ;;  %v4775_v58 = vpack.c.bf16 %v4736_v50, %v4735_v49  ;;  %v9641_v0 = vld [vmem:[#allocation9] ss:$0 sm:$0xff] }
 0x6db   : > { %v5751_v23 = vadd.f32 %v9364_v18, %v5669_v21  ;;  %v4071_v53 = vadd.f32 %v3910_v42, %v10514_v40  ;;  %6763 = vst.msk [vmem:[%s9462_s29 + $0xc] sm:$0xf] %vm6727_vm7, %v6761_v15  ;;  %v9631_v36 = vpop.f32.mrf.mxu1  ;;  %v5235_v15 = vld [vmem:[#allocation2 + $0x18e] sm:$0xff] }
 0x6dc   : > { %v10516_v21 = vld [vmem:[#allocation64_spill] sm:$0xff] }
 0x6dd   : > { %v5829_v62 = vmax.f32 %v5751_v23, 0.0  ;;  %v4604_v29 = vadd.f32 %v10515_v16, %v4071_v53  ;;  %v10517_v23 = vld [vmem:[#allocation42_spill] sm:$0xff]  ;;  %v5291_v53 = vpack.c.bf16 %v5235_v15, %v5234_v14 }
 0x6df   : > { %v6004_v37 = vrot.slane %v5829_v62, 1  ;;  %v5137_v26 = vadd.f32 %v9227_v56, %v4604_v29  ;;  %7337 = vmatmul.msk.bf16.gmra.mxu3 %vm997_vm2, %v3691_v38  ;;  %7449 = vmatmul.msk.bf16.gmra.mxu1 %vm997_vm2, %v4775_v58  ;;  %v3636_v38 = vld [vmem:[#allocation2 + $0x174] sm:$0xff] }
 0x6e0   : > { %v6760_v18 = vld [vmem:[#allocation3 + $0x78] ss:$2 sm:$0xf] }
 0x6e1   : > { %v6762_v54 = vpack.c.bf16 %v6760_v18, %v6760_v18  ;;  %v6005_v5 = vsel %vm5960_vm4, %v6002_v6, %v6004_v37  ;;  %v5670_v4 = vadd.f32 %v5509_v22, %v5137_v26  ;;  %v10518_v26 = vld [vmem:[#allocation66_spill] sm:$0xff] }
 0x6e2   : > { %v9637_v1 = vmax.f32 %v5828_v17, %v6005_v5  ;;  %v3913_v8 = vpop.f32.mrf.mxu3  ;;  %v5514_v63 = vpop.f32.mrf.mxu2  ;;  %v3635_v5 = vld [vmem:[#allocation2 + $0x16c] sm:$0xff] }
 0x6e3   : > { %6764 = vst.msk [vmem:[%s9462_s29 + $0x10] sm:$0x3] %vm6735_vm8, %v6762_v54  ;;  %v5752_v56 = vadd.f32 %v9641_v0, %v5670_v4  ;;  %v4072_v42 = vadd.f32 %v3913_v8, %v10516_v21  ;;  %v10519_v8 = vld [vmem:[#allocation110_spill] sm:$0xff]  ;;  %v3692_v15 = vpack.c.bf16 %v3636_v38, %v3635_v5  ;;  %v10521_v38 = vld [vmem:[#allocation111_spill] sm:$0xff] }
 0x6e5   : > { %v5830_v49 = vmax.f32 %v5752_v56, 0.0  ;;  %v4605_v40 = vadd.f32 %v10517_v23, %v4072_v42  ;;  %v5237_v23 = vld [vmem:[#allocation2 + $0x19e] sm:$0xff] }
 0x6e7   : > { %v6006_v6 = vrot.slane %v5830_v49, 1  ;;  %v5138_v22 = vadd.f32 %v9238_v7, %v4605_v40  ;;  %7479 = vmatmul.msk.bf16.gmra.mxu2 %vm997_vm2, %v5291_v53  ;;  %v10520_v53 = vld [vmem:[#allocation68_spill] sm:$0xff] }
 0x6e9   : > { %v6007_v17 = vsel %vm5960_vm4, %v6004_v37, %v6006_v6  ;;  %v5671_v52 = vadd.f32 %v5512_v31, %v5138_v22 }
 0x6ea   : > { %v9649_v50 = vmax.f32 %v5829_v62, %v6007_v17  ;;  %v3915_v16 = vpop.f32.mrf.mxu3  ;;  %v5517_v29 = vpop.f32.mrf.mxu2 }
 0x6eb   : > { %v5753_v58 = vadd.f32 %v9641_v0, %v5671_v52  ;;  %v4073_v18 = vadd.f32 %v3915_v16, %v10518_v26  ;;  %v5236_v52 = vld [vmem:[#allocation2 + $0x196] sm:$0xff] }
 0x6ec   : > { %v6390_v54 = vrot.slane %v9649_v50, 2  ;;  %v5292_v26 = vpack.c.bf16 %v5237_v23, %v5236_v52  ;;  %v10523_v23 = vld [vmem:[#allocation46_spill] sm:$0xff] }
 0x6ed   : > { %v5831_v4 = vmax.f32 %v5753_v58, 0.0  ;;  %v4606_v7 = vadd.f32 %v10519_v8, %v4073_v18 }
 0x6ef   : > { %v6008_v56 = vrot.slane %v5831_v4, 1  ;;  %v5139_v37 = vadd.f32 %v9248_v59, %v4606_v7  ;;  %7338 = vmatmul.msk.bf16.gmra.mxu3 %vm997_vm2, %v3692_v15 }
 0x6f1   : > { %v6009_v31 = vsel %vm5960_vm4, %v6006_v6, %v6008_v56  ;;  %v5672_v62 = vadd.f32 %v5514_v63, %v5139_v37  ;;  %v3638_v37 = vld [vmem:[#allocation2 + $0x184] sm:$0xff] }
 0x6f2   : > { %v6208_v21 = vmax.f32 %v5830_v49, %v6009_v31  ;;  %v3918_v42 = vpop.f32.mrf.mxu3  ;;  %v5519_v14 = vpop.f32.mrf.mxu2 }
 0x6f3   : > { %v5754_v40 = vadd.f32 %v9641_v0, %v5672_v62  ;;  %v4074_v22 = vadd.f32 %v3918_v42, %v10520_v53  ;;  %v10522_v62 = vld [vmem:[#allocation70_spill] sm:$0xff] }
 0x6f4   : > { %v6392_v17 = vrot.slane %v6208_v21, 2 }
 0x6f5   : > { %v5832_v16 = vmax.f32 %v5754_v40, 0.0  ;;  %v4607_v58 = vadd.f32 %v10521_v38, %v4074_v22 }
 0x6f6   : > { %v6393_v59 = vsel %vm6352_vm5, %v6390_v54, %v6392_v17 }
 0x6f7   : > { %v6596_v18 = vmax.f32 %v9610_v33, %v6393_v59  ;;  %v6010_v6 = vrot.slane %v5832_v16, 1  ;;  %v5140_v63 = vadd.f32 %v9262_v12, %v4607_v58  ;;  %7480 = vmatmul.msk.bf16.gmra.mxu2 %vm997_vm2, %v5292_v26  ;;  %v3637_v33 = vld [vmem:[#allocation2 + $0x17c] sm:$0xff]  ;;  %v5239_v59 = vld [vmem:[#allocation2 + $0x1ae] sm:$0xff] }
 0x6f8   : > { %v3693_v40 = vpack.c.bf16 %v3638_v37, %v3637_v33 }
 0x6f9   : > { %6672 = vst.msk [vmem:[#allocation3 + $0x98] sm:$0xff] %vm6652_vm6, %v6596_v18  ;;  %v6011_v49 = vsel %vm5960_vm4, %v6008_v56, %v6010_v6  ;;  %v5673_v5 = vadd.f32 %v5517_v29, %v5140_v63  ;;  %v10524_v63 = vld [vmem:[#allocation72_spill] sm:$0xff] }
 0x6fa   : > { %v6209_v8 = vmax.f32 %v5831_v4, %v6011_v49  ;;  %v3920_v7 = vpop.f32.mrf.mxu3  ;;  %v5522_v15 = vpop.f32.mrf.mxu2 }
 0x6fb   : > { %v5755_v31 = vadd.f32 %v9641_v0, %v5673_v5  ;;  %v4075_v54 = vadd.f32 %v3920_v7, %v10522_v62 }
 0x6fc   : > { %v6394_v21 = vrot.slane %v6209_v8, 2  ;;  %v10525_v8 = vld [vmem:[#allocation114_spill] sm:$0xff] }
 0x6fd   : > { %v5833_v42 = vmax.f32 %v5755_v31, 0.0  ;;  %v4608_v12 = vadd.f32 %v10523_v23, %v4075_v54 }
 0x6fe   : > { %v6395_v53 = vsel %vm6352_vm5, %v6392_v17, %v6394_v21 }
 0x6ff   : > { %v6597_v22 = vmax.f32 %v9624_v10, %v6395_v53  ;;  %v6012_v56 = vrot.slane %v5833_v42, 1  ;;  %v5141_v29 = vadd.f32 %v9271_v24, %v4608_v12  ;;  %7339 = vmatmul.msk.bf16.gmra.mxu3 %vm997_vm2, %v3693_v40  ;;  %v5238_v10 = vld [vmem:[#allocation2 + $0x1a6] sm:$0xff]  ;;  %v3640_v12 = vld [vmem:[#allocation2 + $0x194] sm:$0xff] }
 0x700   : > { %v5293_v7 = vpack.c.bf16 %v5239_v59, %v5238_v10 }
 0x701   : > { %6673 = vst.msk [vmem:[#allocation3 + $0xa0] sm:$0xff] %vm6652_vm6, %v6597_v22  ;;  %v6013_v4 = vsel %vm5960_vm4, %v6010_v6, %v6012_v56  ;;  %v5674_v52 = vadd.f32 %v5519_v14, %v5141_v29  ;;  %v3639_v22 = vld [vmem:[#allocation2 + $0x18c] sm:$0xff] }
 0x702   : > { %v6210_v38 = vmax.f32 %v5832_v16, %v6013_v4  ;;  %v3923_v58 = vpop.f32.mrf.mxu3  ;;  %v5524_v26 = vpop.f32.mrf.mxu2  ;;  %v10527_v29 = vld [vmem:[#allocation115_spill] sm:$0xff] }
 0x703   : > { %v5756_v18 = vadd.f32 %v9641_v0, %v5674_v52  ;;  %v4076_v17 = vadd.f32 %v3923_v58, %v10524_v63  ;;  %v3694_v52 = vpack.c.bf16 %v3640_v12, %v3639_v22  ;;  %v3642_v22 = vld [vmem:[#allocation2 + $0x1a4] sm:$0xff] }
 0x704   : > { %v6396_v49 = vrot.slane %v6210_v38, 2 }
 0x705   : > { %v5834_v5 = vmax.f32 %v5756_v18, 0.0  ;;  %v4609_v24 = vadd.f32 %v10525_v8, %v4076_v17 }
 0x706   : > { %v6397_v37 = vsel %vm6352_vm5, %v6394_v21, %v6396_v49  ;;  %v10526_v21 = vld [vmem:[#allocation74_spill] sm:$0xff] }
 0x707   : > { %v6598_v31 = vmax.f32 %v9637_v1, %v6397_v37  ;;  %v6014_v6 = vrot.slane %v5834_v5, 1  ;;  %v5142_v14 = vadd.f32 %v9283_v39, %v4609_v24  ;;  %7481 = vmatmul.msk.bf16.gmra.mxu2 %vm997_vm2, %v5293_v7  ;;  %v10528_v7 = vld [vmem:[#allocation76_spill] sm:$0xff] }
 0x709   : > { %6674 = vst.msk [vmem:[#allocation3 + $0xa8] sm:$0xff] %vm6652_vm6, %v6598_v31  ;;  %v6015_v16 = vsel %vm5960_vm4, %v6012_v56, %v6014_v6  ;;  %v5675_v62 = vadd.f32 %v5522_v15, %v5142_v14  ;;  %v10529_v14 = vld [vmem:[#allocation50_spill] sm:$0xff] }
 0x70a   : > { %v9685_v54 = vmax.f32 %v5833_v42, %v6015_v16  ;;  %v3925_v33 = vpop.f32.mrf.mxu3  ;;  %v5527_v23 = vpop.f32.mrf.mxu2 }
 0x70b   : > { %v5757_v40 = vadd.f32 %v9641_v0, %v5675_v62  ;;  %v4077_v53 = vadd.f32 %v3925_v33, %v10526_v21 }
 0x70c   : > { %v6398_v1 = vrot.slane %v9685_v54, 2 }
 0x70d   : > { %v5835_v39 = vmax.f32 %v5757_v40, 0.0  ;;  %v4610_v4 = vadd.f32 %v10527_v29, %v4077_v53 }
 0x70e   : > { %v6399_v38 = vsel %vm6352_vm5, %v6396_v49, %v6398_v1  ;;  %v5241_v49 = vld [vmem:[#allocation2 + $0x1be] sm:$0xff] }
 0x70f   : > { %v6599_v15 = vmax.f32 %v9649_v50, %v6399_v38  ;;  %v6016_v42 = vrot.slane %v5835_v39, 1  ;;  %v5143_v56 = vadd.f32 %v9294_v44, %v4610_v4  ;;  %7340 = vmatmul.msk.bf16.gmra.mxu3 %vm997_vm2, %v3694_v52  ;;  %v5240_v44 = vld [vmem:[#allocation2 + $0x1b6] sm:$0xff]  ;;  %v10530_v38 = vld [vmem:[#allocation78_spill] sm:$0xff] }
 0x710   : > { %v6766_v58 = vld [vmem:[#allocation3 + $0x9c] ss:$2 sm:$0xff]  ;;  %v5294_v62 = vpack.c.bf16 %v5241_v49, %v5240_v44  ;;  %v10532_v44 = vld [vmem:[#allocation80_spill] sm:$0xff] }
 0x711   : > { %v6769_v59 = vpack.c.bf16 %v6766_v58, %v6766_v58  ;;  %6675 = vst.msk [vmem:[#allocation3 + $0xb0] sm:$0xff] %vm6652_vm6, %v6599_v15  ;;  %v6017_v18 = vsel %vm5960_vm4, %v6014_v6, %v6016_v42  ;;  %v5676_v63 = vadd.f32 %v5524_v26, %v5143_v56  ;;  %v10531_v58 = vld [vmem:[#allocation51_spill] sm:$0xff] }
 0x712   : > { %v9697_v17 = vmax.f32 %v5834_v5, %v6017_v18  ;;  %v3928_v10 = vpop.f32.mrf.mxu3  ;;  %v5529_v8 = vpop.f32.mrf.mxu2 }
 0x713   : > { %v6773_v24 = vrot.slane %v6769_v59, 6  ;;  %v5758_v50 = vadd.f32 %v9641_v0, %v5676_v63  ;;  %v4078_v37 = vadd.f32 %v3928_v10, %v10528_v7  ;;  %v5243_v7 = vld [vmem:[#allocation2 + $0x1ce] sm:$0xff] }
 0x715   : > { %6779 = vst.msk [vmem:[%s9462_s29 + $0x10] sm:$0xc] %vm6754_vm9, %v6773_v24  ;;  %v5836_v31 = vmax.f32 %v5758_v50, 0.0  ;;  %v4611_v16 = vadd.f32 %v10529_v14, %v4078_v37  ;;  %v6774_v29 = vrot.slane %v6773_v24, 4 }
 0x717   : > { %v6018_v33 = vrot.slane %v5836_v31, 1  ;;  %v5144_v26 = vadd.f32 %v9307_v13, %v4611_v16  ;;  %7482 = vmatmul.msk.bf16.gmra.mxu2 %vm997_vm2, %v5294_v62  ;;  %v3641_v13 = vld [vmem:[#allocation2 + $0x19c] sm:$0xff]  ;;  %v5242_v62 = vld [vmem:[#allocation2 + $0x1c6] sm:$0xff] }
 0x718   : > { %v6768_v5 = vld [vmem:[#allocation3 + $0xac] ss:$2 sm:$0xf]  ;;  %v3695_v18 = vpack.c.bf16 %v3642_v22, %v3641_v13  ;;  %v3643_v13 = vld [vmem:[#allocation2 + $0x1ac] sm:$0xff] }
 0x719   : > { %v6770_v6 = vpack.c.bf16 %v6768_v5, %v6768_v5  ;;  %v6019_v12 = vsel %vm5960_vm4, %v6016_v42, %v6018_v33  ;;  %v5677_v40 = vadd.f32 %v5527_v23, %v5144_v26  ;;  %v10533_v5 = vld [vmem:[#allocation118_spill] sm:$0xff] }
 0x71a   : > { %v9707_v21 = vmax.f32 %v5835_v39, %v6019_v12  ;;  %v3930_v53 = vpop.f32.mrf.mxu3  ;;  %v5532_v1 = vpop.f32.mrf.mxu2  ;;  %v5295_v12 = vpack.c.bf16 %v5243_v7, %v5242_v62  ;;  %v5245_v7 = vld [vmem:[#allocation2 + $0x1de] sm:$0xff] }
 0x71b   : > { %v6775_v4 = vrot.slane %v6770_v6, 6  ;;  %v5759_v52 = vadd.f32 %v9641_v0, %v5677_v40  ;;  %v4079_v15 = vadd.f32 %v3930_v53, %v10530_v38 }
 0x71d   : > { %v5837_v56 = vmax.f32 %v5759_v52, 0.0  ;;  %v4612_v59 = vadd.f32 %v10531_v58, %v4079_v15  ;;  %v6776_v42 = vsel %vm9564_vm12, %v6774_v29, %v6775_v4  ;;  %v3644_v29 = vld [vmem:[#allocation2 + $0x1b4] sm:$0xff]  ;;  %v10534_v52 = vld [vmem:[#allocation82_spill] sm:$0xff] }
 0x71e   : > { %6780 = vst.msk [vmem:[%s9462_s29 + $0x14] sm:$0xf] %vm6727_vm7, %v6776_v42  ;;  %v3696_v42 = vpack.c.bf16 %v3644_v29, %v3643_v13  ;;  %v3646_v29 = vld [vmem:[#allocation2 + $0x1c4] sm:$0xff] }
 0x71f   : > { %v6020_v23 = vrot.slane %v5837_v56, 1  ;;  %v5145_v39 = vadd.f32 %v9318_v3, %v4612_v59  ;;  %7341 = vmatmul.msk.bf16.gmra.mxu3 %vm997_vm2, %v3695_v18  ;;  %v10535_v59 = vld [vmem:[#allocation119_spill] sm:$0xff] }
 0x721   : > { %v6021_v63 = vsel %vm5960_vm4, %v6018_v33, %v6020_v23  ;;  %v5678_v10 = vadd.f32 %v5529_v8, %v5145_v39 }
 0x722   : > { %v6214_v49 = vmax.f32 %v5836_v31, %v6021_v63  ;;  %v3933_v24 = vpop.f32.mrf.mxu3  ;;  %v5534_v50 = vpop.f32.mrf.mxu2 }
 0x723   : > { %v5760_v37 = vadd.f32 %v9641_v0, %v5678_v10  ;;  %v4080_v14 = vadd.f32 %v3933_v24, %v10532_v44  ;;  %v10536_v44 = vld [vmem:[#allocation84_spill] sm:$0xff] }
 0x724   : > { %v6404_v16 = vrot.slane %v6214_v49, 2 }
 0x725   : > { %v5838_v26 = vmax.f32 %v5760_v37, 0.0  ;;  %v4613_v6 = vadd.f32 %v10533_v5, %v4080_v14  ;;  %v10537_v5 = vld [vmem:[#allocation55_spill] sm:$0xff] }
 0x727   : > { %v6022_v3 = vrot.slane %v5838_v26, 1  ;;  %v5146_v40 = vadd.f32 %v9329_v28, %v4613_v6  ;;  %7483 = vmatmul.msk.bf16.gmra.mxu2 %vm997_vm2, %v5295_v12 }
 0x729   : > { %v6023_v8 = vsel %vm5960_vm4, %v6020_v23, %v6022_v3  ;;  %v5679_v31 = vadd.f32 %v5532_v1, %v5146_v40 }
 0x72a   : > { %v6215_v33 = vmax.f32 %v5837_v56, %v6023_v8  ;;  %v3935_v53 = vpop.f32.mrf.mxu3  ;;  %v5537_v22 = vpop.f32.mrf.mxu2 }
 0x72b   : > { %v5761_v4 = vadd.f32 %v9641_v0, %v5679_v31  ;;  %v4081_v38 = vadd.f32 %v3935_v53, %v10534_v52  ;;  %v10538_v52 = vld [vmem:[#allocation86_spill] sm:$0xff] }
 0x72c   : > { %v6406_v15 = vrot.slane %v6215_v33, 2 }
 0x72d   : > { %v5839_v58 = vmax.f32 %v5761_v4, 0.0  ;;  %v4614_v18 = vadd.f32 %v10535_v59, %v4081_v38 }
 0x72e   : > { %v6407_v28 = vsel %vm6352_vm5, %v6404_v16, %v6406_v15 }
 0x72f   : > { %v6603_v39 = vmax.f32 %v9685_v54, %v6407_v28  ;;  %v6024_v23 = vrot.slane %v5839_v58, 1  ;;  %v5147_v1 = vadd.f32 %v9340_v57, %v4614_v18  ;;  %7342 = vmatmul.msk.bf16.gmra.mxu3 %vm997_vm2, %v3696_v42  ;;  %v5244_v54 = vld [vmem:[#allocation2 + $0x1d6] sm:$0xff] }
 0x730   : > { %v5296_v6 = vpack.c.bf16 %v5245_v7, %v5244_v54 }
 0x731   : > { %6679 = vst.msk [vmem:[#allocation3 + $0xd0] sm:$0xff] %vm6652_vm6, %v6603_v39  ;;  %v6025_v56 = vsel %vm5960_vm4, %v6022_v3, %v6024_v23  ;;  %v5680_v63 = vadd.f32 %v5534_v50, %v5147_v1 }
 0x732   : > { %v6216_v10 = vmax.f32 %v5838_v26, %v6025_v56  ;;  %v3938_v49 = vpop.f32.mrf.mxu3  ;;  %v5539_v24 = vpop.f32.mrf.mxu2 }
 0x733   : > { %v5762_v37 = vadd.f32 %v9641_v0, %v5680_v63  ;;  %v4082_v14 = vadd.f32 %v3938_v49, %v10536_v44  ;;  %v10540_v44 = vld [vmem:[#allocation121_spill] sm:$0xff] }
 0x734   : > { %v6408_v16 = vrot.slane %v6216_v10, 2  ;;  %v5247_v10 = vld [vmem:[#allocation2 + $0x1ee] sm:$0xff] }
 0x735   : > { %v5840_v62 = vmax.f32 %v5762_v37, 0.0  ;;  %v4615_v57 = vadd.f32 %v10537_v5, %v4082_v14 }
 0x736   : > { %v6409_v12 = vsel %vm6352_vm5, %v6406_v15, %v6408_v16  ;;  %v3645_v15 = vld [vmem:[#allocation2 + $0x1bc] sm:$0xff] }
 0x737   : > { %v6604_v40 = vmax.f32 %v9697_v17, %v6409_v12  ;;  %v6026_v3 = vrot.slane %v5840_v62, 1  ;;  %v5148_v50 = vadd.f32 %v9354_v27, %v4615_v57  ;;  %7484 = vmatmul.msk.bf16.gmra.mxu2 %vm997_vm2, %v5296_v6  ;;  %v3697_v59 = vpack.c.bf16 %v3646_v29, %v3645_v15  ;;  %v3647_v29 = vld [vmem:[#allocation2 + $0x1cc] sm:$0xff] }
 0x739   : > { %6680 = vst.msk [vmem:[#allocation3 + $0xd8] sm:$0xff] %vm6652_vm6, %v6604_v40  ;;  %v6027_v26 = vsel %vm5960_vm4, %v6024_v23, %v6026_v3  ;;  %v5681_v8 = vadd.f32 %v5537_v22, %v5148_v50  ;;  %v3648_v50 = vld [vmem:[#allocation2 + $0x1d4] sm:$0xff] }
 0x73a   : > { %v9743_v31 = vmax.f32 %v5839_v58, %v6027_v26  ;;  %v3940_v33 = vpop.f32.mrf.mxu3  ;;  %v5542_v53 = vpop.f32.mrf.mxu2 }
 0x73b   : > { %v5763_v4 = vadd.f32 %v9641_v0, %v5681_v8  ;;  %v4083_v38 = vadd.f32 %v3940_v33, %v10538_v52  ;;  %v10541_v8 = vld [vmem:[#allocation90_spill] sm:$0xff] }
 0x73c   : > { %v6410_v17 = vrot.slane %v9743_v31, 2 }
 0x73d   : > { %v5841_v27 = vmax.f32 %v5763_v4, 0.0  ;;  %v4616_v13 = vadd.f32 %v9172_v41, %v4083_v38  ;;  %v10542_v4 = vld [vmem:[#allocation122_spill] sm:$0xff]  ;;  %v3698_v38 = vpack.c.bf16 %v3648_v50, %v3647_v29 }
 0x73e   : > { %v6411_v18 = vsel %vm6352_vm5, %v6408_v16, %v6410_v17 }
 0x73f   : > { %v6605_v22 = vmax.f32 %v9707_v21, %v6411_v18  ;;  %v6028_v58 = vrot.slane %v5841_v27, 1  ;;  %v5149_v42 = vadd.f32 %v9362_v11, %v4616_v13  ;;  %7343 = vmatmul.msk.bf16.gmra.mxu3 %vm997_vm2, %v3697_v59  ;;  %v10539_v21 = vld [vmem:[#allocation88_spill] sm:$0xff]  ;;  %v5246_v11 = vld [vmem:[#allocation2 + $0x1e6] sm:$0xff] }
 0x740   : > { %v6782_v28 = vld [vmem:[#allocation3 + $0xd0] ss:$2 sm:$0xff]  ;;  %v5297_v16 = vpack.c.bf16 %v5247_v10, %v5246_v11 }
 0x741   : > { %v6785_v39 = vpack.c.bf16 %v6782_v28, %v6782_v28  ;;  %6681 = vst.msk [vmem:[#allocation3 + $0xe0] sm:$0xff] %vm6652_vm6, %v6605_v22  ;;  %v6029_v23 = vsel %vm5960_vm4, %v6026_v3, %v6028_v58  ;;  %v5682_v1 = vadd.f32 %v5539_v24, %v5149_v42  ;;  %v5249_v22 = vld [vmem:[#allocation2 + $0x1fe] sm:$0xff]  ;;  %v10543_v42 = vld [vmem:[#allocation92_spill] sm:$0xff] }
 0x742   : > { %v9755_v56 = vmax.f32 %v5840_v62, %v6029_v23  ;;  %v3943_v41 = vpop.f32.mrf.mxu3  ;;  %v5544_v63 = vpop.f32.mrf.mxu2  ;;  %v5248_v23 = vld [vmem:[#allocation2 + $0x1f6] sm:$0xff] }
 0x743   : > { %v5764_v49 = vadd.f32 %v9641_v0, %v5682_v1  ;;  %v4084_v7 = vadd.f32 %v3943_v41, %v10539_v21  ;;  %6787 = vst.msk [vmem:[%s9462_s29 + $0x18] sm:$0xf] %vm6727_vm7, %v6785_v39  ;;  %v10544_v41 = vld [vmem:[#allocation65_spill] sm:$0xff]  ;;  %v5298_v10 = vpack.c.bf16 %v5249_v22, %v5248_v23 }
 0x744   : > { %v10548_v22 = vld [vmem:[#allocation125_spill] sm:$0xff] }
 0x745   : > { %v5842_v37 = vmax.f32 %v5764_v49, 0.0  ;;  %v4617_v14 = vadd.f32 %v10540_v44, %v4084_v7 }
 0x747   : > { %v6030_v54 = vrot.slane %v5842_v37, 1  ;;  %v5150_v24 = vadd.f32 %v9377_v30, %v4617_v14  ;;  %7485 = vmatmul.msk.bf16.gmra.mxu2 %vm997_vm2, %v5297_v16  ;;  %v3650_v14 = vld [vmem:[#allocation2 + $0x1e4] sm:$0xff] }
 0x748   : > { %v6784_v62 = vld [vmem:[#allocation3 + $0xe0] ss:$2 sm:$0xf] }
 0x749   : > { %v6786_v5 = vpack.c.bf16 %v6784_v62, %v6784_v62  ;;  %v6031_v57 = vsel %vm5960_vm4, %v6028_v58, %v6030_v54  ;;  %v5683_v6 = vadd.f32 %v5542_v53, %v5150_v24 }
 0x74a   : > { %v9765_v12 = vmax.f32 %v5841_v27, %v6031_v57  ;;  %v3945_v40 = vpop.f32.mrf.mxu3  ;;  %v5547_v3 = vpop.f32.mrf.mxu2 }
 0x74b   : > { %6788 = vst.msk [vmem:[%s9462_s29 + $0x1c] sm:$0x3] %vm6735_vm8, %v6786_v5  ;;  %v5765_v26 = vadd.f32 %v9641_v0, %v5683_v6  ;;  %v4085_v33 = vadd.f32 %v3945_v40, %v10541_v8  ;;  %v3649_v5 = vld [vmem:[#allocation2 + $0x1dc] sm:$0xff]  ;;  %v10546_v6 = vld [vmem:[#allocation67_spill] sm:$0xff] }
 0x74c   : > { %v3699_v50 = vpack.c.bf16 %v3650_v14, %v3649_v5  ;;  %v10550_v14 = vld [vmem:[#allocation126_spill] sm:$0xff] }
 0x74d   : > { %v5843_v30 = vmax.f32 %v5765_v26, 0.0  ;;  %v4618_v52 = vadd.f32 %v10542_v4, %v4085_v33 }
 0x74f   : > { %v6032_v17 = vrot.slane %v5843_v30, 1  ;;  %v5151_v15 = vadd.f32 %v9391_v34, %v4618_v52  ;;  %7344 = vmatmul.msk.bf16.gmra.mxu3 %vm997_vm2, %v3698_v38  ;;  %v5251_v38 = vld [vmem:[#allocation2 + $0x20e] sm:$0xff] }
 0x751   : > { %v6033_v53 = vsel %vm5960_vm4, %v6030_v54, %v6032_v17  ;;  %v5684_v27 = vadd.f32 %v5544_v63, %v5151_v15  ;;  %v10545_v54 = vld [vmem:[#allocation94_spill] sm:$0xff]  ;;  %v10547_v15 = vld [vmem:[#allocation96_spill] sm:$0xff] }
 0x752   : > { %v9775_v13 = vmax.f32 %v5842_v37, %v6033_v53  ;;  %v3948_v59 = vpop.f32.mrf.mxu3  ;;  %v5549_v18 = vpop.f32.mrf.mxu2 }
 0x753   : > { %v5766_v58 = vadd.f32 %v9641_v0, %v5684_v27  ;;  %v4086_v28 = vadd.f32 %v3948_v59, %v10543_v42 }
 0x754   : > { %v6416_v39 = vrot.slane %v9775_v13, 2 }
 0x755   : > { %v5844_v1 = vmax.f32 %v5766_v58, 0.0  ;;  %v4619_v34 = vadd.f32 %v10544_v41, %v4086_v28 }
 0x757   : > { %v6034_v49 = vrot.slane %v5844_v1, 1  ;;  %v5152_v21 = vadd.f32 %v9404_v48, %v4619_v34  ;;  %7486 = vmatmul.msk.bf16.gmra.mxu2 %vm997_vm2, %v5298_v10 }
 0x759   : > { %v6035_v63 = vsel %vm5960_vm4, %v6032_v17, %v6034_v49  ;;  %v5685_v7 = vadd.f32 %v5547_v3, %v5152_v21 }
 0x75a   : > { %v6221_v11 = vmax.f32 %v5843_v30, %v6035_v63  ;;  %v3950_v37 = vpop.f32.mrf.mxu3  ;;  %v5552_v44 = vpop.f32.mrf.mxu2  ;;  %v10549_v63 = vld [vmem:[#allocation97_spill] sm:$0xff] }
 0x75b   : > { %v5767_v16 = vadd.f32 %v9641_v0, %v5685_v7  ;;  %v4087_v24 = vadd.f32 %v3950_v37, %v10545_v54 }
 0x75c   : > { %v6418_v62 = vrot.slane %v6221_v11, 2 }
 0x75d   : > { %v5845_v57 = vmax.f32 %v5767_v16, 0.0  ;;  %v4620_v40 = vadd.f32 %v10546_v6, %v4087_v24 }
 0x75e   : > { %v6419_v48 = vsel %vm6352_vm5, %v6416_v39, %v6418_v62 }
 0x75f   : > { %v6609_v26 = vmax.f32 %v9743_v31, %v6419_v48  ;;  %v6036_v8 = vrot.slane %v5845_v57, 1  ;;  %v5153_v3 = vadd.f32 %v9416_v32, %v4620_v40  ;;  %7345 = vmatmul.msk.bf16.gmra.mxu3 %vm997_vm2, %v3699_v50  ;;  %v5250_v31 = vld [vmem:[#allocation2 + $0x206] sm:$0xff]  ;;  %v5253_v48 = vld [vmem:[#allocation2 + $0x21e] sm:$0xff] }
 0x760   : > { %v5299_v58 = vpack.c.bf16 %v5251_v38, %v5250_v31 }
 0x761   : > { %6685 = vst.msk [vmem:[#allocation3 + $0x100] sm:$0xff] %vm6652_vm6, %v6609_v26  ;;  %v6037_v33 = vsel %vm5960_vm4, %v6034_v49, %v6036_v8  ;;  %v5686_v29 = vadd.f32 %v5549_v18, %v5153_v3  ;;  %v3652_v49 = vld [vmem:[#allocation2 + $0x1f4] sm:$0xff] }
 0x762   : > { %v6222_v30 = vmax.f32 %v5844_v1, %v6037_v33  ;;  %v3953_v4 = vpop.f32.mrf.mxu3  ;;  %v5554_v52 = vpop.f32.mrf.mxu2  ;;  %v5252_v33 = vld [vmem:[#allocation2 + $0x216] sm:$0xff] }
 0x763   : > { %v5768_v17 = vadd.f32 %v9641_v0, %v5686_v29  ;;  %v4088_v53 = vadd.f32 %v3953_v4, %v10547_v15  ;;  %v10552_v29 = vld [vmem:[#allocation75_spill] sm:$0xff]  ;;  %v5300_v4 = vpack.c.bf16 %v5253_v48, %v5252_v33 }
 0x764   : > { %v6420_v27 = vrot.slane %v6222_v30, 2 }
 0x765   : > { %v5846_v59 = vmax.f32 %v5768_v17, 0.0  ;;  %v4621_v32 = vadd.f32 %v10548_v22, %v4088_v53 }
 0x766   : > { %v6421_v42 = vsel %vm6352_vm5, %v6418_v62, %v6420_v27 }
 0x767   : > { %v6610_v28 = vmax.f32 %v9755_v56, %v6421_v42  ;;  %v6038_v39 = vrot.slane %v5846_v59, 1  ;;  %v5154_v18 = vadd.f32 %v9426_v25, %v4621_v32  ;;  %7487 = vmatmul.msk.bf16.gmra.mxu2 %vm997_vm2, %v5299_v58  ;;  %v3651_v56 = vld [vmem:[#allocation2 + $0x1ec] sm:$0xff]  ;;  %v3654_v42 = vld [vmem:[#allocation2 + $0x204] sm:$0xff] }
 0x768   : > { %v3700_v16 = vpack.c.bf16 %v3652_v49, %v3651_v56 }
 0x769   : > { %6686 = vst.msk [vmem:[#allocation3 + $0x108] sm:$0xff] %vm6652_vm6, %v6610_v28  ;;  %v6039_v23 = vsel %vm5960_vm4, %v6036_v8, %v6038_v39  ;;  %v5687_v1 = vadd.f32 %v5552_v44, %v5154_v18  ;;  %v10551_v8 = vld [vmem:[#allocation37_spill] sm:$0xff] }
 0x76a   : > { %v6223_v41 = vmax.f32 %v5845_v57, %v6039_v23  ;;  %v3955_v34 = vpop.f32.mrf.mxu3  ;;  %v5557_v10 = vpop.f32.mrf.mxu2 }
 0x76b   : > { %v5769_v21 = vadd.f32 %v9641_v0, %v5687_v1  ;;  %v4089_v7 = vadd.f32 %v3955_v34, %v10549_v63  ;;  %v10554_v1 = vld [vmem:[#allocation77_spill] sm:$0xff] }
 0x76c   : > { %v6422_v11 = vrot.slane %v6223_v41, 2 }
 0x76d   : > { %v5847_v37 = vmax.f32 %v5769_v21, 0.0  ;;  %v4622_v25 = vadd.f32 %v10550_v14, %v4089_v7 }
 0x76e   : > { %v6423_v54 = vsel %vm6352_vm5, %v6420_v27, %v6422_v11 }
 0x76f   : > { %v6611_v24 = vmax.f32 %v9765_v12, %v6423_v54  ;;  %v6040_v62 = vrot.slane %v5847_v37, 1  ;;  %v5155_v44 = vadd.f32 %v9440_v51, %v4622_v25  ;;  %7346 = vmatmul.msk.bf16.gmra.mxu3 %vm997_vm2, %v3700_v16  ;;  %v5255_v25 = vld [vmem:[#allocation2 + $0x22e] sm:$0xff] }
 0x771   : > { %6687 = vst.msk [vmem:[#allocation3 + $0x110] sm:$0xff] %vm6652_vm6, %v6611_v24  ;;  %v6041_v5 = vsel %vm5960_vm4, %v6038_v39, %v6040_v62  ;;  %v5688_v57 = vadd.f32 %v5554_v52, %v5155_v44  ;;  %v10553_v39 = vld [vmem:[#allocation39_spill] sm:$0xff] }
 0x772   : > { %v9811_v6 = vmax.f32 %v5846_v59, %v6041_v5  ;;  %v3958_v40 = vpop.f32.mrf.mxu3  ;;  %v5559_v50 = vpop.f32.mrf.mxu2 }
 0x773   : > { %v5770_v26 = vadd.f32 %v9641_v0, %v5688_v57  ;;  %v4090_v3 = vadd.f32 %v3958_v40, %v10551_v8  ;;  %v10556_v57 = vld [vmem:[#allocation129_spill] sm:$0xff] }
 0x774   : > { %v6424_v12 = vrot.slane %v9811_v6, 2 }
 0x775   : > { %v5848_v51 = vmax.f32 %v5770_v26, 0.0  ;;  %v4623_v30 = vadd.f32 %v10552_v29, %v4090_v3 }
 0x776   : > { %v6425_v38 = vsel %vm6352_vm5, %v6422_v11, %v6424_v12 }
 0x777   : > { %v6612_v52 = vmax.f32 %v9775_v13, %v6425_v38  ;;  %v6042_v17 = vrot.slane %v5848_v51, 1  ;;  %v5156_v15 = vadd.f32 %v9464_v60, %v4623_v30  ;;  %7488 = vmatmul.msk.bf16.gmra.mxu2 %vm997_vm2, %v5300_v4  ;;  %v3653_v60 = vld [vmem:[#allocation2 + $0x1fc] sm:$0xff]  ;;  %v3656_v30 = vld [vmem:[#allocation2 + $0x214] sm:$0xff]  ;;  %v10557_v38 = vld [vmem:[#allocation43_spill] sm:$0xff] }
 0x778   : > { %v6790_v53 = vld [vmem:[#allocation3 + $0x104] ss:$2 sm:$0xff]  ;;  %v3701_v34 = vpack.c.bf16 %v3654_v42, %v3653_v60 }
 0x779   : > { %v6793_v27 = vpack.c.bf16 %v6790_v53, %v6790_v53  ;;  %6688 = vst.msk [vmem:[#allocation3 + $0x118] sm:$0xff] %vm6652_vm6, %v6612_v52  ;;  %v6043_v31 = vsel %vm5960_vm4, %v6040_v62, %v6042_v17  ;;  %v5689_v59 = vadd.f32 %v5557_v10, %v5156_v15  ;;  %v10555_v62 = vld [vmem:[#allocation41_spill] sm:$0xff]  ;;  %v3655_v15 = vld [vmem:[#allocation2 + $0x20c] sm:$0xff] }
 0x77a   : > { %v9823_v22 = vmax.f32 %v5847_v37, %v6043_v31  ;;  %v3960_v32 = vpop.f32.mrf.mxu3  ;;  %v5562_v58 = vpop.f32.mrf.mxu2 }
 0x77b   : > { %v6797_v28 = vrot.slane %v6793_v27, 6  ;;  %v5771_v13 = vadd.f32 %v9641_v0, %v5689_v59  ;;  %v4091_v18 = vadd.f32 %v3960_v32, %v10553_v39  ;;  %v10558_v27 = vld [vmem:[#allocation130_spill] sm:$0xff]  ;;  %v3702_v59 = vpack.c.bf16 %v3656_v30, %v3655_v15 }
 0x77d   : > { %6803 = vst.msk [vmem:[%s9462_s29 + $0x1c] sm:$0xc] %vm6754_vm9, %v6797_v28  ;;  %v5849_v23 = vmax.f32 %v5771_v13, 0.0  ;;  %v4624_v41 = vadd.f32 %v10554_v1, %v4091_v18  ;;  %v6798_v16 = vrot.slane %v6797_v28, 4  ;;  %v5257_v18 = vld [vmem:[#allocation2 + $0x23e] sm:$0xff] }
 0x77f   : > { %v6044_v49 = vrot.slane %v5849_v23, 1  ;;  %v5157_v10 = vadd.f32 %v9480_v46, %v4624_v41  ;;  %7347 = vmatmul.msk.bf16.gmra.mxu3 %vm997_vm2, %v3701_v34  ;;  %v5254_v46 = vld [vmem:[#allocation2 + $0x226] sm:$0xff]  ;;  %v5256_v34 = vld [vmem:[#allocation2 + $0x236] sm:$0xff] }
 0x780   : > { %v6792_v21 = vld [vmem:[#allocation3 + $0x114] ss:$2 sm:$0xf]  ;;  %v5301_v48 = vpack.c.bf16 %v5255_v25, %v5254_v46  ;;  %v10561_v46 = vld [vmem:[#allocation112_spill] sm:$0xff] }
 0x781   : > { %v6794_v63 = vpack.c.bf16 %v6792_v21, %v6792_v21  ;;  %v6045_v7 = vsel %vm5960_vm4, %v6042_v17, %v6044_v49  ;;  %v5690_v11 = vadd.f32 %v5559_v50, %v5157_v10  ;;  %v10560_v10 = vld [vmem:[#allocation85_spill] sm:$0xff] }
 0x782   : > { %v9833_v56 = vmax.f32 %v5848_v51, %v6045_v7  ;;  %v3963_v37 = vpop.f32.mrf.mxu3  ;;  %v5564_v14 = vpop.f32.mrf.mxu2 }
 0x783   : > { %v6799_v54 = vrot.slane %v6794_v63, 6  ;;  %v5772_v24 = vadd.f32 %v9641_v0, %v5690_v11  ;;  %v4092_v44 = vadd.f32 %v3963_v37, %v10555_v62  ;;  %v5302_v63 = vpack.c.bf16 %v5257_v18, %v5256_v34  ;;  %v3658_v62 = vld [vmem:[#allocation2 + $0x224] sm:$0xff] }
 0x785   : > { %v5850_v5 = vmax.f32 %v5772_v24, 0.0  ;;  %v4625_v40 = vadd.f32 %v10556_v57, %v4092_v44  ;;  %v6800_v26 = vsel %vm9564_vm12, %v6798_v16, %v6799_v54 }
 0x786   : > { %6804 = vst.msk [vmem:[%s9462_s29 + $0x20] sm:$0xf] %vm6727_vm7, %v6800_v26 }
 0x787   : > { %v6046_v50 = vrot.slane %v5850_v5, 1  ;;  %v5158_v8 = vadd.f32 %v9496_v43, %v4625_v40  ;;  %7489 = vmatmul.msk.bf16.gmra.mxu2 %vm997_vm2, %v5301_v48  ;;  %v10562_v48 = vld [vmem:[#allocation87_spill] sm:$0xff] }
 0x789   : > { %v6047_v3 = vsel %vm5960_vm4, %v6044_v49, %v6046_v50  ;;  %v5691_v12 = vadd.f32 %v5562_v58, %v5158_v8 }
 0x78a   : > { %v6227_v33 = vmax.f32 %v5849_v23, %v6047_v3  ;;  %v3965_v51 = vpop.f32.mrf.mxu3  ;;  %v5567_v29 = vpop.f32.mrf.mxu2  ;;  %v10559_v23 = vld [vmem:[#allocation44_spill] sm:$0xff] }
 0x78b   : > { %v5773_v4 = vadd.f32 %v9641_v0, %v5691_v12  ;;  %v4093_v52 = vadd.f32 %v3965_v51, %v10557_v38  ;;  %v5259_v38 = vld [vmem:[#allocation2 + $0x24e] sm:$0xff] }
 0x78c   : > { %v6430_v17 = vrot.slane %v6227_v33, 2 }
 0x78d   : > { %v5851_v53 = vmax.f32 %v5773_v4, 0.0  ;;  %v4626_v31 = vadd.f32 %v10558_v27, %v4093_v52 }
 0x78f   : > { %v6048_v43 = vrot.slane %v5851_v53, 1  ;;  %v5159_v32 = vadd.f32 %v9506_v47, %v4626_v31  ;;  %7348 = vmatmul.msk.bf16.gmra.mxu3 %vm997_vm2, %v3702_v59  ;;  %v10564_v31 = vld [vmem:[#allocation133_spill] sm:$0xff] }
 0x791   : > { %v6049_v58 = vsel %vm5960_vm4, %v6046_v50, %v6048_v43  ;;  %v5692_v42 = vadd.f32 %v5564_v14, %v5159_v32 }
 0x792   : > { %v6228_v28 = vmax.f32 %v5850_v5, %v6049_v58  ;;  %v3968_v13 = vpop.f32.mrf.mxu3  ;;  %v5569_v39 = vpop.f32.mrf.mxu2 }
 0x793   : > { %v5774_v60 = vadd.f32 %v9641_v0, %v5692_v42  ;;  %v4094_v1 = vadd.f32 %v3968_v13, %v10559_v23  ;;  %v9878_v58 = vpop.f32.mrf.mxu1 }
 0x794   : > { %v6432_v41 = vrot.slane %v6228_v28, 2 }
 0x795   : > { %v5852_v49 = vmax.f32 %v5774_v60, 0.0  ;;  %v4627_v21 = vadd.f32 %v10560_v10, %v4094_v1 }
 0x796   : > { %v6433_v47 = vsel %vm6352_vm5, %v6430_v17, %v6432_v41  ;;  %v10563_v17 = vld [vmem:[#allocation113_spill] sm:$0xff] }
 0x797   : > { %v6616_v7 = vmax.f32 %v9811_v6, %v6433_v47  ;;  %v6050_v11 = vrot.slane %v5852_v49, 1  ;;  %v5160_v37 = vadd.f32 %v9521_v2, %v4627_v21  ;;  %7490 = vmatmul.msk.bf16.gmra.mxu2 %vm997_vm2, %v5302_v63  ;;  %v3657_v6 = vld [vmem:[#allocation2 + $0x21c] sm:$0xff]  ;;  %v10566_v47 = vld [vmem:[#allocation134_spill] sm:$0xff] }
 0x798   : > { %v3703_v26 = vpack.c.bf16 %v3658_v62, %v3657_v6  ;;  %v9903_v6 = vld [vmem:[#allocation9] ss:$0 sm:$0xff] }
 0x799   : > { %6692 = vst.msk [vmem:[#allocation3 + $0x138] sm:$0xff] %vm6652_vm6, %v6616_v7  ;;  %v6051_v14 = vsel %vm5960_vm4, %v6048_v43, %v6050_v11  ;;  %v5693_v25 = vadd.f32 %v5567_v29, %v5160_v37 }
 0x79a   : > { %v6229_v16 = vmax.f32 %v5851_v53, %v6051_v14  ;;  %v3970_v54 = vpop.f32.mrf.mxu3  ;;  %v5572_v24 = vpop.f32.mrf.mxu2  ;;  %v5258_v53 = vld [vmem:[#allocation2 + $0x246] sm:$0xff] }
 0x79b   : > { %v5775_v44 = vadd.f32 %v9641_v0, %v5693_v25  ;;  %v4095_v5 = vadd.f32 %v3970_v54, %v10561_v46  ;;  %v5303_v43 = vpack.c.bf16 %v5259_v38, %v5258_v53  ;;  %v9896_v54 = vpop.f32.mrf.mxu1 }
 0x79c   : > { %v6434_v57 = vrot.slane %v6229_v16, 2 }
 0x79d   : > { %v5853_v40 = vmax.f32 %v5775_v44, 0.0  ;;  %v4628_v2 = vadd.f32 %v10562_v48, %v4095_v5 }
 0x79e   : > { %v6435_v50 = vsel %vm6352_vm5, %v6432_v41, %v6434_v57 }
 0x79f   : > { %v6617_v8 = vmax.f32 %v9823_v22, %v6435_v50  ;;  %v6052_v3 = vrot.slane %v5853_v40, 1  ;;  %v5161_v12 = vadd.f32 %v9537_v9, %v4628_v2  ;;  %7349 = vmatmul.msk.bf16.gmra.mxu3 %vm997_vm2, %v3703_v26  ;;  %v9874_v9 = vpop.f32.mrf.mxu0  ;;  %v5260_v2 = vld [vmem:[#allocation2 + $0x256] sm:$0xff]  ;;  %v10568_v50 = vld [vmem:[#allocation95_spill] sm:$0xff] }
 0x7a1   : > { %6693 = vst.msk [vmem:[#allocation3 + $0x140] sm:$0xff] %vm6652_vm6, %v6617_v8  ;;  %v6053_v33 = vsel %vm5960_vm4, %v6050_v11, %v6052_v3  ;;  %v5694_v51 = vadd.f32 %v5569_v39, %v5161_v12 }
 0x7a2   : > { %v9869_v29 = vmax.f32 %v5852_v49, %v6053_v33  ;;  %v3973_v30 = vpop.f32.mrf.mxu3  ;;  %v5574_v4 = vpop.f32.mrf.mxu2  ;;  %v3660_v49 = vld [vmem:[#allocation2 + $0x234] sm:$0xff] }
 0x7a3   : > { %v5776_v52 = vadd.f32 %v9641_v0, %v5694_v51  ;;  %v4096_v15 = vadd.f32 %v3973_v30, %v10563_v17 }
 0x7a4   : > { %v6436_v22 = vrot.slane %v9869_v29, 2 }
 0x7a5   : > { %v5854_v27 = vmax.f32 %v5776_v52, 0.0  ;;  %v4629_v59 = vadd.f32 %v10564_v31, %v4096_v15  ;;  %v3662_v15 = vld [vmem:[#allocation2 + $0x244] sm:$0xff] }
 0x7a6   : > { %v6437_v32 = vsel %vm6352_vm5, %v6434_v57, %v6436_v22  ;;  %v5261_v57 = vld [vmem:[#allocation2 + $0x25e] sm:$0xff]  ;;  %v9915_v22 = vpop.f32.mrf.mxu1 }
 0x7a7   : > { %v6618_v42 = vmax.f32 %v9833_v56, %v6437_v32  ;;  %v6054_v28 = vrot.slane %v5854_v27, 1  ;;  %v5162_v13 = vadd.f32 %v9553_v55, %v4629_v59  ;;  %7491 = vmatmul.msk.bf16.gmra.mxu2 %vm997_vm2, %v5303_v43  ;;  %v10565_v56 = vld [vmem:[#allocation47_spill] sm:$0xff]  ;;  %v9892_v37 = vpop.f32.mrf.mxu0  ;;  %v3661_v59 = vld [vmem:[#allocation2 + $0x23c] sm:$0xff]  ;;  %v10570_v32 = vld [vmem:[#allocation136_spill] sm:$0xff] }
 0x7a8   : > { %v6806_v39 = vld [vmem:[#allocation3 + $0x138] ss:$2 sm:$0xff] }
 0x7a9   : > { %v6809_v18 = vpack.c.bf16 %v6806_v39, %v6806_v39  ;;  %6694 = vst.msk [vmem:[#allocation3 + $0x148] sm:$0xff] %vm6652_vm6, %v6618_v42  ;;  %v6055_v60 = vsel %vm5960_vm4, %v6052_v3, %v6054_v28  ;;  %v5695_v23 = vadd.f32 %v5572_v24, %v5162_v13  ;;  %v3659_v55 = vld [vmem:[#allocation2 + $0x22c] sm:$0xff]  ;;  %v5304_v3 = vpack.c.bf16 %v5261_v57, %v5260_v2 }
 0x7aa   : > { %v9885_v1 = vmax.f32 %v5853_v40, %v6055_v60  ;;  %v3975_v41 = vpop.f32.mrf.mxu3  ;;  %v5577_v34 = vpop.f32.mrf.mxu2  ;;  %v3704_v11 = vpack.c.bf16 %v3660_v49, %v3659_v55  ;;  %v10567_v40 = vld [vmem:[#allocation48_spill] sm:$0xff] }
 0x7ab   : > { %v5777_v10 = vadd.f32 %v9641_v0, %v5695_v23  ;;  %v4097_v21 = vadd.f32 %v3975_v41, %v10565_v56  ;;  %6811 = vst.msk [vmem:[%s9462_s29 + $0x24] sm:$0xf] %vm6727_vm7, %v6809_v18  ;;  %v5263_v49 = vld [vmem:[#allocation2 + $0x26e] sm:$0xff] }
 0x7ad   : > { %v5855_v63 = vmax.f32 %v5777_v10, 0.0  ;;  %v4630_v7 = vadd.f32 %v10566_v47, %v4097_v21  ;;  %v10571_v21 = vld [vmem:[#allocation116_spill] sm:$0xff]  ;;  %v5262_v47 = vld [vmem:[#allocation2 + $0x266] sm:$0xff] }
 0x7af   : > { %v6056_v14 = vrot.slane %v5855_v63, 1  ;;  %v5163_v25 = vadd.f32 %v9575_v45, %v4630_v7  ;;  %7350 = vmatmul.msk.bf16.gmra.mxu3 %vm997_vm2, %v3704_v11  ;;  %v9910_v51 = vpop.f32.mrf.mxu0  ;;  %v9928_v7 = vpop.f32.mrf.mxu1  ;;  %v10572_v11 = vld [vmem:[#allocation137_spill] sm:$0xff] }
 0x7b0   : > { %v6808_v16 = vld [vmem:[#allocation3 + $0x148] ss:$2 sm:$0xf] }
 0x7b1   : > { %v6810_v0 = vpack.c.bf16 %v6808_v16, %v6808_v16  ;;  %v6057_v24 = vsel %vm5960_vm4, %v6054_v28, %v6056_v14  ;;  %v5696_v62 = vadd.f32 %v5574_v4, %v5163_v25  ;;  %v3705_v28 = vpack.c.bf16 %v3662_v15, %v3661_v59 }
 0x7b2   : > { %v9899_v44 = vmax.f32 %v5854_v27, %v6057_v24  ;;  %v3978_v46 = vpop.f32.mrf.mxu3  ;;  %v5579_v5 = vpop.f32.mrf.mxu2  ;;  %v10569_v27 = vld [vmem:[#allocation49_spill] sm:$0xff]  ;;  %v5305_v25 = vpack.c.bf16 %v5263_v49, %v5262_v47 }
 0x7b3   : > { %6812 = vst.msk [vmem:[%s9462_s29 + $0x28] sm:$0x3] %vm6735_vm8, %v6810_v0  ;;  %v5778_v45 = vadd.f32 %v9903_v6, %v5696_v62  ;;  %v4098_v48 = vadd.f32 %v3978_v46, %v10567_v40 }
 0x7b5   : > { %v5856_v26 = vmax.f32 %v5778_v45, 0.0  ;;  %v4631_v8 = vadd.f32 %v10568_v50, %v4098_v48  ;;  %v3664_v48 = vld [vmem:[#allocation2 + $0x254] sm:$0xff] }
 0x7b7   : > { %v6058_v12 = vrot.slane %v5856_v26, 1  ;;  %v5164_v33 = vadd.f32 %v9586_v35, %v4631_v8  ;;  %7492 = vmatmul.msk.bf16.gmra.mxu2 %vm997_vm2, %v5304_v3  ;;  %v9924_v10 = vpop.f32.mrf.mxu0 }
 0x7b9   : > { %v6059_v30 = vsel %vm5960_vm4, %v6056_v14, %v6058_v12  ;;  %v5697_v4 = vadd.f32 %v5577_v34, %v5164_v33 }
 0x7ba   : > { %v9913_v38 = vmax.f32 %v5855_v63, %v6059_v30  ;;  %v3980_v52 = vpop.f32.mrf.mxu3  ;;  %v5582_v17 = vpop.f32.mrf.mxu2 }
 0x7bb   : > { %v5779_v53 = vadd.f32 %v9903_v6, %v5697_v4  ;;  %v4099_v31 = vadd.f32 %v3980_v52, %v10569_v27  ;;  %v9943_v52 = vpop.f32.mrf.mxu1 }
 0x7bc   : > { %v6442_v35 = vrot.slane %v9913_v38, 2 }
 0x7bd   : > { %v5857_v43 = vmax.f32 %v5779_v53, 0.0  ;;  %v4632_v42 = vadd.f32 %v10570_v32, %v4099_v31  ;;  %v5265_v32 = vld [vmem:[#allocation2 + $0x27e] sm:$0xff] }
 0x7bf   : > { %v6060_v13 = vrot.slane %v5857_v43, 1  ;;  %v5165_v39 = vadd.f32 %v9598_v61, %v4632_v42  ;;  %7351 = vmatmul.msk.bf16.gmra.mxu3 %vm997_vm2, %v3705_v28  ;;  %v9939_v3 = vpop.f32.mrf.mxu0  ;;  %v10575_v28 = vld [vmem:[#allocation52_spill] sm:$0xff] }
 0x7c1   : > { %v6061_v18 = vsel %vm5960_vm4, %v6058_v12, %v6060_v13  ;;  %v5698_v60 = vadd.f32 %v5579_v5, %v5165_v39  ;;  %v10574_v12 = vld [vmem:[#allocation138_spill] sm:$0xff] }
 0x7c2   : > { %v6234_v23 = vmax.f32 %v5856_v26, %v6061_v18  ;;  %v3983_v41 = vpop.f32.mrf.mxu3  ;;  %v5584_v34 = vpop.f32.mrf.mxu2  ;;  %v10573_v26 = vld [vmem:[#allocation117_spill] sm:$0xff] }
 0x7c3   : > { %v5780_v56 = vadd.f32 %v9903_v6, %v5698_v60  ;;  %v4100_v55 = vadd.f32 %v3983_v41, %v10571_v21  ;;  %v9959_v21 = vpop.f32.mrf.mxu1 }
 0x7c4   : > { %v6444_v63 = vrot.slane %v6234_v23, 2 }
 0x7c5   : > { %v5858_v61 = vmax.f32 %v5780_v56, 0.0  ;;  %v4633_v14 = vadd.f32 %v10572_v11, %v4100_v55  ;;  %v3666_v11 = vld [vmem:[#allocation2 + $0x264] sm:$0xff] }
 0x7c6   : > { %v6445_v16 = vsel %vm6352_vm5, %v6442_v35, %v6444_v63 }
 0x7c7   : > { %v6622_v0 = vmax.f32 %v9869_v29, %v6445_v16  ;;  %v6062_v24 = vrot.slane %v5858_v61, 1  ;;  %v5166_v62 = vadd.f32 %v9615_v20, %v4633_v14  ;;  %7493 = vmatmul.msk.bf16.gmra.mxu2 %vm997_vm2, %v5305_v25  ;;  %v3663_v29 = vld [vmem:[#allocation2 + $0x24c] sm:$0xff]  ;;  %v9954_v41 = vpop.f32.mrf.mxu0  ;;  %v3665_v16 = vld [vmem:[#allocation2 + $0x25c] sm:$0xff] }
 0x7c8   : > { %v3706_v30 = vpack.c.bf16 %v3664_v48, %v3663_v29 }
 0x7c9   : > { %6698 = vst.msk [vmem:[#allocation3 + $0x168] sm:$0xff] %vm6652_vm6, %v6622_v0  ;;  %v6063_v46 = vsel %vm5960_vm4, %v6060_v13, %v6062_v24  ;;  %v5699_v5 = vadd.f32 %v5582_v17, %v5166_v62  ;;  %v3707_v62 = vpack.c.bf16 %v3666_v11, %v3665_v16  ;;  %v5268_v16 = vld [vmem:[#allocation2 + $0x296] sm:$0xff] }
 0x7ca   : > { %v6235_v57 = vmax.f32 %v5857_v43, %v6063_v46  ;;  %v3985_v45 = vpop.f32.mrf.mxu3  ;;  %v5587_v40 = vpop.f32.mrf.mxu2 }
 0x7cb   : > { %v5781_v2 = vadd.f32 %v9903_v6, %v5699_v5  ;;  %v4101_v50 = vadd.f32 %v3985_v45, %v10573_v26 }
 0x7cc   : > { %v6446_v8 = vrot.slane %v6235_v57, 2 }
 0x7cd   : > { %v5859_v20 = vmax.f32 %v5781_v2, 0.0  ;;  %v4634_v33 = vadd.f32 %v10574_v12, %v4101_v50  ;;  %v9979_v12 = vpop.f32.mrf.mxu1 }
 0x7ce   : > { %v6447_v4 = vsel %vm6352_vm5, %v6444_v63, %v6446_v8 }
 0x7cf   : > { %v6623_v17 = vmax.f32 %v9885_v1, %v6447_v4  ;;  %v6064_v15 = vrot.slane %v5859_v20, 1  ;;  %v5167_v53 = vadd.f32 %v9631_v36, %v4634_v33  ;;  %7352 = vmatmul.msk.bf16.gmra.mxu3 %vm997_vm2, %v3706_v30  ;;  %v5264_v1 = vld [vmem:[#allocation2 + $0x276] sm:$0xff]  ;;  %v9973_v48 = vpop.f32.mrf.mxu0  ;;  %v10577_v30 = vld [vmem:[#allocation54_spill] sm:$0xff] }
 0x7d0   : > { %v5306_v60 = vpack.c.bf16 %v5265_v32, %v5264_v1 }
 0x7d1   : > { %6699 = vst.msk [vmem:[#allocation3 + $0x170] sm:$0xff] %vm6652_vm6, %v6623_v17  ;;  %v6065_v27 = vsel %vm5960_vm4, %v6062_v24, %v6064_v15  ;;  %v5700_v31 = vadd.f32 %v5584_v34, %v5167_v53 }
 0x7d2   : > { %v6236_v35 = vmax.f32 %v5858_v61, %v6065_v27  ;;  %v3988_v59 = vpop.f32.mrf.mxu3  ;;  %v5589_v43 = vpop.f32.mrf.mxu2 }
 0x7d3   : > { %v5782_v42 = vadd.f32 %v9903_v6, %v5700_v31  ;;  %v4102_v13 = vadd.f32 %v3988_v59, %v10575_v28 }
 0x7d4   : > { %v6448_v39 = vrot.slane %v6236_v35, 2 }
 0x7d5   : > { %v5860_v18 = vmax.f32 %v5782_v42, 0.0  ;;  %v4635_v36 = vadd.f32 %v9874_v9, %v4102_v13 }
 0x7d6   : > { %v6449_v23 = vsel %vm6352_vm5, %v6446_v8, %v6448_v39 }
 0x7d7   : > { %v6624_v34 = vmax.f32 %v9899_v44, %v6449_v23  ;;  %v6066_v49 = vrot.slane %v5860_v18, 1  ;;  %v5168_v56 = vadd.f32 %v9878_v58, %v4635_v36  ;;  %7494 = vmatmul.msk.bf16.gmra.mxu2 %vm997_vm2, %v5306_v60  ;;  %v10576_v44 = vld [vmem:[#allocation53_spill] sm:$0xff]  ;;  %v9991_v1 = vpop.f32.mrf.mxu0  ;;  %v3667_v23 = vld [vmem:[#allocation2 + $0x26c] sm:$0xff] }
 0x7d9   : > { %6700 = vst.msk [vmem:[#allocation3 + $0x178] sm:$0xff] %vm6652_vm6, %v6624_v34  ;;  %v6067_v55 = vsel %vm5960_vm4, %v6064_v15, %v6066_v49  ;;  %v5701_v63 = vadd.f32 %v5587_v40, %v5168_v56  ;;  %v9995_v34 = vpop.f32.mrf.mxu1 }
 0x7da   : > { %v9963_v9 = vmax.f32 %v5859_v20, %v6067_v55  ;;  %v3990_v47 = vpop.f32.mrf.mxu3  ;;  %v5592_v61 = vpop.f32.mrf.mxu2  ;;  %v5267_v20 = vld [vmem:[#allocation2 + $0x28e] sm:$0xff] }
 0x7db   : > { %v5783_v14 = vadd.f32 %v9903_v6, %v5701_v63  ;;  %v4103_v25 = vadd.f32 %v3990_v47, %v10576_v44 }
 0x7dc   : > { %v6450_v58 = vrot.slane %v9963_v9, 2 }
 0x7dd   : > { %v5861_v0 = vmax.f32 %v5783_v14, 0.0  ;;  %v4636_v24 = vadd.f32 %v9892_v37, %v4103_v25 }
 0x7de   : > { %v6451_v46 = vsel %vm6352_vm5, %v6448_v39, %v6450_v58  ;;  %v3668_v39 = vld [vmem:[#allocation2 + $0x274] sm:$0xff] }
 0x7df   : > { %v6625_v5 = vmax.f32 %v9913_v38, %v6451_v46  ;;  %v6068_v57 = vrot.slane %v5861_v0, 1  ;;  %v5169_v45 = vadd.f32 %v9896_v54, %v4636_v24  ;;  %7353 = vmatmul.msk.bf16.gmra.mxu3 %vm997_vm2, %v3707_v62  ;;  %v5266_v38 = vld [vmem:[#allocation2 + $0x286] sm:$0xff]  ;;  %v3708_v55 = vpack.c.bf16 %v3668_v39, %v3667_v23  ;;  %v5269_v46 = vld [vmem:[#allocation2 + $0x29e] sm:$0xff] }
 0x7e0   : > { %v6814_v40 = vld [vmem:[#allocation3 + $0x16c] ss:$2 sm:$0xff]  ;;  %v5307_v53 = vpack.c.bf16 %v5267_v20, %v5266_v38 }
 0x7e1   : > { %v6817_v2 = vpack.c.bf16 %v6814_v40, %v6814_v40  ;;  %6701 = vst.msk [vmem:[#allocation3 + $0x180] sm:$0xff] %vm6652_vm6, %v6625_v5  ;;  %v6069_v26 = vsel %vm5960_vm4, %v6066_v49, %v6068_v57  ;;  %v5702_v37 = vadd.f32 %v5589_v43, %v5169_v45  ;;  %v10007_v5 = vpop.f32.mrf.mxu0  ;;  %v5308_v45 = vpack.c.bf16 %v5269_v46, %v5268_v16  ;;  %v10010_v40 = vpop.f32.mrf.mxu1 }
 0x7e2   : > { %v9977_v50 = vmax.f32 %v5860_v18, %v6069_v26  ;;  %v3993_v8 = vpop.f32.mrf.mxu3  ;;  %v5594_v29 = vpop.f32.mrf.mxu2 }
 0x7e3   : > { %v6821_v54 = vrot.slane %v6817_v2, 6  ;;  %v5784_v33 = vadd.f32 %v9903_v6, %v5702_v37  ;;  %v4104_v4 = vadd.f32 %v3993_v8, %v10577_v30 }
 0x7e5   : > { %6827 = vst.msk [vmem:[%s9462_s29 + $0x28] sm:$0xc] %vm6754_vm9, %v6821_v54  ;;  %v5862_v17 = vmax.f32 %v5784_v33, 0.0  ;;  %v4637_v15 = vadd.f32 %v9910_v51, %v4104_v4  ;;  %v6822_v51 = vrot.slane %v6821_v54, 4  ;;  %v3669_v54 = vld [vmem:[#allocation2 + $0x27c] sm:$0xff]  ;;  %v3670_v33 = vld [vmem:[#allocation2 + $0x284] sm:$0xff] }
 0x7e6   : > { %v10580_v4 = vld [vmem:[#allocation59_spill] sm:$0xff] }
 0x7e7   : > { %v6070_v27 = vrot.slane %v5862_v17, 1  ;;  %v5170_v31 = vadd.f32 %v9915_v22, %v4637_v15  ;;  %7495 = vmatmul.msk.bf16.gmra.mxu2 %vm997_vm2, %v5307_v53  ;;  %v10578_v22 = vld [vmem:[#allocation120_spill] sm:$0xff] }
 0x7e8   : > { %v6816_v35 = vld [vmem:[#allocation3 + $0x17c] ss:$2 sm:$0xf] }
 0x7e9   : > { %v6818_v59 = vpack.c.bf16 %v6816_v35, %v6816_v35  ;;  %v6071_v43 = vsel %vm5960_vm4, %v6068_v57, %v6070_v27  ;;  %v5703_v32 = vadd.f32 %v5592_v61, %v5170_v31  ;;  %v10019_v31 = vpop.f32.mrf.mxu0 }
 0x7ea   : > { %v9989_v42 = vmax.f32 %v5861_v0, %v6071_v43  ;;  %v3995_v28 = vpop.f32.mrf.mxu3  ;;  %v5597_v13 = vpop.f32.mrf.mxu2  ;;  %v10579_v0 = vld [vmem:[#allocation57_spill] sm:$0xff] }
 0x7eb   : > { %v6823_v18 = vrot.slane %v6818_v59, 6  ;;  %v5785_v36 = vadd.f32 %v9903_v6, %v5703_v32  ;;  %v4105_v60 = vadd.f32 %v3995_v28, %v10578_v22  ;;  %v10024_v32 = vpop.f32.mrf.mxu1 }
 0x7ed   : > { %v5863_v49 = vmax.f32 %v5785_v36, 0.0  ;;  %v4638_v56 = vadd.f32 %v9924_v10, %v4105_v60  ;;  %v6824_v63 = vsel %vm9564_vm12, %v6822_v51, %v6823_v18  ;;  %v10581_v36 = vld [vmem:[#allocation61_spill] sm:$0xff] }
 0x7ee   : > { %6828 = vst.msk [vmem:[%s9462_s29 + $0x2c] sm:$0xf] %vm6727_vm7, %v6824_v63 }
 0x7ef   : > { %v6072_v47 = vrot.slane %v5863_v49, 1  ;;  %v5171_v61 = vadd.f32 %v9928_v7, %v4638_v56  ;;  %7354 = vmatmul.msk.bf16.gmra.mxu3 %vm997_vm2, %v3708_v55 }
 0x7f1   : > { %v6073_v11 = vsel %vm5960_vm4, %v6070_v27, %v6072_v47  ;;  %v5704_v14 = vadd.f32 %v5594_v29, %v5171_v61  ;;  %v3709_v27 = vpack.c.bf16 %v3670_v33, %v3669_v54  ;;  %v4546_v63 = vpop.f32.mrf.mxu0 }
 0x7f2   : > { %v6240_v44 = vmax.f32 %v5862_v17, %v6073_v11  ;;  %v3998_v25 = vpop.f32.mrf.mxu3  ;;  %v5599_v58 = vpop.f32.mrf.mxu2 }
 0x7f3   : > { %v5786_v10 = vadd.f32 %v9903_v6, %v5704_v14  ;;  %v4106_v24 = vadd.f32 %v3998_v25, %v10579_v0  ;;  %v5079_v25 = vpop.f32.mrf.mxu1 }
 0x7f4   : > { %v6456_v62 = vrot.slane %v6240_v44, 2 }
 0x7f5   : > { %v5864_v57 = vmax.f32 %v5786_v10, 0.0  ;;  %v4639_v7 = vadd.f32 %v9939_v3, %v4106_v24 }
 0x7f7   : > { %v6074_v2 = vrot.slane %v5864_v57, 1  ;;  %v5172_v26 = vadd.f32 %v9943_v52, %v4639_v7  ;;  %7496 = vmatmul.msk.bf16.gmra.mxu2 %vm997_vm2, %v5308_v45 }
 0x7f9   : > { %v6075_v37 = vsel %vm5960_vm4, %v6072_v47, %v6074_v2  ;;  %v5705_v8 = vadd.f32 %v5597_v13, %v5172_v26 }
 0x7fa   : > { %v6241_v29 = vmax.f32 %v5863_v49, %v6075_v37  ;;  %v4000_v38 = vpop.f32.mrf.mxu3  ;;  %v5602_v20 = vpop.f32.mrf.mxu2 }
 0x7fb   : > { %v5787_v30 = vadd.f32 %v9903_v6, %v5705_v8  ;;  %v4107_v3 = vadd.f32 %v4000_v38, %v10580_v4  ;;  %v10583_v38 = vld [vmem:[#allocation123_spill] sm:$0xff] }
 0x7fc   : > { %v6458_v17 = vrot.slane %v6241_v29, 2 }
 0x7fd   : > { %v5865_v15 = vmax.f32 %v5787_v30, 0.0  ;;  %v4640_v53 = vadd.f32 %v9954_v41, %v4107_v3 }
 0x7fe   : > { %v6459_v52 = vsel %vm6352_vm5, %v6456_v62, %v6458_v17 }
 0x7ff   : > { %v6629_v35 = vmax.f32 %v9963_v9, %v6459_v52  ;;  %v6076_v59 = vrot.slane %v5865_v15, 1  ;;  %v5173_v43 = vadd.f32 %v9959_v21, %v4640_v53  ;;  %7355 = vmatmul.msk.bf16.gmra.mxu3 %vm997_vm2, %v3709_v27 }
 0x801   : > { %6705 = vst.msk [vmem:[#allocation3 + $0x1a0] sm:$0xff] %vm6652_vm6, %v6629_v35  ;;  %v6077_v28 = vsel %vm5960_vm4, %v6074_v2, %v6076_v59  ;;  %v5706_v13 = vadd.f32 %v5599_v58, %v5173_v43  ;;  %v10582_v58 = vld [vmem:[#allocation63_spill] sm:$0xff] }
 0x802   : > { %v6242_v41 = vmax.f32 %v5864_v57, %v6077_v28  ;;  %v4003_v39 = vpop.f32.mrf.mxu3  ;;  %v5604_v51 = vpop.f32.mrf.mxu2 }
 0x803   : > { %v5788_v18 = vadd.f32 %v9903_v6, %v5706_v13  ;;  %v4108_v22 = vadd.f32 %v4003_v39, %v10581_v36 }
 0x804   : > { %v6460_v9 = vrot.slane %v6242_v41, 2 }
 0x805   : > { %v5866_v60 = vmax.f32 %v5788_v18, 0.0  ;;  %v4641_v21 = vadd.f32 %v9973_v48, %v4108_v22 }
 0x806   : > { %v6461_v23 = vsel %vm6352_vm5, %v6458_v17, %v6460_v9 }
 0x807   : > { %v6630_v49 = vmax.f32 %v9977_v50, %v6461_v23  ;;  %v6078_v56 = vrot.slane %v5866_v60, 1  ;;  %v5174_v55 = vadd.f32 %v9979_v12, %v4641_v21  ;;  %v10585_v21 = vld [vmem:[#allocation69_spill] sm:$0xff] }
 0x809   : > { %6706 = vst.msk [vmem:[#allocation3 + $0x1a8] sm:$0xff] %vm6652_vm6, %v6630_v49  ;;  %v6079_v47 = vsel %vm5960_vm4, %v6076_v59, %v6078_v56  ;;  %v5707_v61 = vadd.f32 %v5602_v20, %v5174_v55  ;;  %v10584_v59 = vld [vmem:[#allocation124_spill] sm:$0xff] }
 0x80a   : > { %v10036_v11 = vmax.f32 %v5865_v15, %v6079_v47  ;;  %v4005_v14 = vpop.f32.mrf.mxu3  ;;  %v5607_v44 = vpop.f32.mrf.mxu2 }
 0x80b   : > { %v5789_v48 = vadd.f32 %v9903_v6, %v5707_v61  ;;  %v4109_v16 = vadd.f32 %v4005_v14, %v10582_v58 }
 0x80c   : > { %v6462_v50 = vrot.slane %v10036_v11, 2 }
 0x80d   : > { %v5867_v10 = vmax.f32 %v5789_v48, 0.0  ;;  %v4642_v12 = vadd.f32 %v9991_v1, %v4109_v16  ;;  %v4548_v1 = vpop.f32.mrf.mxu0 }
 0x80e   : > { %v6463_v0 = vsel %vm6352_vm5, %v6460_v9, %v6462_v50 }
 0x80f   : > { %v6631_v24 = vmax.f32 %v9989_v42, %v6463_v0  ;;  %v6080_v62 = vrot.slane %v5867_v10, 1  ;;  %v5175_v46 = vadd.f32 %v9995_v34, %v4642_v12  ;;  %v5081_v34 = vpop.f32.mrf.mxu1 }
 0x810   : > { %v6830_v57 = vld [vmem:[#allocation3 + $0x1a0] ss:$2 sm:$0xff] }
 0x811   : > { %v6833_v7 = vpack.c.bf16 %v6830_v57, %v6830_v57  ;;  %6707 = vst.msk [vmem:[#allocation3 + $0x1b0] sm:$0xff] %vm6652_vm6, %v6631_v24  ;;  %v6081_v45 = vsel %vm5960_vm4, %v6078_v56, %v6080_v62  ;;  %v5708_v2 = vadd.f32 %v5604_v51, %v5175_v46 }
 0x812   : > { %v10047_v26 = vmax.f32 %v5866_v60, %v6081_v45  ;;  %v4008_v37 = vpop.f32.mrf.mxu3  ;;  %v5609_v8 = vpop.f32.mrf.mxu2 }
 0x813   : > { %v5790_v29 = vadd.f32 %v9903_v6, %v5708_v2  ;;  %v4110_v42 = vadd.f32 %v4008_v37, %v10583_v38  ;;  %6835 = vst.msk [vmem:[%s9462_s29 + $0x30] sm:$0xf] %vm6727_vm7, %v6833_v7 }
 0x815   : > { %v5868_v20 = vmax.f32 %v5790_v29, 0.0  ;;  %v4643_v54 = vadd.f32 %v10007_v5, %v4110_v42  ;;  %v4551_v28 = vpop.f32.mrf.mxu0  ;;  %v10587_v42 = vld [vmem:[#allocation73_spill] sm:$0xff] }
 0x817   : > { %v6082_v33 = vrot.slane %v5868_v20, 1  ;;  %v5176_v30 = vadd.f32 %v10010_v40, %v4643_v54  ;;  %v5084_v40 = vpop.f32.mrf.mxu1 }
 0x818   : > { %v6832_v4 = vld [vmem:[#allocation3 + $0x1b0] ss:$2 sm:$0xf] }
 0x819   : > { %v6834_v3 = vpack.c.bf16 %v6832_v4, %v6832_v4  ;;  %v6083_v17 = vsel %vm5960_vm4, %v6080_v62, %v6082_v33  ;;  %v5709_v15 = vadd.f32 %v5607_v44, %v5176_v30 }
 0x81a   : > { %v10056_v53 = vmax.f32 %v5867_v10, %v6083_v17  ;;  %v4010_v27 = vpop.f32.mrf.mxu3  ;;  %v5612_v52 = vpop.f32.mrf.mxu2  ;;  %v10586_v10 = vld [vmem:[#allocation71_spill] sm:$0xff] }
 0x81b   : > { %6836 = vst.msk [vmem:[%s9462_s29 + $0x34] sm:$0x3] %vm6735_vm8, %v6834_v3  ;;  %v5791_v35 = vadd.f32 %v9903_v6, %v5709_v15  ;;  %v4111_v43 = vadd.f32 %v4010_v27, %v10584_v59 }
 0x81d   : > { %v5869_v5 = vmax.f32 %v5791_v35, 0.0  ;;  %v4644_v13 = vadd.f32 %v10019_v31, %v4111_v43  ;;  %v4553_v31 = vpop.f32.mrf.mxu0  ;;  %v10588_v43 = vld [vmem:[#allocation127_spill] sm:$0xff] }
 0x81f   : > { %v6084_v41 = vrot.slane %v5869_v5, 1  ;;  %v5177_v39 = vadd.f32 %v10024_v32, %v4644_v13  ;;  %v5086_v14 = vpop.f32.mrf.mxu1 }
 0x821   : > { %v6085_v51 = vsel %vm5960_vm4, %v6082_v33, %v6084_v41  ;;  %v5710_v18 = vadd.f32 %v5609_v8, %v5177_v39 }
 0x822   : > { %v10065_v36 = vmax.f32 %v5868_v20, %v6085_v51  ;;  %v4013_v22 = vpop.f32.mrf.mxu3  ;;  %v5614_v9 = vpop.f32.mrf.mxu2 }
 0x823   : > { %v5792_v60 = vadd.f32 %v9903_v6, %v5710_v18  ;;  %v4112_v23 = vadd.f32 %v4013_v22, %v10585_v21 }
 0x824   : > { %v6468_v49 = vrot.slane %v10065_v36, 2 }
 0x825   : > { %v5870_v56 = vmax.f32 %v5792_v60, 0.0  ;;  %v4645_v55 = vadd.f32 %v4546_v63, %v4112_v23  ;;  %v4556_v7 = vpop.f32.mrf.mxu0 }
 0x827   : > { %v6086_v47 = vrot.slane %v5870_v56, 1  ;;  %v5178_v61 = vadd.f32 %v5079_v25, %v4645_v55  ;;  %v10589_v55 = vld [vmem:[#allocation128_spill] sm:$0xff] }
 0x829   : > { %v6087_v32 = vsel %vm5960_vm4, %v6084_v41, %v6086_v47  ;;  %v5711_v44 = vadd.f32 %v5612_v52, %v5178_v61 }
 0x82a   : > { %v6247_v48 = vmax.f32 %v5869_v5, %v6087_v32  ;;  %v4015_v58 = vpop.f32.mrf.mxu3  ;;  %v5617_v16 = vpop.f32.mrf.mxu2 }
 0x82b   : > { %v5793_v50 = vadd.f32 %v9903_v6, %v5711_v44  ;;  %v4113_v12 = vadd.f32 %v4015_v58, %v10586_v10 }
 0x82c   : > { %v6470_v0 = vrot.slane %v6247_v48, 2 }
 0x82d   : > { %v5871_v24 = vmax.f32 %v5793_v50, 0.0  ;;  %v4646_v62 = vadd.f32 %v4548_v1, %v4113_v12  ;;  %v5089_v1 = vpop.f32.mrf.mxu1  ;;  %v4558_v13 = vpop.f32.mrf.mxu0 }
 0x82e   : > { %v6471_v46 = vsel %vm6352_vm5, %v6468_v49, %v6470_v0 }
 0x82f   : > { %v6635_v63 = vmax.f32 %v10036_v11, %v6471_v46  ;;  %v6088_v57 = vrot.slane %v5871_v24, 1  ;;  %v5179_v25 = vadd.f32 %v5081_v34, %v4646_v62 }
 0x831   : > { %6711 = vst.msk [vmem:[#allocation3 + $0x1d0] sm:$0xff] %vm6652_vm6, %v6635_v63  ;;  %v6089_v45 = vsel %vm5960_vm4, %v6086_v47, %v6088_v57  ;;  %v5712_v2 = vadd.f32 %v5614_v9, %v5179_v25  ;;  %v10590_v25 = vld [vmem:[#allocation79_spill] sm:$0xff] }
 0x832   : > { %v6248_v37 = vmax.f32 %v5870_v56, %v6089_v45  ;;  %v4018_v8 = vpop.f32.mrf.mxu3  ;;  %v5619_v29 = vpop.f32.mrf.mxu2 }
 0x833   : > { %v5794_v38 = vadd.f32 %v9903_v6, %v5712_v2  ;;  %v4114_v20 = vadd.f32 %v4018_v8, %v10587_v42 }
 0x834   : > { %v6472_v54 = vrot.slane %v6248_v37, 2 }
 0x835   : > { %v5872_v33 = vmax.f32 %v5794_v38, 0.0  ;;  %v4647_v30 = vadd.f32 %v4551_v28, %v4114_v20  ;;  %v5091_v51 = vpop.f32.mrf.mxu1 }
 0x836   : > { %v6473_v11 = vsel %vm6352_vm5, %v6470_v0, %v6472_v54 }
 0x837   : > { %v6636_v34 = vmax.f32 %v10047_v26, %v6473_v11  ;;  %v6090_v4 = vrot.slane %v5872_v33, 1  ;;  %v5180_v3 = vadd.f32 %v5084_v40, %v4647_v30 }
 0x839   : > { %6712 = vst.msk [vmem:[#allocation3 + $0x1d8] sm:$0xff] %vm6652_vm6, %v6636_v34  ;;  %v6091_v17 = vsel %vm5960_vm4, %v6088_v57, %v6090_v4  ;;  %v5713_v15 = vadd.f32 %v5617_v16, %v5180_v3 }
 0x83a   : > { %v6249_v27 = vmax.f32 %v5871_v24, %v6091_v17  ;;  %v4020_v52 = vpop.f32.mrf.mxu3  ;;  %v5622_v35 = vpop.f32.mrf.mxu2 }
 0x83b   : > { %v5795_v59 = vadd.f32 %v9903_v6, %v5713_v15  ;;  %v4115_v5 = vadd.f32 %v4020_v52, %v10588_v43 }
 0x83c   : > { %v6474_v28 = vrot.slane %v6249_v27, 2 }
 0x83d   : > { %v5873_v41 = vmax.f32 %v5795_v59, 0.0  ;;  %v4648_v39 = vadd.f32 %v4553_v31, %v4115_v5  ;;  %v5094_v16 = vpop.f32.mrf.mxu1 }
 0x83e   : > { %v6475_v26 = vsel %vm6352_vm5, %v6472_v54, %v6474_v28 }
 0x83f   : > { %v6637_v40 = vmax.f32 %v10056_v53, %v6475_v26  ;;  %v6092_v18 = vrot.slane %v5873_v41, 1  ;;  %v5181_v22 = vadd.f32 %v5086_v14, %v4648_v39  ;;  %v4561_v53 = vpop.f32.mrf.mxu0 }
 0x841   : > { %6713 = vst.msk [vmem:[#allocation3 + $0x1e0] sm:$0xff] %vm6652_vm6, %v6637_v40  ;;  %v6093_v9 = vsel %vm5960_vm4, %v6090_v4, %v6092_v18  ;;  %v5714_v60 = vadd.f32 %v5619_v29, %v5181_v22  ;;  %v10591_v4 = vld [vmem:[#allocation81_spill] sm:$0xff] }
 0x842   : > { %v10089_v21 = vmax.f32 %v5872_v33, %v6093_v9  ;;  %v4023_v23 = vpop.f32.mrf.mxu3  ;;  %v5624_v49 = vpop.f32.mrf.mxu2 }
 0x843   : > { %v5796_v56 = vadd.f32 %v9903_v6, %v5714_v60  ;;  %v4116_v31 = vadd.f32 %v4023_v23, %v10589_v55 }
 0x844   : > { %v6476_v47 = vrot.slane %v10089_v21, 2 }
 0x845   : > { %v5874_v61 = vmax.f32 %v5796_v56, 0.0  ;;  %v4649_v32 = vadd.f32 %v4556_v7, %v4116_v31 }
 0x846   : > { %v6477_v14 = vsel %vm6352_vm5, %v6474_v28, %v6476_v47 }
 0x847   : > { %v6638_v44 = vmax.f32 %v10065_v36, %v6477_v14  ;;  %v6094_v48 = vrot.slane %v5874_v61, 1  ;;  %v5182_v58 = vadd.f32 %v5089_v1, %v4649_v32  ;;  %v4563_v8 = vpop.f32.mrf.mxu0  ;;  %v5096_v1 = vpop.f32.mrf.mxu1  ;;  %v10593_v32 = vld [vmem:[#allocation131_spill] sm:$0xff] }
 0x848   : > { %v6838_v50 = vld [vmem:[#allocation3 + $0x1d4] ss:$2 sm:$0xff] }
 0x849   : > { %v6841_v10 = vpack.c.bf16 %v6838_v50, %v6838_v50  ;;  %6714 = vst.msk [vmem:[#allocation3 + $0x1e8] sm:$0xff] %vm6652_vm6, %v6638_v44  ;;  %v6095_v12 = vsel %vm5960_vm4, %v6092_v18, %v6094_v48  ;;  %v5715_v0 = vadd.f32 %v5622_v35, %v5182_v58 }
 0x84a   : > { %v10098_v24 = vmax.f32 %v5873_v41, %v6095_v12  ;;  %v4025_v62 = vpop.f32.mrf.mxu3  ;;  %v5627_v46 = vpop.f32.mrf.mxu2 }
 0x84b   : > { %v6845_v63 = vrot.slane %v6841_v10, 6  ;;  %v5797_v57 = vadd.f32 %v9903_v6, %v5715_v0  ;;  %v4117_v7 = vadd.f32 %v4025_v62, %v10590_v25 }
 0x84d   : > { %6851 = vst.msk [vmem:[%s9462_s29 + $0x34] sm:$0xc] %vm6754_vm9, %v6845_v63  ;;  %v5875_v36 = vmax.f32 %v5797_v57, 0.0  ;;  %v4650_v45 = vadd.f32 %v4558_v13, %v4117_v7  ;;  %v6846_v30 = vrot.slane %v6845_v63, 4 }
 0x84f   : > { %v6096_v2 = vrot.slane %v5875_v36, 1  ;;  %v5183_v37 = vadd.f32 %v5091_v51, %v4650_v45  ;;  %v4566_v13 = vpop.f32.mrf.mxu0  ;;  %v10592_v51 = vld [vmem:[#allocation83_spill] sm:$0xff]  ;;  %v5099_v40 = vpop.f32.mrf.mxu1 }
 0x850   : > { %v6840_v29 = vld [vmem:[#allocation3 + $0x1e4] ss:$2 sm:$0xf] }
 0x851   : > { %v6842_v38 = vpack.c.bf16 %v6840_v29, %v6840_v29  ;;  %v6097_v42 = vsel %vm5960_vm4, %v6094_v48, %v6096_v2  ;;  %v5716_v20 = vadd.f32 %v5624_v49, %v5183_v37 }
 0x852   : > { %v10105_v54 = vmax.f32 %v5874_v61, %v6097_v42  ;;  %v4028_v33 = vpop.f32.mrf.mxu3  ;;  %v5629_v17 = vpop.f32.mrf.mxu2 }
 0x853   : > { %v6847_v11 = vrot.slane %v6842_v38, 6  ;;  %v5798_v34 = vadd.f32 %v9903_v6, %v5716_v20  ;;  %v4118_v3 = vadd.f32 %v4028_v33, %v10591_v4 }
 0x855   : > { %v5876_v15 = vmax.f32 %v5798_v34, 0.0  ;;  %v4651_v27 = vadd.f32 %v4561_v53, %v4118_v3  ;;  %v6848_v52 = vsel %vm9564_vm12, %v6846_v30, %v6847_v11 }
 0x856   : > { %6852 = vst.msk [vmem:[%s9462_s29 + $0x38] sm:$0xf] %vm6727_vm7, %v6848_v52 }
 0x857   : > { %v6098_v35 = vrot.slane %v5876_v15, 1  ;;  %v5184_v59 = vadd.f32 %v5094_v16, %v4651_v27  ;;  %v4568_v14 = vpop.f32.mrf.mxu0  ;;  %v5101_v16 = vpop.f32.mrf.mxu1 }
 0x859   : > { %v6099_v43 = vsel %vm5960_vm4, %v6096_v2, %v6098_v35  ;;  %v5717_v5 = vadd.f32 %v5627_v46, %v5184_v59 }
 0x85a   : > { %v6253_v28 = vmax.f32 %v5875_v36, %v6099_v43  ;;  %v4030_v41 = vpop.f32.mrf.mxu3  ;;  %v5632_v60 = vpop.f32.mrf.mxu2  ;;  %v10594_v36 = vld [vmem:[#allocation132_spill] sm:$0xff] }
 0x85b   : > { %v5799_v39 = vadd.f32 %v9903_v6, %v5717_v5  ;;  %v4119_v26 = vadd.f32 %v4030_v41, %v10592_v51 }
 0x85c   : > { %v6482_v18 = vrot.slane %v6253_v28, 2 }
 0x85d   : > { %v5877_v22 = vmax.f32 %v5799_v39, 0.0  ;;  %v4652_v9 = vadd.f32 %v4563_v8, %v4119_v26 }
 0x85f   : > { %v6100_v23 = vrot.slane %v5877_v22, 1  ;;  %v5185_v49 = vadd.f32 %v5096_v1, %v4652_v9  ;;  %v4571_v29 = vpop.f32.mrf.mxu0  ;;  %v5104_v1 = vpop.f32.mrf.mxu1  ;;  %v10596_v9 = vld [vmem:[#allocation91_spill] sm:$0xff] }
 0x861   : > { %v6101_v56 = vsel %vm5960_vm4, %v6098_v35, %v6100_v23  ;;  %v5718_v55 = vadd.f32 %v5629_v17, %v5185_v49  ;;  %v10595_v17 = vld [vmem:[#allocation89_spill] sm:$0xff] }
 0x862   : > { %v6254_v31 = vmax.f32 %v5876_v15, %v6101_v56  ;;  %v4033_v47 = vpop.f32.mrf.mxu3  ;;  %v5634_v62 = vpop.f32.mrf.mxu2 }
 0x863   : > { %v5800_v61 = vadd.f32 %v9903_v6, %v5718_v55  ;;  %v4120_v53 = vadd.f32 %v4033_v47, %v10593_v32 }
 0x864   : > { %v6484_v44 = vrot.slane %v6254_v31, 2 }
 0x865   : > { %v5878_v48 = vmax.f32 %v5800_v61, 0.0  ;;  %v4653_v58 = vadd.f32 %v4566_v13, %v4120_v53 }
 0x866   : > { %v6485_v50 = vsel %vm6352_vm5, %v6482_v18, %v6484_v44 }
 0x867   : > { %v6642_v10 = vmax.f32 %v10089_v21, %v6485_v50  ;;  %v6102_v12 = vrot.slane %v5878_v48, 1  ;;  %v5186_v0 = vadd.f32 %v5099_v40, %v4653_v58  ;;  %v4573_v13 = vpop.f32.mrf.mxu0  ;;  %v5106_v26 = vpop.f32.mrf.mxu1  ;;  %v10597_v58 = vld [vmem:[#allocation93_spill] sm:$0xff] }
 0x869   : > { %6718 = vst.msk [vmem:[#allocation3 + $0x208] sm:$0xff] %vm6652_vm6, %v6642_v10  ;;  %v6103_v46 = vsel %vm5960_vm4, %v6100_v23, %v6102_v12  ;;  %v5719_v63 = vadd.f32 %v5632_v60, %v5186_v0 }
 0x86a   : > { %v6255_v57 = vmax.f32 %v5877_v22, %v6103_v46  ;;  %v4035_v25 = vpop.f32.mrf.mxu3  ;;  %v5637_v34 = vpop.f32.mrf.mxu2 }
 0x86b   : > { %v5801_v7 = vadd.f32 %v9903_v6, %v5719_v63  ;;  %v4121_v45 = vadd.f32 %v4035_v25, %v10594_v36  ;;  %v7584_v36 = vld [vmem:[#allocation9] ss:$0 sm:$0xff] }
 0x86c   : > { %v6486_v2 = vrot.slane %v6255_v57, 2 }
 0x86d   : > { %v5879_v37 = vmax.f32 %v5801_v7, 0.0  ;;  %v4654_v8 = vadd.f32 %v4568_v14, %v4121_v45 }
 0x86e   : > { %v6487_v21 = vsel %vm6352_vm5, %v6484_v44, %v6486_v2 }
 0x86f   : > { %v6643_v38 = vmax.f32 %v10098_v24, %v6487_v21  ;;  %v6104_v42 = vrot.slane %v5879_v37, 1  ;;  %v5187_v20 = vadd.f32 %v5101_v16, %v4654_v8  ;;  %v4576_v53 = vpop.f32.mrf.mxu0  ;;  %v5109_v50 = vpop.f32.mrf.mxu1 }
 0x871   : > { %6719 = vst.msk [vmem:[#allocation3 + $0x210] sm:$0xff] %vm6652_vm6, %v6643_v38  ;;  %v6105_v33 = vsel %vm5960_vm4, %v6102_v12, %v6104_v42  ;;  %v5720_v30 = vadd.f32 %v5634_v62, %v5187_v20 }
 0x872   : > { %v10129_v11 = vmax.f32 %v5878_v48, %v6105_v33  ;;  %v4038_v4 = vpop.f32.mrf.mxu3 }
 0x873   : > { %v5802_v3 = vadd.f32 %v9903_v6, %v5720_v30  ;;  %v4122_v15 = vadd.f32 %v4038_v4, %v10595_v17 }
 0x874   : > { %v6488_v27 = vrot.slane %v10129_v11, 2 }
 0x875   : > { %v5880_v52 = vmax.f32 %v5802_v3, 0.0  ;;  %v4655_v24 = vadd.f32 %v4571_v29, %v4122_v15 }
 0x876   : > { %v6489_v35 = vsel %vm6352_vm5, %v6486_v2, %v6488_v27  ;;  %v10598_v2 = vld [vmem:[#allocation135_spill] sm:$0xff] }
 0x877   : > { %v6644_v59 = vmax.f32 %v10105_v54, %v6489_v35  ;;  %v6106_v43 = vrot.slane %v5880_v52, 1  ;;  %v5188_v5 = vadd.f32 %v5104_v1, %v4655_v24  ;;  %v5639_v54 = vpop.f32.mrf.mxu2  ;;  %v4578_v8 = vpop.f32.mrf.mxu0 }
 0x878   : > { %v6854_v28 = vld [vmem:[#allocation3 + $0x208] ss:$2 sm:$0xff]  ;;  %v5111_v38 = vpop.f32.mrf.mxu1 }
 0x879   : > { %v6857_v41 = vpack.c.bf16 %v6854_v28, %v6854_v28  ;;  %6720 = vst.msk [vmem:[#allocation3 + $0x218] sm:$0xff] %vm6652_vm6, %v6644_v59  ;;  %v6107_v39 = vsel %vm5960_vm4, %v6104_v42, %v6106_v43  ;;  %v5721_v51 = vadd.f32 %v5637_v34, %v5188_v5 }
 0x87a   : > { %v10138_v40 = vmax.f32 %v5879_v37, %v6107_v39  ;;  %v4040_v18 = vpop.f32.mrf.mxu3 }
 0x87b   : > { %v5803_v22 = vadd.f32 %v9903_v6, %v5721_v51  ;;  %v4123_v60 = vadd.f32 %v4040_v18, %v10596_v9  ;;  %6859 = vst.msk [vmem:[%s9462_s29 + $0x3c] sm:$0xf] %vm6727_vm7, %v6857_v41 }
 0x87d   : > { %v5881_v23 = vmax.f32 %v5803_v22, 0.0  ;;  %v4656_v49 = vadd.f32 %v4573_v13, %v4123_v60 }
 0x87f   : > { %v6108_v56 = vrot.slane %v5881_v23, 1  ;;  %v5189_v55 = vadd.f32 %v5106_v26, %v4656_v49  ;;  %v5642_v0 = vpop.f32.mrf.mxu2 }
 0x880   : > { %v6856_v31 = vld [vmem:[#allocation3 + $0x218] ss:$2 sm:$0xf] }
 0x881   : > { %v6858_v47 = vpack.c.bf16 %v6856_v31, %v6856_v31  ;;  %v6109_v61 = vsel %vm5960_vm4, %v6106_v43, %v6108_v56  ;;  %v5722_v32 = vadd.f32 %v5639_v54, %v5189_v55  ;;  %v6259_v43 = vmax.f32 %v5881_v23, %v6108_v56 }
 0x882   : > { %v4043_v14 = vpop.f32.mrf.mxu3  ;;  %v6258_v44 = vmax.f32 %v5880_v52, %v6109_v61 }
 0x883   : > { %6860 = vst.msk [vmem:[%s9462_s29 + $0x40] sm:$0x3] %vm6735_vm8, %v6858_v47  ;;  %v5804_v48 = vadd.f32 %v9903_v6, %v5722_v32  ;;  %v4124_v16 = vadd.f32 %v4043_v14, %v10597_v58 }
 0x885   : > { %v5882_v10 = vmax.f32 %v5804_v48, 0.0  ;;  %v4657_v12 = vadd.f32 %v4576_v53, %v4124_v16 }
 0x887   : > { %v6263_v62 = vrot.slane %v5882_v10, 1  ;;  %v5190_v46 = vadd.f32 %v5109_v50, %v4657_v12  ;;  %v5644_v1 = vpop.f32.mrf.mxu2 }
 0x889   : > { %v6264_v63 = vsel %vm5960_vm4, %v6108_v56, %v6263_v62  ;;  %v5723_v57 = vadd.f32 %v5642_v0, %v5190_v46 }
 0x88a   : > { %v6273_v25 = vmax.f32 %v5881_v23, %v6264_v63  ;;  %v4045_v7 = vpop.f32.mrf.mxu3 }
 0x88b   : > { %v5805_v45 = vadd.f32 %v7584_v36, %v5723_v57  ;;  %v4125_v37 = vadd.f32 %v4045_v7, %v10598_v2 }
 0x88c   : > { %v6494_v29 = vrot.slane %v6273_v25, 2 }
 0x88d   : > { %v5883_v6 = vmax.f32 %v5805_v45, 0.0  ;;  %v4658_v21 = vadd.f32 %v4578_v8, %v4125_v37 }
 0x88f   : > { %v6265_v42 = vrot.slane %v5883_v6, 1  ;;  %v5191_v20 = vadd.f32 %v5111_v38, %v4658_v21 }
 0x891   : > { %v6266_v33 = vsel %vm5960_vm4, %v6263_v62, %v6265_v42  ;;  %v5724_v30 = vadd.f32 %v5644_v1, %v5191_v20 }
 0x892   : > { %v6274_v34 = vmax.f32 %v5882_v10, %v6266_v33 }
 0x893   : > { %v5806_v4 = vadd.f32 %v7584_v36, %v5724_v30 }
 0x894   : > { %v6496_v3 = vrot.slane %v6274_v34, 2 }
 0x895   : > { %v5884_v17 = vmax.f32 %v5806_v4, 0.0 }
 0x896   : > { %v6497_v15 = vsel %vm6352_vm5, %v6494_v29, %v6496_v3 }
 0x897   : > { %v6648_v27 = vmax.f32 %v10129_v11, %v6497_v15  ;;  %v6267_v52 = vrot.slane %v5884_v17, 1 }
 0x899   : > { %6724 = vst.msk [vmem:[#allocation3 + $0x238] sm:$0xff] %vm6652_vm6, %v6648_v27  ;;  %v6268_v24 = vsel %vm5960_vm4, %v6265_v42, %v6267_v52  ;;  %v6276_v35 = vmax.f32 %v5884_v17, %v6267_v52 }
 0x89a   : > { %v6275_v59 = vmax.f32 %v5883_v6, %v6268_v24 }
 0x89b   : > { %v6500_v5 = vrot.slane %v6276_v35, 2 }
 0x89c   : > { %v6498_v13 = vrot.slane %v6275_v59, 2 }
 0x89d   : > { %v6651_v28 = vmax.f32 %v6259_v43, %v6500_v5 }
 0x89e   : > { %v6499_v41 = vsel %vm6352_vm5, %v6496_v3, %v6498_v13  ;;  %v6501_v39 = vsel %vm6352_vm5, %v6498_v13, %v6500_v5 }
 0x89f   : > { %v6649_v51 = vmax.f32 %v10138_v40, %v6499_v41  ;;  %v6650_v11 = vmax.f32 %v6258_v44, %v6501_v39  ;;  %6728 = vst.msk [vmem:[#allocation3 + $0x250] sm:$0xf] %vm6727_vm7, %v6651_v28 }
 0x8a1   : > { %6725 = vst.msk [vmem:[#allocation3 + $0x240] sm:$0xff] %vm6652_vm6, %v6649_v51 }
 0x8a2   : > { %6726 = vst.msk [vmem:[#allocation3 + $0x248] sm:$0xff] %vm6652_vm6, %v6650_v11 }
 0x8a9   : > { %v6862_v26 = vld [vmem:[#allocation3 + $0x23c] ss:$2 sm:$0xff]  ;;  %v6864_v18 = vld [vmem:[#allocation3 + $0x24c] ss:$2 sm:$0xf] }
 0x8aa   : > { %v6865_v22 = vpack.c.bf16 %v6862_v26, %v6862_v26  ;;  %v6866_v9 = vpack.c.bf16 %v6864_v18, %v6864_v18 }
 0x8ac   : > { %v6869_v60 = vrot.slane %v6865_v22, 6  ;;  %v6871_v23 = vrot.slane %v6866_v9, 6 }
 0x8ae   : > { %v6870_v54 = vrot.slane %v6869_v60, 4  ;;  %6875 = vst.msk [vmem:[%s9462_s29 + $0x40] sm:$0xc] %vm6754_vm9, %v6869_v60 }
 0x8b0   : > { %v6872_v49 = vsel %vm9564_vm12, %v6870_v54, %v6871_v23 }
 0x8b1   : > { %6876 = vst.msk [vmem:[%s9462_s29 + $0x44] sm:$0xf] %vm6727_vm7, %v6872_v49 }
 0x8b2 PF: > { %s18_s18 = sadd.s32 1, %s7723_s18  }
 0x8b3   : > { %p15_p7 = scmp.ge.s32.totalorder %s18_s18, 4  }
 0x8b5   :  { %17 = sbr.rel (!%p15_p7) target bundleno = 3 (0x3), region = 118 }
 0x8ba   :  { %6898 = vsyncpa [#allocation5], 1 }
 0x8bb   :  { %6900 = vsyncpa [#allocation5 + $0x1], 1 }
 0x8bc   :  { %6901 = vsyncpa [#allocation7], 1 }
 0x8bd   :  { %6902 = vsyncpa [#allocation10], 1 }

</bundles_post_ra>
